<compile_context>
chip_gen: v5e
topology: v5e:2x2
jax: 0.10.0
libtpu: 0.0.40
codegen_flags: <defaults>
</compile_context>

<pallas_src>
import functools

import jax
import jax.numpy as jnp
from jax.experimental import pallas as pl
from jax.experimental.pallas import tpu as pltpu


def _layer_norm(y, gamma, beta, eps=1e-5):
    # PyTorch nn.LayerNorm over the last dim: biased variance, eps inside sqrt.
    mu = jnp.mean(y, axis=-1, keepdims=True)
    var = jnp.mean((y - mu) ** 2, axis=-1, keepdims=True)
    return (y - mu) * jax.lax.rsqrt(var + eps) * gamma + beta


def _transformer_block_kernel(
    x_ref,
    wq_ref, bq_ref, wk_ref, bk_ref, wv_ref, bv_ref, wo_ref, bo_ref,
    g1_ref, be1_ref,
    w1_ref, b1_ref, w2_ref, b2_ref,
    g2_ref, be2_ref,
    o_ref,
    q_scr, k_scr, v_scr,
    *, n_heads, head_dim, q_tile, kv_tile, n_kv, n_ffn_chunks,
):
    f32 = jnp.float32
    H, dh, tq = n_heads, head_dim, q_tile
    E = H * dh
    mm_dtype = k_scr.dtype  # MXU operand dtype (bf16 in the bf16 recipe)

    # ---- K/V projections once per batch element.  The q-tile axis is the
    # innermost, sequentially iterated ("arbitrary") axis, so program_id(1)==0
    # runs before every other q-tile of this batch element.
    @pl.when(pl.program_id(1) == 0)
    def _compute_kv():
        xf = x_ref[0]                                                    # (T, E)
        k = (jnp.dot(xf, wk_ref[...], preferred_element_type=f32)
             + bk_ref[...]).astype(mm_dtype)
        v = (jnp.dot(xf, wv_ref[...], preferred_element_type=f32)
             + bv_ref[...]).astype(mm_dtype)
        for h in range(H):  # lane-aligned slice copies into head-major scratch
            k_scr[h] = k[:, h * dh:(h + 1) * dh]
            v_scr[h] = v[:, h * dh:(h + 1) * dh]

    # ---- Q projection for this query tile; 1/sqrt(head_dim) folded into Q. ---
    t = pl.program_id(1)
    q_start = pl.multiple_of(t * tq, tq)
    xt = x_ref[0, pl.ds(q_start, tq), :]                                 # (tq, E)
    scale = 1.0 / (dh ** 0.5)
    q = ((jnp.dot(xt, wq_ref[...], preferred_element_type=f32)
          + bq_ref[...]) * scale).astype(mm_dtype)
    for h in range(H):
        q_scr[h] = q[:, h * dh:(h + 1) * dh]
    q_hm = q_scr[...]                                                    # (H, tq, dh)

    # ---- Flash-style attention: online softmax over K/V tiles, deferred
    # normalization (divide once at the end via the EUP reciprocal).
    m_i = jnp.full((H, tq, 1), -jnp.inf, dtype=f32)
    l_i = jnp.zeros((H, tq, 1), dtype=f32)
    acc = jnp.zeros((H, tq, dh), dtype=f32)
    for kt in range(n_kv):
        lo = kt * kv_tile
        k_blk = k_scr[:, lo:lo + kv_tile, :]
        v_blk = v_scr[:, lo:lo + kv_tile, :]
        s = jnp.einsum("hqd,hkd->hqk", q_hm, k_blk,
                       preferred_element_type=f32)                      # (H, tq, kv)
        m_new = jnp.maximum(m_i, jnp.max(s, axis=-1, keepdims=True))
        alpha = jnp.exp(m_i - m_new)
        p = jnp.exp(s - m_new)
        l_i = alpha * l_i + jnp.sum(p, axis=-1, keepdims=True)
        acc = alpha * acc + jnp.einsum("hqk,hkd->hqd", p.astype(mm_dtype), v_blk,
                                       preferred_element_type=f32)
        m_i = m_new
    o3 = acc * pl.reciprocal(l_i, approx=True)                          # (H, tq, dh)

    # ---- Head concat folded into the output projection (no concat scratch). --
    attn = jnp.zeros((tq, E), dtype=f32)
    for h in range(H):
        attn = attn + jnp.dot(o3[h].astype(mm_dtype), wo_ref[h],
                              preferred_element_type=f32)
    attn = attn + bo_ref[...]

    # ---- residual + LayerNorm 1 (f32 elementwise). ---------------------------
    x1 = _layer_norm(attn + xt.astype(f32), g1_ref[...], be1_ref[...])

    # ---- FFN: chunked hidden dim, accumulated into a (tq, E) f32 value. ------
    x1m = x1.astype(mm_dtype)

    def ffn_chunk(c, acc_f):
        hid = jnp.dot(x1m, w1_ref[c], preferred_element_type=f32) + b1_ref[c]
        hid = jnp.maximum(hid, 0.0)
        return acc_f + jnp.dot(hid.astype(mm_dtype), w2_ref[c],
                               preferred_element_type=f32)

    acc_f = jnp.zeros((tq, E), dtype=f32)
    if n_ffn_chunks <= 4:
        for c in range(n_ffn_chunks):          # short: static unroll
            acc_f = ffn_chunk(c, acc_f)
    else:                                       # many chunks: bounded live ranges
        acc_f = jax.lax.fori_loop(0, n_ffn_chunks, ffn_chunk, acc_f)
    ff = acc_f + b2_ref[...]

    # ---- residual + LayerNorm 2. ---------------------------------------------
    out = _layer_norm(ff + x1, g2_ref[...], be2_ref[...])
    o_ref[0] = out.astype(o_ref.dtype)


def transformer_block(x, params, *, n_heads, q_tile=None, kv_tile=None,
                      ffn_chunk=512, single_buffer_weights=True):
    B, T, E = x.shape
    assert E % n_heads == 0
    head_dim = E // n_heads
    ff_hidden = params["w1"].shape[1]

    if q_tile is None:
        q_tile = min(T, 256)
    assert T % q_tile == 0, "T must be divisible by q_tile"
    nq = T // q_tile

    if kv_tile is None:
        kv_tile = min(T, 512)
    assert T % kv_tile == 0, "T must be divisible by kv_tile"
    n_kv = T // kv_tile

    chunk = min(ffn_chunk, ff_hidden)
    assert ff_hidden % chunk == 0, "ff hidden dim must be divisible by ffn_chunk"
    n_chunks = ff_hidden // chunk

    # bf16 MXU operands whenever activations or weights are bf16; stats in f32.
    mm_dtype = (jnp.bfloat16
                if (x.dtype == jnp.bfloat16 or params["wq"].dtype == jnp.bfloat16)
                else jnp.float32)

    # One-time weight relayouts (outside the kernel): head-major output
    # projection and leading-axis-chunked FFN weights.
    wo3 = params["wo"].reshape(n_heads, head_dim, E)
    w1c = params["w1"].reshape(E, n_chunks, chunk).transpose(1, 0, 2)   # (C, E, chunk)
    b1c = params["b1"].reshape(1, n_chunks, chunk).transpose(1, 0, 2)   # (C, 1, chunk)
    w2c = params["w2"].reshape(n_chunks, chunk, E)                      # (C, chunk, E)

    # Constant index map -> DMA'd once; single-buffer to halve resident VMEM.
    spec_kwargs = {"pipeline_mode": pl.Buffered(1)} if single_buffer_weights else {}

    def fixed(shape):
        nd = len(shape)
        return pl.BlockSpec(shape, lambda b, t: (0,) * nd, **spec_kwargs)

    in_specs = [
        pl.BlockSpec((1, T, E), lambda b, t: (b, 0, 0)),      # x (full seq; q tile sliced in-kernel)
        fixed((E, E)), fixed((1, E)),                         # Wq, bq
        fixed((E, E)), fixed((1, E)),                         # Wk, bk
        fixed((E, E)), fixed((1, E)),                         # Wv, bv
        fixed((n_heads, head_dim, E)), fixed((1, E)),         # Wo (head-major), bo
        fixed((1, E)), fixed((1, E)),                         # ln1 gamma, beta
        fixed((n_chunks, E, chunk)), fixed((n_chunks, 1, chunk)),   # W1, b1 (chunked)
        fixed((n_chunks, chunk, E)), fixed((1, E)),                 # W2, b2
        fixed((1, E)), fixed((1, E)),                         # ln2 gamma, beta
    ]

    scratch_shapes = [
        pltpu.VMEM((n_heads, q_tile, head_dim), mm_dtype),    # Q, head-major
        pltpu.VMEM((n_heads, T, head_dim), mm_dtype),         # K, head-major
        pltpu.VMEM((n_heads, T, head_dim), mm_dtype),         # V, head-major
    ]

    # Explicit, generation-aware VMEM budget.
    def nbytes(a):
        return int(a.size) * jnp.dtype(a.dtype).itemsize

    w_bytes = sum(nbytes(v) for v in params.values())
    w_mult = 1 if single_buffer_weights else 2
    x_item = jnp.dtype(x.dtype).itemsize
    mm_item = jnp.dtype(mm_dtype).itemsize
    act_bytes = 2 * T * E * x_item + 2 * q_tile * E * x_item          # x + out, double-buffered
    scr_bytes = (q_tile + 2 * T) * E * mm_item
    est = w_mult * w_bytes + act_bytes + scr_bytes + (16 << 20)

    try:
        vmem_cap = int(pltpu.get_tpu_info().vmem_capacity_bytes)
    except Exception:
        vmem_cap = 64 << 20
    vmem_limit = int(min(max(est, 32 << 20), max(32 << 20, vmem_cap - (16 << 20))))

    kernel = functools.partial(
        _transformer_block_kernel,
        n_heads=n_heads, head_dim=head_dim, q_tile=q_tile,
        kv_tile=kv_tile, n_kv=n_kv, n_ffn_chunks=n_chunks,
    )

    return pl.pallas_call(
        kernel,
        out_shape=jax.ShapeDtypeStruct((B, T, E), x.dtype),
        grid_spec=pltpu.PrefetchScalarGridSpec(
            num_scalar_prefetch=0,
            grid=(B, nq),
            in_specs=in_specs,
            out_specs=pl.BlockSpec((1, q_tile, E), lambda b, t: (b, t, 0)),
            scratch_shapes=scratch_shapes,
        ),
        compiler_params=pltpu.CompilerParams(
            # Batch elements independent (megacore-shardable); the q-tile axis
            # must stay "arbitrary" because K/V scratch is reused across it.
            dimension_semantics=("parallel", "arbitrary"),
            vmem_limit_bytes=vmem_limit,
        ),
    )(
        x,
        params["wq"], params["bq"], params["wk"], params["bk"],
        params["wv"], params["bv"], wo3, params["bo"],
        params["g1"], params["be1"],
        w1c, b1c, w2c, params["b2"],
        params["g2"], params["be2"],
    )


def transformer_block_ref(x, params, *, n_heads):
    """Pure-JAX reference for correctness checking (f32)."""
    B, T, E = x.shape
    dh = E // n_heads

    def mha(xb):
        q = (xb @ params["wq"] + params["bq"][0]) * (1.0 / (dh ** 0.5))
        k = xb @ params["wk"] + params["bk"][0]
        v = xb @ params["wv"] + params["bv"][0]
        q = q.reshape(T, n_heads, dh).transpose(1, 0, 2)
        k = k.reshape(T, n_heads, dh).transpose(1, 0, 2)
        v = v.reshape(T, n_heads, dh).transpose(1, 0, 2)
        s = jnp.einsum("hqd,hkd->hqk", q, k)
        p = jax.nn.softmax(s, axis=-1)
        a = jnp.einsum("hqk,hkd->hqd", p, v).transpose(1, 0, 2).reshape(T, E)
        return a @ params["wo"] + params["bo"][0]

    def ln(y, g, b, eps=1e-5):
        mu = y.mean(-1, keepdims=True)
        var = ((y - mu) ** 2).mean(-1, keepdims=True)
        return (y - mu) / jnp.sqrt(var + eps) * g[0] + b[0]

    def one(xb):
        a = mha(xb)
        x1 = ln(a + xb, params["g1"], params["be1"])
        h = jnp.maximum(x1 @ params["w1"] + params["b1"][0], 0.0)
        ffo = h @ params["w2"] + params["b2"][0]
        return ln(ffo + x1, params["g2"], params["be2"])

    return jax.vmap(one)(x)


def make_params(key, emb_size, ff=4):
    ks = jax.random.split(key, 12)
    s = 0.05
    E, Hff = emb_size, ff * emb_size
    return {
        "wq": s * jax.random.normal(ks[0], (E, E), jnp.float32),
        "bq": s * jax.random.normal(ks[1], (1, E), jnp.float32),
        "wk": s * jax.random.normal(ks[2], (E, E), jnp.float32),
        "bk": s * jax.random.normal(ks[3], (1, E), jnp.float32),
        "wv": s * jax.random.normal(ks[4], (E, E), jnp.float32),
        "bv": s * jax.random.normal(ks[5], (1, E), jnp.float32),
        "wo": s * jax.random.normal(ks[6], (E, E), jnp.float32),
        "bo": s * jax.random.normal(ks[7], (1, E), jnp.float32),
        "g1": jnp.ones((1, E), jnp.float32),
        "be1": jnp.zeros((1, E), jnp.float32),
        "w1": s * jax.random.normal(ks[8], (E, Hff), jnp.float32),
        "b1": s * jax.random.normal(ks[9], (1, Hff), jnp.float32),
        "w2": s * jax.random.normal(ks[10], (Hff, E), jnp.float32),
        "b2": s * jax.random.normal(ks[11], (1, E), jnp.float32),
        "g2": jnp.ones((1, E), jnp.float32),
        "be2": jnp.zeros((1, E), jnp.float32),
    }


if __name__ == "__main__":
    # TPU-aligned small shapes: E multiple of 128, T multiple of 8, head_dim=128.
    B, T, E, n_heads, ff = 2, 32, 256, 2, 2

    key = jax.random.PRNGKey(0)
    kx, kp = jax.random.split(key)
    x = jax.random.normal(kx, (B, T, E), jnp.float32)
    params = make_params(kp, E, ff)

    def run(xx, pp, sb):
        # q_tile=16, kv_tile=16, ffn_chunk=256 exercise the multi-q-tile,
        # multi-kv-tile (online softmax) and multi-FFN-chunk paths.
        return jax.block_until_ready(
            transformer_block(xx, pp, n_heads=n_heads, q_tile=16, kv_tile=16,
                              ffn_chunk=256, single_buffer_weights=sb))

    # f32 run.  Fall back to default (double) weight buffering only if this JAX
    # build rejects pl.Buffered(1) for constant-index-map weight specs.
    sb = True
    try:
        out = run(x, params, sb)
    except Exception:
        sb = False
        out = run(x, params, sb)

    ref = transformer_block_ref(x, params, n_heads=n_heads)
    assert out.shape == (B, T, E)
    # Tolerance covers the EUP approximate reciprocal used for the softmax denom.
    assert jnp.allclose(out, ref, atol=1e-2, rtol=1e-2), "f32 mismatch vs reference"

    # bf16-weight run: bf16 MXU operands (Q/K/V/P scratch in bf16), f32
    # accumulation, f32 LayerNorm/softmax/residual math.
    mm_keys = ("wq", "bq", "wk", "bk", "wv", "bv", "wo", "bo", "w1", "b1", "w2", "b2")
    params_bf16 = {k: (v.astype(jnp.bfloat16) if k in mm_keys else v)
                   for k, v in params.items()}
    out_bf16 = run(x.astype(jnp.bfloat16), params_bf16, sb)
    assert jnp.allclose(out_bf16.astype(jnp.float32), ref, atol=1e-1, rtol=1e-1), \
        "bf16 mismatch vs reference"

    print("KERNEL_OK")
</pallas_src>

<mosaic_0001>
module attributes {stable_mosaic.version = 11 : i64} {
  func.func @_transformer_block_kernel(%arg0: i32, %arg1: i32, %arg2: memref<1x32x256xf32, #tpu.memory_space<vmem>>, %arg3: memref<256x256xf32, #tpu.memory_space<vmem>>, %arg4: memref<1x256xf32, #tpu.memory_space<vmem>>, %arg5: memref<256x256xf32, #tpu.memory_space<vmem>>, %arg6: memref<1x256xf32, #tpu.memory_space<vmem>>, %arg7: memref<256x256xf32, #tpu.memory_space<vmem>>, %arg8: memref<1x256xf32, #tpu.memory_space<vmem>>, %arg9: memref<2x128x256xf32, #tpu.memory_space<vmem>>, %arg10: memref<1x256xf32, #tpu.memory_space<vmem>>, %arg11: memref<1x256xf32, #tpu.memory_space<vmem>>, %arg12: memref<1x256xf32, #tpu.memory_space<vmem>>, %arg13: memref<2x256x256xf32, #tpu.memory_space<vmem>>, %arg14: memref<2x1x256xf32, #tpu.memory_space<vmem>>, %arg15: memref<2x256x256xf32, #tpu.memory_space<vmem>>, %arg16: memref<1x256xf32, #tpu.memory_space<vmem>>, %arg17: memref<1x256xf32, #tpu.memory_space<vmem>>, %arg18: memref<1x256xf32, #tpu.memory_space<vmem>>, %arg19: memref<1x16x256xf32, #tpu.memory_space<vmem>>, %arg20: memref<2x16x128xf32, #tpu.memory_space<vmem>>, %arg21: memref<2x32x128xf32, #tpu.memory_space<vmem>>, %arg22: memref<2x32x128xf32, #tpu.memory_space<vmem>>) attributes {dimension_semantics = [#tpu.dimension_semantics<parallel>, #tpu.dimension_semantics<arbitrary>], iteration_bounds = array<i64: 2, 2>, scalar_prefetch = 0 : i64, scratch_operands = 3 : i64, tpu.core_type = #tpu.core_type<tc>, window_params = [{transform_indices = @transform_0, window_bounds = array<i64: 1, 32, 256>}, {pipeline_mode = #tpu.pipeline_mode<synchronous>, transform_indices = @transform_1, window_bounds = array<i64: 256, 256>}, {pipeline_mode = #tpu.pipeline_mode<synchronous>, transform_indices = @transform_2, window_bounds = array<i64: 1, 256>}, {pipeline_mode = #tpu.pipeline_mode<synchronous>, transform_indices = @transform_3, window_bounds = array<i64: 256, 256>}, {pipeline_mode = #tpu.pipeline_mode<synchronous>, transform_indices = @transform_4, window_bounds = array<i64: 1, 256>}, {pipeline_mode = #tpu.pipeline_mode<synchronous>, transform_indices = @transform_5, window_bounds = array<i64: 256, 256>}, {pipeline_mode = #tpu.pipeline_mode<synchronous>, transform_indices = @transform_6, window_bounds = array<i64: 1, 256>}, {pipeline_mode = #tpu.pipeline_mode<synchronous>, transform_indices = @transform_7, window_bounds = array<i64: 2, 128, 256>}, {pipeline_mode = #tpu.pipeline_mode<synchronous>, transform_indices = @transform_8, window_bounds = array<i64: 1, 256>}, {pipeline_mode = #tpu.pipeline_mode<synchronous>, transform_indices = @transform_9, window_bounds = array<i64: 1, 256>}, {pipeline_mode = #tpu.pipeline_mode<synchronous>, transform_indices = @transform_10, window_bounds = array<i64: 1, 256>}, {pipeline_mode = #tpu.pipeline_mode<synchronous>, transform_indices = @transform_11, window_bounds = array<i64: 2, 256, 256>}, {pipeline_mode = #tpu.pipeline_mode<synchronous>, transform_indices = @transform_12, window_bounds = array<i64: 2, 1, 256>}, {pipeline_mode = #tpu.pipeline_mode<synchronous>, transform_indices = @transform_13, window_bounds = array<i64: 2, 256, 256>}, {pipeline_mode = #tpu.pipeline_mode<synchronous>, transform_indices = @transform_14, window_bounds = array<i64: 1, 256>}, {pipeline_mode = #tpu.pipeline_mode<synchronous>, transform_indices = @transform_15, window_bounds = array<i64: 1, 256>}, {pipeline_mode = #tpu.pipeline_mode<synchronous>, transform_indices = @transform_16, window_bounds = array<i64: 1, 256>}, {transform_indices = @transform_17, window_bounds = array<i64: 1, 16, 256>}]} {
    %c0_i32 = arith.constant 0 : i32
    %0 = arith.cmpi eq, %arg1, %c0_i32 : i32
    %1 = arith.extui %0 : i1 to i32
    %c0_i32_0 = arith.constant 0 : i32
    %2 = arith.cmpi ne, %1, %c0_i32_0 : i32
    scf.if %2 {
      %c0_96 = arith.constant 0 : index
      %c0_97 = arith.constant 0 : index
      %c0_98 = arith.constant 0 : index
      %167 = vector.load %arg2[%c0_96, %c0_97, %c0_98] : memref<1x32x256xf32, #tpu.memory_space<vmem>>, vector<1x32x256xf32>
      %168 = vector.shape_cast %167 : vector<1x32x256xf32> to vector<32x256xf32>
      %c0_99 = arith.constant 0 : index
      %c0_100 = arith.constant 0 : index
      %169 = vector.load %arg5[%c0_99, %c0_100] : memref<256x256xf32, #tpu.memory_space<vmem>>, vector<256x256xf32>
      %cst_101 = arith.constant dense<0.000000e+00> : vector<32x256xf32>
      %170 = tpu.matmul %168, %169, %cst_101 {dimension_numbers = #tpu.dot_dimension_numbers<[1], [0], [0], [1], [0, 0, 1, 1], [], []>} : vector<32x256xf32>, vector<256x256xf32>, vector<32x256xf32> -> vector<32x256xf32>
      %c0_102 = arith.constant 0 : index
      %c0_103 = arith.constant 0 : index
      %171 = vector.load %arg6[%c0_102, %c0_103] : memref<1x256xf32, #tpu.memory_space<vmem>>, vector<1x256xf32>
      %172 = vector.broadcast %171 : vector<1x256xf32> to vector<32x256xf32>
      %173 = arith.addf %170, %172 : vector<32x256xf32>
      %c0_104 = arith.constant 0 : index
      %c0_105 = arith.constant 0 : index
      %174 = vector.load %arg7[%c0_104, %c0_105] : memref<256x256xf32, #tpu.memory_space<vmem>>, vector<256x256xf32>
      %cst_106 = arith.constant dense<0.000000e+00> : vector<32x256xf32>
      %175 = tpu.matmul %168, %174, %cst_106 {dimension_numbers = #tpu.dot_dimension_numbers<[1], [0], [0], [1], [0, 0, 1, 1], [], []>} : vector<32x256xf32>, vector<256x256xf32>, vector<32x256xf32> -> vector<32x256xf32>
      %c0_107 = arith.constant 0 : index
      %c0_108 = arith.constant 0 : index
      %176 = vector.load %arg8[%c0_107, %c0_108] : memref<1x256xf32, #tpu.memory_space<vmem>>, vector<1x256xf32>
      %177 = vector.broadcast %176 : vector<1x256xf32> to vector<32x256xf32>
      %178 = arith.addf %175, %177 : vector<32x256xf32>
      %179 = vector.extract_strided_slice %173 {offsets = [0, 0], sizes = [32, 128], strides = [1, 1]} : vector<32x256xf32> to vector<32x128xf32>
      %c0_109 = arith.constant 0 : index
      %c0_110 = arith.constant 0 : index
      %c0_111 = arith.constant 0 : index
      %180 = vector.load %arg21[%c0_109, %c0_110, %c0_111] : memref<2x32x128xf32, #tpu.memory_space<vmem>>, vector<1x32x128xf32>
      %181 = vector.shape_cast %180 : vector<1x32x128xf32> to vector<32x128xf32>
      %182 = vector.shape_cast %179 : vector<32x128xf32> to vector<1x32x128xf32>
      tpu.vector_store %arg21[%c0_109, %c0_110, %c0_111], %182 {strides = array<i32>} : memref<2x32x128xf32, #tpu.memory_space<vmem>>, vector<1x32x128xf32>,
      %183 = vector.extract_strided_slice %178 {offsets = [0, 0], sizes = [32, 128], strides = [1, 1]} : vector<32x256xf32> to vector<32x128xf32>
      %c0_112 = arith.constant 0 : index
      %c0_113 = arith.constant 0 : index
      %c0_114 = arith.constant 0 : index
      %184 = vector.load %arg22[%c0_112, %c0_113, %c0_114] : memref<2x32x128xf32, #tpu.memory_space<vmem>>, vector<1x32x128xf32>
      %185 = vector.shape_cast %184 : vector<1x32x128xf32> to vector<32x128xf32>
      %186 = vector.shape_cast %183 : vector<32x128xf32> to vector<1x32x128xf32>
      tpu.vector_store %arg22[%c0_112, %c0_113, %c0_114], %186 {strides = array<i32>} : memref<2x32x128xf32, #tpu.memory_space<vmem>>, vector<1x32x128xf32>,
      %187 = vector.extract_strided_slice %173 {offsets = [0, 128], sizes = [32, 128], strides = [1, 1]} : vector<32x256xf32> to vector<32x128xf32>
      %c1_115 = arith.constant 1 : index
      %c0_116 = arith.constant 0 : index
      %c0_117 = arith.constant 0 : index
      %188 = vector.load %arg21[%c1_115, %c0_116, %c0_117] : memref<2x32x128xf32, #tpu.memory_space<vmem>>, vector<1x32x128xf32>
      %189 = vector.shape_cast %188 : vector<1x32x128xf32> to vector<32x128xf32>
      %190 = vector.shape_cast %187 : vector<32x128xf32> to vector<1x32x128xf32>
      tpu.vector_store %arg21[%c1_115, %c0_116, %c0_117], %190 {strides = array<i32>} : memref<2x32x128xf32, #tpu.memory_space<vmem>>, vector<1x32x128xf32>,
      %191 = vector.extract_strided_slice %178 {offsets = [0, 128], sizes = [32, 128], strides = [1, 1]} : vector<32x256xf32> to vector<32x128xf32>
      %c1_118 = arith.constant 1 : index
      %c0_119 = arith.constant 0 : index
      %c0_120 = arith.constant 0 : index
      %192 = vector.load %arg22[%c1_118, %c0_119, %c0_120] : memref<2x32x128xf32, #tpu.memory_space<vmem>>, vector<1x32x128xf32>
      %193 = vector.shape_cast %192 : vector<1x32x128xf32> to vector<32x128xf32>
      %194 = vector.shape_cast %191 : vector<32x128xf32> to vector<1x32x128xf32>
      tpu.vector_store %arg22[%c1_118, %c0_119, %c0_120], %194 {strides = array<i32>} : memref<2x32x128xf32, #tpu.memory_space<vmem>>, vector<1x32x128xf32>,
    } else {
    }
    %c16_i32 = arith.constant 16 : i32
    %3 = arith.muli %arg1, %c16_i32 : i32
    %4 = tpu.assume_multiple %3, 16 : i32
    %c0 = arith.constant 0 : index
    %5 = arith.index_cast %4 : i32 to index
    %c0_1 = arith.constant 0 : index
    %6 = vector.load %arg2[%c0, %5, %c0_1] : memref<1x32x256xf32, #tpu.memory_space<vmem>>, vector<1x16x256xf32>
    %7 = vector.shape_cast %6 : vector<1x16x256xf32> to vector<16x256xf32>
    %c0_2 = arith.constant 0 : index
    %c0_3 = arith.constant 0 : index
    %8 = vector.load %arg3[%c0_2, %c0_3] : memref<256x256xf32, #tpu.memory_space<vmem>>, vector<256x256xf32>
    %cst = arith.constant dense<0.000000e+00> : vector<16x256xf32>
    %9 = tpu.matmul %7, %8, %cst {dimension_numbers = #tpu.dot_dimension_numbers<[1], [0], [0], [1], [0, 0, 1, 1], [], []>} : vector<16x256xf32>, vector<256x256xf32>, vector<16x256xf32> -> vector<16x256xf32>
    %c0_4 = arith.constant 0 : index
    %c0_5 = arith.constant 0 : index
    %10 = vector.load %arg4[%c0_4, %c0_5] : memref<1x256xf32, #tpu.memory_space<vmem>>, vector<1x256xf32>
    %11 = vector.broadcast %10 : vector<1x256xf32> to vector<16x256xf32>
    %12 = arith.addf %9, %11 : vector<16x256xf32>
    %cst_6 = arith.constant 0.0883883461 : f32
    %13 = vector.broadcast %cst_6 : f32 to vector<16x256xf32>
    %14 = arith.mulf %12, %13 : vector<16x256xf32>
    %15 = vector.extract_strided_slice %14 {offsets = [0, 0], sizes = [16, 128], strides = [1, 1]} : vector<16x256xf32> to vector<16x128xf32>
    %c0_7 = arith.constant 0 : index
    %c0_8 = arith.constant 0 : index
    %c0_9 = arith.constant 0 : index
    %16 = vector.load %arg20[%c0_7, %c0_8, %c0_9] : memref<2x16x128xf32, #tpu.memory_space<vmem>>, vector<1x16x128xf32>
    %17 = vector.shape_cast %16 : vector<1x16x128xf32> to vector<16x128xf32>
    %18 = vector.shape_cast %15 : vector<16x128xf32> to vector<1x16x128xf32>
    tpu.vector_store %arg20[%c0_7, %c0_8, %c0_9], %18 {strides = array<i32>} : memref<2x16x128xf32, #tpu.memory_space<vmem>>, vector<1x16x128xf32>,
    %19 = vector.extract_strided_slice %14 {offsets = [0, 128], sizes = [16, 128], strides = [1, 1]} : vector<16x256xf32> to vector<16x128xf32>
    %c1 = arith.constant 1 : index
    %c0_10 = arith.constant 0 : index
    %c0_11 = arith.constant 0 : index
    %20 = vector.load %arg20[%c1, %c0_10, %c0_11] : memref<2x16x128xf32, #tpu.memory_space<vmem>>, vector<1x16x128xf32>
    %21 = vector.shape_cast %20 : vector<1x16x128xf32> to vector<16x128xf32>
    %22 = vector.shape_cast %19 : vector<16x128xf32> to vector<1x16x128xf32>
    tpu.vector_store %arg20[%c1, %c0_10, %c0_11], %22 {strides = array<i32>} : memref<2x16x128xf32, #tpu.memory_space<vmem>>, vector<1x16x128xf32>,
    %c0_12 = arith.constant 0 : index
    %c0_13 = arith.constant 0 : index
    %c0_14 = arith.constant 0 : index
    %23 = vector.load %arg20[%c0_12, %c0_13, %c0_14] : memref<2x16x128xf32, #tpu.memory_space<vmem>>, vector<2x16x128xf32>
    %cst_15 = arith.constant 0xFF800000 : f32
    %24 = vector.broadcast %cst_15 : f32 to vector<2x16x1xf32>
    %cst_16 = arith.constant 0.000000e+00 : f32
    %25 = vector.broadcast %cst_16 : f32 to vector<2x16x1xf32>
    %cst_17 = arith.constant 0.000000e+00 : f32
    %26 = vector.broadcast %cst_17 : f32 to vector<2x16x128xf32>
    %c0_18 = arith.constant 0 : index
    %c0_19 = arith.constant 0 : index
    %c0_20 = arith.constant 0 : index
    %27 = vector.load %arg21[%c0_18, %c0_19, %c0_20] : memref<2x32x128xf32, #tpu.memory_space<vmem>>, vector<2x16x128xf32>
    %c0_21 = arith.constant 0 : index
    %c0_22 = arith.constant 0 : index
    %c0_23 = arith.constant 0 : index
    %28 = vector.load %arg22[%c0_21, %c0_22, %c0_23] : memref<2x32x128xf32, #tpu.memory_space<vmem>>, vector<2x16x128xf32>
    "tpu.trace_start"() <{level = 10 : i32, message = "hqd,hkd->hqk"}> : () -> ()
    %cst_24 = arith.constant dense<0.000000e+00> : vector<2x16x16xf32>
    %29 = tpu.matmul %23, %27, %cst_24 {dimension_numbers = #tpu.dot_dimension_numbers<[2], [2], [1], [1], [0, 0, 0, 1, 1, 1], [0], [0]>} : vector<2x16x128xf32>, vector<2x16x128xf32>, vector<2x16x16xf32> -> vector<2x16x16xf32>
    "tpu.trace_stop"() : () -> ()
    %cst_25 = arith.constant dense<0xFF800000> : vector<2x16xf32>
    %30 = vector.multi_reduction <maximumf>, %29, %cst_25 [2] : vector<2x16x16xf32> to vector<2x16xf32>
    %31 = vector.shape_cast %30 : vector<2x16xf32> to vector<2x16x1xf32>
    %32 = arith.maximumf %24, %31 : vector<2x16x1xf32>
    %33 = arith.subf %24, %32 : vector<2x16x1xf32>
    %34 = math.exp %33 : vector<2x16x1xf32>
    %35 = vector.broadcast %32 : vector<2x16x1xf32> to vector<2x16x16xf32>
    %36 = arith.subf %29, %35 : vector<2x16x16xf32>
    %37 = math.exp %36 : vector<2x16x16xf32>
    %38 = arith.mulf %34, %25 : vector<2x16x1xf32>
    %cst_26 = arith.constant dense<0.000000e+00> : vector<2x16xf32>
    %39 = vector.multi_reduction <add>, %37, %cst_26 [2] : vector<2x16x16xf32> to vector<2x16xf32>
    %40 = vector.shape_cast %39 : vector<2x16xf32> to vector<2x16x1xf32>
    %41 = arith.addf %38, %40 : vector<2x16x1xf32>
    %42 = vector.broadcast %34 : vector<2x16x1xf32> to vector<2x16x128xf32>
    %43 = arith.mulf %42, %26 : vector<2x16x128xf32>
    "tpu.trace_start"() <{level = 10 : i32, message = "hqk,hkd->hqd"}> : () -> ()
    %cst_27 = arith.constant dense<0.000000e+00> : vector<2x16x128xf32>
    %44 = tpu.matmul %37, %28, %cst_27 {dimension_numbers = #tpu.dot_dimension_numbers<[2], [1], [1], [2], [0, 0, 0, 1, 1, 2], [0], [0]>} : vector<2x16x16xf32>, vector<2x16x128xf32>, vector<2x16x128xf32> -> vector<2x16x128xf32>
    "tpu.trace_stop"() : () -> ()
    %45 = arith.addf %43, %44 : vector<2x16x128xf32>
    %c0_28 = arith.constant 0 : index
    %c16 = arith.constant 16 : index
    %c0_29 = arith.constant 0 : index
    %46 = vector.load %arg21[%c0_28, %c16, %c0_29] : memref<2x32x128xf32, #tpu.memory_space<vmem>>, vector<2x16x128xf32>
    %c0_30 = arith.constant 0 : index
    %c16_31 = arith.constant 16 : index
    %c0_32 = arith.constant 0 : index
    %47 = vector.load %arg22[%c0_30, %c16_31, %c0_32] : memref<2x32x128xf32, #tpu.memory_space<vmem>>, vector<2x16x128xf32>
    "tpu.trace_start"() <{level = 10 : i32, message = "hqd,hkd->hqk"}> : () -> ()
    %cst_33 = arith.constant dense<0.000000e+00> : vector<2x16x16xf32>
    %48 = tpu.matmul %23, %46, %cst_33 {dimension_numbers = #tpu.dot_dimension_numbers<[2], [2], [1], [1], [0, 0, 0, 1, 1, 1], [0], [0]>} : vector<2x16x128xf32>, vector<2x16x128xf32>, vector<2x16x16xf32> -> vector<2x16x16xf32>
    "tpu.trace_stop"() : () -> ()
    %cst_34 = arith.constant dense<0xFF800000> : vector<2x16xf32>
    %49 = vector.multi_reduction <maximumf>, %48, %cst_34 [2] : vector<2x16x16xf32> to vector<2x16xf32>
    %50 = vector.shape_cast %49 : vector<2x16xf32> to vector<2x16x1xf32>
    %51 = arith.maximumf %32, %50 : vector<2x16x1xf32>
    %52 = arith.subf %32, %51 : vector<2x16x1xf32>
    %53 = math.exp %52 : vector<2x16x1xf32>
    %54 = vector.broadcast %51 : vector<2x16x1xf32> to vector<2x16x16xf32>
    %55 = arith.subf %48, %54 : vector<2x16x16xf32>
    %56 = math.exp %55 : vector<2x16x16xf32>
    %57 = arith.mulf %53, %41 : vector<2x16x1xf32>
    %cst_35 = arith.constant dense<0.000000e+00> : vector<2x16xf32>
    %58 = vector.multi_reduction <add>, %56, %cst_35 [2] : vector<2x16x16xf32> to vector<2x16xf32>
    %59 = vector.shape_cast %58 : vector<2x16xf32> to vector<2x16x1xf32>
    %60 = arith.addf %57, %59 : vector<2x16x1xf32>
    %61 = vector.broadcast %53 : vector<2x16x1xf32> to vector<2x16x128xf32>
    %62 = arith.mulf %61, %45 : vector<2x16x128xf32>
    "tpu.trace_start"() <{level = 10 : i32, message = "hqk,hkd->hqd"}> : () -> ()
    %cst_36 = arith.constant dense<0.000000e+00> : vector<2x16x128xf32>
    %63 = tpu.matmul %56, %47, %cst_36 {dimension_numbers = #tpu.dot_dimension_numbers<[2], [1], [1], [2], [0, 0, 0, 1, 1, 2], [0], [0]>} : vector<2x16x16xf32>, vector<2x16x128xf32>, vector<2x16x128xf32> -> vector<2x16x128xf32>
    "tpu.trace_stop"() : () -> ()
    %64 = arith.addf %62, %63 : vector<2x16x128xf32>
    %65 = tpu.reciprocal %60 {approx = true} : vector<2x16x1xf32> -> vector<2x16x1xf32>
    %66 = vector.broadcast %65 : vector<2x16x1xf32> to vector<2x16x128xf32>
    %67 = arith.mulf %64, %66 : vector<2x16x128xf32>
    %cst_37 = arith.constant 0.000000e+00 : f32
    %68 = vector.broadcast %cst_37 : f32 to vector<16x256xf32>
    %69 = vector.extract_strided_slice %67 {offsets = [0, 0, 0], sizes = [1, 16, 128], strides = [1, 1, 1]} : vector<2x16x128xf32> to vector<1x16x128xf32>
    %70 = vector.shape_cast %69 : vector<1x16x128xf32> to vector<16x128xf32>
    %c0_38 = arith.constant 0 : index
    %c0_39 = arith.constant 0 : index
    %c0_40 = arith.constant 0 : index
    %71 = vector.load %arg9[%c0_38, %c0_39, %c0_40] : memref<2x128x256xf32, #tpu.memory_space<vmem>>, vector<1x128x256xf32>
    %72 = vector.shape_cast %71 : vector<1x128x256xf32> to vector<128x256xf32>
    %cst_41 = arith.constant dense<0.000000e+00> : vector<16x256xf32>
    %73 = tpu.matmul %70, %72, %cst_41 {dimension_numbers = #tpu.dot_dimension_numbers<[1], [0], [0], [1], [0, 0, 1, 1], [], []>} : vector<16x128xf32>, vector<128x256xf32>, vector<16x256xf32> -> vector<16x256xf32>
    %74 = arith.addf %68, %73 : vector<16x256xf32>
    %75 = vector.extract_strided_slice %67 {offsets = [1, 0, 0], sizes = [1, 16, 128], strides = [1, 1, 1]} : vector<2x16x128xf32> to vector<1x16x128xf32>
    %76 = vector.shape_cast %75 : vector<1x16x128xf32> to vector<16x128xf32>
    %c1_42 = arith.constant 1 : index
    %c0_43 = arith.constant 0 : index
    %c0_44 = arith.constant 0 : index
    %77 = vector.load %arg9[%c1_42, %c0_43, %c0_44] : memref<2x128x256xf32, #tpu.memory_space<vmem>>, vector<1x128x256xf32>
    %78 = vector.shape_cast %77 : vector<1x128x256xf32> to vector<128x256xf32>
    %cst_45 = arith.constant dense<0.000000e+00> : vector<16x256xf32>
    %79 = tpu.matmul %76, %78, %cst_45 {dimension_numbers = #tpu.dot_dimension_numbers<[1], [0], [0], [1], [0, 0, 1, 1], [], []>} : vector<16x128xf32>, vector<128x256xf32>, vector<16x256xf32> -> vector<16x256xf32>
    %80 = arith.addf %74, %79 : vector<16x256xf32>
    %c0_46 = arith.constant 0 : index
    %c0_47 = arith.constant 0 : index
    %81 = vector.load %arg10[%c0_46, %c0_47] : memref<1x256xf32, #tpu.memory_space<vmem>>, vector<1x256xf32>
    %82 = vector.broadcast %81 : vector<1x256xf32> to vector<16x256xf32>
    %83 = arith.addf %80, %82 : vector<16x256xf32>
    %84 = arith.addf %83, %7 : vector<16x256xf32>
    %c0_48 = arith.constant 0 : index
    %c0_49 = arith.constant 0 : index
    %85 = vector.load %arg11[%c0_48, %c0_49] : memref<1x256xf32, #tpu.memory_space<vmem>>, vector<1x256xf32>
    %c0_50 = arith.constant 0 : index
    %c0_51 = arith.constant 0 : index
    %86 = vector.load %arg12[%c0_50, %c0_51] : memref<1x256xf32, #tpu.memory_space<vmem>>, vector<1x256xf32>
    %cst_52 = arith.constant dense<0.000000e+00> : vector<16xf32>
    %87 = vector.multi_reduction <add>, %84, %cst_52 [1] : vector<16x256xf32> to vector<16xf32>
    %88 = vector.shape_cast %87 : vector<16xf32> to vector<16x1xf32>
    %cst_53 = arith.constant 2.560000e+02 : f32
    %89 = vector.broadcast %cst_53 : f32 to vector<16x1xf32>
    %90 = arith.divf %88, %89 : vector<16x1xf32>
    %91 = vector.broadcast %90 : vector<16x1xf32> to vector<16x256xf32>
    %92 = arith.subf %84, %91 : vector<16x256xf32>
    %93 = arith.mulf %92, %92 : vector<16x256xf32>
    %cst_54 = arith.constant dense<0.000000e+00> : vector<16xf32>
    %94 = vector.multi_reduction <add>, %93, %cst_54 [1] : vector<16x256xf32> to vector<16xf32>
    %95 = vector.shape_cast %94 : vector<16xf32> to vector<16x1xf32>
    %cst_55 = arith.constant 2.560000e+02 : f32
    %96 = vector.broadcast %cst_55 : f32 to vector<16x1xf32>
    %97 = arith.divf %95, %96 : vector<16x1xf32>
    %98 = vector.broadcast %90 : vector<16x1xf32> to vector<16x256xf32>
    %99 = arith.subf %84, %98 : vector<16x256xf32>
    %cst_56 = arith.constant 9.99999974E-6 : f32
    %100 = vector.broadcast %cst_56 : f32 to vector<16x1xf32>
    %101 = arith.addf %97, %100 : vector<16x1xf32>
    %102 = math.rsqrt %101 : vector<16x1xf32>
    %103 = vector.broadcast %102 : vector<16x1xf32> to vector<16x256xf32>
    %104 = arith.mulf %99, %103 : vector<16x256xf32>
    %105 = vector.broadcast %85 : vector<1x256xf32> to vector<16x256xf32>
    %106 = arith.mulf %104, %105 : vector<16x256xf32>
    %107 = vector.broadcast %86 : vector<1x256xf32> to vector<16x256xf32>
    %108 = arith.addf %106, %107 : vector<16x256xf32>
    %cst_57 = arith.constant 0.000000e+00 : f32
    %109 = vector.broadcast %cst_57 : f32 to vector<16x256xf32>
    %c0_58 = arith.constant 0 : index
    %c0_59 = arith.constant 0 : index
    %c0_60 = arith.constant 0 : index
    %110 = vector.load %arg13[%c0_58, %c0_59, %c0_60] : memref<2x256x256xf32, #tpu.memory_space<vmem>>, vector<1x256x256xf32>
    %111 = vector.shape_cast %110 : vector<1x256x256xf32> to vector<256x256xf32>
    %cst_61 = arith.constant dense<0.000000e+00> : vector<16x256xf32>
    %112 = tpu.matmul %108, %111, %cst_61 {dimension_numbers = #tpu.dot_dimension_numbers<[1], [0], [0], [1], [0, 0, 1, 1], [], []>} : vector<16x256xf32>, vector<256x256xf32>, vector<16x256xf32> -> vector<16x256xf32>
    %c0_62 = arith.constant 0 : index
    %c0_63 = arith.constant 0 : index
    %c0_64 = arith.constant 0 : index
    %113 = vector.load %arg14[%c0_62, %c0_63, %c0_64] : memref<2x1x256xf32, #tpu.memory_space<vmem>>, vector<1x1x256xf32>
    %114 = vector.shape_cast %113 : vector<1x1x256xf32> to vector<1x256xf32>
    %115 = vector.broadcast %114 : vector<1x256xf32> to vector<16x256xf32>
    %116 = arith.addf %112, %115 : vector<16x256xf32>
    %cst_65 = arith.constant 0.000000e+00 : f32
    %117 = vector.broadcast %cst_65 : f32 to vector<16x256xf32>
    %118 = arith.maximumf %116, %117 : vector<16x256xf32>
    %c0_66 = arith.constant 0 : index
    %c0_67 = arith.constant 0 : index
    %c0_68 = arith.constant 0 : index
    %119 = vector.load %arg15[%c0_66, %c0_67, %c0_68] : memref<2x256x256xf32, #tpu.memory_space<vmem>>, vector<1x256x256xf32>
    %120 = vector.shape_cast %119 : vector<1x256x256xf32> to vector<256x256xf32>
    %cst_69 = arith.constant dense<0.000000e+00> : vector<16x256xf32>
    %121 = tpu.matmul %118, %120, %cst_69 {dimension_numbers = #tpu.dot_dimension_numbers<[1], [0], [0], [1], [0, 0, 1, 1], [], []>} : vector<16x256xf32>, vector<256x256xf32>, vector<16x256xf32> -> vector<16x256xf32>
    %122 = arith.addf %109, %121 : vector<16x256xf32>
    %c1_70 = arith.constant 1 : index
    %c0_71 = arith.constant 0 : index
    %c0_72 = arith.constant 0 : index
    %123 = vector.load %arg13[%c1_70, %c0_71, %c0_72] : memref<2x256x256xf32, #tpu.memory_space<vmem>>, vector<1x256x256xf32>
    %124 = vector.shape_cast %123 : vector<1x256x256xf32> to vector<256x256xf32>
    %cst_73 = arith.constant dense<0.000000e+00> : vector<16x256xf32>
    %125 = tpu.matmul %108, %124, %cst_73 {dimension_numbers = #tpu.dot_dimension_numbers<[1], [0], [0], [1], [0, 0, 1, 1], [], []>} : vector<16x256xf32>, vector<256x256xf32>, vector<16x256xf32> -> vector<16x256xf32>
    %c1_74 = arith.constant 1 : index
    %c0_75 = arith.constant 0 : index
    %c0_76 = arith.constant 0 : index
    %126 = vector.load %arg14[%c1_74, %c0_75, %c0_76] : memref<2x1x256xf32, #tpu.memory_space<vmem>>, vector<1x1x256xf32>
    %127 = vector.shape_cast %126 : vector<1x1x256xf32> to vector<1x256xf32>
    %128 = vector.broadcast %127 : vector<1x256xf32> to vector<16x256xf32>
    %129 = arith.addf %125, %128 : vector<16x256xf32>
    %cst_77 = arith.constant 0.000000e+00 : f32
    %130 = vector.broadcast %cst_77 : f32 to vector<16x256xf32>
    %131 = arith.maximumf %129, %130 : vector<16x256xf32>
    %c1_78 = arith.constant 1 : index
    %c0_79 = arith.constant 0 : index
    %c0_80 = arith.constant 0 : index
    %132 = vector.load %arg15[%c1_78, %c0_79, %c0_80] : memref<2x256x256xf32, #tpu.memory_space<vmem>>, vector<1x256x256xf32>
    %133 = vector.shape_cast %132 : vector<1x256x256xf32> to vector<256x256xf32>
    %cst_81 = arith.constant dense<0.000000e+00> : vector<16x256xf32>
    %134 = tpu.matmul %131, %133, %cst_81 {dimension_numbers = #tpu.dot_dimension_numbers<[1], [0], [0], [1], [0, 0, 1, 1], [], []>} : vector<16x256xf32>, vector<256x256xf32>, vector<16x256xf32> -> vector<16x256xf32>
    %135 = arith.addf %122, %134 : vector<16x256xf32>
    %c0_82 = arith.constant 0 : index
    %c0_83 = arith.constant 0 : index
    %136 = vector.load %arg16[%c0_82, %c0_83] : memref<1x256xf32, #tpu.memory_space<vmem>>, vector<1x256xf32>
    %137 = vector.broadcast %136 : vector<1x256xf32> to vector<16x256xf32>
    %138 = arith.addf %135, %137 : vector<16x256xf32>
    %139 = arith.addf %138, %108 : vector<16x256xf32>
    %c0_84 = arith.constant 0 : index
    %c0_85 = arith.constant 0 : index
    %140 = vector.load %arg17[%c0_84, %c0_85] : memref<1x256xf32, #tpu.memory_space<vmem>>, vector<1x256xf32>
    %c0_86 = arith.constant 0 : index
    %c0_87 = arith.constant 0 : index
    %141 = vector.load %arg18[%c0_86, %c0_87] : memref<1x256xf32, #tpu.memory_space<vmem>>, vector<1x256xf32>
    %cst_88 = arith.constant dense<0.000000e+00> : vector<16xf32>
    %142 = vector.multi_reduction <add>, %139, %cst_88 [1] : vector<16x256xf32> to vector<16xf32>
    %143 = vector.shape_cast %142 : vector<16xf32> to vector<16x1xf32>
    %cst_89 = arith.constant 2.560000e+02 : f32
    %144 = vector.broadcast %cst_89 : f32 to vector<16x1xf32>
    %145 = arith.divf %143, %144 : vector<16x1xf32>
    %146 = vector.broadcast %145 : vector<16x1xf32> to vector<16x256xf32>
    %147 = arith.subf %139, %146 : vector<16x256xf32>
    %148 = arith.mulf %147, %147 : vector<16x256xf32>
    %cst_90 = arith.constant dense<0.000000e+00> : vector<16xf32>
    %149 = vector.multi_reduction <add>, %148, %cst_90 [1] : vector<16x256xf32> to vector<16xf32>
    %150 = vector.shape_cast %149 : vector<16xf32> to vector<16x1xf32>
    %cst_91 = arith.constant 2.560000e+02 : f32
    %151 = vector.broadcast %cst_91 : f32 to vector<16x1xf32>
    %152 = arith.divf %150, %151 : vector<16x1xf32>
    %153 = vector.broadcast %145 : vector<16x1xf32> to vector<16x256xf32>
    %154 = arith.subf %139, %153 : vector<16x256xf32>
    %cst_92 = arith.constant 9.99999974E-6 : f32
    %155 = vector.broadcast %cst_92 : f32 to vector<16x1xf32>
    %156 = arith.addf %152, %155 : vector<16x1xf32>
    %157 = math.rsqrt %156 : vector<16x1xf32>
    %158 = vector.broadcast %157 : vector<16x1xf32> to vector<16x256xf32>
    %159 = arith.mulf %154, %158 : vector<16x256xf32>
    %160 = vector.broadcast %140 : vector<1x256xf32> to vector<16x256xf32>
    %161 = arith.mulf %159, %160 : vector<16x256xf32>
    %162 = vector.broadcast %141 : vector<1x256xf32> to vector<16x256xf32>
    %163 = arith.addf %161, %162 : vector<16x256xf32>
    %c0_93 = arith.constant 0 : index
    %c0_94 = arith.constant 0 : index
    %c0_95 = arith.constant 0 : index
    %164 = vector.load %arg19[%c0_93, %c0_94, %c0_95] : memref<1x16x256xf32, #tpu.memory_space<vmem>>, vector<1x16x256xf32>
    %165 = vector.shape_cast %164 : vector<1x16x256xf32> to vector<16x256xf32>
    %166 = vector.shape_cast %163 : vector<16x256xf32> to vector<1x16x256xf32>
    tpu.vector_store %arg19[%c0_93, %c0_94, %c0_95], %166 {strides = array<i32>} : memref<1x16x256xf32, #tpu.memory_space<vmem>>, vector<1x16x256xf32>,
    return
  }
  func.func @transform_0(%arg0: i32, %arg1: i32) -> (i32, i32, i32) {
    %c0_i32 = arith.constant 0 : i32
    %c0_i32_0 = arith.constant 0 : i32
    %c0_i32_1 = arith.constant 0 : i32
    return %arg0, %c0_i32, %c0_i32_0 : i32, i32, i32
  }
  func.func @transform_1(%arg0: i32, %arg1: i32) -> (i32, i32) {
    %c0_i32 = arith.constant 0 : i32
    %c0_i32_0 = arith.constant 0 : i32
    %c0_i32_1 = arith.constant 0 : i32
    return %c0_i32, %c0_i32_0 : i32, i32
  }
  func.func @transform_2(%arg0: i32, %arg1: i32) -> (i32, i32) {
    %c0_i32 = arith.constant 0 : i32
    %c0_i32_0 = arith.constant 0 : i32
    %c0_i32_1 = arith.constant 0 : i32
    return %c0_i32, %c0_i32_0 : i32, i32
  }
  func.func @transform_3(%arg0: i32, %arg1: i32) -> (i32, i32) {
    %c0_i32 = arith.constant 0 : i32
    %c0_i32_0 = arith.constant 0 : i32
    %c0_i32_1 = arith.constant 0 : i32
    return %c0_i32, %c0_i32_0 : i32, i32
  }
  func.func @transform_4(%arg0: i32, %arg1: i32) -> (i32, i32) {
    %c0_i32 = arith.constant 0 : i32
    %c0_i32_0 = arith.constant 0 : i32
    %c0_i32_1 = arith.constant 0 : i32
    return %c0_i32, %c0_i32_0 : i32, i32
  }
  func.func @transform_5(%arg0: i32, %arg1: i32) -> (i32, i32) {
    %c0_i32 = arith.constant 0 : i32
    %c0_i32_0 = arith.constant 0 : i32
    %c0_i32_1 = arith.constant 0 : i32
    return %c0_i32, %c0_i32_0 : i32, i32
  }
  func.func @transform_6(%arg0: i32, %arg1: i32) -> (i32, i32) {
    %c0_i32 = arith.constant 0 : i32
    %c0_i32_0 = arith.constant 0 : i32
    %c0_i32_1 = arith.constant 0 : i32
    return %c0_i32, %c0_i32_0 : i32, i32
  }
  func.func @transform_7(%arg0: i32, %arg1: i32) -> (i32, i32, i32) {
    %c0_i32 = arith.constant 0 : i32
    %c0_i32_0 = arith.constant 0 : i32
    %c0_i32_1 = arith.constant 0 : i32
    %c0_i32_2 = arith.constant 0 : i32
    return %c0_i32, %c0_i32_0, %c0_i32_1 : i32, i32, i32
  }
  func.func @transform_8(%arg0: i32, %arg1: i32) -> (i32, i32) {
    %c0_i32 = arith.constant 0 : i32
    %c0_i32_0 = arith.constant 0 : i32
    %c0_i32_1 = arith.constant 0 : i32
    return %c0_i32, %c0_i32_0 : i32, i32
  }
  func.func @transform_9(%arg0: i32, %arg1: i32) -> (i32, i32) {
    %c0_i32 = arith.constant 0 : i32
    %c0_i32_0 = arith.constant 0 : i32
    %c0_i32_1 = arith.constant 0 : i32
    return %c0_i32, %c0_i32_0 : i32, i32
  }
  func.func @transform_10(%arg0: i32, %arg1: i32) -> (i32, i32) {
    %c0_i32 = arith.constant 0 : i32
    %c0_i32_0 = arith.constant 0 : i32
    %c0_i32_1 = arith.constant 0 : i32
    return %c0_i32, %c0_i32_0 : i32, i32
  }
  func.func @transform_11(%arg0: i32, %arg1: i32) -> (i32, i32, i32) {
    %c0_i32 = arith.constant 0 : i32
    %c0_i32_0 = arith.constant 0 : i32
    %c0_i32_1 = arith.constant 0 : i32
    %c0_i32_2 = arith.constant 0 : i32
    return %c0_i32, %c0_i32_0, %c0_i32_1 : i32, i32, i32
  }
  func.func @transform_12(%arg0: i32, %arg1: i32) -> (i32, i32, i32) {
    %c0_i32 = arith.constant 0 : i32
    %c0_i32_0 = arith.constant 0 : i32
    %c0_i32_1 = arith.constant 0 : i32
    %c0_i32_2 = arith.constant 0 : i32
    return %c0_i32, %c0_i32_0, %c0_i32_1 : i32, i32, i32
  }
  func.func @transform_13(%arg0: i32, %arg1: i32) -> (i32, i32, i32) {
    %c0_i32 = arith.constant 0 : i32
    %c0_i32_0 = arith.constant 0 : i32
    %c0_i32_1 = arith.constant 0 : i32
    %c0_i32_2 = arith.constant 0 : i32
    return %c0_i32, %c0_i32_0, %c0_i32_1 : i32, i32, i32
  }
  func.func @transform_14(%arg0: i32, %arg1: i32) -> (i32, i32) {
    %c0_i32 = arith.constant 0 : i32
    %c0_i32_0 = arith.constant 0 : i32
    %c0_i32_1 = arith.constant 0 : i32
    return %c0_i32, %c0_i32_0 : i32, i32
  }
  func.func @transform_15(%arg0: i32, %arg1: i32) -> (i32, i32) {
    %c0_i32 = arith.constant 0 : i32
    %c0_i32_0 = arith.constant 0 : i32
    %c0_i32_1 = arith.constant 0 : i32
    return %c0_i32, %c0_i32_0 : i32, i32
  }
  func.func @transform_16(%arg0: i32, %arg1: i32) -> (i32, i32) {
    %c0_i32 = arith.constant 0 : i32
    %c0_i32_0 = arith.constant 0 : i32
    %c0_i32_1 = arith.constant 0 : i32
    return %c0_i32, %c0_i32_0 : i32, i32
  }
  func.func @transform_17(%arg0: i32, %arg1: i32) -> (i32, i32, i32) {
    %c0_i32 = arith.constant 0 : i32
    %c0_i32_0 = arith.constant 0 : i32
    return %arg0, %arg1, %c0_i32 : i32, i32, i32
  }
}

module attributes {stable_mosaic.version = 11 : i64} {
  func.func @_transformer_block_kernel(%arg0: i32, %arg1: i32, %arg2: memref<1x32x256xf32, #tpu.memory_space<vmem>>, %arg3: memref<256x256xf32, #tpu.memory_space<vmem>>, %arg4: memref<1x256xf32, #tpu.memory_space<vmem>>, %arg5: memref<256x256xf32, #tpu.memory_space<vmem>>, %arg6: memref<1x256xf32, #tpu.memory_space<vmem>>, %arg7: memref<256x256xf32, #tpu.memory_space<vmem>>, %arg8: memref<1x256xf32, #tpu.memory_space<vmem>>, %arg9: memref<2x128x256xf32, #tpu.memory_space<vmem>>, %arg10: memref<1x256xf32, #tpu.memory_space<vmem>>, %arg11: memref<1x256xf32, #tpu.memory_space<vmem>>, %arg12: memref<1x256xf32, #tpu.memory_space<vmem>>, %arg13: memref<2x256x256xf32, #tpu.memory_space<vmem>>, %arg14: memref<2x1x256xf32, #tpu.memory_space<vmem>>, %arg15: memref<2x256x256xf32, #tpu.memory_space<vmem>>, %arg16: memref<1x256xf32, #tpu.memory_space<vmem>>, %arg17: memref<1x256xf32, #tpu.memory_space<vmem>>, %arg18: memref<1x256xf32, #tpu.memory_space<vmem>>, %arg19: memref<1x16x256xf32, #tpu.memory_space<vmem>>, %arg20: memref<2x16x128xf32, #tpu.memory_space<vmem>>, %arg21: memref<2x32x128xf32, #tpu.memory_space<vmem>>, %arg22: memref<2x32x128xf32, #tpu.memory_space<vmem>>) attributes {dimension_semantics = [#tpu.dimension_semantics<parallel>, #tpu.dimension_semantics<arbitrary>], iteration_bounds = array<i64: 2, 2>, scalar_prefetch = 0 : i64, scratch_operands = 3 : i64, tpu.core_type = #tpu.core_type<tc>, window_params = [{transform_indices = @transform_0, window_bounds = array<i64: 1, 32, 256>}, {pipeline_mode = #tpu.pipeline_mode<synchronous>, transform_indices = @transform_1, window_bounds = array<i64: 256, 256>}, {pipeline_mode = #tpu.pipeline_mode<synchronous>, transform_indices = @transform_2, window_bounds = array<i64: 1, 256>}, {pipeline_mode = #tpu.pipeline_mode<synchronous>, transform_indices = @transform_3, window_bounds = array<i64: 256, 256>}, {pipeline_mode = #tpu.pipeline_mode<synchronous>, transform_indices = @transform_4, window_bounds = array<i64: 1, 256>}, {pipeline_mode = #tpu.pipeline_mode<synchronous>, transform_indices = @transform_5, window_bounds = array<i64: 256, 256>}, {pipeline_mode = #tpu.pipeline_mode<synchronous>, transform_indices = @transform_6, window_bounds = array<i64: 1, 256>}, {pipeline_mode = #tpu.pipeline_mode<synchronous>, transform_indices = @transform_7, window_bounds = array<i64: 2, 128, 256>}, {pipeline_mode = #tpu.pipeline_mode<synchronous>, transform_indices = @transform_8, window_bounds = array<i64: 1, 256>}, {pipeline_mode = #tpu.pipeline_mode<synchronous>, transform_indices = @transform_9, window_bounds = array<i64: 1, 256>}, {pipeline_mode = #tpu.pipeline_mode<synchronous>, transform_indices = @transform_10, window_bounds = array<i64: 1, 256>}, {pipeline_mode = #tpu.pipeline_mode<synchronous>, transform_indices = @transform_11, window_bounds = array<i64: 2, 256, 256>}, {pipeline_mode = #tpu.pipeline_mode<synchronous>, transform_indices = @transform_12, window_bounds = array<i64: 2, 1, 256>}, {pipeline_mode = #tpu.pipeline_mode<synchronous>, transform_indices = @transform_13, window_bounds = array<i64: 2, 256, 256>}, {pipeline_mode = #tpu.pipeline_mode<synchronous>, transform_indices = @transform_14, window_bounds = array<i64: 1, 256>}, {pipeline_mode = #tpu.pipeline_mode<synchronous>, transform_indices = @transform_15, window_bounds = array<i64: 1, 256>}, {pipeline_mode = #tpu.pipeline_mode<synchronous>, transform_indices = @transform_16, window_bounds = array<i64: 1, 256>}, {transform_indices = @transform_17, window_bounds = array<i64: 1, 16, 256>}]} {
    %c0_i32 = arith.constant 0 : i32
    %0 = arith.cmpi eq, %arg1, %c0_i32 : i32
    %1 = arith.extui %0 : i1 to i32
    %c0_i32_0 = arith.constant 0 : i32
    %2 = arith.cmpi ne, %1, %c0_i32_0 : i32
    scf.if %2 {
      %c0_96 = arith.constant 0 : index
      %c0_97 = arith.constant 0 : index
      %c0_98 = arith.constant 0 : index
      %167 = vector.load %arg2[%c0_96, %c0_97, %c0_98] : memref<1x32x256xf32, #tpu.memory_space<vmem>>, vector<1x32x256xf32>
      %168 = vector.shape_cast %167 : vector<1x32x256xf32> to vector<32x256xf32>
      %c0_99 = arith.constant 0 : index
      %c0_100 = arith.constant 0 : index
      %169 = vector.load %arg5[%c0_99, %c0_100] : memref<256x256xf32, #tpu.memory_space<vmem>>, vector<256x256xf32>
      %cst_101 = arith.constant dense<0.000000e+00> : vector<32x256xf32>
      %170 = tpu.matmul %168, %169, %cst_101 {dimension_numbers = #tpu.dot_dimension_numbers<[1], [0], [0], [1], [0, 0, 1, 1], [], []>} : vector<32x256xf32>, vector<256x256xf32>, vector<32x256xf32> -> vector<32x256xf32>
      %c0_102 = arith.constant 0 : index
      %c0_103 = arith.constant 0 : index
      %171 = vector.load %arg6[%c0_102, %c0_103] : memref<1x256xf32, #tpu.memory_space<vmem>>, vector<1x256xf32>
      %172 = vector.broadcast %171 : vector<1x256xf32> to vector<32x256xf32>
      %173 = arith.addf %170, %172 : vector<32x256xf32>
      %c0_104 = arith.constant 0 : index
      %c0_105 = arith.constant 0 : index
      %174 = vector.load %arg7[%c0_104, %c0_105] : memref<256x256xf32, #tpu.memory_space<vmem>>, vector<256x256xf32>
      %cst_106 = arith.constant dense<0.000000e+00> : vector<32x256xf32>
      %175 = tpu.matmul %168, %174, %cst_106 {dimension_numbers = #tpu.dot_dimension_numbers<[1], [0], [0], [1], [0, 0, 1, 1], [], []>} : vector<32x256xf32>, vector<256x256xf32>, vector<32x256xf32> -> vector<32x256xf32>
      %c0_107 = arith.constant 0 : index
      %c0_108 = arith.constant 0 : index
      %176 = vector.load %arg8[%c0_107, %c0_108] : memref<1x256xf32, #tpu.memory_space<vmem>>, vector<1x256xf32>
      %177 = vector.broadcast %176 : vector<1x256xf32> to vector<32x256xf32>
      %178 = arith.addf %175, %177 : vector<32x256xf32>
      %179 = vector.extract_strided_slice %173 {offsets = [0, 0], sizes = [32, 128], strides = [1, 1]} : vector<32x256xf32> to vector<32x128xf32>
      %c0_109 = arith.constant 0 : index
      %c0_110 = arith.constant 0 : index
      %c0_111 = arith.constant 0 : index
      %180 = vector.load %arg21[%c0_109, %c0_110, %c0_111] : memref<2x32x128xf32, #tpu.memory_space<vmem>>, vector<1x32x128xf32>
      %181 = vector.shape_cast %180 : vector<1x32x128xf32> to vector<32x128xf32>
      %182 = vector.shape_cast %179 : vector<32x128xf32> to vector<1x32x128xf32>
      tpu.vector_store %arg21[%c0_109, %c0_110, %c0_111], %182 {strides = array<i32>} : memref<2x32x128xf32, #tpu.memory_space<vmem>>, vector<1x32x128xf32>,
      %183 = vector.extract_strided_slice %178 {offsets = [0, 0], sizes = [32, 128], strides = [1, 1]} : vector<32x256xf32> to vector<32x128xf32>
      %c0_112 = arith.constant 0 : index
      %c0_113 = arith.constant 0 : index
      %c0_114 = arith.constant 0 : index
      %184 = vector.load %arg22[%c0_112, %c0_113, %c0_114] : memref<2x32x128xf32, #tpu.memory_space<vmem>>, vector<1x32x128xf32>
      %185 = vector.shape_cast %184 : vector<1x32x128xf32> to vector<32x128xf32>
      %186 = vector.shape_cast %183 : vector<32x128xf32> to vector<1x32x128xf32>
      tpu.vector_store %arg22[%c0_112, %c0_113, %c0_114], %186 {strides = array<i32>} : memref<2x32x128xf32, #tpu.memory_space<vmem>>, vector<1x32x128xf32>,
      %187 = vector.extract_strided_slice %173 {offsets = [0, 128], sizes = [32, 128], strides = [1, 1]} : vector<32x256xf32> to vector<32x128xf32>
      %c1_115 = arith.constant 1 : index
      %c0_116 = arith.constant 0 : index
      %c0_117 = arith.constant 0 : index
      %188 = vector.load %arg21[%c1_115, %c0_116, %c0_117] : memref<2x32x128xf32, #tpu.memory_space<vmem>>, vector<1x32x128xf32>
      %189 = vector.shape_cast %188 : vector<1x32x128xf32> to vector<32x128xf32>
      %190 = vector.shape_cast %187 : vector<32x128xf32> to vector<1x32x128xf32>
      tpu.vector_store %arg21[%c1_115, %c0_116, %c0_117], %190 {strides = array<i32>} : memref<2x32x128xf32, #tpu.memory_space<vmem>>, vector<1x32x128xf32>,
      %191 = vector.extract_strided_slice %178 {offsets = [0, 128], sizes = [32, 128], strides = [1, 1]} : vector<32x256xf32> to vector<32x128xf32>
      %c1_118 = arith.constant 1 : index
      %c0_119 = arith.constant 0 : index
      %c0_120 = arith.constant 0 : index
      %192 = vector.load %arg22[%c1_118, %c0_119, %c0_120] : memref<2x32x128xf32, #tpu.memory_space<vmem>>, vector<1x32x128xf32>
      %193 = vector.shape_cast %192 : vector<1x32x128xf32> to vector<32x128xf32>
      %194 = vector.shape_cast %191 : vector<32x128xf32> to vector<1x32x128xf32>
      tpu.vector_store %arg22[%c1_118, %c0_119, %c0_120], %194 {strides = array<i32>} : memref<2x32x128xf32, #tpu.memory_space<vmem>>, vector<1x32x128xf32>,
    } else {
    }
    %c16_i32 = arith.constant 16 : i32
    %3 = arith.muli %arg1, %c16_i32 : i32
    %4 = tpu.assume_multiple %3, 16 : i32
    %c0 = arith.constant 0 : index
    %5 = arith.index_cast %4 : i32 to index
    %c0_1 = arith.constant 0 : index
    %6 = vector.load %arg2[%c0, %5, %c0_1] : memref<1x32x256xf32, #tpu.memory_space<vmem>>, vector<1x16x256xf32>
    %7 = vector.shape_cast %6 : vector<1x16x256xf32> to vector<16x256xf32>
    %c0_2 = arith.constant 0 : index
    %c0_3 = arith.constant 0 : index
    %8 = vector.load %arg3[%c0_2, %c0_3] : memref<256x256xf32, #tpu.memory_space<vmem>>, vector<256x256xf32>
    %cst = arith.constant dense<0.000000e+00> : vector<16x256xf32>
    %9 = tpu.matmul %7, %8, %cst {dimension_numbers = #tpu.dot_dimension_numbers<[1], [0], [0], [1], [0, 0, 1, 1], [], []>} : vector<16x256xf32>, vector<256x256xf32>, vector<16x256xf32> -> vector<16x256xf32>
    %c0_4 = arith.constant 0 : index
    %c0_5 = arith.constant 0 : index
    %10 = vector.load %arg4[%c0_4, %c0_5] : memref<1x256xf32, #tpu.memory_space<vmem>>, vector<1x256xf32>
    %11 = vector.broadcast %10 : vector<1x256xf32> to vector<16x256xf32>
    %12 = arith.addf %9, %11 : vector<16x256xf32>
    %cst_6 = arith.constant 0.0883883461 : f32
    %13 = vector.broadcast %cst_6 : f32 to vector<16x256xf32>
    %14 = arith.mulf %12, %13 : vector<16x256xf32>
    %15 = vector.extract_strided_slice %14 {offsets = [0, 0], sizes = [16, 128], strides = [1, 1]} : vector<16x256xf32> to vector<16x128xf32>
    %c0_7 = arith.constant 0 : index
    %c0_8 = arith.constant 0 : index
    %c0_9 = arith.constant 0 : index
    %16 = vector.load %arg20[%c0_7, %c0_8, %c0_9] : memref<2x16x128xf32, #tpu.memory_space<vmem>>, vector<1x16x128xf32>
    %17 = vector.shape_cast %16 : vector<1x16x128xf32> to vector<16x128xf32>
    %18 = vector.shape_cast %15 : vector<16x128xf32> to vector<1x16x128xf32>
    tpu.vector_store %arg20[%c0_7, %c0_8, %c0_9], %18 {strides = array<i32>} : memref<2x16x128xf32, #tpu.memory_space<vmem>>, vector<1x16x128xf32>,
    %19 = vector.extract_strided_slice %14 {offsets = [0, 128], sizes = [16, 128], strides = [1, 1]} : vector<16x256xf32> to vector<16x128xf32>
    %c1 = arith.constant 1 : index
    %c0_10 = arith.constant 0 : index
    %c0_11 = arith.constant 0 : index
    %20 = vector.load %arg20[%c1, %c0_10, %c0_11] : memref<2x16x128xf32, #tpu.memory_space<vmem>>, vector<1x16x128xf32>
    %21 = vector.shape_cast %20 : vector<1x16x128xf32> to vector<16x128xf32>
    %22 = vector.shape_cast %19 : vector<16x128xf32> to vector<1x16x128xf32>
    tpu.vector_store %arg20[%c1, %c0_10, %c0_11], %22 {strides = array<i32>} : memref<2x16x128xf32, #tpu.memory_space<vmem>>, vector<1x16x128xf32>,
    %c0_12 = arith.constant 0 : index
    %c0_13 = arith.constant 0 : index
    %c0_14 = arith.constant 0 : index
    %23 = vector.load %arg20[%c0_12, %c0_13, %c0_14] : memref<2x16x128xf32, #tpu.memory_space<vmem>>, vector<2x16x128xf32>
    %cst_15 = arith.constant 0xFF800000 : f32
    %24 = vector.broadcast %cst_15 : f32 to vector<2x16x1xf32>
    %cst_16 = arith.constant 0.000000e+00 : f32
    %25 = vector.broadcast %cst_16 : f32 to vector<2x16x1xf32>
    %cst_17 = arith.constant 0.000000e+00 : f32
    %26 = vector.broadcast %cst_17 : f32 to vector<2x16x128xf32>
    %c0_18 = arith.constant 0 : index
    %c0_19 = arith.constant 0 : index
    %c0_20 = arith.constant 0 : index
    %27 = vector.load %arg21[%c0_18, %c0_19, %c0_20] : memref<2x32x128xf32, #tpu.memory_space<vmem>>, vector<2x16x128xf32>
    %c0_21 = arith.constant 0 : index
    %c0_22 = arith.constant 0 : index
    %c0_23 = arith.constant 0 : index
    %28 = vector.load %arg22[%c0_21, %c0_22, %c0_23] : memref<2x32x128xf32, #tpu.memory_space<vmem>>, vector<2x16x128xf32>
    "tpu.trace_start"() <{level = 10 : i32, message = "hqd,hkd->hqk"}> : () -> ()
    %cst_24 = arith.constant dense<0.000000e+00> : vector<2x16x16xf32>
    %29 = tpu.matmul %23, %27, %cst_24 {dimension_numbers = #tpu.dot_dimension_numbers<[2], [2], [1], [1], [0, 0, 0, 1, 1, 1], [0], [0]>} : vector<2x16x128xf32>, vector<2x16x128xf32>, vector<2x16x16xf32> -> vector<2x16x16xf32>
    "tpu.trace_stop"() : () -> ()
    %cst_25 = arith.constant dense<0xFF800000> : vector<2x16xf32>
    %30 = vector.multi_reduction <maximumf>, %29, %cst_25 [2] : vector<2x16x16xf32> to vector<2x16xf32>
    %31 = vector.shape_cast %30 : vector<2x16xf32> to vector<2x16x1xf32>
    %32 = arith.maximumf %24, %31 : vector<2x16x1xf32>
    %33 = arith.subf %24, %32 : vector<2x16x1xf32>
    %34 = math.exp %33 : vector<2x16x1xf32>
    %35 = vector.broadcast %32 : vector<2x16x1xf32> to vector<2x16x16xf32>
    %36 = arith.subf %29, %35 : vector<2x16x16xf32>
    %37 = math.exp %36 : vector<2x16x16xf32>
    %38 = arith.mulf %34, %25 : vector<2x16x1xf32>
    %cst_26 = arith.constant dense<0.000000e+00> : vector<2x16xf32>
    %39 = vector.multi_reduction <add>, %37, %cst_26 [2] : vector<2x16x16xf32> to vector<2x16xf32>
    %40 = vector.shape_cast %39 : vector<2x16xf32> to vector<2x16x1xf32>
    %41 = arith.addf %38, %40 : vector<2x16x1xf32>
    %42 = vector.broadcast %34 : vector<2x16x1xf32> to vector<2x16x128xf32>
    %43 = arith.mulf %42, %26 : vector<2x16x128xf32>
    "tpu.trace_start"() <{level = 10 : i32, message = "hqk,hkd->hqd"}> : () -> ()
    %cst_27 = arith.constant dense<0.000000e+00> : vector<2x16x128xf32>
    %44 = tpu.matmul %37, %28, %cst_27 {dimension_numbers = #tpu.dot_dimension_numbers<[2], [1], [1], [2], [0, 0, 0, 1, 1, 2], [0], [0]>} : vector<2x16x16xf32>, vector<2x16x128xf32>, vector<2x16x128xf32> -> vector<2x16x128xf32>
    "tpu.trace_stop"() : () -> ()
    %45 = arith.addf %43, %44 : vector<2x16x128xf32>
    %c0_28 = arith.constant 0 : index
    %c16 = arith.constant 16 : index
    %c0_29 = arith.constant 0 : index
    %46 = vector.load %arg21[%c0_28, %c16, %c0_29] : memref<2x32x128xf32, #tpu.memory_space<vmem>>, vector<2x16x128xf32>
    %c0_30 = arith.constant 0 : index
    %c16_31 = arith.constant 16 : index
    %c0_32 = arith.constant 0 : index
    %47 = vector.load %arg22[%c0_30, %c16_31, %c0_32] : memref<2x32x128xf32, #tpu.memory_space<vmem>>, vector<2x16x128xf32>
    "tpu.trace_start"() <{level = 10 : i32, message = "hqd,hkd->hqk"}> : () -> ()
    %cst_33 = arith.constant dense<0.000000e+00> : vector<2x16x16xf32>
    %48 = tpu.matmul %23, %46, %cst_33 {dimension_numbers = #tpu.dot_dimension_numbers<[2], [2], [1], [1], [0, 0, 0, 1, 1, 1], [0], [0]>} : vector<2x16x128xf32>, vector<2x16x128xf32>, vector<2x16x16xf32> -> vector<2x16x16xf32>
    "tpu.trace_stop"() : () -> ()
    %cst_34 = arith.constant dense<0xFF800000> : vector<2x16xf32>
    %49 = vector.multi_reduction <maximumf>, %48, %cst_34 [2] : vector<2x16x16xf32> to vector<2x16xf32>
    %50 = vector.shape_cast %49 : vector<2x16xf32> to vector<2x16x1xf32>
    %51 = arith.maximumf %32, %50 : vector<2x16x1xf32>
    %52 = arith.subf %32, %51 : vector<2x16x1xf32>
    %53 = math.exp %52 : vector<2x16x1xf32>
    %54 = vector.broadcast %51 : vector<2x16x1xf32> to vector<2x16x16xf32>
    %55 = arith.subf %48, %54 : vector<2x16x16xf32>
    %56 = math.exp %55 : vector<2x16x16xf32>
    %57 = arith.mulf %53, %41 : vector<2x16x1xf32>
    %cst_35 = arith.constant dense<0.000000e+00> : vector<2x16xf32>
    %58 = vector.multi_reduction <add>, %56, %cst_35 [2] : vector<2x16x16xf32> to vector<2x16xf32>
    %59 = vector.shape_cast %58 : vector<2x16xf32> to vector<2x16x1xf32>
    %60 = arith.addf %57, %59 : vector<2x16x1xf32>
    %61 = vector.broadcast %53 : vector<2x16x1xf32> to vector<2x16x128xf32>
    %62 = arith.mulf %61, %45 : vector<2x16x128xf32>
    "tpu.trace_start"() <{level = 10 : i32, message = "hqk,hkd->hqd"}> : () -> ()
    %cst_36 = arith.constant dense<0.000000e+00> : vector<2x16x128xf32>
    %63 = tpu.matmul %56, %47, %cst_36 {dimension_numbers = #tpu.dot_dimension_numbers<[2], [1], [1], [2], [0, 0, 0, 1, 1, 2], [0], [0]>} : vector<2x16x16xf32>, vector<2x16x128xf32>, vector<2x16x128xf32> -> vector<2x16x128xf32>
    "tpu.trace_stop"() : () -> ()
    %64 = arith.addf %62, %63 : vector<2x16x128xf32>
    %65 = tpu.reciprocal %60 {approx = true} : vector<2x16x1xf32> -> vector<2x16x1xf32>
    %66 = vector.broadcast %65 : vector<2x16x1xf32> to vector<2x16x128xf32>
    %67 = arith.mulf %64, %66 : vector<2x16x128xf32>
    %cst_37 = arith.constant 0.000000e+00 : f32
    %68 = vector.broadcast %cst_37 : f32 to vector<16x256xf32>
    %69 = vector.extract_strided_slice %67 {offsets = [0, 0, 0], sizes = [1, 16, 128], strides = [1, 1, 1]} : vector<2x16x128xf32> to vector<1x16x128xf32>
    %70 = vector.shape_cast %69 : vector<1x16x128xf32> to vector<16x128xf32>
    %c0_38 = arith.constant 0 : index
    %c0_39 = arith.constant 0 : index
    %c0_40 = arith.constant 0 : index
    %71 = vector.load %arg9[%c0_38, %c0_39, %c0_40] : memref<2x128x256xf32, #tpu.memory_space<vmem>>, vector<1x128x256xf32>
    %72 = vector.shape_cast %71 : vector<1x128x256xf32> to vector<128x256xf32>
    %cst_41 = arith.constant dense<0.000000e+00> : vector<16x256xf32>
    %73 = tpu.matmul %70, %72, %cst_41 {dimension_numbers = #tpu.dot_dimension_numbers<[1], [0], [0], [1], [0, 0, 1, 1], [], []>} : vector<16x128xf32>, vector<128x256xf32>, vector<16x256xf32> -> vector<16x256xf32>
    %74 = arith.addf %68, %73 : vector<16x256xf32>
    %75 = vector.extract_strided_slice %67 {offsets = [1, 0, 0], sizes = [1, 16, 128], strides = [1, 1, 1]} : vector<2x16x128xf32> to vector<1x16x128xf32>
    %76 = vector.shape_cast %75 : vector<1x16x128xf32> to vector<16x128xf32>
    %c1_42 = arith.constant 1 : index
    %c0_43 = arith.constant 0 : index
    %c0_44 = arith.constant 0 : index
    %77 = vector.load %arg9[%c1_42, %c0_43, %c0_44] : memref<2x128x256xf32, #tpu.memory_space<vmem>>, vector<1x128x256xf32>
    %78 = vector.shape_cast %77 : vector<1x128x256xf32> to vector<128x256xf32>
    %cst_45 = arith.constant dense<0.000000e+00> : vector<16x256xf32>
    %79 = tpu.matmul %76, %78, %cst_45 {dimension_numbers = #tpu.dot_dimension_numbers<[1], [0], [0], [1], [0, 0, 1, 1], [], []>} : vector<16x128xf32>, vector<128x256xf32>, vector<16x256xf32> -> vector<16x256xf32>
    %80 = arith.addf %74, %79 : vector<16x256xf32>
    %c0_46 = arith.constant 0 : index
    %c0_47 = arith.constant 0 : index
    %81 = vector.load %arg10[%c0_46, %c0_47] : memref<1x256xf32, #tpu.memory_space<vmem>>, vector<1x256xf32>
    %82 = vector.broadcast %81 : vector<1x256xf32> to vector<16x256xf32>
    %83 = arith.addf %80, %82 : vector<16x256xf32>
    %84 = arith.addf %83, %7 : vector<16x256xf32>
    %c0_48 = arith.constant 0 : index
    %c0_49 = arith.constant 0 : index
    %85 = vector.load %arg11[%c0_48, %c0_49] : memref<1x256xf32, #tpu.memory_space<vmem>>, vector<1x256xf32>
    %c0_50 = arith.constant 0 : index
    %c0_51 = arith.constant 0 : index
    %86 = vector.load %arg12[%c0_50, %c0_51] : memref<1x256xf32, #tpu.memory_space<vmem>>, vector<1x256xf32>
    %cst_52 = arith.constant dense<0.000000e+00> : vector<16xf32>
    %87 = vector.multi_reduction <add>, %84, %cst_52 [1] : vector<16x256xf32> to vector<16xf32>
    %88 = vector.shape_cast %87 : vector<16xf32> to vector<16x1xf32>
    %cst_53 = arith.constant 2.560000e+02 : f32
    %89 = vector.broadcast %cst_53 : f32 to vector<16x1xf32>
    %90 = arith.divf %88, %89 : vector<16x1xf32>
    %91 = vector.broadcast %90 : vector<16x1xf32> to vector<16x256xf32>
    %92 = arith.subf %84, %91 : vector<16x256xf32>
    %93 = arith.mulf %92, %92 : vector<16x256xf32>
    %cst_54 = arith.constant dense<0.000000e+00> : vector<16xf32>
    %94 = vector.multi_reduction <add>, %93, %cst_54 [1] : vector<16x256xf32> to vector<16xf32>
    %95 = vector.shape_cast %94 : vector<16xf32> to vector<16x1xf32>
    %cst_55 = arith.constant 2.560000e+02 : f32
    %96 = vector.broadcast %cst_55 : f32 to vector<16x1xf32>
    %97 = arith.divf %95, %96 : vector<16x1xf32>
    %98 = vector.broadcast %90 : vector<16x1xf32> to vector<16x256xf32>
    %99 = arith.subf %84, %98 : vector<16x256xf32>
    %cst_56 = arith.constant 9.99999974E-6 : f32
    %100 = vector.broadcast %cst_56 : f32 to vector<16x1xf32>
    %101 = arith.addf %97, %100 : vector<16x1xf32>
    %102 = math.rsqrt %101 : vector<16x1xf32>
    %103 = vector.broadcast %102 : vector<16x1xf32> to vector<16x256xf32>
    %104 = arith.mulf %99, %103 : vector<16x256xf32>
    %105 = vector.broadcast %85 : vector<1x256xf32> to vector<16x256xf32>
    %106 = arith.mulf %104, %105 : vector<16x256xf32>
    %107 = vector.broadcast %86 : vector<1x256xf32> to vector<16x256xf32>
    %108 = arith.addf %106, %107 : vector<16x256xf32>
    %cst_57 = arith.constant 0.000000e+00 : f32
    %109 = vector.broadcast %cst_57 : f32 to vector<16x256xf32>
    %c0_58 = arith.constant 0 : index
    %c0_59 = arith.constant 0 : index
    %c0_60 = arith.constant 0 : index
    %110 = vector.load %arg13[%c0_58, %c0_59, %c0_60] : memref<2x256x256xf32, #tpu.memory_space<vmem>>, vector<1x256x256xf32>
    %111 = vector.shape_cast %110 : vector<1x256x256xf32> to vector<256x256xf32>
    %cst_61 = arith.constant dense<0.000000e+00> : vector<16x256xf32>
    %112 = tpu.matmul %108, %111, %cst_61 {dimension_numbers = #tpu.dot_dimension_numbers<[1], [0], [0], [1], [0, 0, 1, 1], [], []>} : vector<16x256xf32>, vector<256x256xf32>, vector<16x256xf32> -> vector<16x256xf32>
    %c0_62 = arith.constant 0 : index
    %c0_63 = arith.constant 0 : index
    %c0_64 = arith.constant 0 : index
    %113 = vector.load %arg14[%c0_62, %c0_63, %c0_64] : memref<2x1x256xf32, #tpu.memory_space<vmem>>, vector<1x1x256xf32>
    %114 = vector.shape_cast %113 : vector<1x1x256xf32> to vector<1x256xf32>
    %115 = vector.broadcast %114 : vector<1x256xf32> to vector<16x256xf32>
    %116 = arith.addf %112, %115 : vector<16x256xf32>
    %cst_65 = arith.constant 0.000000e+00 : f32
    %117 = vector.broadcast %cst_65 : f32 to vector<16x256xf32>
    %118 = arith.maximumf %116, %117 : vector<16x256xf32>
    %c0_66 = arith.constant 0 : index
    %c0_67 = arith.constant 0 : index
    %c0_68 = arith.constant 0 : index
    %119 = vector.load %arg15[%c0_66, %c0_67, %c0_68] : memref<2x256x256xf32, #tpu.memory_space<vmem>>, vector<1x256x256xf32>
    %120 = vector.shape_cast %119 : vector<1x256x256xf32> to vector<256x256xf32>
    %cst_69 = arith.constant dense<0.000000e+00> : vector<16x256xf32>
    %121 = tpu.matmul %118, %120, %cst_69 {dimension_numbers = #tpu.dot_dimension_numbers<[1], [0], [0], [1], [0, 0, 1, 1], [], []>} : vector<16x256xf32>, vector<256x256xf32>, vector<16x256xf32> -> vector<16x256xf32>
    %122 = arith.addf %109, %121 : vector<16x256xf32>
    %c1_70 = arith.constant 1 : index
    %c0_71 = arith.constant 0 : index
    %c0_72 = arith.constant 0 : index
    %123 = vector.load %arg13[%c1_70, %c0_71, %c0_72] : memref<2x256x256xf32, #tpu.memory_space<vmem>>, vector<1x256x256xf32>
    %124 = vector.shape_cast %123 : vector<1x256x256xf32> to vector<256x256xf32>
    %cst_73 = arith.constant dense<0.000000e+00> : vector<16x256xf32>
    %125 = tpu.matmul %108, %124, %cst_73 {dimension_numbers = #tpu.dot_dimension_numbers<[1], [0], [0], [1], [0, 0, 1, 1], [], []>} : vector<16x256xf32>, vector<256x256xf32>, vector<16x256xf32> -> vector<16x256xf32>
    %c1_74 = arith.constant 1 : index
    %c0_75 = arith.constant 0 : index
    %c0_76 = arith.constant 0 : index
    %126 = vector.load %arg14[%c1_74, %c0_75, %c0_76] : memref<2x1x256xf32, #tpu.memory_space<vmem>>, vector<1x1x256xf32>
    %127 = vector.shape_cast %126 : vector<1x1x256xf32> to vector<1x256xf32>
    %128 = vector.broadcast %127 : vector<1x256xf32> to vector<16x256xf32>
    %129 = arith.addf %125, %128 : vector<16x256xf32>
    %cst_77 = arith.constant 0.000000e+00 : f32
    %130 = vector.broadcast %cst_77 : f32 to vector<16x256xf32>
    %131 = arith.maximumf %129, %130 : vector<16x256xf32>
    %c1_78 = arith.constant 1 : index
    %c0_79 = arith.constant 0 : index
    %c0_80 = arith.constant 0 : index
    %132 = vector.load %arg15[%c1_78, %c0_79, %c0_80] : memref<2x256x256xf32, #tpu.memory_space<vmem>>, vector<1x256x256xf32>
    %133 = vector.shape_cast %132 : vector<1x256x256xf32> to vector<256x256xf32>
    %cst_81 = arith.constant dense<0.000000e+00> : vector<16x256xf32>
    %134 = tpu.matmul %131, %133, %cst_81 {dimension_numbers = #tpu.dot_dimension_numbers<[1], [0], [0], [1], [0, 0, 1, 1], [], []>} : vector<16x256xf32>, vector<256x256xf32>, vector<16x256xf32> -> vector<16x256xf32>
    %135 = arith.addf %122, %134 : vector<16x256xf32>
    %c0_82 = arith.constant 0 : index
    %c0_83 = arith.constant 0 : index
    %136 = vector.load %arg16[%c0_82, %c0_83] : memref<1x256xf32, #tpu.memory_space<vmem>>, vector<1x256xf32>
    %137 = vector.broadcast %136 : vector<1x256xf32> to vector<16x256xf32>
    %138 = arith.addf %135, %137 : vector<16x256xf32>
    %139 = arith.addf %138, %108 : vector<16x256xf32>
    %c0_84 = arith.constant 0 : index
    %c0_85 = arith.constant 0 : index
    %140 = vector.load %arg17[%c0_84, %c0_85] : memref<1x256xf32, #tpu.memory_space<vmem>>, vector<1x256xf32>
    %c0_86 = arith.constant 0 : index
    %c0_87 = arith.constant 0 : index
    %141 = vector.load %arg18[%c0_86, %c0_87] : memref<1x256xf32, #tpu.memory_space<vmem>>, vector<1x256xf32>
    %cst_88 = arith.constant dense<0.000000e+00> : vector<16xf32>
    %142 = vector.multi_reduction <add>, %139, %cst_88 [1] : vector<16x256xf32> to vector<16xf32>
    %143 = vector.shape_cast %142 : vector<16xf32> to vector<16x1xf32>
    %cst_89 = arith.constant 2.560000e+02 : f32
    %144 = vector.broadcast %cst_89 : f32 to vector<16x1xf32>
    %145 = arith.divf %143, %144 : vector<16x1xf32>
    %146 = vector.broadcast %145 : vector<16x1xf32> to vector<16x256xf32>
    %147 = arith.subf %139, %146 : vector<16x256xf32>
    %148 = arith.mulf %147, %147 : vector<16x256xf32>
    %cst_90 = arith.constant dense<0.000000e+00> : vector<16xf32>
    %149 = vector.multi_reduction <add>, %148, %cst_90 [1] : vector<16x256xf32> to vector<16xf32>
    %150 = vector.shape_cast %149 : vector<16xf32> to vector<16x1xf32>
    %cst_91 = arith.constant 2.560000e+02 : f32
    %151 = vector.broadcast %cst_91 : f32 to vector<16x1xf32>
    %152 = arith.divf %150, %151 : vector<16x1xf32>
    %153 = vector.broadcast %145 : vector<16x1xf32> to vector<16x256xf32>
    %154 = arith.subf %139, %153 : vector<16x256xf32>
    %cst_92 = arith.constant 9.99999974E-6 : f32
    %155 = vector.broadcast %cst_92 : f32 to vector<16x1xf32>
    %156 = arith.addf %152, %155 : vector<16x1xf32>
    %157 = math.rsqrt %156 : vector<16x1xf32>
    %158 = vector.broadcast %157 : vector<16x1xf32> to vector<16x256xf32>
    %159 = arith.mulf %154, %158 : vector<16x256xf32>
    %160 = vector.broadcast %140 : vector<1x256xf32> to vector<16x256xf32>
    %161 = arith.mulf %159, %160 : vector<16x256xf32>
    %162 = vector.broadcast %141 : vector<1x256xf32> to vector<16x256xf32>
    %163 = arith.addf %161, %162 : vector<16x256xf32>
    %c0_93 = arith.constant 0 : index
    %c0_94 = arith.constant 0 : index
    %c0_95 = arith.constant 0 : index
    %164 = vector.load %arg19[%c0_93, %c0_94, %c0_95] : memref<1x16x256xf32, #tpu.memory_space<vmem>>, vector<1x16x256xf32>
    %165 = vector.shape_cast %164 : vector<1x16x256xf32> to vector<16x256xf32>
    %166 = vector.shape_cast %163 : vector<16x256xf32> to vector<1x16x256xf32>
    tpu.vector_store %arg19[%c0_93, %c0_94, %c0_95], %166 {strides = array<i32>} : memref<1x16x256xf32, #tpu.memory_space<vmem>>, vector<1x16x256xf32>,
    return
  }
  func.func @transform_0(%arg0: i32, %arg1: i32) -> (i32, i32, i32) {
    %c0_i32 = arith.constant 0 : i32
    %c0_i32_0 = arith.constant 0 : i32
    %c0_i32_1 = arith.constant 0 : i32
    return %arg0, %c0_i32, %c0_i32_0 : i32, i32, i32
  }
  func.func @transform_1(%arg0: i32, %arg1: i32) -> (i32, i32) {
    %c0_i32 = arith.constant 0 : i32
    %c0_i32_0 = arith.constant 0 : i32
    %c0_i32_1 = arith.constant 0 : i32
    return %c0_i32, %c0_i32_0 : i32, i32
  }
  func.func @transform_2(%arg0: i32, %arg1: i32) -> (i32, i32) {
    %c0_i32 = arith.constant 0 : i32
    %c0_i32_0 = arith.constant 0 : i32
    %c0_i32_1 = arith.constant 0 : i32
    return %c0_i32, %c0_i32_0 : i32, i32
  }
  func.func @transform_3(%arg0: i32, %arg1: i32) -> (i32, i32) {
    %c0_i32 = arith.constant 0 : i32
    %c0_i32_0 = arith.constant 0 : i32
    %c0_i32_1 = arith.constant 0 : i32
    return %c0_i32, %c0_i32_0 : i32, i32
  }
  func.func @transform_4(%arg0: i32, %arg1: i32) -> (i32, i32) {
    %c0_i32 = arith.constant 0 : i32
    %c0_i32_0 = arith.constant 0 : i32
    %c0_i32_1 = arith.constant 0 : i32
    return %c0_i32, %c0_i32_0 : i32, i32
  }
  func.func @transform_5(%arg0: i32, %arg1: i32) -> (i32, i32) {
    %c0_i32 = arith.constant 0 : i32
    %c0_i32_0 = arith.constant 0 : i32
    %c0_i32_1 = arith.constant 0 : i32
    return %c0_i32, %c0_i32_0 : i32, i32
  }
  func.func @transform_6(%arg0: i32, %arg1: i32) -> (i32, i32) {
    %c0_i32 = arith.constant 0 : i32
    %c0_i32_0 = arith.constant 0 : i32
    %c0_i32_1 = arith.constant 0 : i32
    return %c0_i32, %c0_i32_0 : i32, i32
  }
  func.func @transform_7(%arg0: i32, %arg1: i32) -> (i32, i32, i32) {
    %c0_i32 = arith.constant 0 : i32
    %c0_i32_0 = arith.constant 0 : i32
    %c0_i32_1 = arith.constant 0 : i32
    %c0_i32_2 = arith.constant 0 : i32
    return %c0_i32, %c0_i32_0, %c0_i32_1 : i32, i32, i32
  }
  func.func @transform_8(%arg0: i32, %arg1: i32) -> (i32, i32) {
    %c0_i32 = arith.constant 0 : i32
    %c0_i32_0 = arith.constant 0 : i32
    %c0_i32_1 = arith.constant 0 : i32
    return %c0_i32, %c0_i32_0 : i32, i32
  }
  func.func @transform_9(%arg0: i32, %arg1: i32) -> (i32, i32) {
    %c0_i32 = arith.constant 0 : i32
    %c0_i32_0 = arith.constant 0 : i32
    %c0_i32_1 = arith.constant 0 : i32
    return %c0_i32, %c0_i32_0 : i32, i32
  }
  func.func @transform_10(%arg0: i32, %arg1: i32) -> (i32, i32) {
    %c0_i32 = arith.constant 0 : i32
    %c0_i32_0 = arith.constant 0 : i32
    %c0_i32_1 = arith.constant 0 : i32
    return %c0_i32, %c0_i32_0 : i32, i32
  }
  func.func @transform_11(%arg0: i32, %arg1: i32) -> (i32, i32, i32) {
    %c0_i32 = arith.constant 0 : i32
    %c0_i32_0 = arith.constant 0 : i32
    %c0_i32_1 = arith.constant 0 : i32
    %c0_i32_2 = arith.constant 0 : i32
    return %c0_i32, %c0_i32_0, %c0_i32_1 : i32, i32, i32
  }
  func.func @transform_12(%arg0: i32, %arg1: i32) -> (i32, i32, i32) {
    %c0_i32 = arith.constant 0 : i32
    %c0_i32_0 = arith.constant 0 : i32
    %c0_i32_1 = arith.constant 0 : i32
    %c0_i32_2 = arith.constant 0 : i32
    return %c0_i32, %c0_i32_0, %c0_i32_1 : i32, i32, i32
  }
  func.func @transform_13(%arg0: i32, %arg1: i32) -> (i32, i32, i32) {
    %c0_i32 = arith.constant 0 : i32
    %c0_i32_0 = arith.constant 0 : i32
    %c0_i32_1 = arith.constant 0 : i32
    %c0_i32_2 = arith.constant 0 : i32
    return %c0_i32, %c0_i32_0, %c0_i32_1 : i32, i32, i32
  }
  func.func @transform_14(%arg0: i32, %arg1: i32) -> (i32, i32) {
    %c0_i32 = arith.constant 0 : i32
    %c0_i32_0 = arith.constant 0 : i32
    %c0_i32_1 = arith.constant 0 : i32
    return %c0_i32, %c0_i32_0 : i32, i32
  }
  func.func @transform_15(%arg0: i32, %arg1: i32) -> (i32, i32) {
    %c0_i32 = arith.constant 0 : i32
    %c0_i32_0 = arith.constant 0 : i32
    %c0_i32_1 = arith.constant 0 : i32
    return %c0_i32, %c0_i32_0 : i32, i32
  }
  func.func @transform_16(%arg0: i32, %arg1: i32) -> (i32, i32) {
    %c0_i32 = arith.constant 0 : i32
    %c0_i32_0 = arith.constant 0 : i32
    %c0_i32_1 = arith.constant 0 : i32
    return %c0_i32, %c0_i32_0 : i32, i32
  }
  func.func @transform_17(%arg0: i32, %arg1: i32) -> (i32, i32, i32) {
    %c0_i32 = arith.constant 0 : i32
    %c0_i32_0 = arith.constant 0 : i32
    return %arg0, %arg1, %c0_i32 : i32, i32, i32
  }
}

</mosaic_0001>

<bundles_post_ra>
// kernel: tpu_custom_call.1
= control target key start
LH: loop header
LB: loop body
LE: loop exit
PB: predicated region body
PF: predicated region fallthrough
CT: control target
= control target key end

     0   :  { %s4351_s0 = inlined_call_operand.hbm [shape: f32[2,32,256], index: 0, kind: input, shape index: {}]   ;;  %s4352_s1 = inlined_call_operand.hbm [shape: f32[256,256], index: 1, kind: input, shape index: {}]   ;;  %s4353_s2 = inlined_call_operand.hbm [shape: f32[1,256], index: 2, kind: input, shape index: {}]   ;;  %s4354_s3 = inlined_call_operand.hbm [shape: f32[256,256], index: 3, kind: input, shape index: {}]   ;;  %s4355_s4 = inlined_call_operand.vmem [shape: f32[1,256], index: 4, kind: input, shape index: {}]   ;;  %s4356_s5 = inlined_call_operand.hbm [shape: f32[256,256], index: 5, kind: input, shape index: {}]   ;;  %s4357_s6 = inlined_call_operand.hbm [shape: f32[1,256], index: 6, kind: input, shape index: {}]   ;;  %s4358_s7 = inlined_call_operand.hbm [shape: f32[2,128,256], index: 7, kind: input, shape index: {}]   ;;  %s4359_s8 = inlined_call_operand.hbm [shape: f32[1,256], index: 8, kind: input, shape index: {}]   ;;  %s4360_s9 = inlined_call_operand.vmem [shape: f32[1,256], index: 9, kind: input, shape index: {}]   ;;  %s4361_s10 = inlined_call_operand.hbm [shape: f32[1,256], index: 10, kind: input, shape index: {}]   ;;  %s4362_s11 = inlined_call_operand.hbm [shape: f32[2,256,256], index: 11, kind: input, shape index: {}]   ;;  %s4363_s12 = inlined_call_operand.vmem [shape: f32[2,1,256], index: 12, kind: input, shape index: {}]   ;;  %s4364_s13 = inlined_call_operand.hbm [shape: f32[2,256,256], index: 13, kind: input, shape index: {}]   ;;  %s4365_s14 = inlined_call_operand.vmem [shape: f32[1,256], index: 14, kind: input, shape index: {}]   ;;  %s4366_s15 = inlined_call_operand.vmem [shape: f32[1,256], index: 15, kind: input, shape index: {}]   ;;  %s4367_s16 = inlined_call_operand.vmem [shape: f32[1,256], index: 16, kind: input, shape index: {}]   ;;  %s4368_s17 = inlined_call_operand.hbm [shape: f32[2,32,256], index: 17, kind: output, shape index: {}]  }
   0x1   :  { %4380 = sst [smem:[#allocation36_spill]] %s4351_s0 }
   0x2   :  { %4381 = sst [smem:[#allocation37_spill]] %s4352_s1 }
   0x3   :  { %4382 = sst [smem:[#allocation38_spill]] %s4353_s2 }
   0x4   :  { %4383 = sst [smem:[#allocation39_spill]] %s4354_s3 }
   0x5   :  { %4384 = sst [smem:[#allocation40_spill]] %s4355_s4 }
   0x6   :  { %4385 = sst [smem:[#allocation41_spill]] %s4356_s5 }
   0x7   :  { %4386 = sst [smem:[#allocation42_spill]] %s4357_s6 }
   0x8   :  { %4387 = sst [smem:[#allocation43_spill]] %s4358_s7 }
   0x9   :  { %4388 = sst [smem:[#allocation44_spill]] %s4359_s8 }
   0xa   :  { %4389 = sst [smem:[#allocation45_spill]] %s4360_s9 }
   0xb   :  { %4390 = sst [smem:[#allocation46_spill]] %s4361_s10 }
   0xc   :  { %4391 = sst [smem:[#allocation47_spill]] %s4362_s11 }
   0xd   :  { %4392 = sst [smem:[#allocation48_spill]] %s4363_s12 }
   0xe   :  { %4393 = sst [smem:[#allocation49_spill]] %s4365_s14 }
   0xf   :  { %4394 = sst [smem:[#allocation50_spill]] %s4366_s15 }
  0x10   :  { %4395 = sst [smem:[#allocation51_spill]] %s4367_s16 }
  0x11   :  { %4396 = sst [smem:[#allocation52_spill]] %s4368_s17 }
  0x12   :  { %22 = vsyncpa [#allocation6], 0 }
  0x13   :  { %24 = vsyncpa [#allocation6 + $0x1], 0 }
  0x14   :  { %25 = vsyncpa [#allocation9], 0 }
  0x15   :  { %26 = vsyncpa [#allocation12], 0 }
  0x16   :  { %27 = vsyncpa [#allocation15], 0 }
  0x17   :  { %28 = vsyncpa [#allocation18], 0 }
  0x18   :  { %29 = vsyncpa [#allocation21], 0 }
  0x19   :  { %30 = vsyncpa [#allocation7], 0 }
  0x1a   :  { %32 = vsyncpa [#allocation7 + $0x1], 0  ;;  %s3765_s24 = smov 0   ;;  %s3767_s25 = smov 0  }
  0x1b   :  { %s3769_s26 = smov 0   ;;  %s3771_s27 = smov 0  }
  0x1c   :  { %s3773_s28 = smov 0   ;;  %s3775_s29 = smov 0  }
  0x1d   :  { %s3777_s0 = smov 0   ;;  %s3779_s30 = smov 0  }
  0x1e   :  { %s3781_s18 = smov 0   ;;  %s3783_s19 = smov 0  }
  0x1f   :  { %s3785_s1 = smov 0  }
  0x20 LB: > { %4397 = sst [smem:[#allocation31_spill]] %s3618_s24  ;;  %s4370_s20 = sadd.s32 4294967295, %s3658_s1   ;;  %s3658_s1 = sphi %s3785_s1, %s38_s1   ;;  %s3654_s19 = sphi %s3783_s19, %s4447_s19   ;;  %s3650_s18 = sphi %s3781_s18, %s4446_s18   ;;  %s3646_s30 = sphi %s3779_s30, %s4445_s30   ;;  %s3642_s0 = sphi %s3777_s0, %s4444_s0   ;;  %s3638_s29 = sphi %s3775_s29, %s4443_s29   ;;  %s3634_s28 = sphi %s3773_s28, %s4442_s28   ;;  %s3630_s27 = sphi %s3771_s27, %s4441_s27   ;;  %s3626_s26 = sphi %s3769_s26, %s4440_s26   ;;  %s3622_s25 = sphi %s3767_s25, %s4439_s25   ;;  %s3618_s24 = sphi %s3765_s24, %s4438_s24  }
  0x21   : > { %4398 = sst [smem:[#allocation32_spill]] %s3622_s25  ;;  %p2877_p0 = scmp.ge.s32.totalorder %s3658_s1, 1 }
  0x22   : > { %4399 = sst [smem:[#allocation33_spill]] %s3642_s0  ;;  %p3824_p1 = scmp.eq.s32.totalorder %s4370_s20, 0 }
  0x23   : > { %4400 = sst [smem:[#allocation34_spill]] %s3646_s30  ;;  %p445_p2 = scmp.lt.s32.totalorder %s3658_s1, 5 }
  0x24   : > { %s4401_s21 = scalar_select %p3824_p1, 1, 0 }
  0x25   : > { %s4402_s17 = sld [smem:[#allocation37_spill]]  ;;  %p3832_p3 = pnand %p2877_p0, %p445_p2 }
  0x26   : > { %s3660_s30 = smov [#allocation8]   ;;  %s4406_s3 = sld [smem:[#allocation39_spill]] }
  0x27   : > { %s4403_s15 = scalar_select %p3832_p3, 1, 0 }
  0x28   : > { %p2972_p4 = pneg %p3832_p3  ;;  %s458_s14 = sshll.u32 %s3660_s30, 4  ;;  %s459_s14 = int_to_ptr.vmem [resolvable:$true] %s458_s14 }
  0x29   : > { %4404 = sst [smem:[#allocation35_spill]] %s4403_s15  ;;  %s4376_s22 = smov 256  }
  0x2a   : > { %p3840_p5 = pnand %p2972_p4, %p3824_p1  ;;  %s4377_s23 = smov 16  }
  0x2b   : > { %s456_s16 = sshll.u32 %s4402_s17, 4  ;;  %s3663_s30 = smov [#allocation11]   ;;  %s457_s16 = int_to_ptr.hbm [resolvable:$true] %s456_s16 }
  0x2c   : > { %s482_s17 = sshll.u32 %s4406_s3, 4  ;;  %s484_s4 = sshll.u32 %s3663_s30, 4  ;;  %s483_s17 = int_to_ptr.hbm [resolvable:$true] %s482_s17  ;;  %s485_s4 = int_to_ptr.vmem [resolvable:$true] %s484_s4 }
  0x2d   : > { %2975 = dma.hbm_to_vmem [thread:$0]  (!%p3840_p5), %s457_s16, 8192, %s459_s14, [#allocation9], %s4376_s22, %s4376_s22, %s4377_s23  }
  0x2e   : > { %s4407_s6 = sld [smem:[#allocation42_spill]]  ;;  %s3664_s25 = smov [#allocation14]  }
  0x2f   : > { %2981 = dma.hbm_to_vmem [thread:$0]  (!%p3840_p5), %s483_s17, 8192, %s485_s4, [#allocation12], %s4376_s22, %s4376_s22, %s4377_s23  }
  0x30   : > { %s4408_s8 = sld [smem:[#allocation44_spill]]  ;;  %s516_s14 = sshll.u32 %s3664_s25, 4  ;;  %s517_s14 = int_to_ptr.vmem [resolvable:$true] %s516_s14 }
  0x31   : > { %s3665_s15 = smov [#allocation17]   ;;  %s4409_s11 = sld [smem:[#allocation47_spill]] }
  0x32   : > { %s542_s16 = sshll.u32 %s3665_s15, 4  ;;  %s4410_s2 = sld [smem:[#allocation38_spill]]  ;;  %s543_s16 = int_to_ptr.vmem [resolvable:$true] %s542_s16 }
  0x33   : > { %s3666_s25 = smov [#allocation20]   ;;  %s4411_s5 = sld [smem:[#allocation41_spill]] }
  0x34   : > { %s514_s24 = sshll.u32 %s4407_s6, 4  ;;  %s568_s12 = sshll.u32 %s3666_s25, 4  ;;  %s515_s24 = int_to_ptr.hbm [resolvable:$true] %s514_s24  ;;  %s569_s12 = int_to_ptr.vmem [resolvable:$true] %s568_s12 }
  0x35   : > { %2987 = dma.hbm_to_vmem [thread:$0]  (!%p3840_p5), %s515_s24, 32, %s517_s14, [#allocation15]  }
  0x36   : > { %s540_s3 = sshll.u32 %s4408_s8, 4  ;;  %s3667_s24 = smov [#allocation10]   ;;  %s541_s3 = int_to_ptr.hbm [resolvable:$true] %s540_s3 }
  0x37   : > { %s566_s6 = sshll.u32 %s4409_s11, 4  ;;  %s473_s14 = sshll.u32 %s3667_s24, 4  ;;  %s567_s6 = int_to_ptr.hbm [resolvable:$true] %s566_s6  ;;  %s474_s14 = int_to_ptr.vmem [resolvable:$true] %s473_s14 }
  0x38   : > { %2993 = dma.hbm_to_vmem [thread:$0]  (!%p3840_p5), %s541_s3, 32, %s543_s16, [#allocation18]  }
  0x39   : > { %s471_s9 = sshll.u32 %s4410_s2, 4  ;;  %s499_s3 = sshll.u32 %s4411_s5, 4  ;;  %s472_s9 = int_to_ptr.hbm [resolvable:$true] %s471_s9  ;;  %s500_s3 = int_to_ptr.hbm [resolvable:$true] %s499_s3 }
  0x3a   : > { %2999 = dma.hbm_to_vmem [thread:$0]  (!%p3840_p5), %s567_s6, 16384, %s569_s12, [#allocation21], %s4376_s22, %s4376_s22, %s4377_s23  }
  0x3b   : > { %2978 = dma.hbm_to_vmem [thread:$0]  (!%p3840_p5), %s472_s9, 32, %s474_s14, [#allocation9]  }
  0x3c   : > { %s4412_s7 = sld [smem:[#allocation43_spill]]  ;;  %s3668_s17 = smov [#allocation13]  }
  0x3d   : > { %s501_s25 = sshll.u32 %s3668_s17, 4  ;;  %s3669_s6 = smov [#allocation16]   ;;  %s502_s25 = int_to_ptr.vmem [resolvable:$true] %s501_s25 }
  0x3e   : > { %2984 = dma.hbm_to_vmem [thread:$0]  (!%p3840_p5), %s500_s3, 8192, %s502_s25, [#allocation12], %s4376_s22, %s4376_s22, %s4377_s23  }
  0x3f   : > { %s527_s12 = sshll.u32 %s3669_s6, 4  ;;  %s4413_s10 = sld [smem:[#allocation46_spill]]  ;;  %s528_s12 = int_to_ptr.vmem [resolvable:$true] %s527_s12 }
  0x40   : > { %s583_s3 = sshll.u32 %s4364_s13, 4  ;;  %s3670_s16 = smov [#allocation19]   ;;  %s584_s3 = int_to_ptr.hbm [resolvable:$true] %s583_s3 }
  0x41   : > { %s557_s30 = sshll.u32 %s3670_s16, 4  ;;  %s3671_s17 = smov [#allocation22]   ;;  %s558_s30 = int_to_ptr.vmem [resolvable:$true] %s557_s30 }
  0x42   : > { %s525_s4 = sshll.u32 %s4412_s7, 4  ;;  %s4414_s25 = sld [smem:[#allocation32_spill]]  ;;  %s526_s4 = int_to_ptr.hbm [resolvable:$true] %s525_s4 }
  0x43   : > { %2990 = dma.hbm_to_vmem [thread:$0]  (!%p3840_p5), %s526_s4, 8192, %s528_s12, [#allocation15], %s4376_s22, %s4376_s22, %s4377_s23  }
  0x44   : > { %s585_s4 = sshll.u32 %s3671_s17, 4  ;;  %s47_s6 = sadd.s32 1, %s3650_s18  ;;  %s586_s4 = int_to_ptr.vmem [resolvable:$true] %s585_s4 }
  0x45   : > { %s555_s14 = sshll.u32 %s4413_s10, 4  ;;  %p48_p6 = scmp.ge.s32.totalorder %s47_s6, 2  ;;  %s556_s14 = int_to_ptr.hbm [resolvable:$true] %s555_s14 }
  0x46   : > { %2996 = dma.hbm_to_vmem [thread:$0]  (!%p3840_p5), %s556_s14, 32, %s558_s30, [#allocation18]  }
  0x47   : > { %3002 = dma.hbm_to_vmem [thread:$0]  (!%p3840_p5), %s584_s3, 16384, %s586_s4, [#allocation21], %s4376_s22, %s4376_s22, %s4377_s23  }
  0x48   : > { %s50_s12 = sadd.s32 1, %s3654_s19  ;;  %s2876_s24 = sadd.s32 4294967294, %s3658_s1  }
  0x49   : > { %s57_s9 = sadd.s32 1, %s3638_s29  ;;  %s4449_s6 = smov (%p48_p6, %s47_s6), 0 }
  0x4a   : > { %s4451_s12 = smov (!%p48_p6, %s50_s12), %s3654_s19  ;;  %p64_p7 = scmp.ne.s32.totalorder %s3638_s29, %s3634_s28 }
  0x4b   : > { %p70_p8 = scmp.ne.s32.totalorder %s3634_s28, %s3630_s27  ;;  %s4415_s20 = sld [smem:[#allocation31_spill]] }
  0x4c   : > { %p52_p9 = scmp.ge.s32.totalorder %s4451_s12, 2  ;;  %p65_p10 = scmp.eq.s32.totalorder %s3658_s1, 0 }
  0x4d   : > { %p3923_p11 = por %p3824_p1, %p70_p8  ;;  %s417_s15 = ssub.s32 %s3650_s18, %s4449_s6 }
  0x4e   : > { %s4453_s12 = smov (%p52_p9, %s4451_s12), 0  ;;  %s421_s0 = sadd.s32 1, %s3626_s26 }
  0x4f   : > { %p431_p12 = scmp.ne.s32.totalorder %s3626_s26, %s4414_s25  ;;  %s54_s27 = ssub.s32 %s3654_s19, %s4453_s12 }
  0x50   : > { %s4417_s3 = sadd.s32 4294967295, %s3658_s1   ;;  %p55_p0 = scmp.eq.s32.totalorder %s54_s27, 0 }
  0x51   : > { %p432_p13 = scmp.eq.s32.totalorder %s4417_s3, 3  ;;  %s418_s16 = sor.u32 %s417_s15, %s54_s27 }
  0x52   : > { %p419_p2 = scmp.eq.s32.totalorder %s418_s16, 0  ;;  %p437_p5 = scmp.ne.s32.totalorder %s4414_s25, %s4415_s20 }
  0x53   : > { %p3938_p4 = por %p432_p13, %p431_p12  ;;  %p438_p6 = scmp.eq.s32.totalorder %s2876_s24, 3 }
  0x54   : > { %s3943_s17 = scalar_select %p55_p0, %s3638_s29, %s57_s9  }
  0x55   : > { %s3946_s4 = scalar_select %p419_p2, %s3626_s26, %s421_s0  }
  0x56   : > { %p66_p8 = por %p65_p10, %p64_p7  ;;  %s608_s22 = sand.u32 1, %s3638_s29  }
  0x57   : > { %p3956_p9 = por %p438_p6, %p437_p5  ;;  %p3021_p1 = scmp.lt.s32.totalorder %s3658_s1, 4 }
  0x58   : > { %s2889_s15 = sshll.u32 %s608_s22, 6  ;;  %s2925_s27 = sshll.u32 %s3654_s19, 6 }
  0x59   : > { %s4420_s2 = sld [smem:[#allocation36_spill]]  ;;  %s612_s0 = scalar_lea.vmem [#allocation5], %s2889_s15 }
  0x5a   : > { %s620_s7 = sshll.u32 %s612_s0, 4  ;;  %p3004_p12 = pnand %p3021_p1, %p66_p8  ;;  %s621_s7 = int_to_ptr.vmem [resolvable:$true] %s620_s7 }
  0x5b   : > { %s609_s25 = scalar_lea.sflag [#allocation6], %s608_s22  ;;  %s4421_s24 = smov 16  }
  0x5c   : > { %s4422_s20 = smov 256   ;;  %s634_s10 = sand.u32 (!%p3832_p3), 1, %s3634_s28  }
  0x5d   : > { %632 = sbr.rel (%p3832_p3) target bundleno = 1930 (0x78a), region = 88  ;;  %s2893_s11 = sshll.u32 (!%p3832_p3), %s634_s10, 6 }
  0x5e   : > { %s635_s3 = scalar_lea.sflag (!%p3832_p3), [#allocation6], %s634_s10 }
  0x5f   : > { %s617_s9 = scalar_lea.hbm %s4420_s2, %s2925_s27  ;;  %s3971_s2 = scalar_lea.vmem (!%p3832_p3), [#allocation5], %s2893_s11 }
  0x60   : > { %s618_s5 = sshll.u32 %s617_s9, 4  ;;  %s619_s5 = int_to_ptr.hbm [resolvable:$true] %s618_s5 }
  0x61   : > { %3006 = dma.hbm_to_vmem [thread:$0]  (!%p3004_p12), %s619_s5, 1024, %s621_s7, %s609_s25, %s4422_s20, %s4422_s20, %s4421_s24  }
  0x62   : > { %3589 = dma.done.wait (%p3923_p11), %s635_s3, 1024  }
  0x63   : > { %3591 = vsyncadd (%p3923_p11), %s635_s3, 4294966272  ;;  %p4424_p1 = scmp.ne.s32.totalorder %s4401_s21, 0 }
  0x65   : > { %3593 = dma.done.wait (%p4424_p1), [#allocation9], 8224  }
  0x66   : > { %3595 = vsyncadd (%p4424_p1), [#allocation9], 4294959072 }
  0x67   : > { %3597 = dma.done.wait (%p4424_p1), [#allocation12], 16384  }
  0x68   : > { %3599 = vsyncadd (%p4424_p1), [#allocation12], 4294950912 }
  0x69   : > { %3601 = dma.done.wait (%p4424_p1), [#allocation15], 8224  }
  0x6a   : > { %3603 = vsyncadd (%p4424_p1), [#allocation15], 4294959072 }
  0x6b   : > { %3605 = dma.done.wait (%p4424_p1), [#allocation18], 64  }
  0x6c   : > { %3607 = vsyncadd (%p4424_p1), [#allocation18], 4294967232 }
  0x6d   : > { %3609 = dma.done.wait (%p4424_p1), [#allocation21], 32768  }
  0x6e   : > { %3611 = vsyncadd (%p4424_p1), [#allocation21], 4294934528  ;;  %s4425_s5 = sld [smem:[#allocation32_spill]] }
  0x6f   : > { %s4426_s11 = sld [smem:[#allocation33_spill]] }
  0x74   : > { %s737_s7 = sand.u32 1, %s4425_s5  }
  0x75   : > { %s2904_s8 = sshll.u32 %s737_s7, 5  ;;  %p2905_p3 = scmp.ne.s32.totalorder %s4426_s11, 0 }
  0x76   : > { %s4000_s10 = scalar_lea.vmem [#allocation23], %s2904_s8  ;;  %s4427_s14 = sld [smem:[#allocation40_spill]] (!%p2905_p3) }
  0x77   : > { %744 = sbr.rel (%p2905_p3) target bundleno = 355 (0x163), region = 136 }
  0x7c   : > { %v784_v0 = vld [vmem:[#allocation11 + $0xf8] sm:$0xff]  ;;  %v782_v1 = vld [vmem:[#allocation11 + $0xe8] sm:$0xff]  ;;  %v783_v4 = vld [vmem:[#allocation11 + $0xf0] sm:$0xff] }
  0x7d   : > { %v816_v2 = vld [vmem:[#allocation11 + $0x1f8] sm:$0xff]  ;;  %881 = vmatpush.msra.mxu2 %v784_v0  ;;  %v814_v3 = vld [vmem:[#allocation11 + $0x1e8] sm:$0xff]  ;;  %823 = vmatpush.msra.mxu0 %v783_v4  ;;  %v781_v7 = vld [vmem:[#allocation11 + $0xe0] sm:$0xff] }
  0x7e   : > { %910 = vmatpush.msra.mxu3 %v816_v2  ;;  %v780_v5 = vld [vmem:[#allocation11 + $0xd8] sm:$0xff]  ;;  %v778_v8 = vld [vmem:[#allocation11 + $0xc8] sm:$0xff]  ;;  %v815_v9 = vld [vmem:[#allocation11 + $0x1f0] sm:$0xff] }
  0x7f   : > { %v812_v6 = vld [vmem:[#allocation11 + $0x1d8] sm:$0xff]  ;;  %882 = vmatpush.msra.mxu2 %v782_v1  ;;  %824 = vmatpush.msra.mxu0 %v781_v7  ;;  %v810_v10 = vld [vmem:[#allocation11 + $0x1c8] sm:$0xff]  ;;  %v779_v11 = vld [vmem:[#allocation11 + $0xd0] sm:$0xff] }
  0x80   : > { %911 = vmatpush.msra.mxu3 %v814_v3  ;;  %852 = vmatpush.msra.mxu1 %v815_v9  ;;  %v813_v12 = vld [vmem:[#allocation11 + $0x1e0] sm:$0xff]  ;;  %v811_v14 = vld [vmem:[#allocation11 + $0x1d0] sm:$0xff]  ;;  %v776_v15 = vld [vmem:[#allocation11 + $0xb8] sm:$0xff] }
  0x81   : > { %883 = vmatpush.msra.mxu2 %v780_v5  ;;  %v777_v13 = vld [vmem:[#allocation11 + $0xc0] sm:$0xff]  ;;  %825 = vmatpush.msra.mxu0 %v779_v11  ;;  %v808_v16 = vld [vmem:[#allocation11 + $0x1b8] sm:$0xff]  ;;  %v775_v17 = vld [vmem:[#allocation11 + $0xb0] sm:$0xff] }
  0x82   : > { %912 = vmatpush.msra.mxu3 %v812_v6  ;;  %853 = vmatpush.msra.mxu1 %v813_v12  ;;  %v809_v18 = vld [vmem:[#allocation11 + $0x1c0] sm:$0xff]  ;;  %v774_v19 = vld [vmem:[#allocation11 + $0xa8] sm:$0xff]  ;;  %v807_v22 = vld [vmem:[#allocation11 + $0x1b0] sm:$0xff] }
  0x83   : > { %884 = vmatpush.msra.mxu2 %v778_v8  ;;  %826 = vmatpush.msra.mxu0 %v777_v13  ;;  %v806_v20 = vld [vmem:[#allocation11 + $0x1a8] sm:$0xff]  ;;  %v773_v21 = vld [vmem:[#allocation11 + $0xa0] sm:$0xff]  ;;  %v772_v23 = vld [vmem:[#allocation11 + $0x98] sm:$0xff] }
  0x84   : > { %913 = vmatpush.msra.mxu3 %v810_v10  ;;  %854 = vmatpush.msra.mxu1 %v811_v14  ;;  %v804_v24 = vld [vmem:[#allocation11 + $0x198] sm:$0xff]  ;;  %v771_v25 = vld [vmem:[#allocation11 + $0x90] sm:$0xff]  ;;  %v805_v26 = vld [vmem:[#allocation11 + $0x1a0] sm:$0xff] }
  0x85   : > { %885 = vmatpush.msra.mxu2 %v776_v15  ;;  %827 = vmatpush.msra.mxu0 %v775_v17  ;;  %v770_v27 = vld [vmem:[#allocation11 + $0x88] sm:$0xff]  ;;  %v769_v29 = vld [vmem:[#allocation11 + $0x80] sm:$0xff]  ;;  %v803_v30 = vld [vmem:[#allocation11 + $0x190] sm:$0xff] }
  0x86   : > { %914 = vmatpush.msra.mxu3 %v808_v16  ;;  %855 = vmatpush.msra.mxu1 %v809_v18  ;;  %v802_v28 = vld [vmem:[#allocation11 + $0x188] sm:$0xff]  ;;  %v768_v31 = vld [vmem:[#allocation11 + $0x78] sm:$0xff]  ;;  %v767_v33 = vld [vmem:[#allocation11 + $0x70] sm:$0xff] }
  0x87   : > { %886 = vmatpush.msra.mxu2 %v774_v19  ;;  %828 = vmatpush.msra.mxu0 %v773_v21  ;;  %v800_v32 = vld [vmem:[#allocation11 + $0x178] sm:$0xff]  ;;  %v801_v34 = vld [vmem:[#allocation11 + $0x180] sm:$0xff]  ;;  %v766_v35 = vld [vmem:[#allocation11 + $0x68] sm:$0xff] }
  0x88   : > { %915 = vmatpush.msra.mxu3 %v806_v20  ;;  %856 = vmatpush.msra.mxu1 %v807_v22  ;;  %v798_v36 = vld [vmem:[#allocation11 + $0x168] sm:$0xff]  ;;  %v765_v37 = vld [vmem:[#allocation11 + $0x60] sm:$0xff]  ;;  %v799_v38 = vld [vmem:[#allocation11 + $0x170] sm:$0xff] }
  0x89   : > { %887 = vmatpush.msra.mxu2 %v772_v23  ;;  %829 = vmatpush.msra.mxu0 %v771_v25  ;;  %v764_v39 = vld [vmem:[#allocation11 + $0x58] sm:$0xff]  ;;  %v763_v41 = vld [vmem:[#allocation11 + $0x50] sm:$0xff]  ;;  %v797_v42 = vld [vmem:[#allocation11 + $0x160] sm:$0xff] }
  0x8a   : > { %916 = vmatpush.msra.mxu3 %v804_v24  ;;  %857 = vmatpush.msra.mxu1 %v805_v26  ;;  %v796_v40 = vld [vmem:[#allocation11 + $0x158] sm:$0xff]  ;;  %v762_v43 = vld [vmem:[#allocation11 + $0x48] sm:$0xff]  ;;  %v761_v45 = vld [vmem:[#allocation11 + $0x40] sm:$0xff] }
  0x8b   : > { %888 = vmatpush.msra.mxu2 %v770_v27  ;;  %830 = vmatpush.msra.mxu0 %v769_v29  ;;  %v794_v44 = vld [vmem:[#allocation11 + $0x148] sm:$0xff]  ;;  %v795_v46 = vld [vmem:[#allocation11 + $0x150] sm:$0xff]  ;;  %v760_v47 = vld [vmem:[#allocation11 + $0x38] sm:$0xff] }
  0x8c   : > { %917 = vmatpush.msra.mxu3 %v802_v28  ;;  %858 = vmatpush.msra.mxu1 %v803_v30  ;;  %v792_v48 = vld [vmem:[#allocation11 + $0x138] sm:$0xff]  ;;  %v759_v49 = vld [vmem:[#allocation11 + $0x30] sm:$0xff]  ;;  %v793_v50 = vld [vmem:[#allocation11 + $0x140] sm:$0xff] }
  0x8d   : > { %889 = vmatpush.msra.mxu2 %v768_v31  ;;  %831 = vmatpush.msra.mxu0 %v767_v33  ;;  %v758_v51 = vld [vmem:[#allocation11 + $0x28] sm:$0xff]  ;;  %v757_v53 = vld [vmem:[#allocation11 + $0x20] sm:$0xff]  ;;  %v791_v54 = vld [vmem:[#allocation11 + $0x130] sm:$0xff] }
  0x8e   : > { %918 = vmatpush.msra.mxu3 %v800_v32  ;;  %859 = vmatpush.msra.mxu1 %v801_v34  ;;  %v790_v52 = vld [vmem:[#allocation11 + $0x128] sm:$0xff]  ;;  %v756_v55 = vld [vmem:[#allocation11 + $0x18] sm:$0xff]  ;;  %v755_v57 = vld [vmem:[#allocation11 + $0x10] sm:$0xff] }
  0x8f   : > { %890 = vmatpush.msra.mxu2 %v766_v35  ;;  %832 = vmatpush.msra.mxu0 %v765_v37  ;;  %v788_v56 = vld [vmem:[#allocation11 + $0x118] sm:$0xff]  ;;  %v789_v58 = vld [vmem:[#allocation11 + $0x120] sm:$0xff]  ;;  %v754_v59 = vld [vmem:[#allocation11 + $0x8] sm:$0xff] }
  0x90   : > { %919 = vmatpush.msra.mxu3 %v798_v36  ;;  %860 = vmatpush.msra.mxu1 %v799_v38  ;;  %v786_v60 = vld [vmem:[#allocation11 + $0x108] sm:$0xff]  ;;  %v4004_v61 = vld [vmem:[%s3971_s2] sm:$0xff]  ;;  %v787_v2 = vld [vmem:[#allocation11 + $0x110] sm:$0xff] }
  0x91   : > { %891 = vmatpush.msra.mxu2 %v764_v39  ;;  %833 = vmatpush.msra.mxu0 %v763_v41  ;;  %v4007_v62 = vld [vmem:[%s3971_s2 + $0x8] sm:$0xff]  ;;  %v970_v63 = vld [vmem:[#allocation13 + $0xf8] sm:$0xff]  ;;  %v969_v7 = vld [vmem:[#allocation13 + $0xf0] sm:$0xff] }
  0x92   : > { %920 = vmatpush.msra.mxu3 %v796_v40  ;;  %861 = vmatpush.msra.mxu1 %v797_v42  ;;  %v1002_v0 = vld [vmem:[#allocation13 + $0x1f8] sm:$0xff]  ;;  %v753_v1 = vld [vmem:[#allocation11] sm:$0xff]  ;;  %v968_v3 = vld [vmem:[#allocation13 + $0xe8] sm:$0xff] }
  0x93   : > { %892 = vmatpush.msra.mxu2 %v762_v43  ;;  %834 = vmatpush.msra.mxu0 %v761_v45  ;;  %v1000_v4 = vld [vmem:[#allocation13 + $0x1e8] sm:$0xff]  ;;  %v785_v5 = vld [vmem:[#allocation11 + $0x100] sm:$0xff]  ;;  %v966_v6 = vld [vmem:[#allocation13 + $0xd8] sm:$0xff] }
  0x94   : > { %921 = vmatpush.msra.mxu3 %v794_v44  ;;  %862 = vmatpush.msra.mxu1 %v795_v46  ;;  %v998_v8 = vld [vmem:[#allocation13 + $0x1d8] sm:$0xff]  ;;  %v964_v9 = vld [vmem:[#allocation13 + $0xc8] sm:$0xff]  ;;  %v967_v10 = vld [vmem:[#allocation13 + $0xe0] sm:$0xff] }
  0x95   : > { %893 = vmatpush.msra.mxu2 %v760_v47  ;;  %835 = vmatpush.msra.mxu0 %v759_v49  ;;  %v4013_v11 = vld [vmem:[%s3971_s2 + $0x10] sm:$0xff]  ;;  %v962_v13 = vld [vmem:[#allocation13 + $0xb8] sm:$0xff]  ;;  %v999_v17 = vld [vmem:[#allocation13 + $0x1e0] sm:$0xff] }
  0x96   : > { %922 = vmatpush.msra.mxu3 %v792_v48  ;;  %863 = vmatpush.msra.mxu1 %v793_v50  ;;  %v1001_v12 = vld [vmem:[#allocation13 + $0x1f0] sm:$0xff]  ;;  %v996_v14 = vld [vmem:[#allocation13 + $0x1c8] sm:$0xff]  ;;  %v994_v19 = vld [vmem:[#allocation13 + $0x1b8] sm:$0xff] }
  0x97   : > { %894 = vmatpush.msra.mxu2 %v758_v51  ;;  %836 = vmatpush.msra.mxu0 %v757_v53  ;;  %v4017_v15 = vld [vmem:[%s3971_s2 + $0x18] sm:$0xff]  ;;  %v960_v18 = vld [vmem:[#allocation13 + $0xa8] sm:$0xff]  ;;  %v963_v20 = vld [vmem:[#allocation13 + $0xc0] sm:$0xff] }
  0x98   : > { %923 = vmatpush.msra.mxu3 %v790_v52  ;;  %864 = vmatpush.msra.mxu1 %v791_v54  ;;  %v965_v16 = vld [vmem:[#allocation13 + $0xd0] sm:$0xff]  ;;  %v958_v22 = vld [vmem:[#allocation13 + $0x98] sm:$0xff]  ;;  %v992_v23 = vld [vmem:[#allocation13 + $0x1a8] sm:$0xff] }
  0x99   : > { %895 = vmatpush.msra.mxu2 %v756_v55  ;;  %837 = vmatpush.msra.mxu0 %v755_v57  ;;  %v997_v21 = vld [vmem:[#allocation13 + $0x1d0] sm:$0xff]  ;;  %v995_v25 = vld [vmem:[#allocation13 + $0x1c0] sm:$0xff]  ;;  %v956_v26 = vld [vmem:[#allocation13 + $0x88] sm:$0xff] }
  0x9a   : > { %924 = vmatpush.msra.mxu3 %v788_v56  ;;  %865 = vmatpush.msra.mxu1 %v789_v58  ;;  %v961_v24 = vld [vmem:[#allocation13 + $0xb0] sm:$0xff]  ;;  %v990_v27 = vld [vmem:[#allocation13 + $0x198] sm:$0xff]  ;;  %v959_v29 = vld [vmem:[#allocation13 + $0xa0] sm:$0xff] }
  0x9b   : > { %896 = vmatpush.msra.mxu2 %v754_v59  ;;  %838 = vmatpush.msra.mxu0 %v753_v1  ;;  %v4023_v28 = vld [vmem:[%s3971_s2 + $0x20] sm:$0xff]  ;;  %v993_v30 = vld [vmem:[#allocation13 + $0x1b0] sm:$0xff]  ;;  %v988_v32 = vld [vmem:[#allocation13 + $0x188] sm:$0xff] }
  0x9c   : > { %925 = vmatpush.msra.mxu3 %v786_v60  ;;  %897 = vmatmul.f32.vlgmr.msra.gmra.mxu2 %v4004_v61  ;;  %v954_v31 = vld [vmem:[#allocation13 + $0x78] sm:$0xff]  ;;  %v4028_v33 = vld [vmem:[%s3971_s2 + $0x28] sm:$0xff]  ;;  %v957_v34 = vld [vmem:[#allocation13 + $0x90] sm:$0xff] }
  0x9d   : > { %926 = vmatmul.f32.vlgmr.msra.gmra.mxu3 %v4007_v62  ;;  %1067 = vmatpush.msrb.mxu2 %v970_v63  ;;  %v991_v35 = vld [vmem:[#allocation13 + $0x1a0] sm:$0xff]  ;;  %v952_v36 = vld [vmem:[#allocation13 + $0x68] sm:$0xff]  ;;  %v986_v37 = vld [vmem:[#allocation13 + $0x178] sm:$0xff] }
  0x9e   : > { %1096 = vmatpush.msrb.mxu3 %v1002_v0  ;;  %866 = vmatpush.msra.mxu1 %v787_v2  ;;  %v955_v38 = vld [vmem:[#allocation13 + $0x80] sm:$0xff]  ;;  %v989_v39 = vld [vmem:[#allocation13 + $0x190] sm:$0xff]  ;;  %v950_v40 = vld [vmem:[#allocation13 + $0x58] sm:$0xff] }
  0x9f   : > { %1068 = vmatpush.msrb.mxu2 %v968_v3  ;;  %839 = vmatmul.f32.vlgmr.msra.gmra.mxu0 %v4004_v61  ;;  %v984_v41 = vld [vmem:[#allocation13 + $0x168] sm:$0xff]  ;;  %v953_v42 = vld [vmem:[#allocation13 + $0x70] sm:$0xff]  ;;  %v987_v43 = vld [vmem:[#allocation13 + $0x180] sm:$0xff] }
  0xa0   : > { %1097 = vmatpush.msrb.mxu3 %v1000_v4  ;;  %867 = vmatpush.msra.mxu1 %v785_v5  ;;  %v948_v44 = vld [vmem:[#allocation13 + $0x48] sm:$0xff]  ;;  %v982_v45 = vld [vmem:[#allocation13 + $0x158] sm:$0xff]  ;;  %v951_v47 = vld [vmem:[#allocation13 + $0x60] sm:$0xff] }
  0xa1   : > { %1069 = vmatpush.msrb.mxu2 %v966_v6  ;;  %1009 = vmatpush.msrb.mxu0 %v969_v7  ;;  %v4033_v46 = vld [vmem:[%s3971_s2 + $0x30] sm:$0xff]  ;;  %v946_v49 = vld [vmem:[#allocation13 + $0x38] sm:$0xff]  ;;  %v983_v53 = vld [vmem:[#allocation13 + $0x160] sm:$0xff] }
  0xa2   : > { %1098 = vmatpush.msrb.mxu3 %v998_v8  ;;  %868 = vmatmul.f32.vlgmr.msra.gmra.mxu1 %v4007_v62  ;;  %v985_v48 = vld [vmem:[#allocation13 + $0x170] sm:$0xff]  ;;  %v980_v50 = vld [vmem:[#allocation13 + $0x148] sm:$0xff]  ;;  %v978_v55 = vld [vmem:[#allocation13 + $0x138] sm:$0xff] }
  0xa3   : > { %1070 = vmatpush.msrb.mxu2 %v964_v9  ;;  %1010 = vmatpush.msrb.mxu0 %v967_v10  ;;  %v752_v51 = vld [vmem:[%s3971_s2 + $0x38] sm:$0xff]  ;;  %v944_v54 = vld [vmem:[#allocation13 + $0x28] sm:$0xff]  ;;  %v947_v56 = vld [vmem:[#allocation13 + $0x40] sm:$0xff] }
  0xa4   : > { %900 = vmatmul.f32.gmra.mxu2 %v4013_v11  ;;  %1038 = vmatpush.msrb.mxu1 %v1001_v12  ;;  %v949_v52 = vld [vmem:[#allocation13 + $0x50] sm:$0xff]  ;;  %v942_v58 = vld [vmem:[#allocation13 + $0x18] sm:$0xff]  ;;  %v976_v59 = vld [vmem:[#allocation13 + $0x128] sm:$0xff] }
  0xa5   : > { %1071 = vmatpush.msrb.mxu2 %v962_v13  ;;  %1099 = vmatpush.msrb.mxu3 %v996_v14  ;;  %v981_v57 = vld [vmem:[#allocation13 + $0x150] sm:$0xff]  ;;  %v979_v63 = vld [vmem:[#allocation13 + $0x140] sm:$0xff]  ;;  %v940_v0 = vld [vmem:[#allocation13 + $0x8] sm:$0xff] }
  0xa6   : > { %929 = vmatmul.f32.gmra.mxu3 %v4017_v15  ;;  %1011 = vmatpush.msrb.mxu0 %v965_v16  ;;  %v945_v60 = vld [vmem:[#allocation13 + $0x30] sm:$0xff]  ;;  %v974_v1 = vld [vmem:[#allocation13 + $0x118] sm:$0xff]  ;;  %v943_v2 = vld [vmem:[#allocation13 + $0x20] sm:$0xff] }
  0xa7   : > { %1039 = vmatpush.msrb.mxu1 %v999_v17  ;;  %1072 = vmatpush.msrb.mxu2 %v960_v18  ;;  %v977_v3 = vld [vmem:[#allocation13 + $0x130] sm:$0xff]  ;;  %v972_v4 = vld [vmem:[#allocation13 + $0x108] sm:$0xff]  ;;  %v975_v6 = vld [vmem:[#allocation13 + $0x120] sm:$0xff] }
  0xa8   : > { %1100 = vmatpush.msrb.mxu3 %v994_v19  ;;  %1012 = vmatpush.msrb.mxu0 %v963_v20  ;;  %v941_v5 = vld [vmem:[#allocation13 + $0x10] sm:$0xff]  ;;  %v939_v7 = vld [vmem:[#allocation13] sm:$0xff] }
  0xa9   : > { %1040 = vmatpush.msrb.mxu1 %v997_v21  ;;  %1073 = vmatpush.msrb.mxu2 %v958_v22  ;;  %v973_v8 = vld [vmem:[#allocation13 + $0x110] sm:$0xff]  ;;  %v971_v9 = vld [vmem:[#allocation13 + $0x100] sm:$0xff] }
  0xaa   : > { %1101 = vmatpush.msrb.mxu3 %v992_v23  ;;  %842 = vmatmul.f32.gmra.mxu0 %v4013_v11 }
  0xab   : > { %1013 = vmatpush.msrb.mxu0 %v961_v24  ;;  %1041 = vmatpush.msrb.mxu1 %v995_v25 }
  0xac   : > { %1074 = vmatpush.msrb.mxu2 %v956_v26  ;;  %1102 = vmatpush.msrb.mxu3 %v990_v27 }
  0xad   : > { %871 = vmatmul.f32.gmra.mxu1 %v4017_v15  ;;  %903 = vmatmul.f32.gmra.mxu2 %v4023_v28 }
  0xae   : > { %1014 = vmatpush.msrb.mxu0 %v959_v29  ;;  %1042 = vmatpush.msrb.mxu1 %v993_v30 }
  0xaf   : > { %1075 = vmatpush.msrb.mxu2 %v954_v31  ;;  %1103 = vmatpush.msrb.mxu3 %v988_v32 }
  0xb0   : > { %932 = vmatmul.f32.gmra.mxu3 %v4028_v33  ;;  %1015 = vmatpush.msrb.mxu0 %v957_v34 }
  0xb1   : > { %1043 = vmatpush.msrb.mxu1 %v991_v35  ;;  %1076 = vmatpush.msrb.mxu2 %v952_v36 }
  0xb2   : > { %1104 = vmatpush.msrb.mxu3 %v986_v37  ;;  %1016 = vmatpush.msrb.mxu0 %v955_v38 }
  0xb3   : > { %1044 = vmatpush.msrb.mxu1 %v989_v39  ;;  %1077 = vmatpush.msrb.mxu2 %v950_v40  ;;  %v1003_v40 = vld [vmem:[#allocation14] sm:$0x3] }
  0xb4   : > { %1105 = vmatpush.msrb.mxu3 %v984_v41  ;;  %845 = vmatmul.f32.gmra.mxu0 %v4023_v28 }
  0xb5   : > { %1017 = vmatpush.msrb.mxu0 %v953_v42  ;;  %1045 = vmatpush.msrb.mxu1 %v987_v43 }
  0xb6   : > { %1078 = vmatpush.msrb.mxu2 %v948_v44  ;;  %1106 = vmatpush.msrb.mxu3 %v982_v45  ;;  %v1005_v44 = vperm.slane %v1003_v40, 0  ;;  %v1006_v45 = vperm.slane %v1003_v40, 1 }
  0xb7   : > { %874 = vmatmul.f32.gmra.mxu1 %v4028_v33  ;;  %906 = vmatmul.f32.gmra.mxu2 %v4033_v46 }
  0xb8   : > { %1018 = vmatpush.msrb.mxu0 %v951_v47  ;;  %1046 = vmatpush.msrb.mxu1 %v985_v48 }
  0xb9   : > { %1079 = vmatpush.msrb.mxu2 %v946_v49  ;;  %1107 = vmatpush.msrb.mxu3 %v980_v50 }
  0xba   : > { %935 = vmatmul.f32.gmra.mxu3 %v752_v51  ;;  %1019 = vmatpush.msrb.mxu0 %v949_v52 }
  0xbb   : > { %1047 = vmatpush.msrb.mxu1 %v983_v53  ;;  %1080 = vmatpush.msrb.mxu2 %v944_v54 }
  0xbc   : > { %1108 = vmatpush.msrb.mxu3 %v978_v55  ;;  %1020 = vmatpush.msrb.mxu0 %v947_v56 }
  0xbd   : > { %1048 = vmatpush.msrb.mxu1 %v981_v57  ;;  %1081 = vmatpush.msrb.mxu2 %v942_v58 }
  0xbe   : > { %1109 = vmatpush.msrb.mxu3 %v976_v59  ;;  %848 = vmatmul.f32.gmra.mxu0 %v4033_v46 }
  0xbf   : > { %1021 = vmatpush.msrb.mxu0 %v945_v60  ;;  %1049 = vmatpush.msrb.mxu1 %v979_v63 }
  0xc0   : > { %1082 = vmatpush.msrb.mxu2 %v940_v0  ;;  %1110 = vmatpush.msrb.mxu3 %v974_v1 }
  0xc1   : > { %877 = vmatmul.f32.gmra.mxu1 %v752_v51  ;;  %1022 = vmatpush.msrb.mxu0 %v943_v2 }
  0xc2   : > { %1050 = vmatpush.msrb.mxu1 %v977_v3  ;;  %1083 = vmatmul.f32.vlgmr.msrb.gmra.mxu2 %v4004_v61 }
  0xc3   : > { %1111 = vmatpush.msrb.mxu3 %v972_v4  ;;  %1023 = vmatpush.msrb.mxu0 %v941_v5 }
  0xc4   : > { %1051 = vmatpush.msrb.mxu1 %v975_v6  ;;  %1112 = vmatmul.f32.vlgmr.msrb.gmra.mxu3 %v4007_v62 }
  0xc5   : > { %1024 = vmatpush.msrb.mxu0 %v939_v7 }
  0xc6   : > { %1052 = vmatpush.msrb.mxu1 %v973_v8  ;;  %1025 = vmatmul.f32.vlgmr.msrb.gmra.mxu0 %v4004_v61  ;;  %v817_v61 = vld [vmem:[%s4427_s14] sm:$0x3] }
  0xc7   : > { %v820_v10 = vperm.slane %v817_v61, 1 }
  0xc8   : > { %1053 = vmatpush.msrb.mxu1 %v971_v9 }
  0xc9   : > { %1054 = vmatmul.f32.vlgmr.msrb.gmra.mxu1 %v4007_v62  ;;  %v819_v62 = vperm.slane %v817_v61, 0 }
  0xca   : > { %1086 = vmatmul.f32.gmra.mxu2 %v4013_v11 }
  0xcc   : > { %1115 = vmatmul.f32.gmra.mxu3 %v4017_v15 }
  0xce   : > { %1028 = vmatmul.f32.gmra.mxu0 %v4013_v11 }
  0xd1   : > { %1057 = vmatmul.f32.gmra.mxu1 %v4017_v15 }
  0xd2   : > { %1089 = vmatmul.f32.gmra.mxu2 %v4023_v28 }
  0xd4   : > { %1118 = vmatmul.f32.gmra.mxu3 %v4028_v33 }
  0xd6   : > { %1031 = vmatmul.f32.gmra.mxu0 %v4023_v28 }
  0xd9   : > { %1060 = vmatmul.f32.gmra.mxu1 %v4028_v33 }
  0xda   : > { %1092 = vmatmul.f32.gmra.mxu2 %v4033_v46 }
  0xdc   : > { %1121 = vmatmul.f32.gmra.mxu3 %v752_v51 }
  0xde   : > { %1034 = vmatmul.f32.gmra.mxu0 %v4033_v46 }
  0xe1   : > { %1063 = vmatmul.f32.gmra.mxu1 %v752_v51 }
 0x11c   : > { %v840_v11 = vpop.f32.mrf.mxu0 }
 0x11d   : > { %v841_v12 = vadd.f32 %v840_v11, %v819_v62 }
 0x11f   : > { %v898_v13 = vpop.f32.mrf.mxu2  ;;  %v869_v14 = vpop.f32.mrf.mxu1 }
 0x120   : > { %v899_v15 = vadd.f32 %v898_v13, %v820_v10  ;;  %v870_v16 = vadd.f32 %v869_v14, %v841_v12  ;;  %v927_v17 = vpop.f32.mrf.mxu3 }
 0x122   : > { %1125 = vst [vmem:[#allocation3 + $0x30] sm:$0xff] %v870_v16  ;;  %v928_v18 = vadd.f32 %v927_v17, %v899_v15 }
 0x124   : > { %1134 = vst [vmem:[#allocation3 + $0x8] sm:$0xff] %v928_v18 }
 0x127   : > { %v843_v19 = vpop.f32.mrf.mxu0  ;;  %v901_v20 = vpop.f32.mrf.mxu2 }
 0x128   : > { %v844_v21 = vadd.f32 %v843_v19, %v819_v62  ;;  %v902_v22 = vadd.f32 %v901_v20, %v820_v10 }
 0x129   : > { %v930_v23 = vpop.f32.mrf.mxu3 }
 0x12a   : > { %v872_v24 = vpop.f32.mrf.mxu1  ;;  %v931_v25 = vadd.f32 %v930_v23, %v902_v22 }
 0x12b   : > { %v873_v26 = vadd.f32 %v872_v24, %v844_v21 }
 0x12c   : > { %1135 = vst [vmem:[#allocation3 + $0x20] sm:$0xff] %v931_v25 }
 0x12d   : > { %1126 = vst [vmem:[#allocation3] sm:$0xff] %v873_v26 }
 0x130   : > { %v904_v27 = vpop.f32.mrf.mxu2 }
 0x131   : > { %v846_v28 = vpop.f32.mrf.mxu0  ;;  %v905_v29 = vadd.f32 %v904_v27, %v820_v10 }
 0x132   : > { %v847_v30 = vadd.f32 %v846_v28, %v819_v62 }
 0x133   : > { %v933_v31 = vpop.f32.mrf.mxu3 }
 0x134   : > { %v875_v32 = vpop.f32.mrf.mxu1  ;;  %v934_v33 = vadd.f32 %v933_v31, %v905_v29 }
 0x135   : > { %v876_v34 = vadd.f32 %v875_v32, %v847_v30 }
 0x136   : > { %1136 = vst [vmem:[#allocation3 + $0x28] sm:$0xff] %v934_v33 }
 0x137   : > { %1127 = vst [vmem:[#allocation3 + $0x18] sm:$0xff] %v876_v34 }
 0x13a   : > { %v907_v35 = vpop.f32.mrf.mxu2 }
 0x13b   : > { %v849_v36 = vpop.f32.mrf.mxu0  ;;  %v908_v37 = vadd.f32 %v907_v35, %v820_v10 }
 0x13c   : > { %v850_v38 = vadd.f32 %v849_v36, %v819_v62 }
 0x13d   : > { %v936_v39 = vpop.f32.mrf.mxu3 }
 0x13e   : > { %v878_v41 = vpop.f32.mrf.mxu1  ;;  %v937_v42 = vadd.f32 %v936_v39, %v908_v37 }
 0x13f   : > { %v879_v43 = vadd.f32 %v878_v41, %v850_v38 }
 0x140   : > { %1137 = vst [vmem:[#allocation3 + $0x38] sm:$0xff] %v937_v42 }
 0x141   : > { %1128 = vst [vmem:[#allocation3 + $0x10] sm:$0xff] %v879_v43 }
 0x143   : > { %v1026_v46 = vpop.f32.mrf.mxu0 }
 0x144   : > { %v1027_v47 = vadd.f32 %v1026_v46, %v1005_v44 }
 0x145   : > { %v1084_v48 = vpop.f32.mrf.mxu2 }
 0x146   : > { %v1085_v49 = vadd.f32 %v1084_v48, %v1006_v45  ;;  %v1055_v50 = vpop.f32.mrf.mxu1 }
 0x147   : > { %v1056_v51 = vadd.f32 %v1055_v50, %v1027_v47  ;;  %v1113_v52 = vpop.f32.mrf.mxu3 }
 0x148   : > { %v1114_v53 = vadd.f32 %v1113_v52, %v1085_v49 }
 0x149   : > { %1129 = vst [vmem:[#allocation4] sm:$0xff] %v1056_v51 }
 0x14a   : > { %1139 = vst [vmem:[#allocation4 + $0x28] sm:$0xff] %v1114_v53 }
 0x14b   : > { %v1029_v54 = vpop.f32.mrf.mxu0 }
 0x14c   : > { %v1030_v55 = vadd.f32 %v1029_v54, %v1005_v44 }
 0x14d   : > { %v1087_v56 = vpop.f32.mrf.mxu2 }
 0x14e   : > { %v1088_v57 = vadd.f32 %v1087_v56, %v1006_v45  ;;  %v1058_v58 = vpop.f32.mrf.mxu1 }
 0x14f   : > { %v1059_v59 = vadd.f32 %v1058_v58, %v1030_v55  ;;  %v1116_v60 = vpop.f32.mrf.mxu3 }
 0x150   : > { %v1117_v63 = vadd.f32 %v1116_v60, %v1088_v57 }
 0x151   : > { %1130 = vst [vmem:[#allocation4 + $0x18] sm:$0xff] %v1059_v59 }
 0x152   : > { %1140 = vst [vmem:[#allocation4 + $0x8] sm:$0xff] %v1117_v63 }
 0x153   : > { %v1032_v0 = vpop.f32.mrf.mxu0 }
 0x154   : > { %v1033_v1 = vadd.f32 %v1032_v0, %v1005_v44 }
 0x155   : > { %v1090_v2 = vpop.f32.mrf.mxu2 }
 0x156   : > { %v1091_v3 = vadd.f32 %v1090_v2, %v1006_v45  ;;  %v1061_v4 = vpop.f32.mrf.mxu1 }
 0x157   : > { %v1062_v5 = vadd.f32 %v1061_v4, %v1033_v1  ;;  %v1119_v6 = vpop.f32.mrf.mxu3 }
 0x158   : > { %v1120_v7 = vadd.f32 %v1119_v6, %v1091_v3 }
 0x159   : > { %1131 = vst [vmem:[#allocation4 + $0x10] sm:$0xff] %v1062_v5 }
 0x15a   : > { %1141 = vst [vmem:[#allocation4 + $0x30] sm:$0xff] %v1120_v7 }
 0x15b   : > { %v1035_v8 = vpop.f32.mrf.mxu0 }
 0x15c   : > { %v1036_v9 = vadd.f32 %v1035_v8, %v1005_v44 }
 0x15d   : > { %v1093_v61 = vpop.f32.mrf.mxu2 }
 0x15e   : > { %v1094_v62 = vadd.f32 %v1093_v61, %v1006_v45  ;;  %v1064_v10 = vpop.f32.mrf.mxu1 }
 0x15f   : > { %v1065_v11 = vadd.f32 %v1064_v10, %v1036_v9  ;;  %v1122_v12 = vpop.f32.mrf.mxu3 }
 0x160   : > { %v1123_v13 = vadd.f32 %v1122_v12, %v1094_v62 }
 0x161   : > { %1132 = vst [vmem:[#allocation4 + $0x20] sm:$0xff] %v1065_v11 }
 0x162   : > { %1142 = vst [vmem:[#allocation4 + $0x38] sm:$0xff] %v1123_v13 }
 0x163 PF: > { %v1183_v14 = vld [vmem:[#allocation8 + $0xf0] sm:$0xff]  ;;  %v1184_v15 = vld [vmem:[#allocation8 + $0xf8] sm:$0xff]  ;;  %v1181_v16 = vld [vmem:[#allocation8 + $0xe0] sm:$0xff]  ;;  %s4428_s15 = sld [smem:[#allocation33_spill]]  ;;  %vm1382_vm0 = vcmask 130048  }
 0x164   : > { %1223 = vmatpush.msra.mxu0 %v1183_v14  ;;  %1269 = vmatpush.msra.mxu2 %v1184_v15  ;;  %v1215_v17 = vld [vmem:[#allocation8 + $0x1f0] sm:$0xff]  ;;  %v1182_v18 = vld [vmem:[#allocation8 + $0xe8] sm:$0xff]  ;;  %v1216_v19 = vld [vmem:[#allocation8 + $0x1f8] sm:$0xff]  ;;  %s4429_s20 = sld [smem:[#allocation45_spill]] }
 0x165   : > { %1246 = vmatpush.msra.mxu1 %v1215_v17  ;;  %1292 = vmatpush.msra.mxu3 %v1216_v19  ;;  %v1179_v20 = vld [vmem:[#allocation8 + $0xd0] sm:$0xff]  ;;  %v1213_v21 = vld [vmem:[#allocation8 + $0x1e0] sm:$0xff]  ;;  %v1180_v22 = vld [vmem:[#allocation8 + $0xd8] sm:$0xff]  ;;  %s4430_s5 = sld [smem:[#allocation48_spill]] }
 0x166   : > { %1224 = vmatpush.msra.mxu0 %v1181_v16  ;;  %1270 = vmatpush.msra.mxu2 %v1182_v18  ;;  %v1214_v23 = vld [vmem:[#allocation8 + $0x1e8] sm:$0xff]  ;;  %v1211_v24 = vld [vmem:[#allocation8 + $0x1d0] sm:$0xff]  ;;  %v1177_v25 = vld [vmem:[#allocation8 + $0xc0] sm:$0xff]  ;;  %s4431_s14 = sld [smem:[#allocation49_spill]] }
 0x167   : > { %1247 = vmatpush.msra.mxu1 %v1213_v21  ;;  %1293 = vmatpush.msra.mxu3 %v1214_v23  ;;  %v1178_v26 = vld [vmem:[#allocation8 + $0xc8] sm:$0xff]  ;;  %v1212_v27 = vld [vmem:[#allocation8 + $0x1d8] sm:$0xff]  ;;  %v1209_v28 = vld [vmem:[#allocation8 + $0x1c0] sm:$0xff]  ;;  %s4435_s22 = sld [smem:[#allocation52_spill]] }
 0x168   : > { %1225 = vmatpush.msra.mxu0 %v1179_v20  ;;  %1271 = vmatpush.msra.mxu2 %v1180_v22  ;;  %v1210_v29 = vld [vmem:[#allocation8 + $0x1c8] sm:$0xff]  ;;  %v1175_v30 = vld [vmem:[#allocation8 + $0xb0] sm:$0xff]  ;;  %v1176_v31 = vld [vmem:[#allocation8 + $0xb8] sm:$0xff] }
 0x169   : > { %1248 = vmatpush.msra.mxu1 %v1211_v24  ;;  %1294 = vmatpush.msra.mxu3 %v1212_v27  ;;  %v1207_v32 = vld [vmem:[#allocation8 + $0x1b0] sm:$0xff]  ;;  %v1208_v33 = vld [vmem:[#allocation8 + $0x1b8] sm:$0xff]  ;;  %v1173_v34 = vld [vmem:[#allocation8 + $0xa0] sm:$0xff]  ;;  %s2906_s27 = sshll.u32 %s4428_s15, 4  ;;  %s2927_s3 = sshll.u32 %s4428_s15, 2 }
 0x16a   : > { %1226 = vmatpush.msra.mxu0 %v1177_v25  ;;  %1272 = vmatpush.msra.mxu2 %v1178_v26  ;;  %v1174_v35 = vld [vmem:[#allocation8 + $0xa8] sm:$0xff]  ;;  %v1205_v36 = vld [vmem:[#allocation8 + $0x1a0] sm:$0xff]  ;;  %v1171_v38 = vld [vmem:[#allocation8 + $0x90] sm:$0xff]  ;;  %s1144_s16 = sshra.s32 %s2906_s27, 3  ;;  %s4432_s27 = sld [smem:[#allocation34_spill]] }
 0x16b   : > { %1249 = vmatpush.msra.mxu1 %v1209_v28  ;;  %1295 = vmatpush.msra.mxu3 %v1210_v29  ;;  %v1206_v37 = vld [vmem:[#allocation8 + $0x1a8] sm:$0xff]  ;;  %v1172_v39 = vld [vmem:[#allocation8 + $0x98] sm:$0xff]  ;;  %v1203_v40 = vld [vmem:[#allocation8 + $0x190] sm:$0xff]  ;;  %s2926_s9 = sshll.u32 %s1144_s16, 4  ;;  %s2688_s16 = sshll.u32 %s4000_s10, 4  ;;  %s2689_s16 = int_to_ptr.vmem [resolvable:$true] %s2688_s16 }
 0x16c   : > { %1227 = vmatpush.msra.mxu0 %v1175_v30  ;;  %1273 = vmatpush.msra.mxu2 %v1176_v31  ;;  %v1204_v41 = vld [vmem:[#allocation8 + $0x198] sm:$0xff]  ;;  %v1169_v42 = vld [vmem:[#allocation8 + $0x80] sm:$0xff]  ;;  %v1170_v43 = vld [vmem:[#allocation8 + $0x88] sm:$0xff]  ;;  %s4058_s0 = scalar_lea.vmem %s3971_s2, %s2926_s9 [#allocation5] }
 0x16d   : > { %1250 = vmatpush.msra.mxu1 %v1207_v32  ;;  %1296 = vmatpush.msra.mxu3 %v1208_v33  ;;  %v1201_v44 = vld [vmem:[#allocation8 + $0x180] sm:$0xff]  ;;  %v1202_v45 = vld [vmem:[#allocation8 + $0x188] sm:$0xff]  ;;  %v1167_v46 = vld [vmem:[#allocation8 + $0x70] sm:$0xff] }
 0x16e   : > { %1228 = vmatpush.msra.mxu0 %v1173_v34  ;;  %1274 = vmatpush.msra.mxu2 %v1174_v35  ;;  %v1168_v47 = vld [vmem:[#allocation8 + $0x78] sm:$0xff]  ;;  %v1199_v48 = vld [vmem:[#allocation8 + $0x170] sm:$0xff]  ;;  %v1165_v50 = vld [vmem:[#allocation8 + $0x60] sm:$0xff] }
 0x16f   : > { %1251 = vmatpush.msra.mxu1 %v1205_v36  ;;  %1297 = vmatpush.msra.mxu3 %v1206_v37  ;;  %v1200_v49 = vld [vmem:[#allocation8 + $0x178] sm:$0xff]  ;;  %v1166_v51 = vld [vmem:[#allocation8 + $0x68] sm:$0xff]  ;;  %v1197_v52 = vld [vmem:[#allocation8 + $0x160] sm:$0xff] }
 0x170   : > { %1229 = vmatpush.msra.mxu0 %v1171_v38  ;;  %1275 = vmatpush.msra.mxu2 %v1172_v39  ;;  %v1198_v53 = vld [vmem:[#allocation8 + $0x168] sm:$0xff]  ;;  %v1163_v54 = vld [vmem:[#allocation8 + $0x50] sm:$0xff]  ;;  %v1164_v55 = vld [vmem:[#allocation8 + $0x58] sm:$0xff]  ;;  %s2921_s2 = sshll.u32 %s4432_s27, 3 }
 0x171   : > { %1252 = vmatpush.msra.mxu1 %v1203_v40  ;;  %1298 = vmatpush.msra.mxu3 %v1204_v41  ;;  %v1195_v56 = vld [vmem:[#allocation8 + $0x150] sm:$0xff]  ;;  %v1196_v57 = vld [vmem:[#allocation8 + $0x158] sm:$0xff]  ;;  %v1161_v58 = vld [vmem:[#allocation8 + $0x40] sm:$0xff]  ;;  %s2685_s8 = sadd.s32 %s2927_s3, %s2921_s2  ;;  %s3536_s2 = scalar_lea.hbm %s4435_s22, 128 }
 0x172   : > { %1230 = vmatpush.msra.mxu0 %v1169_v42  ;;  %1276 = vmatpush.msra.mxu2 %v1170_v43  ;;  %v1162_v59 = vld [vmem:[#allocation8 + $0x48] sm:$0xff]  ;;  %v1193_v60 = vld [vmem:[#allocation8 + $0x140] sm:$0xff]  ;;  %v1159_v0 = vld [vmem:[#allocation8 + $0x30] sm:$0xff]  ;;  %s2922_s15 = sshll.u32 %s2685_s8, 3 }
 0x173   : > { %1253 = vmatpush.msra.mxu1 %v1201_v44  ;;  %1299 = vmatpush.msra.mxu3 %v1202_v45  ;;  %v1194_v63 = vld [vmem:[#allocation8 + $0x148] sm:$0xff]  ;;  %v1160_v1 = vld [vmem:[#allocation8 + $0x38] sm:$0xff]  ;;  %v1191_v2 = vld [vmem:[#allocation8 + $0x130] sm:$0xff]  ;;  %s2687_s27 = scalar_lea.hbm %s4435_s22, %s2922_s15 }
 0x174   : > { %1231 = vmatpush.msra.mxu0 %v1167_v46  ;;  %1277 = vmatpush.msra.mxu2 %v1168_v47  ;;  %v1192_v3 = vld [vmem:[#allocation8 + $0x138] sm:$0xff]  ;;  %v1157_v4 = vld [vmem:[#allocation8 + $0x20] sm:$0xff]  ;;  %v1158_v5 = vld [vmem:[#allocation8 + $0x28] sm:$0xff]  ;;  %s2690_s9 = sshll.u32 %s2687_s27, 4  ;;  %s2691_s9 = int_to_ptr.hbm [resolvable:$true] %s2690_s9 }
 0x175   : > { %1254 = vmatpush.msra.mxu1 %v1199_v48  ;;  %1300 = vmatpush.msra.mxu3 %v1200_v49  ;;  %v1189_v6 = vld [vmem:[#allocation8 + $0x120] sm:$0xff]  ;;  %v1190_v7 = vld [vmem:[#allocation8 + $0x128] sm:$0xff]  ;;  %v1155_v8 = vld [vmem:[#allocation8 + $0x10] sm:$0xff]  ;;  %s3530_s25 = sshra.s32 %s2691_s9, 4  ;;  %s3531_s25 = int_to_ptr.hbm [resolvable:$true] %s3530_s25 }
 0x176   : > { %1232 = vmatpush.msra.mxu0 %v1165_v50  ;;  %1278 = vmatpush.msra.mxu2 %v1166_v51  ;;  %v1156_v9 = vld [vmem:[#allocation8 + $0x18] sm:$0xff]  ;;  %v1187_v61 = vld [vmem:[#allocation8 + $0x110] sm:$0xff]  ;;  %v1153_v10 = vld [vmem:[#allocation8] sm:$0xff]  ;;  %s3532_s24 = scalar_lea.hbm %s3531_s25, 32  ;;  %p3537_p13 = scmp.lt.s32.totalorder %s3531_s25, %s4435_s22 }
 0x177   : > { %1255 = vmatpush.msra.mxu1 %v1197_v52  ;;  %1301 = vmatpush.msra.mxu3 %v1198_v53  ;;  %v1188_v62 = vld [vmem:[#allocation8 + $0x118] sm:$0xff]  ;;  %v1154_v11 = vld [vmem:[#allocation8 + $0x8] sm:$0xff]  ;;  %v4061_v12 = vld [vmem:[%s4058_s0] sm:$0xff]  ;;  %p3533_p7 = scmp.ne.s32.totalorder %s3531_s25, %s3532_s24  ;;  %p3538_p0 = scmp.lt.s32.totalorder %s3536_s2, %s3532_s24 }
 0x178   : > { %1233 = vmatpush.msra.mxu0 %v1163_v54  ;;  %1279 = vmatpush.msra.mxu2 %v1164_v55  ;;  %v1185_v13 = vld [vmem:[#allocation8 + $0x100] sm:$0xff]  ;;  %v1186_v14 = vld [vmem:[#allocation8 + $0x108] sm:$0xff]  ;;  %v1328_v18 = vld [vmem:[#allocation3 + $0x30] sm:$0xff] }
 0x179   : > { %1256 = vmatpush.msra.mxu1 %v1195_v56  ;;  %1302 = vmatpush.msra.mxu3 %v1196_v57  ;;  %v4064_v15 = vld [vmem:[%s4058_s0 + $0x8] sm:$0xff]  ;;  %v1329_v16 = vld [vmem:[#allocation3] sm:$0xff]  ;;  %v4071_v19 = vld [vmem:[%s4058_s0 + $0x10] sm:$0xff]  ;;  %p3534_p10 = pnand %p3533_p7, %p3938_p4  ;;  %p3539_p2 = por %p3538_p0, %p3537_p13 }
 0x17a   : > { %1234 = vmatpush.msra.mxu0 %v1161_v58  ;;  %1280 = vmatpush.msra.mxu2 %v1162_v59  ;;  %v1331_v17 = vld [vmem:[#allocation3 + $0x20] sm:$0xff]  ;;  %v4074_v20 = vld [vmem:[%s4058_s0 + $0x18] sm:$0xff]  ;;  %v1330_v21 = vld [vmem:[#allocation3 + $0x8] sm:$0xff]  ;;  %s4433_s0 = sld [smem:[#allocation50_spill]] }
 0x17b   : > { %1257 = vmatpush.msra.mxu1 %v1193_v60  ;;  %1303 = vmatpush.msra.mxu3 %v1194_v63  ;;  %v1502_v22 = vld [vmem:[#allocation3 + $0x10] sm:$0xff]  ;;  %v1501_v23 = vld [vmem:[#allocation3 + $0x18] sm:$0xff]  ;;  %v1503_v25 = vld [vmem:[#allocation3 + $0x28] sm:$0xff]  ;;  %p3535_p11 = pneg %p3534_p10 }
 0x17c   : > { %1235 = vmatpush.msra.mxu0 %v1159_v0  ;;  %1281 = vmatpush.msra.mxu2 %v1160_v1  ;;  %v1504_v24 = vld [vmem:[#allocation3 + $0x38] sm:$0xff]  ;;  %v1217_v26 = vld [vmem:[#allocation10] sm:$0x3] }
 0x17d   : > { %1258 = vmatpush.msra.mxu1 %v1191_v2  ;;  %1304 = vmatpush.msra.mxu3 %v1192_v3  ;;  %v1219_v27 = vperm.slane %v1217_v26, 0  ;;  %v1220_v32 = vperm.slane %v1217_v26, 1  ;;  %v1333_v50 = vld [vmem:[#allocation4 + $0x18] sm:$0xff]  ;;  %p3540_p5 = pnand %p3539_p2, %p3535_p11 }
 0x17e   : > { %1236 = vmatpush.msra.mxu0 %v1157_v4  ;;  %1282 = vmatpush.msra.mxu2 %v1158_v5  ;;  %v1335_v4 = vld [vmem:[#allocation4 + $0x8] sm:$0xff]  ;;  %v1332_v5 = vld [vmem:[#allocation4] sm:$0xff] }
 0x17f   : > { %1259 = vmatpush.msra.mxu1 %v1189_v6  ;;  %1305 = vmatpush.msra.mxu3 %v1190_v7  ;;  %v1334_v6 = vld [vmem:[#allocation4 + $0x28] sm:$0xff]  ;;  %v1506_v7 = vld [vmem:[#allocation4 + $0x20] sm:$0xff] }
 0x180   : > { %1237 = vmatpush.msra.mxu0 %v1155_v8  ;;  %1283 = vmatpush.msra.mxu2 %v1156_v9  ;;  %v1508_v8 = vld [vmem:[#allocation4 + $0x38] sm:$0xff]  ;;  %v1505_v9 = vld [vmem:[#allocation4 + $0x10] sm:$0xff] }
 0x181   : > { %1260 = vmatpush.msra.mxu1 %v1187_v61  ;;  %1306 = vmatpush.msra.mxu3 %v1188_v62 }
 0x182   : > { %1238 = vmatpush.msra.mxu0 %v1153_v10  ;;  %1284 = vmatpush.msra.mxu2 %v1154_v11  ;;  %v1507_v10 = vld [vmem:[#allocation4 + $0x30] sm:$0xff] }
 0x183   : > { %1239 = vmatmul.f32.vlgmr.msra.gmra.mxu0 %v4061_v12  ;;  %1285 = vmatmul.f32.vlgmr.msra.gmra.mxu2 %v4061_v12 }
 0x184   : > { %1261 = vmatpush.msra.mxu1 %v1185_v13  ;;  %1307 = vmatpush.msra.mxu3 %v1186_v14 }
 0x185   : > { %1262 = vmatmul.f32.vlgmr.msra.gmra.mxu1 %v4064_v15  ;;  %1308 = vmatmul.f32.vlgmr.msra.gmra.mxu3 %v4064_v15 }
 0x186   : > { %1350 = vmatpush.xpose.msrb.mxu0 %v1329_v16  ;;  %1373 = vmatpush.xpose.msrb.mxu1 %v1331_v17 }
 0x187   : > { %1459 = vmatpush.msrb.mxu2 %v1333_v50  ;;  %1488 = vmatpush.msrb.mxu3 %v1335_v4  ;;  %v1716_v4 = vld [vmem:[#allocation16 + $0xd8] sm:$0xff] }
 0x189   : > { %1460 = vmatpush.msrb.mxu2 %v1332_v5  ;;  %1489 = vmatpush.msrb.mxu3 %v1334_v6  ;;  %v1713_v5 = vld [vmem:[#allocation16 + $0xc0] sm:$0xff]  ;;  %v1714_v6 = vld [vmem:[#allocation16 + $0xc8] sm:$0xff] }
 0x18a   : > { %1351 = vmatpush.xpose.msrb.mxu0 %v1328_v18  ;;  %1374 = vmatpush.xpose.msrb.mxu1 %v1330_v21 }
 0x18b   : > { %1242 = vmatmul.f32.gmra.mxu0 %v4071_v19  ;;  %1288 = vmatmul.f32.gmra.mxu2 %v4071_v19 }
 0x18c   : > { %1639 = vmatpush.msra.mxu2 %v1506_v7  ;;  %1668 = vmatpush.msra.mxu3 %v1508_v8  ;;  %v1752_v8 = vld [vmem:[#allocation16 + $0x1f0] sm:$0xff] }
 0x18d   : > { %1265 = vmatmul.f32.gmra.mxu1 %v4074_v20  ;;  %1311 = vmatmul.f32.gmra.mxu3 %v4074_v20 }
 0x18e   : > { %1523 = vmatpush.xpose.msra.mxu0 %v1502_v22  ;;  %1546 = vmatpush.xpose.msra.mxu1 %v1504_v24 }
 0x18f   : > { %1640 = vmatpush.msra.mxu2 %v1505_v9  ;;  %1669 = vmatpush.msra.mxu3 %v1507_v10  ;;  %v1753_v9 = vld [vmem:[#allocation16 + $0x1f8] sm:$0xff] }
 0x190   : > { %v1712_v10 = vld [vmem:[#allocation16 + $0xb8] sm:$0xff] }
 0x192   : > { %1524 = vmatpush.xpose.msra.mxu0 %v1501_v23  ;;  %1547 = vmatpush.xpose.msra.mxu1 %v1503_v25 }
 0x200   : > { %v1240_v28 = vpop.f32.mrf.mxu0 }
 0x201   : > { %v1241_v29 = vadd.f32 %v1240_v28, %v1219_v27 }
 0x202   : > { %v1263_v30 = vpop.f32.mrf.mxu1 }
 0x203   : > { %v1264_v31 = vadd.f32 %v1263_v30, %v1241_v29 }
 0x205   : > { %v1315_v33 = vmul.f32 0.088388346, %v1264_v31 }
 0x206   : > { %v1286_v34 = vpop.f32.mrf.mxu2 }
 0x207   : > { %v1287_v35 = vadd.f32 %v1286_v34, %v1220_v32  ;;  %1352 = vmatmul.f32.vlgmr.msrb.gmra.mxu0 %v1315_v33 }
 0x208   : > { %v1243_v36 = vpop.f32.mrf.mxu0  ;;  %v1309_v37 = vpop.f32.mrf.mxu3  ;;  %1754 = vmatpush.msrb.mxu0 %v1752_v8 }
 0x209   : > { %v1244_v38 = vadd.f32 %v1243_v36, %v1219_v27  ;;  %v1310_v39 = vadd.f32 %v1309_v37, %v1287_v35 }
 0x20a   : > { %v1266_v40 = vpop.f32.mrf.mxu1 }
 0x20b   : > { %v1316_v41 = vmul.f32 0.088388346, %v1310_v39  ;;  %v1267_v42 = vadd.f32 %v1266_v40, %v1244_v38 }
 0x20d   : > { %v1317_v43 = vmul.f32 0.088388346, %v1267_v42  ;;  %1375 = vmatmul.f32.vlgmr.msrb.gmra.mxu1 %v1316_v41 }
 0x20e   : > { %v1289_v44 = vpop.f32.mrf.mxu2  ;;  %1777 = vmatpush.msrb.mxu1 %v1753_v9  ;;  %v1732_v9 = vld [vmem:[#allocation16 + $0x150] sm:$0xff] }
 0x20f   : > { %v1290_v45 = vadd.f32 %v1289_v44, %v1220_v32  ;;  %1355 = vmatmul.f32.gmra.mxu0 %v1317_v43 }
 0x210   : > { %v1312_v46 = vpop.f32.mrf.mxu3 }
 0x211   : > { %v1313_v47 = vadd.f32 %v1312_v46, %v1290_v45 }
 0x213   : > { %v1318_v48 = vmul.f32 0.088388346, %v1313_v47 }
 0x215   : > { %1378 = vmatmul.f32.gmra.mxu1 %v1318_v48 }
 0x217   : > { %1525 = vmatmul.f32.vlgmr.msra.gmra.mxu0 %v1315_v33 }
 0x21d   : > { %1548 = vmatmul.f32.vlgmr.msra.gmra.mxu1 %v1316_v41 }
 0x21f   : > { %1528 = vmatmul.f32.gmra.mxu0 %v1317_v43 }
 0x225   : > { %1551 = vmatmul.f32.gmra.mxu1 %v1318_v48 }
 0x284   : > { %v1353_v49 = vpop.f32.mrf.mxu0 }
 0x285   : > { %v1383_v51 = vsel %vm1382_vm0, %v1353_v49, -inf }
 0x286   : > { %1384 = vmax.xlane.f32.xlu0 %v1383_v51 }
 0x28a   : > { %v1376_v52 = vpop.f32.mrf.mxu1 }
 0x28b   : > { %v1389_v53 = vsel %vm1382_vm0, %v1376_v52, -inf }
 0x28c   : > { %v1356_v54 = vpop.f32.mrf.mxu0 }
 0x28d   : > { %v1386_v55 = vsel %vm1382_vm0, %v1356_v54, -inf }
 0x28e   : > { %1390 = vmax.xlane.f32.xlu0 %v1389_v53  ;;  %1387 = vmax.xlane.f32.xlu1 %v1386_v55 }
 0x292   : > { %v1379_v56 = vpop.f32.mrf.mxu1 }
 0x293   : > { %v1392_v57 = vsel %vm1382_vm0, %v1379_v56, -inf }
 0x294   : > { %v1526_v58 = vpop.f32.mrf.mxu0 }
 0x295   : > { %v1555_v59 = vsel %vm1382_vm0, %v1526_v58, -inf }
 0x296   : > { %1556 = vmax.xlane.f32.xlu2 %v1555_v59  ;;  %1393 = vmax.xlane.f32.xlu1 %v1392_v57 }
 0x29a   : > { %v4085_v60 = vpop.f32.mrf.mxu1 }
 0x29b   : > { %v1561_v0 = vsel %vm1382_vm0, %v4085_v60, -inf }
 0x29c   : > { %v4087_v63 = vpop.f32.mrf.mxu0 }
 0x29d   : > { %v1558_v1 = vsel %vm1382_vm0, %v4087_v63, -inf }
 0x29e   : > { %1562 = vmax.xlane.f32.xlu2 %v1561_v0  ;;  %1559 = vmax.xlane.f32.xlu0 %v1558_v1  ;;  %v1720_v0 = vld [vmem:[#allocation16 + $0xf8] sm:$0xff]  ;;  %v1717_v1 = vld [vmem:[#allocation16 + $0xe0] sm:$0xff] }
 0x2a2   : > { %v4093_v2 = vpop.f32.mrf.mxu1 }
 0x2a3   : > { %v1564_v3 = vsel %vm1382_vm0, %v4093_v2, -inf }
 0x2a4   : > { %1565 = vmax.xlane.f32.xlu1 %v1564_v3  ;;  %v1715_v3 = vld [vmem:[#allocation16 + $0xd0] sm:$0xff] }
 0x2f9   : > { %v4097_v61 = vpop.xlane.xlu0 %1384 }
 0x2fa   : > { %v1407_v62 = vsub.f32 %v1353_v49, %v4097_v61  ;;  %v1395_v7 = vsub.f32 -inf, %v4097_v61 }
 0x2fc   : > { %v1411_v11 = vmul.f32 1.442695, %v1407_v62  ;;  %v1711_v62 = vld [vmem:[#allocation16 + $0xb0] sm:$0xff] }
 0x2fe   : > { %3136 = vpow2.f32 %v1411_v11  ;;  %v1399_v11 = vmul.f32 1.442695, %v1395_v7  ;;  %v1735_v7 = vld [vmem:[#allocation16 + $0x168] sm:$0xff] }
 0x301   : > { %v4100_v13 = vpop.xlane.xlu0 %1390  ;;  %v4102_v14 = vpop.xlane.xlu1 %1387 }
 0x302   : > { %v1409_v16 = vsub.f32 %v1376_v52, %v4100_v13  ;;  %v1408_v17 = vsub.f32 %v1356_v54, %v4102_v14 }
 0x304   : > { %v3137_v18 = vpop.eup %3136  ;;  %v1415_v21 = vmul.f32 1.442695, %v1409_v16  ;;  %v1413_v22 = vmul.f32 1.442695, %v1408_v17  ;;  %v1750_v16 = vld [vmem:[#allocation16 + $0x1e0] sm:$0xff]  ;;  %v1751_v17 = vld [vmem:[#allocation16 + $0x1e8] sm:$0xff] }
 0x305   : > { %2909 = vmatmul.msk.f32.vlgmr.msrb.gmra.mxu2 %vm1382_vm0, %v3137_v18  ;;  %v1423_v23 = vsel %vm1382_vm0, %v3137_v18, 0.0  ;;  %v1709_v18 = vld [vmem:[#allocation16 + $0xa0] sm:$0xff]  ;;  %1755 = vmatpush.msrb.mxu0 %v1750_v16 }
 0x306   : > { %3138 = vpow2.f32 %v1415_v21  ;;  %1424 = vadd.xlane.f32.xlu2 %v1423_v23  ;;  %1778 = vmatpush.msrb.mxu1 %v1751_v17  ;;  %v1710_v21 = vld [vmem:[#allocation16 + $0xa8] sm:$0xff]  ;;  %v1749_v23 = vld [vmem:[#allocation16 + $0x1d8] sm:$0xff]  ;;  %v1730_v16 = vld [vmem:[#allocation16 + $0x140] sm:$0xff] }
 0x307   : > { %3140 = vpow2.f32 %v1413_v22  ;;  %v1748_v22 = vld [vmem:[#allocation16 + $0x1d0] sm:$0xff]  ;;  %v1731_v17 = vld [vmem:[#allocation16 + $0x148] sm:$0xff] }
 0x308   : > { %1756 = vmatpush.msrb.mxu0 %v1748_v22  ;;  %1779 = vmatpush.msrb.mxu1 %v1749_v23  ;;  %v1690_v22 = vld [vmem:[#allocation16 + $0x8] sm:$0xff]  ;;  %v1728_v23 = vld [vmem:[#allocation16 + $0x130] sm:$0xff] }
 0x309   : > { %v1557_v24 = vpop.xlane.xlu2 %1556  ;;  %v4108_v25 = vpop.xlane.xlu1 %1393 }
 0x30a   : > { %v4111_v26 = vmax.f32 %v4097_v61, %v1557_v24  ;;  %v1410_v27 = vsub.f32 %v1379_v56, %v4108_v25  ;;  %v1707_v24 = vld [vmem:[#allocation16 + $0x90] sm:$0xff] }
 0x30c   : > { %v3139_v28 = vpop.eup %3138  ;;  %v1571_v29 = vsub.f32 %v4097_v61, %v4111_v26  ;;  %v1583_v30 = vsub.f32 %v1526_v58, %v4111_v26  ;;  %v1417_v31 = vmul.f32 1.442695, %v1410_v27  ;;  %v1397_v27 = vsub.f32 -inf, %v4100_v13  ;;  %v1740_v26 = vld [vmem:[#allocation16 + $0x190] sm:$0xff] }
 0x30d   : > { %v3141_v32 = vpop.eup %3140  ;;  %2911 = vmatmul.msk.f32.vlgmr.msrb.gmra.mxu3 %vm1382_vm0, %v3139_v28  ;;  %v1429_v33 = vsel %vm1382_vm0, %v3139_v28, 0.0  ;;  %v1708_v28 = vld [vmem:[#allocation16 + $0x98] sm:$0xff] }
 0x30e   : > { %v1587_v34 = vmul.f32 1.442695, %v1583_v30  ;;  %3142 = vpow2.f32 %v1417_v31  ;;  %2910 = vmatmul.msk.f32.gmra.mxu2 %vm1382_vm0, %v3141_v32  ;;  %1430 = vadd.xlane.f32.xlu1 %v1429_v33  ;;  %v1426_v35 = vsel %vm1382_vm0, %v3141_v32, 0.0  ;;  %v1746_v30 = vld [vmem:[#allocation16 + $0x1c0] sm:$0xff]  ;;  %v1747_v31 = vld [vmem:[#allocation16 + $0x1c8] sm:$0xff]  ;;  %v1396_v32 = vsub.f32 -inf, %v4102_v14 }
 0x30f   : > { %1427 = vadd.xlane.f32.xlu2 %v1426_v35  ;;  %1823 = vmatpush.msrb.mxu3 %v1720_v0  ;;  %v1705_v33 = vld [vmem:[#allocation16 + $0x80] sm:$0xff]  ;;  %v1575_v35 = vmul.f32 1.442695, %v1571_v29  ;;  %v1741_v29 = vld [vmem:[#allocation16 + $0x198] sm:$0xff]  ;;  %v1736_v0 = vld [vmem:[#allocation16 + $0x170] sm:$0xff] }
 0x310   : > { %3144 = vpow2.f32 %v1587_v34  ;;  %v1706_v34 = vld [vmem:[#allocation16 + $0x88] sm:$0xff]  ;;  %1757 = vmatpush.msrb.mxu0 %v1746_v30  ;;  %1780 = vmatpush.msrb.mxu1 %v1747_v31 }
 0x311   : > { %v1563_v36 = vpop.xlane.xlu2 %1562  ;;  %v1560_v37 = vpop.xlane.xlu0 %1559 }
 0x312   : > { %v4122_v38 = vmax.f32 %v4100_v13, %v1563_v36  ;;  %v4125_v39 = vmax.f32 %v4102_v14, %v1560_v37  ;;  %v1744_v36 = vld [vmem:[#allocation16 + $0x1b0] sm:$0xff]  ;;  %v1745_v37 = vld [vmem:[#allocation16 + $0x1b8] sm:$0xff] }
 0x313   : > { %1758 = vmatpush.msrb.mxu0 %v1744_v36  ;;  %1781 = vmatpush.msrb.mxu1 %v1745_v37  ;;  %v1726_v37 = vld [vmem:[#allocation16 + $0x120] sm:$0xff] }
 0x314   : > { %v3143_v40 = vpop.eup %3142  ;;  %v1573_v41 = vsub.f32 %v4100_v13, %v4122_v38  ;;  %v1585_v42 = vsub.f32 %v4085_v60, %v4122_v38  ;;  %v1572_v43 = vsub.f32 %v4102_v14, %v4125_v39  ;;  %v1584_v44 = vsub.f32 %v4087_v63, %v4125_v39  ;;  %v1719_v63 = vld [vmem:[#allocation16 + $0xf0] sm:$0xff]  ;;  %v1693_v14 = vld [vmem:[#allocation16 + $0x20] sm:$0xff] }
 0x315   : > { %2912 = vmatmul.msk.f32.gmra.mxu3 %vm1382_vm0, %v3143_v40  ;;  %v1432_v45 = vsel %vm1382_vm0, %v3143_v40, 0.0  ;;  %1800 = vmatpush.msrb.mxu2 %v1719_v63  ;;  %v1703_v40 = vld [vmem:[#allocation16 + $0x70] sm:$0xff]  ;;  %v1698_v63 = vld [vmem:[#allocation16 + $0x48] sm:$0xff] }
 0x316   : > { %v1591_v46 = vmul.f32 1.442695, %v1585_v42  ;;  %v3145_v47 = vpop.eup %3144  ;;  %v1589_v48 = vmul.f32 1.442695, %v1584_v44  ;;  %v1403_v42 = vmul.f32 1.442695, %v1397_v27 }
 0x317   : > { %1433 = vadd.xlane.f32.xlu2 %v1432_v45  ;;  %v1566_v49 = vpop.xlane.xlu1 %1565  ;;  %2913 = vmatmul.msk.f32.vlgmr.msra.gmra.mxu2 %vm1382_vm0, %v3145_v47  ;;  %v1599_v51 = vsel %vm1382_vm0, %v3145_v47, 0.0  ;;  %v1704_v44 = vld [vmem:[#allocation16 + $0x78] sm:$0xff]  ;;  %v1742_v45 = vld [vmem:[#allocation16 + $0x1a0] sm:$0xff]  ;;  %v1401_v47 = vmul.f32 1.442695, %v1396_v32 }
 0x318   : > { %v4139_v50 = vmax.f32 %v4108_v25, %v1566_v49  ;;  %3146 = vpow2.f32 %v1591_v46  ;;  %1600 = vadd.xlane.f32.xlu0 %v1599_v51  ;;  %1801 = vmatpush.msrb.mxu2 %v1717_v1  ;;  %v1743_v46 = vld [vmem:[#allocation16 + $0x1a8] sm:$0xff]  ;;  %v1699_v51 = vld [vmem:[#allocation16 + $0x50] sm:$0xff]  ;;  %v1737_v1 = vld [vmem:[#allocation16 + $0x178] sm:$0xff] }
 0x319   : > { %3148 = vpow2.f32 %v1589_v48  ;;  %v1701_v48 = vld [vmem:[#allocation16 + $0x60] sm:$0xff]  ;;  %v1702_v49 = vld [vmem:[#allocation16 + $0x68] sm:$0xff]  ;;  %1759 = vmatpush.msrb.mxu0 %v1742_v45  ;;  %1782 = vmatpush.msrb.mxu1 %v1743_v46  ;;  %v1724_v45 = vld [vmem:[#allocation16 + $0x110] sm:$0xff] }
 0x31a   : > { %v1574_v52 = vsub.f32 %v4108_v25, %v4139_v50  ;;  %v1586_v53 = vsub.f32 %v4093_v2, %v4139_v50  ;;  %v1718_v2 = vld [vmem:[#allocation16 + $0xe8] sm:$0xff]  ;;  %1802 = vmatpush.msrb.mxu2 %v1715_v3  ;;  %v1722_v50 = vld [vmem:[#allocation16 + $0x100] sm:$0xff] }
 0x31b   : > { %1824 = vmatpush.msrb.mxu3 %v1718_v2  ;;  %1760 = vmatpush.msrb.mxu0 %v1740_v26  ;;  %v1577_v2 = vmul.f32 1.442695, %v1572_v43  ;;  %v1694_v43 = vld [vmem:[#allocation16 + $0x28] sm:$0xff] }
 0x31c   : > { %v1593_v54 = vmul.f32 1.442695, %v1586_v53  ;;  %1803 = vmatpush.msrb.mxu2 %v1713_v5  ;;  %1783 = vmatpush.msrb.mxu1 %v1741_v29  ;;  %v1700_v53 = vld [vmem:[#allocation16 + $0x58] sm:$0xff]  ;;  %v1581_v30 = vmul.f32 1.442695, %v1574_v52  ;;  %v1723_v52 = vld [vmem:[#allocation16 + $0x108] sm:$0xff] }
 0x31d   : > { %1825 = vmatpush.msrb.mxu3 %v1716_v4  ;;  %v1695_v4 = vld [vmem:[#allocation16 + $0x30] sm:$0xff]  ;;  %v1696_v5 = vld [vmem:[#allocation16 + $0x38] sm:$0xff] }
 0x31e   : > { %v3147_v55 = vpop.eup %3146  ;;  %3150 = vpow2.f32 %v1593_v54  ;;  %1804 = vmatpush.msrb.mxu2 %v1711_v62  ;;  %v1733_v62 = vld [vmem:[#allocation16 + $0x158] sm:$0xff] }
 0x31f   : > { %2915 = vmatmul.msk.f32.vlgmr.msra.gmra.mxu3 %vm1382_vm0, %v3147_v55  ;;  %v1605_v56 = vsel %vm1382_vm0, %v3147_v55, 0.0  ;;  %v3149_v57 = vpop.eup %3148  ;;  %3152 = vpow2.f32 %v1399_v11  ;;  %v1398_v55 = vsub.f32 -inf, %v4108_v25  ;;  %v1692_v11 = vld [vmem:[#allocation16 + $0x18] sm:$0xff] }
 0x320   : > { %1606 = vadd.xlane.f32.xlu0 %v1605_v56  ;;  %2914 = vmatmul.msk.f32.gmra.mxu2 %vm1382_vm0, %v3149_v57  ;;  %v1602_v58 = vsel %vm1382_vm0, %v3149_v57, 0.0  ;;  %3154 = vpow2.f32 %v1575_v35  ;;  %v1738_v56 = vld [vmem:[#allocation16 + $0x180] sm:$0xff]  ;;  %v1739_v57 = vld [vmem:[#allocation16 + $0x188] sm:$0xff]  ;;  %v1725_v25 = vld [vmem:[#allocation16 + $0x118] sm:$0xff] }
 0x321   : > { %1603 = vadd.xlane.f32.xlu1 %v1602_v58  ;;  %1826 = vmatpush.msrb.mxu3 %v1714_v6  ;;  %3156 = vpow2.f32 %v1403_v42  ;;  %v1697_v58 = vld [vmem:[#allocation16 + $0x40] sm:$0xff]  ;;  %v1405_v13 = vmul.f32 1.442695, %v1398_v55 }
 0x322   : > { %1805 = vmatpush.msrb.mxu2 %v1709_v18  ;;  %3158 = vpow2.f32 %v1401_v47  ;;  %1761 = vmatpush.msrb.mxu0 %v1738_v56 }
 0x323   : > { %1827 = vmatpush.msrb.mxu3 %v1712_v10  ;;  %1784 = vmatpush.msrb.mxu1 %v1739_v57  ;;  %v1691_v10 = vld [vmem:[#allocation16 + $0x10] sm:$0xff] }
 0x324   : > { %v3151_v59 = vpop.eup %3150  ;;  %1806 = vmatpush.msrb.mxu2 %v1707_v24  ;;  %1762 = vmatpush.msrb.mxu0 %v1736_v0 }
 0x325   : > { %v1608_v60 = vsel %vm1382_vm0, %v3151_v59, 0.0  ;;  %1828 = vmatpush.msrb.mxu3 %v1710_v21  ;;  %v3153_v61 = vpop.eup %3152  ;;  %1785 = vmatpush.msrb.mxu1 %v1737_v1  ;;  %v1689_v21 = vld [vmem:[#allocation16] sm:$0xff] }
 0x326   : > { %1807 = vmatpush.msrb.mxu2 %v1705_v33  ;;  %v4158_v54 = vmul.f32 0.0, %v3153_v61  ;;  %v4168_v6 = vpop.eup %3154 }
 0x327   : > { %2916 = vmatmul.msk.f32.gmra.mxu3 %vm1382_vm0, %v3151_v59  ;;  %v1579_v59 = vmul.f32 1.442695, %v1573_v41  ;;  %v1734_v41 = vld [vmem:[#allocation16 + $0x160] sm:$0xff]  ;;  %v3157_v39 = vpop.eup %3156  ;;  %1786 = vmatpush.msrb.mxu1 %v1735_v7 }
 0x328   : > { %1609 = vadd.xlane.f32.xlu0 %v1608_v60  ;;  %1829 = vmatpush.msrb.mxu3 %v1708_v28  ;;  %v3159_v8 = vpop.eup %3158  ;;  %v1421_v18 = vmul.f32 0.0, %v3157_v39  ;;  %v1729_v28 = vld [vmem:[#allocation16 + $0x138] sm:$0xff] }
 0x329   : > { %1808 = vmatpush.msrb.mxu2 %v1703_v40  ;;  %3160 = vpow2.f32 %v1579_v59  ;;  %1763 = vmatpush.msrb.mxu0 %v1734_v41  ;;  %v1420_v24 = vmul.f32 0.0, %v3159_v8  ;;  %v1727_v40 = vld [vmem:[#allocation16 + $0x128] sm:$0xff] }
 0x32a   : > { %1830 = vmatpush.msrb.mxu3 %v1706_v34  ;;  %3162 = vpow2.f32 %v1577_v2  ;;  %1787 = vmatpush.msrb.mxu1 %v1733_v62 }
 0x32b   : > { %1809 = vmatpush.msrb.mxu2 %v1701_v48  ;;  %1764 = vmatpush.msrb.mxu0 %v1732_v9  ;;  %3164 = vpow2.f32 %v1405_v13 }
 0x32c   : > { %1831 = vmatpush.msrb.mxu3 %v1704_v44  ;;  %1788 = vmatpush.msrb.mxu1 %v1731_v17  ;;  %3166 = vpow2.f32 %v1581_v30 }
 0x32d   : > { %1810 = vmatpush.msrb.mxu2 %v1699_v51  ;;  %1765 = vmatpush.msrb.mxu0 %v1730_v16 }
 0x32e   : > { %1832 = vmatpush.msrb.mxu3 %v1702_v49  ;;  %1789 = vmatpush.msrb.mxu1 %v1729_v28 }
 0x32f   : > { %1811 = vmatpush.msrb.mxu2 %v1697_v58  ;;  %v3161_v33 = vpop.eup %3160  ;;  %1766 = vmatpush.msrb.mxu0 %v1728_v23  ;;  %v1846_v23 = vld [vmem:[#allocation17] sm:$0x3] }
 0x330   : > { %1833 = vmatpush.msrb.mxu3 %v1700_v53  ;;  %v3163_v35 = vpop.eup %3162  ;;  %1790 = vmatpush.msrb.mxu1 %v1727_v40  ;;  %v1848_v28 = vperm.slane %v1846_v23, 0  ;;  %v1849_v30 = vperm.slane %v1846_v23, 1 }
 0x331   : > { %1812 = vmatpush.msrb.mxu2 %v1695_v4  ;;  %1767 = vmatpush.msrb.mxu0 %v1726_v37  ;;  %v3165_v44 = vpop.eup %3164 }
 0x332   : > { %1834 = vmatpush.msrb.mxu3 %v1698_v63  ;;  %1791 = vmatpush.msrb.mxu1 %v1725_v25  ;;  %v1422_v48 = vmul.f32 0.0, %v3165_v44  ;;  %v3167_v29 = vpop.eup %3166 }
 0x333   : > { %1813 = vmatpush.msrb.mxu2 %v1693_v14  ;;  %1768 = vmatpush.msrb.mxu0 %v1724_v45 }
 0x334   : > { %1835 = vmatpush.msrb.mxu3 %v1696_v5  ;;  %1792 = vmatpush.msrb.mxu1 %v1723_v52 }
 0x335   : > { %1814 = vmatpush.msrb.mxu2 %v1691_v10  ;;  %1769 = vmatpush.msrb.mxu0 %v1722_v50 }
 0x336   : > { %1836 = vmatpush.msrb.mxu3 %v1694_v43 }
 0x337   : > { %1815 = vmatpush.msrb.mxu2 %v1689_v21 }
 0x338   : > { %1837 = vmatpush.msrb.mxu3 %v1692_v11 }
 0x33a   : > { %1838 = vmatpush.msrb.mxu3 %v1690_v22 }
 0x379   : > { %v1425_v60 = vpop.xlane.xlu2 %1424 }
 0x37a   : > { %v1435_v3 = vadd.f32 %v1425_v60, %v4158_v54 }
 0x37c   : > { %v4171_v38 = vmul.f32 %v4168_v6, %v1435_v3 }
 0x381   : > { %v1431_v27 = vpop.xlane.xlu1 %1430 }
 0x382   : > { %v1428_v31 = vpop.xlane.xlu2 %1427  ;;  %v1437_v32 = vadd.f32 %v1431_v27, %v1421_v18 }
 0x383   : > { %v1436_v34 = vadd.f32 %v1428_v31, %v1420_v24 }
 0x384   : > { %v1597_v36 = vmul.f32 %v3161_v33, %v1437_v32 }
 0x385   : > { %v1596_v42 = vmul.f32 %v3163_v35, %v1436_v34 }
 0x388   : > { %v1462_v46 = vpop.f32.mrf.mxu2 }
 0x389   : > { %v1497_v47 = vadd.f32 %v1462_v46, %v4158_v54 }
 0x38a   : > { %v1434_v49 = vpop.xlane.xlu2 %1433 }
 0x38b   : > { %v1438_v61 = vadd.f32 %v1434_v49, %v1422_v48  ;;  %v1615_v26 = vmul.f32 %v4168_v6, %v1497_v47  ;;  %v1601_v51 = vpop.xlane.xlu0 %1600 }
 0x38c   : > { %v1611_v59 = vadd.f32 %v1601_v51, %v4171_v38 }
 0x38d   : > { %v1598_v53 = vmul.f32 %v3167_v29, %v1438_v61  ;;  %v3672_v61 = vmov 256.0  }
 0x38e   : > { %3168 = vrcp.f32 %v1611_v59  ;;  %v1998_v59 = vld [vmem:[#allocation20 + $0x1e8] sm:$0xff] }
 0x390   : > { %v1491_v55 = vpop.f32.mrf.mxu3 }
 0x391   : > { %v1465_v56 = vpop.f32.mrf.mxu2  ;;  %v1499_v57 = vadd.f32 %v1491_v55, %v1421_v18  ;;  %v1999_v55 = vld [vmem:[#allocation20 + $0x1f0] sm:$0xff] }
 0x392   : > { %v1498_v58 = vadd.f32 %v1465_v56, %v1420_v24  ;;  %v1968_v56 = vld [vmem:[#allocation20 + $0xf8] sm:$0xff]  ;;  %2030 = vmatpush.msra.mxu1 %v1999_v55  ;;  %v1943_v55 = vld [vmem:[#allocation20 + $0x30] sm:$0xff] }
 0x393   : > { %v1617_v60 = vmul.f32 %v3161_v33, %v1499_v57  ;;  %v1607_v0 = vpop.xlane.xlu0 %1606  ;;  %v2000_v57 = vld [vmem:[#allocation20 + $0x1f8] sm:$0xff]  ;;  %2053 = vmatpush.msra.mxu2 %v1968_v56  ;;  %v1975_v56 = vld [vmem:[#allocation20 + $0x130] sm:$0xff] }
 0x394   : > { %v1616_v63 = vmul.f32 %v3163_v35, %v1498_v58  ;;  %v1604_v2 = vpop.xlane.xlu1 %1603  ;;  %v1613_v3 = vadd.f32 %v1607_v0, %v1597_v36  ;;  %v3169_v13 = vpop.eup %3168  ;;  %v1997_v58 = vld [vmem:[#allocation20 + $0x1e0] sm:$0xff]  ;;  %2076 = vmatpush.msra.mxu3 %v2000_v57  ;;  %v1964_v0 = vld [vmem:[#allocation20 + $0xd8] sm:$0xff] }
 0x395   : > { %v1612_v41 = vadd.f32 %v1604_v2, %v1596_v42  ;;  %2031 = vmatpush.msra.mxu1 %v1997_v58  ;;  %v1961_v2 = vld [vmem:[#allocation20 + $0xc0] sm:$0xff]  ;;  %v1944_v57 = vld [vmem:[#allocation20 + $0x38] sm:$0xff] }
 0x396   : > { %3170 = vrcp.f32 %v1613_v3  ;;  %2077 = vmatpush.msra.mxu3 %v1998_v59  ;;  %v1993_v3 = vld [vmem:[#allocation20 + $0x1c0] sm:$0xff]  ;;  %v1942_v59 = vld [vmem:[#allocation20 + $0x28] sm:$0xff] }
 0x397   : > { %3172 = vrcp.f32 %v1612_v41  ;;  %v1960_v41 = vld [vmem:[#allocation20 + $0xb8] sm:$0xff]  ;;  %v1941_v58 = vld [vmem:[#allocation20 + $0x20] sm:$0xff] }
 0x398   : > { %v1494_v54 = vpop.f32.mrf.mxu3 }
 0x399   : > { %v1500_v1 = vadd.f32 %v1494_v54, %v1422_v48  ;;  %v1996_v54 = vld [vmem:[#allocation20 + $0x1d8] sm:$0xff] }
 0x39a   : > { %v1642_v4 = vpop.f32.mrf.mxu2  ;;  %2078 = vmatpush.msra.mxu3 %v1996_v54  ;;  %v1940_v54 = vld [vmem:[#allocation20 + $0x18] sm:$0xff] }
 0x39b   : > { %v1618_v5 = vmul.f32 %v3167_v29, %v1500_v1  ;;  %v1677_v6 = vadd.f32 %v1642_v4, %v1615_v26  ;;  %v1610_v14 = vpop.xlane.xlu0 %1609  ;;  %v1962_v4 = vld [vmem:[#allocation20 + $0xc8] sm:$0xff] }
 0x39c   : > { %v1614_v38 = vadd.f32 %v1610_v14, %v1598_v53  ;;  %v3171_v8 = vpop.eup %3170  ;;  %v1967_v53 = vld [vmem:[#allocation20 + $0xf0] sm:$0xff] }
 0x39d   : > { %v1685_v7 = vmul.f32 %v3169_v13, %v1677_v6  ;;  %v3173_v11 = vpop.eup %3172  ;;  %2007 = vmatpush.msra.mxu0 %v1967_v53  ;;  %v1959_v6 = vld [vmem:[#allocation20 + $0xb0] sm:$0xff]  ;;  %v1978_v53 = vld [vmem:[#allocation20 + $0x148] sm:$0xff] }
 0x39e   : > { %3174 = vrcp.f32 %v1614_v38  ;;  %v1991_v13 = vld [vmem:[#allocation20 + $0x1b0] sm:$0xff]  ;;  %v1957_v38 = vld [vmem:[#allocation20 + $0xa0] sm:$0xff] }
 0x39f   : > { %1816 = vmatmul.f32.vlgmr.msrb.gmra.mxu2 %v1685_v7  ;;  %1839 = vmatmul.f32.vlgmr.msrb.gmra.mxu3 %v1685_v7  ;;  %3176 = vrcp.f32 %v3672_v61  ;;  %v1992_v7 = vld [vmem:[#allocation20 + $0x1b8] sm:$0xff] }
 0x3a0   : > { %v1980_v61 = vld [vmem:[#allocation20 + $0x158] sm:$0xff] }
 0x3a2   : > { %v1671_v39 = vpop.f32.mrf.mxu3 }
 0x3a3   : > { %v1679_v43 = vadd.f32 %v1671_v39, %v1617_v60  ;;  %v1645_v9 = vpop.f32.mrf.mxu2  ;;  %v1963_v60 = vld [vmem:[#allocation20 + $0xd0] sm:$0xff]  ;;  %v1989_v39 = vld [vmem:[#allocation20 + $0x1a0] sm:$0xff] }
 0x3a4   : > { %v1678_v62 = vadd.f32 %v1645_v9, %v1616_v63  ;;  %v3175_v21 = vpop.eup %3174  ;;  %v1995_v63 = vld [vmem:[#allocation20 + $0x1d0] sm:$0xff] }
 0x3a5   : > { %v1687_v10 = vmul.f32 %v3171_v8, %v1679_v43  ;;  %v3177_v26 = vpop.eup %3176  ;;  %2032 = vmatpush.msra.mxu1 %v1995_v63  ;;  %v1958_v43 = vld [vmem:[#allocation20 + $0xa8] sm:$0xff]  ;;  %v1955_v9 = vld [vmem:[#allocation20 + $0x90] sm:$0xff] }
 0x3a6   : > { %v1686_v16 = vmul.f32 %v3173_v11, %v1678_v62  ;;  %v1869_v29 = vmul.f32 256.0, %v3177_v26  ;;  %vm1873_vm1 = vweird.f32 %v3177_v26  ;;  %v1990_v8 = vld [vmem:[#allocation20 + $0x1a8] sm:$0xff]  ;;  %v1987_v62 = vld [vmem:[#allocation20 + $0x190] sm:$0xff]  ;;  %v1988_v11 = vld [vmem:[#allocation20 + $0x198] sm:$0xff] }
 0x3a7   : > { %1770 = vmatmul.f32.vlgmr.msrb.gmra.mxu0 %v1687_v10  ;;  %1793 = vmatmul.f32.vlgmr.msrb.gmra.mxu1 %v1687_v10  ;;  %v1956_v10 = vld [vmem:[#allocation20 + $0x98] sm:$0xff]  ;;  %v1939_v63 = vld [vmem:[#allocation20 + $0x10] sm:$0xff] }
 0x3a8   : > { %1819 = vmatmul.f32.gmra.mxu2 %v1686_v16  ;;  %1842 = vmatmul.f32.gmra.mxu3 %v1686_v16  ;;  %v1870_v51 = vsub.f32 1.0, %v1869_v29  ;;  %v1977_v29 = vld [vmem:[#allocation20 + $0x140] sm:$0xff] }
 0x3a9   : > { %2033 = vmatpush.msra.mxu1 %v1993_v3  ;;  %v1969_v3 = vld [vmem:[#allocation20 + $0x100] sm:$0xff] }
 0x3aa   : > { %v1674_v17 = vpop.f32.mrf.mxu3  ;;  %v1871_v1 = vmul.f32 %v3177_v26, %v1870_v51  ;;  %v1946_v51 = vld [vmem:[#allocation20 + $0x48] sm:$0xff] }
 0x3ab   : > { %v1680_v18 = vadd.f32 %v1674_v17, %v1618_v5  ;;  %v1994_v5 = vld [vmem:[#allocation20 + $0x1c8] sm:$0xff]  ;;  %2034 = vmatpush.msra.mxu1 %v1991_v13  ;;  %v1953_v17 = vld [vmem:[#allocation20 + $0x80] sm:$0xff]  ;;  %v2230_v13 = vld [vmem:[#allocation20 + $0x3f0] sm:$0xff] }
 0x3ac   : > { %v1872_v14 = vadd.f32 %v3177_v26, %v1871_v1  ;;  %2079 = vmatpush.msra.mxu3 %v1994_v5  ;;  %v1972_v1 = vld [vmem:[#allocation20 + $0x118] sm:$0xff]  ;;  %v1970_v5 = vld [vmem:[#allocation20 + $0x108] sm:$0xff] }
 0x3ad   : > { %v1688_v22 = vmul.f32 %v3175_v21, %v1680_v18  ;;  %2035 = vmatpush.msra.mxu1 %v1989_v39  ;;  %v1985_v18 = vld [vmem:[#allocation20 + $0x180] sm:$0xff]  ;;  %v1954_v21 = vld [vmem:[#allocation20 + $0x88] sm:$0xff] }
 0x3ae   : > { %2080 = vmatpush.msra.mxu3 %v1992_v7  ;;  %v4195_v16 = vsel %vm1873_vm1, %v3177_v26, %v1872_v14  ;;  %v1945_v26 = vld [vmem:[#allocation20 + $0x40] sm:$0xff]  ;;  %v2231_v7 = vld [vmem:[#allocation20 + $0x3f8] sm:$0xff]  ;;  %v2197_v39 = vld [vmem:[#allocation20 + $0x2e8] sm:$0xff] }
 0x3af   : > { %1773 = vmatmul.f32.gmra.mxu0 %v1688_v22  ;;  %1796 = vmatmul.f32.gmra.mxu1 %v1688_v22  ;;  %v1986_v22 = vld [vmem:[#allocation20 + $0x188] sm:$0xff]  ;;  %v2196_v14 = vld [vmem:[#allocation20 + $0x2e0] sm:$0xff] }
 0x3b0   : > { %2081 = vmatpush.msra.mxu3 %v1990_v8  ;;  %2036 = vmatpush.msra.mxu1 %v1987_v62  ;;  %v2194_v8 = vld [vmem:[#allocation20 + $0x2d0] sm:$0xff]  ;;  %v2195_v62 = vld [vmem:[#allocation20 + $0x2d8] sm:$0xff] }
 0x3b2   : > { %2082 = vmatpush.msra.mxu3 %v1988_v11  ;;  %2037 = vmatpush.msra.mxu1 %v1985_v18  ;;  %v2192_v11 = vld [vmem:[#allocation20 + $0x2c0] sm:$0xff]  ;;  %v2193_v18 = vld [vmem:[#allocation20 + $0x2c8] sm:$0xff] }
 0x3b4   : > { %2083 = vmatpush.msra.mxu3 %v1986_v22  ;;  %v2190_v22 = vld [vmem:[#allocation20 + $0x2b0] sm:$0xff] }
 0x422   : > { %v1817_v24 = vpop.f32.mrf.mxu2  ;;  %v1840_v27 = vpop.f32.mrf.mxu3 }
 0x424   : > { %v1771_v31 = vpop.f32.mrf.mxu0  ;;  %v1794_v32 = vpop.f32.mrf.mxu1 }
 0x425   : > { %v1818_v33 = vadd.f32 %v1817_v24, %v1771_v31  ;;  %v1841_v34 = vadd.f32 %v1840_v27, %v1794_v32  ;;  %v1951_v24 = vld [vmem:[#allocation20 + $0x70] sm:$0xff]  ;;  %v1984_v31 = vld [vmem:[#allocation20 + $0x178] sm:$0xff] }
 0x426   : > { %v1983_v27 = vld [vmem:[#allocation20 + $0x170] sm:$0xff]  ;;  %2084 = vmatpush.msra.mxu3 %v1984_v31  ;;  %v2189_v31 = vld [vmem:[#allocation20 + $0x2a8] sm:$0xff] }
 0x427   : > { %v1852_v35 = vadd.f32 %v1848_v28, %v1818_v33  ;;  %v1853_v36 = vadd.f32 %v1849_v30, %v1841_v34  ;;  %2038 = vmatpush.msra.mxu1 %v1983_v27  ;;  %v2223_v27 = vld [vmem:[#allocation20 + $0x3b8] sm:$0xff] }
 0x429   : > { %v4180_v37 = vadd.f32 %v1852_v35, %v4061_v12  ;;  %v4183_v40 = vadd.f32 %v1853_v36, %v4064_v15 }
 0x42b   : > { %v1862_v42 = vadd.f32 %v4183_v40, %v4180_v37  ;;  %v1820_v44 = vpop.f32.mrf.mxu2  ;;  %v1843_v45 = vpop.f32.mrf.mxu3 }
 0x42c   : > { %v1774_v25 = vpop.f32.mrf.mxu0  ;;  %v1797_v50 = vpop.f32.mrf.mxu1 }
 0x42d   : > { %1863 = vadd.xlane.f32.xlu1 %v1862_v42  ;;  %v1821_v52 = vadd.f32 %v1820_v44, %v1774_v25  ;;  %v1844_v46 = vadd.f32 %v1843_v45, %v1797_v50 }
 0x42f   : > { %v1854_v47 = vadd.f32 %v1848_v28, %v1821_v52  ;;  %v1855_v48 = vadd.f32 %v1849_v30, %v1844_v46  ;;  %v1952_v30 = vld [vmem:[#allocation20 + $0x78] sm:$0xff]  ;;  %v1949_v52 = vld [vmem:[#allocation20 + $0x60] sm:$0xff] }
 0x430   : > { %v1981_v46 = vld [vmem:[#allocation20 + $0x160] sm:$0xff] }
 0x431   : > { %v4188_v49 = vadd.f32 %v1854_v47, %v4071_v19  ;;  %v4191_v12 = vadd.f32 %v1855_v48, %v4074_v20  ;;  %v1965_v19 = vld [vmem:[#allocation20 + $0xe0] sm:$0xff]  ;;  %v1966_v20 = vld [vmem:[#allocation20 + $0xe8] sm:$0xff]  ;;  %2039 = vmatpush.msra.mxu1 %v1981_v46  ;;  %v2182_v46 = vld [vmem:[#allocation20 + $0x270] sm:$0xff] }
 0x432   : > { %2008 = vmatpush.msra.mxu0 %v1965_v19  ;;  %2054 = vmatpush.msra.mxu2 %v1966_v20  ;;  %v1950_v47 = vld [vmem:[#allocation20 + $0x68] sm:$0xff]  ;;  %v1976_v19 = vld [vmem:[#allocation20 + $0x138] sm:$0xff]  ;;  %v1973_v20 = vld [vmem:[#allocation20 + $0x120] sm:$0xff] }
 0x433   : > { %v1865_v15 = vadd.f32 %v4191_v12, %v4188_v49  ;;  %v1982_v48 = vld [vmem:[#allocation20 + $0x168] sm:$0xff] }
 0x434   : > { %2009 = vmatpush.msra.mxu0 %v1963_v60  ;;  %2055 = vmatpush.msra.mxu2 %v1964_v0  ;;  %v1974_v60 = vld [vmem:[#allocation20 + $0x128] sm:$0xff]  ;;  %v1971_v0 = vld [vmem:[#allocation20 + $0x110] sm:$0xff] }
 0x435   : > { %1866 = vadd.xlane.f32.xlu2 %v1865_v15  ;;  %2085 = vmatpush.msra.mxu3 %v1982_v48  ;;  %v1979_v15 = vld [vmem:[#allocation20 + $0x150] sm:$0xff]  ;;  %v2183_v48 = vld [vmem:[#allocation20 + $0x278] sm:$0xff] }
 0x436   : > { %2010 = vmatpush.msra.mxu0 %v1961_v2  ;;  %2056 = vmatpush.msra.mxu2 %v1962_v4  ;;  %v1937_v2 = vld [vmem:[#allocation20] sm:$0xff]  ;;  %v1938_v4 = vld [vmem:[#allocation20 + $0x8] sm:$0xff] }
 0x437   : > { %2040 = vmatpush.msra.mxu1 %v1979_v15  ;;  %2086 = vmatpush.msra.mxu3 %v1980_v61  ;;  %v2215_v15 = vld [vmem:[#allocation20 + $0x378] sm:$0xff]  ;;  %v2180_v61 = vld [vmem:[#allocation20 + $0x260] sm:$0xff] }
 0x438   : > { %2011 = vmatpush.msra.mxu0 %v1959_v6  ;;  %2057 = vmatpush.msra.mxu2 %v1960_v41  ;;  %v2198_v6 = vld [vmem:[#allocation20 + $0x2f0] sm:$0xff]  ;;  %v2199_v41 = vld [vmem:[#allocation20 + $0x2f8] sm:$0xff] }
 0x439   : > { %2041 = vmatpush.msra.mxu1 %v1977_v29  ;;  %2087 = vmatpush.msra.mxu3 %v1978_v53  ;;  %v2181_v29 = vld [vmem:[#allocation20 + $0x268] sm:$0xff]  ;;  %v2178_v53 = vld [vmem:[#allocation20 + $0x250] sm:$0xff] }
 0x43a   : > { %2012 = vmatpush.msra.mxu0 %v1957_v38  ;;  %2058 = vmatpush.msra.mxu2 %v1958_v43  ;;  %v2228_v38 = vld [vmem:[#allocation20 + $0x3e0] sm:$0xff]  ;;  %v2229_v43 = vld [vmem:[#allocation20 + $0x3e8] sm:$0xff] }
 0x43b   : > { %2042 = vmatpush.msra.mxu1 %v1975_v56  ;;  %2088 = vmatpush.msra.mxu3 %v1976_v19  ;;  %v2211_v19 = vld [vmem:[#allocation20 + $0x358] sm:$0xff] }
 0x43c   : > { %2013 = vmatpush.msra.mxu0 %v1955_v9  ;;  %2059 = vmatpush.msra.mxu2 %v1956_v10  ;;  %v2226_v9 = vld [vmem:[#allocation20 + $0x3d0] sm:$0xff]  ;;  %v2227_v10 = vld [vmem:[#allocation20 + $0x3d8] sm:$0xff] }
 0x43d   : > { %2043 = vmatpush.msra.mxu1 %v1973_v20  ;;  %2089 = vmatpush.msra.mxu3 %v1974_v60  ;;  %v2208_v20 = vld [vmem:[#allocation20 + $0x340] sm:$0xff]  ;;  %v2209_v60 = vld [vmem:[#allocation20 + $0x348] sm:$0xff] }
 0x43e   : > { %2014 = vmatpush.msra.mxu0 %v1953_v17  ;;  %2060 = vmatpush.msra.mxu2 %v1954_v21  ;;  %v2224_v17 = vld [vmem:[#allocation20 + $0x3c0] sm:$0xff]  ;;  %v2225_v21 = vld [vmem:[#allocation20 + $0x3c8] sm:$0xff] }
 0x43f   : > { %2044 = vmatpush.msra.mxu1 %v1971_v0  ;;  %2090 = vmatpush.msra.mxu3 %v1972_v1  ;;  %v2206_v0 = vld [vmem:[#allocation20 + $0x330] sm:$0xff]  ;;  %v2207_v1 = vld [vmem:[#allocation20 + $0x338] sm:$0xff] }
 0x440   : > { %2015 = vmatpush.msra.mxu0 %v1951_v24  ;;  %2061 = vmatpush.msra.mxu2 %v1952_v30  ;;  %v2191_v24 = vld [vmem:[#allocation20 + $0x2b8] sm:$0xff]  ;;  %v2220_v30 = vld [vmem:[#allocation20 + $0x3a0] sm:$0xff] }
 0x441   : > { %2045 = vmatpush.msra.mxu1 %v1969_v3  ;;  %2091 = vmatpush.msra.mxu3 %v1970_v5  ;;  %v2204_v3 = vld [vmem:[#allocation20 + $0x320] sm:$0xff]  ;;  %v2173_v5 = vld [vmem:[#allocation20 + $0x228] sm:$0xff] }
 0x442   : > { %2016 = vmatpush.msra.mxu0 %v1949_v52  ;;  %2062 = vmatpush.msra.mxu2 %v1950_v47  ;;  %v2217_v52 = vld [vmem:[#allocation20 + $0x388] sm:$0xff]  ;;  %v2214_v47 = vld [vmem:[#allocation20 + $0x370] sm:$0xff] }
 0x443   : > { %2262 = vmatpush.msrb.mxu1 %v2230_v13  ;;  %2308 = vmatpush.msrb.mxu3 %v2231_v7  ;;  %v2202_v7 = vld [vmem:[#allocation20 + $0x310] sm:$0xff] }
 0x445   : > { %2263 = vmatpush.msrb.mxu1 %v2228_v38  ;;  %2309 = vmatpush.msrb.mxu3 %v2229_v43  ;;  %v2171_v38 = vld [vmem:[#allocation20 + $0x218] sm:$0xff] }
 0x447   : > { %2264 = vmatpush.msrb.mxu1 %v2226_v9  ;;  %2310 = vmatpush.msrb.mxu3 %v2227_v10  ;;  %v2168_v9 = vld [vmem:[#allocation20 + $0x200] sm:$0xff]  ;;  %v2169_v10 = vld [vmem:[#allocation20 + $0x208] sm:$0xff] }
 0x449   : > { %2265 = vmatpush.msrb.mxu1 %v2224_v17  ;;  %2311 = vmatpush.msrb.mxu3 %v2225_v21  ;;  %v1860_v21 = vld [vmem:[%s4429_s20] sm:$0x3]  ;;  %s4434_s20 = sld [smem:[#allocation51_spill]] }
 0x44b   : > { %2312 = vmatpush.msrb.mxu3 %v2223_v27 }
 0x4a0   : > { %v1864_v23 = vpop.xlane.xlu1 %1863 }
 0x4a1   : > { %v1875_v28 = vmul.f32 %v4195_v16, %v1864_v23  ;;  %v2222_v23 = vld [vmem:[#allocation20 + $0x3b0] sm:$0xff] }
 0x4a2   : > { %2266 = vmatpush.msrb.mxu1 %v2222_v23  ;;  %v1861_v23 = vld [vmem:[#allocation19] sm:$0x3] }
 0x4a3   : > { %v4199_v32 = vsub.f32 %v4180_v37, %v1875_v28  ;;  %v4202_v33 = vsub.f32 %v4183_v40, %v1875_v28  ;;  %v2188_v28 = vld [vmem:[#allocation20 + $0x2a0] sm:$0xff] }
 0x4a4   : > { %2267 = vmatpush.msrb.mxu1 %v2220_v30  ;;  %v1921_v30 = vperm.slane %v1860_v21, 1 }
 0x4a5   : > { %v1881_v34 = vmul.f32 %v4199_v32, %v4199_v32  ;;  %v1882_v35 = vmul.f32 %v4202_v33, %v4202_v33 }
 0x4a7   : > { %v1885_v36 = vadd.f32 %v1882_v35, %v1881_v34  ;;  %v2221_v34 = vld [vmem:[#allocation20 + $0x3a8] sm:$0xff]  ;;  %v2186_v35 = vld [vmem:[#allocation20 + $0x290] sm:$0xff] }
 0x4a8   : > { %v1867_v42 = vpop.xlane.xlu2 %1866  ;;  %2313 = vmatpush.msrb.mxu3 %v2221_v34 }
 0x4a9   : > { %1886 = vadd.xlane.f32.xlu0 %v1885_v36  ;;  %v1876_v44 = vmul.f32 %v4195_v16, %v1867_v42  ;;  %v2218_v36 = vld [vmem:[#allocation20 + $0x390] sm:$0xff]  ;;  %v2187_v42 = vld [vmem:[#allocation20 + $0x298] sm:$0xff] }
 0x4aa   : > { %2268 = vmatpush.msrb.mxu1 %v2218_v36 }
 0x4ab   : > { %v4210_v37 = vsub.f32 %v4188_v49, %v1876_v44  ;;  %v4213_v40 = vsub.f32 %v4191_v12, %v1876_v44  ;;  %v1947_v49 = vld [vmem:[#allocation20 + $0x50] sm:$0xff]  ;;  %v1948_v12 = vld [vmem:[#allocation20 + $0x58] sm:$0xff] }
 0x4ac   : > { %2017 = vmatpush.msra.mxu0 %v1947_v49  ;;  %2063 = vmatpush.msra.mxu2 %v1948_v12  ;;  %v2219_v44 = vld [vmem:[#allocation20 + $0x398] sm:$0xff] }
 0x4ad   : > { %v1883_v45 = vmul.f32 %v4210_v37, %v4210_v37  ;;  %v1884_v25 = vmul.f32 %v4213_v40, %v4213_v40  ;;  %2314 = vmatpush.msrb.mxu3 %v2219_v44 }
 0x4ae   : > { %2018 = vmatpush.msra.mxu0 %v1945_v26  ;;  %2064 = vmatpush.msra.mxu2 %v1946_v51  ;;  %v2212_v26 = vld [vmem:[#allocation20 + $0x360] sm:$0xff]  ;;  %v2213_v51 = vld [vmem:[#allocation20 + $0x368] sm:$0xff] }
 0x4af   : > { %v1888_v50 = vadd.f32 %v1884_v25, %v1883_v45  ;;  %v2184_v45 = vld [vmem:[#allocation20 + $0x280] sm:$0xff]  ;;  %2315 = vmatpush.msrb.mxu3 %v2217_v52 }
 0x4b0   : > { %2019 = vmatpush.msra.mxu0 %v1943_v55  ;;  %2065 = vmatpush.msra.mxu2 %v1944_v57  ;;  %v2216_v25 = vld [vmem:[#allocation20 + $0x380] sm:$0xff]  ;;  %v2210_v55 = vld [vmem:[#allocation20 + $0x350] sm:$0xff]  ;;  %v2179_v57 = vld [vmem:[#allocation20 + $0x258] sm:$0xff] }
 0x4b1   : > { %1889 = vadd.xlane.f32.xlu1 %v1888_v50  ;;  %v2185_v50 = vld [vmem:[#allocation20 + $0x288] sm:$0xff]  ;;  %2269 = vmatpush.msrb.mxu1 %v2216_v25 }
 0x4b2   : > { %2020 = vmatpush.msra.mxu0 %v1941_v58  ;;  %2066 = vmatpush.msra.mxu2 %v1942_v59  ;;  %v2176_v58 = vld [vmem:[#allocation20 + $0x240] sm:$0xff]  ;;  %v2177_v59 = vld [vmem:[#allocation20 + $0x248] sm:$0xff] }
 0x4b3   : > { %2270 = vmatpush.msrb.mxu1 %v2214_v47  ;;  %2316 = vmatpush.msrb.mxu3 %v2215_v15  ;;  %v2367_v15 = vld [vmem:[#allocation22 + $0x2f8] sm:$0xff] }
 0x4b4   : > { %2021 = vmatpush.msra.mxu0 %v1939_v63  ;;  %2067 = vmatpush.msra.mxu2 %v1940_v54  ;;  %v2174_v63 = vld [vmem:[#allocation20 + $0x230] sm:$0xff]  ;;  %v2175_v54 = vld [vmem:[#allocation20 + $0x238] sm:$0xff] }
 0x4b5   : > { %2271 = vmatpush.msrb.mxu1 %v2212_v26  ;;  %2317 = vmatpush.msrb.mxu3 %v2213_v51  ;;  %v2365_v26 = vld [vmem:[#allocation22 + $0x2e8] sm:$0xff]  ;;  %v2396_v51 = vld [vmem:[#allocation22 + $0x3e0] sm:$0xff] }
 0x4b6   : > { %2022 = vmatpush.msra.mxu0 %v1937_v2  ;;  %2068 = vmatpush.msra.mxu2 %v1938_v4  ;;  %v2172_v2 = vld [vmem:[#allocation20 + $0x220] sm:$0xff] }
 0x4b7   : > { %2272 = vmatpush.msrb.mxu1 %v2210_v55  ;;  %2318 = vmatpush.msrb.mxu3 %v2211_v19  ;;  %v2363_v19 = vld [vmem:[#allocation22 + $0x2d8] sm:$0xff] }
 0x4b8   : > { %2239 = vmatpush.msrb.mxu0 %v2198_v6  ;;  %2285 = vmatpush.msrb.mxu2 %v2199_v41  ;;  %v2205_v6 = vld [vmem:[#allocation20 + $0x328] sm:$0xff]  ;;  %v2170_v41 = vld [vmem:[#allocation20 + $0x210] sm:$0xff] }
 0x4b9   : > { %2273 = vmatpush.msrb.mxu1 %v2208_v20  ;;  %2319 = vmatpush.msrb.mxu3 %v2209_v60  ;;  %v2395_v20 = vld [vmem:[#allocation22 + $0x3d8] sm:$0xff] }
 0x4ba   : > { %2240 = vmatpush.msrb.mxu0 %v2196_v14  ;;  %2286 = vmatpush.msrb.mxu2 %v2197_v39  ;;  %v2203_v39 = vld [vmem:[#allocation20 + $0x318] sm:$0xff] }
 0x4bb   : > { %2274 = vmatpush.msrb.mxu1 %v2206_v0  ;;  %2320 = vmatpush.msrb.mxu3 %v2207_v1  ;;  %v2361_v0 = vld [vmem:[#allocation22 + $0x2c8] sm:$0xff]  ;;  %v2359_v1 = vld [vmem:[#allocation22 + $0x2b8] sm:$0xff] }
 0x4bc   : > { %2241 = vmatpush.msrb.mxu0 %v2194_v8  ;;  %2287 = vmatpush.msrb.mxu2 %v2195_v62  ;;  %v2200_v62 = vld [vmem:[#allocation20 + $0x300] sm:$0xff] }
 0x4bd   : > { %2275 = vmatpush.msrb.mxu1 %v2204_v3  ;;  %2321 = vmatpush.msrb.mxu3 %v2205_v6  ;;  %v2393_v3 = vld [vmem:[#allocation22 + $0x3c8] sm:$0xff]  ;;  %v2390_v6 = vld [vmem:[#allocation22 + $0x3b0] sm:$0xff] }
 0x4be   : > { %2242 = vmatpush.msrb.mxu0 %v2192_v11  ;;  %2288 = vmatpush.msrb.mxu2 %v2193_v18  ;;  %v2201_v11 = vld [vmem:[#allocation20 + $0x308] sm:$0xff] }
 0x4bf   : > { %2276 = vmatpush.msrb.mxu1 %v2202_v7  ;;  %2322 = vmatpush.msrb.mxu3 %v2203_v39  ;;  %v2355_v7 = vld [vmem:[#allocation22 + $0x298] sm:$0xff]  ;;  %v2352_v39 = vld [vmem:[#allocation22 + $0x280] sm:$0xff] }
 0x4c0   : > { %2243 = vmatpush.msrb.mxu0 %v2190_v22  ;;  %2289 = vmatpush.msrb.mxu2 %v2191_v24 }
 0x4c1   : > { %2277 = vmatpush.msrb.mxu1 %v2200_v62  ;;  %2323 = vmatpush.msrb.mxu3 %v2201_v11  ;;  %v2350_v62 = vld [vmem:[#allocation22 + $0x270] sm:$0xff]  ;;  %v2384_v11 = vld [vmem:[#allocation22 + $0x380] sm:$0xff] }
 0x4c2   : > { %2244 = vmatpush.msrb.mxu0 %v2188_v28  ;;  %2290 = vmatpush.msrb.mxu2 %v2189_v31  ;;  %v1920_v28 = vperm.slane %v1860_v21, 0  ;;  %v2349_v21 = vld [vmem:[#allocation22 + $0x268] sm:$0xff] }
 0x4c4   : > { %2245 = vmatpush.msrb.mxu0 %v2186_v35  ;;  %2291 = vmatpush.msrb.mxu2 %v2187_v42  ;;  %v1929_v35 = vperm.slane %v1861_v23, 0 }
 0x4c6   : > { %2246 = vmatpush.msrb.mxu0 %v2184_v45  ;;  %2292 = vmatpush.msrb.mxu2 %v2185_v50  ;;  %v1930_v45 = vperm.slane %v1861_v23, 1  ;;  %v2383_v23 = vld [vmem:[#allocation22 + $0x378] sm:$0xff] }
 0x4c8   : > { %2247 = vmatpush.msrb.mxu0 %v2182_v46  ;;  %2293 = vmatpush.msrb.mxu2 %v2183_v48 }
 0x4ca   : > { %2248 = vmatpush.msrb.mxu0 %v2180_v61  ;;  %2294 = vmatpush.msrb.mxu2 %v2181_v29  ;;  %v2364_v61 = vld [vmem:[#allocation22 + $0x2e0] sm:$0xff] }
 0x4cc   : > { %2249 = vmatpush.msrb.mxu0 %v2178_v53  ;;  %2295 = vmatpush.msrb.mxu2 %v2179_v57  ;;  %v2397_v53 = vld [vmem:[#allocation22 + $0x3e8] sm:$0xff]  ;;  %v2362_v57 = vld [vmem:[#allocation22 + $0x2d0] sm:$0xff] }
 0x4ce   : > { %2250 = vmatpush.msrb.mxu0 %v2176_v58  ;;  %2296 = vmatpush.msrb.mxu2 %v2177_v59  ;;  %v2394_v58 = vld [vmem:[#allocation22 + $0x3d0] sm:$0xff] }
 0x4d0   : > { %2251 = vmatpush.msrb.mxu0 %v2174_v63  ;;  %2297 = vmatpush.msrb.mxu2 %v2175_v54  ;;  %v2360_v63 = vld [vmem:[#allocation22 + $0x2c0] sm:$0xff] }
 0x4d2   : > { %2252 = vmatpush.msrb.mxu0 %v2172_v2  ;;  %2298 = vmatpush.msrb.mxu2 %v2173_v5  ;;  %v2392_v2 = vld [vmem:[#allocation22 + $0x3c0] sm:$0xff]  ;;  %v2357_v5 = vld [vmem:[#allocation22 + $0x2a8] sm:$0xff] }
 0x4d4   : > { %2253 = vmatpush.msrb.mxu0 %v2170_v41  ;;  %2299 = vmatpush.msrb.mxu2 %v2171_v38  ;;  %v2354_v41 = vld [vmem:[#allocation22 + $0x290] sm:$0xff]  ;;  %v2389_v38 = vld [vmem:[#allocation22 + $0x3a8] sm:$0xff] }
 0x4d6   : > { %2254 = vmatpush.msrb.mxu0 %v2168_v9  ;;  %2300 = vmatpush.msrb.mxu2 %v2169_v10  ;;  %v2387_v9 = vld [vmem:[#allocation22 + $0x398] sm:$0xff] }
 0x4d7   : > { %v2351_v10 = vld [vmem:[#allocation22 + $0x278] sm:$0xff] }
 0x51c   : > { %v1887_v49 = vpop.xlane.xlu0 %1886 }
 0x51d   : > { %v1891_v12 = vmul.f32 %v1887_v49, %v4195_v16  ;;  %v2366_v49 = vld [vmem:[#allocation22 + $0x2f0] sm:$0xff] }
 0x51f   : > { %v4220_v56 = vadd.f32 1e-05, %v1891_v12 }
 0x521   : > { %3178 = vrsqrt.f32 %v4220_v56  ;;  %vm1901_vm3 = vweird.f32 %v4220_v56 }
 0x524   : > { %v1890_v4 = vpop.xlane.xlu1 %1889 }
 0x525   : > { %v1892_v13 = vmul.f32 %v1890_v4, %v4195_v16  ;;  %v2356_v4 = vld [vmem:[#allocation22 + $0x2a0] sm:$0xff] }
 0x527   : > { %v3179_v14 = vpop.eup %3178  ;;  %v1894_v8 = vadd.f32 1e-05, %v1892_v13  ;;  %v2391_v13 = vld [vmem:[#allocation22 + $0x3b8] sm:$0xff] }
 0x528   : > { %v1896_v43 = vmul.f32 %v3179_v14, %v4220_v56  ;;  %vm1902_vm2 = vweird.f32 %v3179_v14 }
 0x529   : > { %3180 = vrsqrt.f32 %v1894_v8  ;;  %vm1903_vm4 = vmor %vm1901_vm3, %vm1902_vm2  ;;  %vm1911_vm6 = vweird.f32 %v1894_v8 }
 0x52a   : > { %v1897_v17 = vmul.f32 %v3179_v14, %v1896_v43  ;;  %v2353_v43 = vld [vmem:[#allocation22 + $0x288] sm:$0xff] }
 0x52c   : > { %v1898_v18 = vmul.f32 0.5, %v1897_v17  ;;  %v2385_v17 = vld [vmem:[#allocation22 + $0x388] sm:$0xff] }
 0x52e   : > { %v1899_v22 = vsub.f32 1.5, %v1898_v18  ;;  %v2348_v18 = vld [vmem:[#allocation22 + $0x260] sm:$0xff] }
 0x52f   : > { %v3181_v24 = vpop.eup %3180 }
 0x530   : > { %v1900_v27 = vmul.f32 %v3179_v14, %v1899_v22  ;;  %v1906_v31 = vmul.f32 %v3181_v24, %v1894_v8  ;;  %vm1912_vm5 = vweird.f32 %v3181_v24  ;;  %v2386_v8 = vld [vmem:[#allocation22 + $0x390] sm:$0xff] }
 0x531   : > { %vm1913_vm7 = vmor %vm1911_vm6, %vm1912_vm5  ;;  %v2382_v22 = vld [vmem:[#allocation22 + $0x370] sm:$0xff] }
 0x532   : > { %v1904_v34 = vsel %vm1903_vm4, %v3179_v14, %v1900_v27  ;;  %v1907_v44 = vmul.f32 %v3181_v24, %v1906_v31  ;;  %v2388_v14 = vld [vmem:[#allocation22 + $0x3a0] sm:$0xff]  ;;  %v2347_v27 = vld [vmem:[#allocation22 + $0x258] sm:$0xff]  ;;  %v2342_v31 = vld [vmem:[#allocation22 + $0x230] sm:$0xff] }
 0x533   : > { %v1915_v36 = vmul.f32 %v1904_v34, %v4199_v32  ;;  %v1916_v42 = vmul.f32 %v1904_v34, %v4202_v33  ;;  %v2398_v32 = vld [vmem:[#allocation22 + $0x3f0] sm:$0xff]  ;;  %v2399_v33 = vld [vmem:[#allocation22 + $0x3f8] sm:$0xff]  ;;  %v2380_v34 = vld [vmem:[#allocation22 + $0x360] sm:$0xff] }
 0x534   : > { %v1908_v52 = vmul.f32 0.5, %v1907_v44  ;;  %v2378_v44 = vld [vmem:[#allocation22 + $0x350] sm:$0xff] }
 0x535   : > { %v1924_v25 = vmul.f32 %v1920_v28, %v1915_v36  ;;  %v1925_v50 = vmul.f32 %v1921_v30, %v1916_v42  ;;  %v2381_v36 = vld [vmem:[#allocation22 + $0x368] sm:$0xff]  ;;  %v2340_v42 = vld [vmem:[#allocation22 + $0x220] sm:$0xff] }
 0x536   : > { %v1909_v46 = vsub.f32 1.5, %v1908_v52  ;;  %v2376_v52 = vld [vmem:[#allocation22 + $0x340] sm:$0xff] }
 0x537   : > { %v4231_v47 = vadd.f32 %v1929_v35, %v1924_v25  ;;  %v4233_v48 = vadd.f32 %v1930_v45, %v1925_v50  ;;  %v2379_v25 = vld [vmem:[#allocation22 + $0x358] sm:$0xff]  ;;  %v2338_v50 = vld [vmem:[#allocation22 + $0x210] sm:$0xff] }
 0x538   : > { %v1910_v12 = vmul.f32 %v3181_v24, %v1909_v46  ;;  %v2339_v46 = vld [vmem:[#allocation22 + $0x218] sm:$0xff] }
 0x539   : > { %2023 = vmatmul.f32.vlgmr.msra.gmra.mxu0 %v4231_v47  ;;  %2046 = vmatmul.f32.vlgmr.msra.gmra.mxu1 %v4233_v48 }
 0x53a   : > { %2069 = vmatmul.f32.vlgmr.msra.gmra.mxu2 %v4231_v47  ;;  %2092 = vmatmul.f32.vlgmr.msra.gmra.mxu3 %v4233_v48  ;;  %v1914_v29 = vsel %vm1913_vm7, %v3181_v24, %v1910_v12  ;;  %v2346_v24 = vld [vmem:[#allocation22 + $0x250] sm:$0xff] }
 0x53b   : > { %2400 = vmatpush.msra.mxu0 %v2366_v49  ;;  %2446 = vmatpush.msra.mxu2 %v2367_v15  ;;  %v1917_v55 = vmul.f32 %v1914_v29, %v4210_v37  ;;  %v1918_v56 = vmul.f32 %v1914_v29, %v4213_v40  ;;  %v2358_v40 = vld [vmem:[#allocation22 + $0x2b0] sm:$0xff]  ;;  %v2377_v49 = vld [vmem:[#allocation22 + $0x348] sm:$0xff]  ;;  %v2336_v15 = vld [vmem:[#allocation22 + $0x200] sm:$0xff] }
 0x53c   : > { %2423 = vmatpush.msra.mxu1 %v2398_v32  ;;  %2469 = vmatpush.msra.mxu3 %v2399_v33  ;;  %v2374_v12 = vld [vmem:[#allocation22 + $0x330] sm:$0xff]  ;;  %v2337_v32 = vld [vmem:[#allocation22 + $0x208] sm:$0xff]  ;;  %v2375_v33 = vld [vmem:[#allocation22 + $0x338] sm:$0xff] }
 0x53d   : > { %2401 = vmatpush.msra.mxu0 %v2364_v61  ;;  %2447 = vmatpush.msra.mxu2 %v2365_v26  ;;  %v1926_v59 = vmul.f32 %v1920_v28, %v1917_v55  ;;  %v1927_v60 = vmul.f32 %v1921_v30, %v1918_v56  ;;  %v2344_v28 = vld [vmem:[#allocation22 + $0x240] sm:$0xff]  ;;  %v2345_v30 = vld [vmem:[#allocation22 + $0x248] sm:$0xff]  ;;  %v2133_v61 = vld [vmem:[#allocation22 + $0xf0] sm:$0xff] }
 0x53e   : > { %2424 = vmatpush.msra.mxu1 %v2396_v51  ;;  %2470 = vmatpush.msra.mxu3 %v2397_v53  ;;  %v2134_v26 = vld [vmem:[#allocation22 + $0xf8] sm:$0xff]  ;;  %v2372_v29 = vld [vmem:[#allocation22 + $0x320] sm:$0xff]  ;;  %v2373_v51 = vld [vmem:[#allocation22 + $0x328] sm:$0xff] }
 0x53f   : > { %2402 = vmatpush.msra.mxu0 %v2362_v57  ;;  %2448 = vmatpush.msra.mxu2 %v2363_v19  ;;  %v4241_v54 = vadd.f32 %v1929_v35, %v1926_v59  ;;  %v4243_v37 = vadd.f32 %v1930_v45, %v1927_v60  ;;  %v2343_v35 = vld [vmem:[#allocation22 + $0x238] sm:$0xff]  ;;  %v2341_v45 = vld [vmem:[#allocation22 + $0x228] sm:$0xff]  ;;  %v2131_v53 = vld [vmem:[#allocation22 + $0xe0] sm:$0xff] }
 0x540   : > { %2425 = vmatpush.msra.mxu1 %v2394_v58  ;;  %2471 = vmatpush.msra.mxu3 %v2395_v20  ;;  %v2132_v55 = vld [vmem:[#allocation22 + $0xe8] sm:$0xff]  ;;  %v2370_v56 = vld [vmem:[#allocation22 + $0x310] sm:$0xff]  ;;  %v2371_v57 = vld [vmem:[#allocation22 + $0x318] sm:$0xff] }
 0x541   : > { %2403 = vmatpush.msra.mxu0 %v2360_v63  ;;  %2449 = vmatpush.msra.mxu2 %v2361_v0  ;;  %v2129_v19 = vld [vmem:[#allocation22 + $0xd0] sm:$0xff]  ;;  %v2130_v58 = vld [vmem:[#allocation22 + $0xd8] sm:$0xff]  ;;  %v2368_v20 = vld [vmem:[#allocation22 + $0x300] sm:$0xff] }
 0x542   : > { %2026 = vmatmul.f32.gmra.mxu0 %v4241_v54  ;;  %2049 = vmatmul.f32.gmra.mxu1 %v4243_v37  ;;  %v2369_v59 = vld [vmem:[#allocation22 + $0x308] sm:$0xff]  ;;  %v2127_v60 = vld [vmem:[#allocation22 + $0xc0] sm:$0xff]  ;;  %v2165_v63 = vld [vmem:[#allocation22 + $0x1f0] sm:$0xff] }
 0x543   : > { %2072 = vmatmul.f32.gmra.mxu2 %v4241_v54  ;;  %2095 = vmatmul.f32.gmra.mxu3 %v4243_v37  ;;  %v2128_v0 = vld [vmem:[#allocation22 + $0xc8] sm:$0xff] }
 0x544   : > { %2404 = vmatpush.msra.mxu0 %v2358_v40  ;;  %2450 = vmatpush.msra.mxu2 %v2359_v1  ;;  %v2166_v40 = vld [vmem:[#allocation22 + $0x1f8] sm:$0xff]  ;;  %v2125_v1 = vld [vmem:[#allocation22 + $0xb0] sm:$0xff] }
 0x545   : > { %2426 = vmatpush.msra.mxu1 %v2392_v2  ;;  %2472 = vmatpush.msra.mxu3 %v2393_v3  ;;  %v2163_v2 = vld [vmem:[#allocation22 + $0x1e0] sm:$0xff]  ;;  %v2126_v3 = vld [vmem:[#allocation22 + $0xb8] sm:$0xff] }
 0x546   : > { %2405 = vmatpush.msra.mxu0 %v2356_v4  ;;  %2451 = vmatpush.msra.mxu2 %v2357_v5  ;;  %v2164_v4 = vld [vmem:[#allocation22 + $0x1e8] sm:$0xff]  ;;  %v2123_v5 = vld [vmem:[#allocation22 + $0xa0] sm:$0xff] }
 0x547   : > { %2427 = vmatpush.msra.mxu1 %v2390_v6  ;;  %2473 = vmatpush.msra.mxu3 %v2391_v13  ;;  %v2161_v6 = vld [vmem:[#allocation22 + $0x1d0] sm:$0xff]  ;;  %v2124_v13 = vld [vmem:[#allocation22 + $0xa8] sm:$0xff] }
 0x548   : > { %2406 = vmatpush.msra.mxu0 %v2354_v41  ;;  %2452 = vmatpush.msra.mxu2 %v2355_v7  ;;  %v2162_v41 = vld [vmem:[#allocation22 + $0x1d8] sm:$0xff]  ;;  %v2121_v7 = vld [vmem:[#allocation22 + $0x90] sm:$0xff] }
 0x549   : > { %2428 = vmatpush.msra.mxu1 %v2388_v14  ;;  %2474 = vmatpush.msra.mxu3 %v2389_v38  ;;  %v2159_v14 = vld [vmem:[#allocation22 + $0x1c0] sm:$0xff]  ;;  %v2122_v38 = vld [vmem:[#allocation22 + $0x98] sm:$0xff] }
 0x54a   : > { %2255 = vmatmul.f32.vlgmr.msrb.gmra.mxu0 %v4231_v47  ;;  %2278 = vmatmul.f32.vlgmr.msrb.gmra.mxu1 %v4233_v48 }
 0x54b   : > { %2301 = vmatmul.f32.vlgmr.msrb.gmra.mxu2 %v4231_v47  ;;  %2324 = vmatmul.f32.vlgmr.msrb.gmra.mxu3 %v4233_v48 }
 0x54c   : > { %2407 = vmatpush.msra.mxu0 %v2352_v39  ;;  %2453 = vmatpush.msra.mxu2 %v2353_v43  ;;  %v2160_v39 = vld [vmem:[#allocation22 + $0x1c8] sm:$0xff]  ;;  %v2119_v43 = vld [vmem:[#allocation22 + $0x80] sm:$0xff] }
 0x54d   : > { %2429 = vmatpush.msra.mxu1 %v2386_v8  ;;  %2475 = vmatpush.msra.mxu3 %v2387_v9  ;;  %v2157_v8 = vld [vmem:[#allocation22 + $0x1b0] sm:$0xff]  ;;  %v2120_v9 = vld [vmem:[#allocation22 + $0x88] sm:$0xff] }
 0x54e   : > { %2408 = vmatpush.msra.mxu0 %v2350_v62  ;;  %2454 = vmatpush.msra.mxu2 %v2351_v10  ;;  %v2158_v62 = vld [vmem:[#allocation22 + $0x1b8] sm:$0xff]  ;;  %v2117_v10 = vld [vmem:[#allocation22 + $0x70] sm:$0xff] }
 0x54f   : > { %2430 = vmatpush.msra.mxu1 %v2384_v11  ;;  %2476 = vmatpush.msra.mxu3 %v2385_v17  ;;  %v2155_v11 = vld [vmem:[#allocation22 + $0x1a0] sm:$0xff]  ;;  %v2118_v17 = vld [vmem:[#allocation22 + $0x78] sm:$0xff] }
 0x550   : > { %2409 = vmatpush.msra.mxu0 %v2348_v18  ;;  %2455 = vmatpush.msra.mxu2 %v2349_v21  ;;  %v2156_v18 = vld [vmem:[#allocation22 + $0x1a8] sm:$0xff]  ;;  %v2115_v21 = vld [vmem:[#allocation22 + $0x60] sm:$0xff] }
 0x551   : > { %2431 = vmatpush.msra.mxu1 %v2382_v22  ;;  %2477 = vmatpush.msra.mxu3 %v2383_v23  ;;  %v2153_v22 = vld [vmem:[#allocation22 + $0x190] sm:$0xff]  ;;  %v2116_v23 = vld [vmem:[#allocation22 + $0x68] sm:$0xff] }
 0x552   : > { %2258 = vmatmul.f32.gmra.mxu0 %v4241_v54  ;;  %2281 = vmatmul.f32.gmra.mxu1 %v4243_v37 }
 0x553   : > { %2304 = vmatmul.f32.gmra.mxu2 %v4241_v54  ;;  %2327 = vmatmul.f32.gmra.mxu3 %v4243_v37 }
 0x554   : > { %2410 = vmatpush.msra.mxu0 %v2346_v24  ;;  %2456 = vmatpush.msra.mxu2 %v2347_v27  ;;  %v2154_v24 = vld [vmem:[#allocation22 + $0x198] sm:$0xff]  ;;  %v2113_v27 = vld [vmem:[#allocation22 + $0x50] sm:$0xff] }
 0x555   : > { %2432 = vmatpush.msra.mxu1 %v2380_v34  ;;  %2478 = vmatpush.msra.mxu3 %v2381_v36  ;;  %v2111_v34 = vld [vmem:[#allocation22 + $0x40] sm:$0xff]  ;;  %v2112_v36 = vld [vmem:[#allocation22 + $0x48] sm:$0xff] }
 0x556   : > { %2411 = vmatpush.msra.mxu0 %v2344_v28  ;;  %2457 = vmatpush.msra.mxu2 %v2345_v30  ;;  %v2151_v28 = vld [vmem:[#allocation22 + $0x180] sm:$0xff]  ;;  %v2114_v30 = vld [vmem:[#allocation22 + $0x58] sm:$0xff] }
 0x557   : > { %2433 = vmatpush.msra.mxu1 %v2378_v44  ;;  %2479 = vmatpush.msra.mxu3 %v2379_v25  ;;  %v2109_v25 = vld [vmem:[#allocation22 + $0x30] sm:$0xff] }
 0x558   : > { %2412 = vmatpush.msra.mxu0 %v2342_v31  ;;  %2458 = vmatpush.msra.mxu2 %v2343_v35  ;;  %v2152_v31 = vld [vmem:[#allocation22 + $0x188] sm:$0xff]  ;;  %v2149_v35 = vld [vmem:[#allocation22 + $0x170] sm:$0xff] }
 0x559   : > { %2434 = vmatpush.msra.mxu1 %v2376_v52  ;;  %2480 = vmatpush.msra.mxu3 %v2377_v49  ;;  %v2110_v52 = vld [vmem:[#allocation22 + $0x38] sm:$0xff]  ;;  %v2107_v49 = vld [vmem:[#allocation22 + $0x20] sm:$0xff] }
 0x55a   : > { %2413 = vmatpush.msra.mxu0 %v2340_v42  ;;  %2459 = vmatpush.msra.mxu2 %v2341_v45  ;;  %v2150_v45 = vld [vmem:[#allocation22 + $0x178] sm:$0xff] }
 0x55b   : > { %2435 = vmatpush.msra.mxu1 %v2374_v12  ;;  %2481 = vmatpush.msra.mxu3 %v2375_v33  ;;  %v2108_v12 = vld [vmem:[#allocation22 + $0x28] sm:$0xff]  ;;  %v2105_v33 = vld [vmem:[#allocation22 + $0x10] sm:$0xff] }
 0x55c   : > { %2414 = vmatpush.msra.mxu0 %v2338_v50  ;;  %2460 = vmatpush.msra.mxu2 %v2339_v46  ;;  %v2147_v50 = vld [vmem:[#allocation22 + $0x160] sm:$0xff]  ;;  %v2148_v46 = vld [vmem:[#allocation22 + $0x168] sm:$0xff] }
 0x55d   : > { %2436 = vmatpush.msra.mxu1 %v2372_v29  ;;  %2482 = vmatpush.msra.mxu3 %v2373_v51  ;;  %v2144_v29 = vld [vmem:[#allocation22 + $0x148] sm:$0xff] }
 0x55e   : > { %2415 = vmatpush.msra.mxu0 %v2336_v15  ;;  %2461 = vmatpush.msra.mxu2 %v2337_v32  ;;  %v2145_v15 = vld [vmem:[#allocation22 + $0x150] sm:$0xff]  ;;  %v2146_v32 = vld [vmem:[#allocation22 + $0x158] sm:$0xff] }
 0x55f   : > { %2437 = vmatpush.msra.mxu1 %v2370_v56  ;;  %2483 = vmatpush.msra.mxu3 %v2371_v57  ;;  %v2141_v56 = vld [vmem:[#allocation22 + $0x130] sm:$0xff]  ;;  %v2104_v57 = vld [vmem:[#allocation22 + $0x8] sm:$0xff] }
 0x560   : > { %2492 = vmatpush.msrb.mxu0 %v2133_v61  ;;  %2538 = vmatpush.msrb.mxu2 %v2134_v26  ;;  %v2143_v61 = vld [vmem:[#allocation22 + $0x140] sm:$0xff]  ;;  %v2106_v26 = vld [vmem:[#allocation22 + $0x18] sm:$0xff] }
 0x561   : > { %2438 = vmatpush.msra.mxu1 %v2368_v20  ;;  %2484 = vmatpush.msra.mxu3 %v2369_v59 }
 0x562   : > { %2493 = vmatpush.msrb.mxu0 %v2131_v53  ;;  %2539 = vmatpush.msrb.mxu2 %v2132_v55  ;;  %v2103_v55 = vld [vmem:[#allocation22] sm:$0xff] }
 0x563   : > { %2515 = vmatpush.msrb.mxu1 %v2165_v63  ;;  %2561 = vmatpush.msrb.mxu3 %v2166_v40  ;;  %v2137_v63 = vld [vmem:[#allocation22 + $0x110] sm:$0xff]  ;;  %v2138_v40 = vld [vmem:[#allocation22 + $0x118] sm:$0xff] }
 0x564   : > { %2494 = vmatpush.msrb.mxu0 %v2129_v19  ;;  %2540 = vmatpush.msrb.mxu2 %v2130_v58  ;;  %v2142_v19 = vld [vmem:[#allocation22 + $0x138] sm:$0xff]  ;;  %v2139_v58 = vld [vmem:[#allocation22 + $0x120] sm:$0xff] }
 0x565   : > { %2516 = vmatpush.msrb.mxu1 %v2163_v2  ;;  %2562 = vmatpush.msrb.mxu3 %v2164_v4  ;;  %v2136_v2 = vld [vmem:[#allocation22 + $0x108] sm:$0xff] }
 0x566   : > { %2495 = vmatpush.msrb.mxu0 %v2127_v60  ;;  %2541 = vmatpush.msrb.mxu2 %v2128_v0  ;;  %v2140_v60 = vld [vmem:[#allocation22 + $0x128] sm:$0xff]  ;;  %v2917_v0 = vld [vmem:[%s4430_s5 + $0x2] sm:$0x3] }
 0x567   : > { %2517 = vmatpush.msrb.mxu1 %v2161_v6  ;;  %2563 = vmatpush.msrb.mxu3 %v2162_v41 }
 0x568   : > { %2496 = vmatpush.msrb.mxu0 %v2125_v1  ;;  %2542 = vmatpush.msrb.mxu2 %v2126_v3  ;;  %v2135_v1 = vld [vmem:[#allocation22 + $0x100] sm:$0xff]  ;;  %v2235_v3 = vperm.slane %v2917_v0, 0 }
 0x569   : > { %2518 = vmatpush.msrb.mxu1 %v2159_v14  ;;  %2564 = vmatpush.msrb.mxu3 %v2160_v39  ;;  %v2236_v14 = vperm.slane %v2917_v0, 1  ;;  %v2001_v39 = vld [vmem:[%s4430_s5] sm:$0x3] }
 0x56a   : > { %2497 = vmatpush.msrb.mxu0 %v2123_v5  ;;  %2543 = vmatpush.msrb.mxu2 %v2124_v13 }
 0x56b   : > { %2519 = vmatpush.msrb.mxu1 %v2157_v8  ;;  %2565 = vmatpush.msrb.mxu3 %v2158_v62 }
 0x56c   : > { %2498 = vmatpush.msrb.mxu0 %v2121_v7  ;;  %2544 = vmatpush.msrb.mxu2 %v2122_v38 }
 0x56d   : > { %2520 = vmatpush.msrb.mxu1 %v2155_v11  ;;  %2566 = vmatpush.msrb.mxu3 %v2156_v18 }
 0x56e   : > { %2499 = vmatpush.msrb.mxu0 %v2119_v43  ;;  %2545 = vmatpush.msrb.mxu2 %v2120_v9 }
 0x56f   : > { %2521 = vmatpush.msrb.mxu1 %v2153_v22  ;;  %2567 = vmatpush.msrb.mxu3 %v2154_v24 }
 0x570   : > { %2500 = vmatpush.msrb.mxu0 %v2117_v10  ;;  %2546 = vmatpush.msrb.mxu2 %v2118_v17  ;;  %v2003_v10 = vperm.slane %v2001_v39, 0 }
 0x571   : > { %2522 = vmatpush.msrb.mxu1 %v2151_v28  ;;  %2568 = vmatpush.msrb.mxu3 %v2152_v31  ;;  %v2004_v28 = vperm.slane %v2001_v39, 1 }
 0x572   : > { %2501 = vmatpush.msrb.mxu0 %v2115_v21  ;;  %2547 = vmatpush.msrb.mxu2 %v2116_v23 }
 0x573   : > { %2523 = vmatpush.msrb.mxu1 %v2149_v35  ;;  %2569 = vmatpush.msrb.mxu3 %v2150_v45 }
 0x574   : > { %2502 = vmatpush.msrb.mxu0 %v2113_v27  ;;  %2548 = vmatpush.msrb.mxu2 %v2114_v30 }
 0x575   : > { %2524 = vmatpush.msrb.mxu1 %v2147_v50  ;;  %2570 = vmatpush.msrb.mxu3 %v2148_v46 }
 0x576   : > { %2503 = vmatpush.msrb.mxu0 %v2111_v34  ;;  %2549 = vmatpush.msrb.mxu2 %v2112_v36 }
 0x577   : > { %2525 = vmatpush.msrb.mxu1 %v2145_v15  ;;  %2571 = vmatpush.msrb.mxu3 %v2146_v32 }
 0x578   : > { %2504 = vmatpush.msrb.mxu0 %v2109_v25  ;;  %2550 = vmatpush.msrb.mxu2 %v2110_v52 }
 0x579   : > { %2526 = vmatpush.msrb.mxu1 %v2143_v61  ;;  %2572 = vmatpush.msrb.mxu3 %v2144_v29 }
 0x57a   : > { %2505 = vmatpush.msrb.mxu0 %v2107_v49  ;;  %2551 = vmatpush.msrb.mxu2 %v2108_v12 }
 0x57b   : > { %2527 = vmatpush.msrb.mxu1 %v2141_v56  ;;  %2573 = vmatpush.msrb.mxu3 %v2142_v19 }
 0x57c   : > { %2506 = vmatpush.msrb.mxu0 %v2105_v33  ;;  %2552 = vmatpush.msrb.mxu2 %v2106_v26 }
 0x57d   : > { %2528 = vmatpush.msrb.mxu1 %v2139_v58  ;;  %2574 = vmatpush.msrb.mxu3 %v2140_v60  ;;  %v2584_v58 = vld [vmem:[%s4431_s14] sm:$0x3] }
 0x57e   : > { %2507 = vmatpush.msrb.mxu0 %v2103_v55  ;;  %2553 = vmatpush.msrb.mxu2 %v2104_v57  ;;  %v2586_v0 = vperm.slane %v2584_v58, 0 }
 0x57f   : > { %2529 = vmatpush.msrb.mxu1 %v2137_v63  ;;  %2575 = vmatpush.msrb.mxu3 %v2138_v40 }
 0x581   : > { %2530 = vmatpush.msrb.mxu1 %v2135_v1  ;;  %2576 = vmatpush.msrb.mxu3 %v2136_v2  ;;  %v2587_v1 = vperm.slane %v2584_v58, 1 }
 0x5b6   : > { %v4257_v42 = vpop.f32.mrf.mxu0  ;;  %v4259_v44 = vpop.f32.mrf.mxu1 }
 0x5b7   : > { %v2025_v23 = vadd.f32 %v4257_v42, %v2003_v10 }
 0x5b9   : > { %v2048_v31 = vadd.f32 %v4259_v44, %v2025_v23 }
 0x5bb   : > { %v2099_v25 = vmax.f32 %v2048_v31, 0.0 }
 0x5bd   : > { %v4261_v51 = vpop.f32.mrf.mxu2  ;;  %v4263_v53 = vpop.f32.mrf.mxu3 }
 0x5be   : > { %v2071_v36 = vadd.f32 %v4261_v51, %v2004_v28 }
 0x5bf   : > { %v2027_v20 = vpop.f32.mrf.mxu0  ;;  %v2050_v59 = vpop.f32.mrf.mxu1 }
 0x5c0   : > { %v2028_v50 = vadd.f32 %v2027_v20, %v2003_v10  ;;  %v2094_v42 = vadd.f32 %v4263_v53, %v2071_v36 }
 0x5c2   : > { %v2051_v52 = vadd.f32 %v2050_v59, %v2028_v50  ;;  %v2100_v46 = vmax.f32 %v2094_v42, 0.0 }
 0x5c4   : > { %v2101_v15 = vmax.f32 %v2051_v52, 0.0 }
 0x5c6   : > { %v2073_v4 = vpop.f32.mrf.mxu2  ;;  %v2096_v5 = vpop.f32.mrf.mxu3 }
 0x5c7   : > { %v2256_v6 = vpop.f32.mrf.mxu0  ;;  %v2279_v13 = vpop.f32.mrf.mxu1  ;;  %v2074_v49 = vadd.f32 %v2073_v4, %v2004_v28 }
 0x5c8   : > { %v2257_v41 = vadd.f32 %v2256_v6, %v2235_v3 }
 0x5c9   : > { %v2097_v44 = vadd.f32 %v2096_v5, %v2074_v49 }
 0x5ca   : > { %v2280_v7 = vadd.f32 %v2279_v13, %v2257_v41 }
 0x5cb   : > { %v2102_v12 = vmax.f32 %v2097_v44, 0.0 }
 0x5cc   : > { %v2331_v38 = vmax.f32 %v2280_v7, 0.0 }
 0x5ce   : > { %v2302_v43 = vpop.f32.mrf.mxu2  ;;  %v2325_v8 = vpop.f32.mrf.mxu3  ;;  %2416 = vmatmul.f32.vlgmr.msra.gmra.mxu0 %v2331_v38  ;;  %2462 = vmatmul.f32.vlgmr.msra.gmra.mxu2 %v2331_v38 }
 0x5cf   : > { %v2303_v9 = vadd.f32 %v2302_v43, %v2236_v14  ;;  %v2259_v62 = vpop.f32.mrf.mxu0  ;;  %v2282_v18 = vpop.f32.mrf.mxu1 }
 0x5d0   : > { %v2260_v11 = vadd.f32 %v2259_v62, %v2235_v3 }
 0x5d1   : > { %v2326_v17 = vadd.f32 %v2325_v8, %v2303_v9 }
 0x5d2   : > { %v2283_v21 = vadd.f32 %v2282_v18, %v2260_v11 }
 0x5d3   : > { %v2332_v22 = vmax.f32 %v2326_v17, 0.0 }
 0x5d4   : > { %v2333_v24 = vmax.f32 %v2283_v21, 0.0 }
 0x5d5   : > { %2439 = vmatmul.f32.vlgmr.msra.gmra.mxu1 %v2332_v22  ;;  %2485 = vmatmul.f32.vlgmr.msra.gmra.mxu3 %v2332_v22 }
 0x5d6   : > { %v2305_v27 = vpop.f32.mrf.mxu2  ;;  %2419 = vmatmul.f32.gmra.mxu0 %v2333_v24  ;;  %2465 = vmatmul.f32.gmra.mxu2 %v2333_v24  ;;  %v2328_v34 = vpop.f32.mrf.mxu3 }
 0x5d7   : > { %v2306_v30 = vadd.f32 %v2305_v27, %v2236_v14 }
 0x5d9   : > { %v2329_v35 = vadd.f32 %v2328_v34, %v2306_v30 }
 0x5db   : > { %v2334_v45 = vmax.f32 %v2329_v35, 0.0 }
 0x5dd   : > { %2442 = vmatmul.f32.gmra.mxu1 %v2334_v45  ;;  %2488 = vmatmul.f32.gmra.mxu3 %v2334_v45 }
 0x5de   : > { %2508 = vmatmul.f32.vlgmr.msrb.gmra.mxu0 %v2099_v25  ;;  %2554 = vmatmul.f32.vlgmr.msrb.gmra.mxu2 %v2099_v25 }
 0x5e5   : > { %2531 = vmatmul.f32.vlgmr.msrb.gmra.mxu1 %v2100_v46  ;;  %2577 = vmatmul.f32.vlgmr.msrb.gmra.mxu3 %v2100_v46 }
 0x5e6   : > { %2511 = vmatmul.f32.gmra.mxu0 %v2101_v15  ;;  %2557 = vmatmul.f32.gmra.mxu2 %v2101_v15 }
 0x5ed   : > { %2534 = vmatmul.f32.gmra.mxu1 %v2102_v12  ;;  %2580 = vmatmul.f32.gmra.mxu3 %v2102_v12 }
 0x64b   : > { %v2417_v32 = vpop.f32.mrf.mxu0 }
 0x651   : > { %v2463_v33 = vpop.f32.mrf.mxu2 }
 0x652   : > { %v2440_v61 = vpop.f32.mrf.mxu1 }
 0x653   : > { %v2420_v26 = vpop.f32.mrf.mxu0  ;;  %v2441_v57 = vadd.f32 %v2440_v61, %v2417_v32  ;;  %v2598_v61 = vld [vmem:[%s4433_s0] sm:$0x3]  ;;  %s2673_s0 = scalar_lea.sflag [#allocation7], %s737_s7 }
 0x658   : > { %v2486_v29 = vpop.f32.mrf.mxu3 }
 0x659   : > { %v2466_v51 = vpop.f32.mrf.mxu2  ;;  %v2487_v60 = vadd.f32 %v2486_v29, %v2463_v33 }
 0x65a   : > { %v2443_v55 = vpop.f32.mrf.mxu1 }
 0x65b   : > { %v2509_v53 = vpop.f32.mrf.mxu0  ;;  %v2444_v4 = vadd.f32 %v2443_v55, %v2420_v26 }
 0x65c   : > { %v2510_v59 = vadd.f32 %v2509_v53, %v2441_v57  ;;  %v2651_v53 = vperm.slane %v2598_v61, 0 }
 0x660   : > { %v2489_v56 = vpop.f32.mrf.mxu3 }
 0x661   : > { %v2555_v20 = vpop.f32.mrf.mxu2  ;;  %v2490_v38 = vadd.f32 %v2489_v56, %v2466_v51  ;;  %v2599_v51 = vld [vmem:[%s4434_s20] sm:$0x3]  ;;  %v2652_v56 = vperm.slane %v2598_v61, 1 }
 0x662   : > { %v2532_v19 = vpop.f32.mrf.mxu1  ;;  %v2556_v40 = vadd.f32 %v2555_v20, %v2487_v60  ;;  %v2660_v58 = vperm.slane %v2599_v51, 0  ;;  %v2661_v20 = vperm.slane %v2599_v51, 1 }
 0x663   : > { %v2533_v63 = vadd.f32 %v2532_v19, %v2510_v59  ;;  %v2512_v2 = vpop.f32.mrf.mxu0 }
 0x664   : > { %v2513_v41 = vadd.f32 %v2512_v2, %v2444_v4 }
 0x665   : > { %v2590_v5 = vadd.f32 %v2586_v0, %v2533_v63 }
 0x667   : > { %v2594_v43 = vadd.f32 %v2590_v5, %v4231_v47 }
 0x668   : > { %v2578_v3 = vpop.f32.mrf.mxu3 }
 0x669   : > { %v2579_v6 = vadd.f32 %v2578_v3, %v2556_v40  ;;  %v2558_v14 = vpop.f32.mrf.mxu2 }
 0x66a   : > { %v2535_v13 = vpop.f32.mrf.mxu1  ;;  %v2559_v9 = vadd.f32 %v2558_v14, %v2490_v38 }
 0x66b   : > { %v2591_v7 = vadd.f32 %v2587_v1, %v2579_v6  ;;  %v2536_v39 = vadd.f32 %v2535_v13, %v2513_v41 }
 0x66d   : > { %v2595_v8 = vadd.f32 %v2591_v7, %v4233_v48  ;;  %v2592_v11 = vadd.f32 %v2586_v0, %v2536_v39 }
 0x66f   : > { %v2600_v62 = vadd.f32 %v2595_v8, %v2594_v43  ;;  %v2596_v21 = vadd.f32 %v2592_v11, %v4241_v54 }
 0x670   : > { %v2581_v10 = vpop.f32.mrf.mxu3 }
 0x671   : > { %v2582_v17 = vadd.f32 %v2581_v10, %v2559_v9  ;;  %2601 = vadd.xlane.f32.xlu2 %v2600_v62 }
 0x673   : > { %v2593_v18 = vadd.f32 %v2587_v1, %v2582_v17 }
 0x675   : > { %v2597_v22 = vadd.f32 %v2593_v18, %v4243_v37 }
 0x677   : > { %v2603_v23 = vadd.f32 %v2597_v22, %v2596_v21 }
 0x679   : > { %2604 = vadd.xlane.f32.xlu0 %v2603_v23 }
 0x6e4   : > { %v2602_v24 = vpop.xlane.xlu2 %2601 }
 0x6e5   : > { %v2606_v27 = vmul.f32 %v2602_v24, %v4195_v16 }
 0x6e7   : > { %v2608_v28 = vsub.f32 %v2594_v43, %v2606_v27  ;;  %v2609_v47 = vsub.f32 %v2595_v8, %v2606_v27 }
 0x6e9   : > { %v2612_v30 = vmul.f32 %v2608_v28, %v2608_v28  ;;  %v2613_v48 = vmul.f32 %v2609_v47, %v2609_v47 }
 0x6eb   : > { %v2616_v31 = vadd.f32 %v2613_v48, %v2612_v30 }
 0x6ec   : > { %v2605_v34 = vpop.xlane.xlu0 %2604 }
 0x6ed   : > { %v2607_v35 = vmul.f32 %v2605_v34, %v4195_v16  ;;  %2617 = vadd.xlane.f32.xlu1 %v2616_v31 }
 0x6ef   : > { %v2610_v36 = vsub.f32 %v2596_v21, %v2607_v35  ;;  %v2611_v45 = vsub.f32 %v2597_v22, %v2607_v35 }
 0x6f1   : > { %v2614_v25 = vmul.f32 %v2610_v36, %v2610_v36  ;;  %v2615_v54 = vmul.f32 %v2611_v45, %v2611_v45 }
 0x6f3   : > { %v2619_v50 = vadd.f32 %v2615_v54, %v2614_v25 }
 0x6f5   : > { %2620 = vadd.xlane.f32.xlu2 %v2619_v50 }
 0x760   : > { %v2618_v37 = vpop.xlane.xlu1 %2617 }
 0x761   : > { %v2622_v42 = vmul.f32 %v2618_v37, %v4195_v16 }
 0x763   : > { %v2624_v52 = vadd.f32 1e-05, %v2622_v42 }
 0x765   : > { %3182 = vrsqrt.f32 %v2624_v52  ;;  %vm2632_vm9 = vweird.f32 %v2624_v52 }
 0x768   : > { %v2621_v46 = vpop.xlane.xlu2 %2620 }
 0x769   : > { %v2623_v49 = vmul.f32 %v2621_v46, %v4195_v16 }
 0x76b   : > { %v3183_v15 = vpop.eup %3182  ;;  %v2625_v44 = vadd.f32 1e-05, %v2623_v49 }
 0x76c   : > { %v2627_v12 = vmul.f32 %v3183_v15, %v2624_v52  ;;  %vm2633_vm8 = vweird.f32 %v3183_v15 }
 0x76d   : > { %3184 = vrsqrt.f32 %v2625_v44  ;;  %vm2634_vm10 = vmor %vm2632_vm9, %vm2633_vm8  ;;  %vm2642_vm12 = vweird.f32 %v2625_v44 }
 0x76e   : > { %v2628_v32 = vmul.f32 %v3183_v15, %v2627_v12 }
 0x770   : > { %v2629_v33 = vmul.f32 0.5, %v2628_v32 }
 0x772   : > { %v2630_v26 = vsub.f32 1.5, %v2629_v33 }
 0x773   : > { %v3185_v29 = vpop.eup %3184 }
 0x774   : > { %v2631_v55 = vmul.f32 %v3183_v15, %v2630_v26  ;;  %v2637_v16 = vmul.f32 %v3185_v29, %v2625_v44  ;;  %vm2643_vm11 = vweird.f32 %v3185_v29 }
 0x775   : > { %vm2644_vm13 = vmor %vm2642_vm12, %vm2643_vm11 }
 0x776   : > { %v2635_v57 = vsel %vm2634_vm10, %v3183_v15, %v2631_v55  ;;  %v2638_v19 = vmul.f32 %v3185_v29, %v2637_v16 }
 0x777   : > { %v2646_v59 = vmul.f32 %v2635_v57, %v2608_v28  ;;  %v2647_v60 = vmul.f32 %v2635_v57, %v2609_v47 }
 0x778   : > { %v2639_v63 = vmul.f32 0.5, %v2638_v19 }
 0x779   : > { %v2655_v0 = vmul.f32 %v2651_v53, %v2646_v59  ;;  %v2656_v40 = vmul.f32 %v2652_v56, %v2647_v60 }
 0x77a   : > { %v2640_v1 = vsub.f32 1.5, %v2639_v63 }
 0x77b   : > { %v2664_v2 = vadd.f32 %v2660_v58, %v2655_v0  ;;  %v2665_v3 = vadd.f32 %v2661_v20, %v2656_v40 }
 0x77c   : > { %v2641_v4 = vmul.f32 %v3185_v29, %v2640_v1 }
 0x77d   : > { %2668 = vst [vmem:[%s4000_s10] sm:$0xff] %v2664_v2 }
 0x77e   : > { %2669 = vst [vmem:[%s4000_s10 + $0x8] sm:$0xff] %v2665_v3  ;;  %v2645_v5 = vsel %vm2644_vm13, %v3185_v29, %v2641_v4 }
 0x77f   : > { %v2648_v6 = vmul.f32 %v2645_v5, %v2610_v36  ;;  %v2649_v13 = vmul.f32 %v2645_v5, %v2611_v45 }
 0x781   : > { %v2657_v41 = vmul.f32 %v2651_v53, %v2648_v6  ;;  %v2658_v7 = vmul.f32 %v2652_v56, %v2649_v13 }
 0x783   : > { %v2666_v14 = vadd.f32 %v2660_v58, %v2657_v41  ;;  %v2667_v38 = vadd.f32 %v2661_v20, %v2658_v7 }
 0x785   : > { %2670 = vst [vmem:[%s4000_s10 + $0x10] sm:$0xff] %v2666_v14 }
 0x786   : > { %2671 = vst [vmem:[%s4000_s10 + $0x18] sm:$0xff] %v2667_v38 }
 0x787   : > { %3543 = shalt.err (!%p3540_p5)
}
 0x788   : > { %s3673_s7 = smov 256   ;;  %s3674_s10 = smov 16  }
 0x789   : > { %2970 = dma.vmem_to_hbm [thread:$0]  (%p3938_p4), %s2689_s16, 512, %s2691_s9, %s2673_s0, %s3673_s7, %s3673_s7, %s3674_s10  }
 0x78a PF: > { %s4437_s11 = sld [smem:[#allocation31_spill]]  ;;  %p3032_p6 = scmp.ge.s32.totalorder %s3658_s1, 2 }
 0x78c   : > { %p3008_p8 = pnand %p3032_p6, %p3956_p9 }
 0x78e   : > { %p3009_p12 = pneg %p3008_p8 }
 0x790   : > { %s2705_s21 = sand.u32 1, %s4437_s11  }
 0x791   : > { %s2706_s14 = scalar_lea.sflag [#allocation7], %s2705_s21 }
 0x792   : > { %3613 = dma.done.wait (%p3009_p12), %s2706_s14, 512  }
 0x793   : > { %3615 = vsyncadd (%p3009_p12), %s2706_s14, 4294966784  ;;  %s38_s1 = sadd.s32 1, %s3658_s1   ;;  %s4438_s24 = sld [smem:[#allocation32_spill]] }
 0x794   : > { %p35_p1 = scmp.ge.s32.totalorder %s38_s1, 6   ;;  %s4439_s25 = smov %s3626_s26 }
 0x795   : > { %s4440_s26 = smov %s3946_s4  ;;  %s4441_s27 = smov %s3634_s28 }
 0x796   : > { %s4442_s28 = smov %s3638_s29  ;;  %s4443_s29 = smov %s3943_s17 }
 0x797   : > { %s4444_s0 = smov %s3650_s18  ;;  %s4445_s30 = smov %s3654_s19 }
 0x798   : > { %s4446_s18 = smov %s4449_s6  ;;  %s4447_s19 = smov %s4453_s12 }
 0x799   :  { %37 = sbr.rel (!%p35_p1) target bundleno = 32 (0x20), region = 185 }
 0x79e   :  { %2712 = vsyncpa [#allocation6], 1 }
 0x79f   :  { %2714 = vsyncpa [#allocation6 + $0x1], 1 }
 0x7a0   :  { %2715 = vsyncpa [#allocation9], 1 }
 0x7a1   :  { %2716 = vsyncpa [#allocation12], 1 }
 0x7a2   :  { %2717 = vsyncpa [#allocation15], 1 }
 0x7a3   :  { %2718 = vsyncpa [#allocation18], 1 }
 0x7a4   :  { %2719 = vsyncpa [#allocation21], 1 }
 0x7a5   :  { %2720 = vsyncpa [#allocation7], 1 }
 0x7a6   :  { %2722 = vsyncpa [#allocation7 + $0x1], 1 }

// kernel: tpu_custom_call.1
= control target key start
LH: loop header
LB: loop body
LE: loop exit
PB: predicated region body
PF: predicated region fallthrough
CT: control target
= control target key end

     0   :  { %s4351_s0 = inlined_call_operand.hbm [shape: f32[2,32,256], index: 0, kind: input, shape index: {}]   ;;  %s4352_s1 = inlined_call_operand.hbm [shape: f32[256,256], index: 1, kind: input, shape index: {}]   ;;  %s4353_s2 = inlined_call_operand.hbm [shape: f32[1,256], index: 2, kind: input, shape index: {}]   ;;  %s4354_s3 = inlined_call_operand.hbm [shape: f32[256,256], index: 3, kind: input, shape index: {}]   ;;  %s4355_s4 = inlined_call_operand.vmem [shape: f32[1,256], index: 4, kind: input, shape index: {}]   ;;  %s4356_s5 = inlined_call_operand.hbm [shape: f32[256,256], index: 5, kind: input, shape index: {}]   ;;  %s4357_s6 = inlined_call_operand.hbm [shape: f32[1,256], index: 6, kind: input, shape index: {}]   ;;  %s4358_s7 = inlined_call_operand.hbm [shape: f32[2,128,256], index: 7, kind: input, shape index: {}]   ;;  %s4359_s8 = inlined_call_operand.hbm [shape: f32[1,256], index: 8, kind: input, shape index: {}]   ;;  %s4360_s9 = inlined_call_operand.vmem [shape: f32[1,256], index: 9, kind: input, shape index: {}]   ;;  %s4361_s10 = inlined_call_operand.hbm [shape: f32[1,256], index: 10, kind: input, shape index: {}]   ;;  %s4362_s11 = inlined_call_operand.hbm [shape: f32[2,256,256], index: 11, kind: input, shape index: {}]   ;;  %s4363_s12 = inlined_call_operand.vmem [shape: f32[2,1,256], index: 12, kind: input, shape index: {}]   ;;  %s4364_s13 = inlined_call_operand.hbm [shape: f32[2,256,256], index: 13, kind: input, shape index: {}]   ;;  %s4365_s14 = inlined_call_operand.vmem [shape: f32[1,256], index: 14, kind: input, shape index: {}]   ;;  %s4366_s15 = inlined_call_operand.vmem [shape: f32[1,256], index: 15, kind: input, shape index: {}]   ;;  %s4367_s16 = inlined_call_operand.vmem [shape: f32[1,256], index: 16, kind: input, shape index: {}]   ;;  %s4368_s17 = inlined_call_operand.hbm [shape: f32[2,32,256], index: 17, kind: output, shape index: {}]  }
   0x1   :  { %4380 = sst [smem:[#allocation36_spill]] %s4351_s0 }
   0x2   :  { %4381 = sst [smem:[#allocation37_spill]] %s4352_s1 }
   0x3   :  { %4382 = sst [smem:[#allocation38_spill]] %s4353_s2 }
   0x4   :  { %4383 = sst [smem:[#allocation39_spill]] %s4354_s3 }
   0x5   :  { %4384 = sst [smem:[#allocation40_spill]] %s4355_s4 }
   0x6   :  { %4385 = sst [smem:[#allocation41_spill]] %s4356_s5 }
   0x7   :  { %4386 = sst [smem:[#allocation42_spill]] %s4357_s6 }
   0x8   :  { %4387 = sst [smem:[#allocation43_spill]] %s4358_s7 }
   0x9   :  { %4388 = sst [smem:[#allocation44_spill]] %s4359_s8 }
   0xa   :  { %4389 = sst [smem:[#allocation45_spill]] %s4360_s9 }
   0xb   :  { %4390 = sst [smem:[#allocation46_spill]] %s4361_s10 }
   0xc   :  { %4391 = sst [smem:[#allocation47_spill]] %s4362_s11 }
   0xd   :  { %4392 = sst [smem:[#allocation48_spill]] %s4363_s12 }
   0xe   :  { %4393 = sst [smem:[#allocation49_spill]] %s4365_s14 }
   0xf   :  { %4394 = sst [smem:[#allocation50_spill]] %s4366_s15 }
  0x10   :  { %4395 = sst [smem:[#allocation51_spill]] %s4367_s16 }
  0x11   :  { %4396 = sst [smem:[#allocation52_spill]] %s4368_s17 }
  0x12   :  { %22 = vsyncpa [#allocation6], 0 }
  0x13   :  { %24 = vsyncpa [#allocation6 + $0x1], 0 }
  0x14   :  { %25 = vsyncpa [#allocation9], 0 }
  0x15   :  { %26 = vsyncpa [#allocation12], 0 }
  0x16   :  { %27 = vsyncpa [#allocation15], 0 }
  0x17   :  { %28 = vsyncpa [#allocation18], 0 }
  0x18   :  { %29 = vsyncpa [#allocation21], 0 }
  0x19   :  { %30 = vsyncpa [#allocation7], 0 }
  0x1a   :  { %32 = vsyncpa [#allocation7 + $0x1], 0  ;;  %s3765_s24 = smov 0   ;;  %s3767_s25 = smov 0  }
  0x1b   :  { %s3769_s26 = smov 0   ;;  %s3771_s27 = smov 0  }
  0x1c   :  { %s3773_s28 = smov 0   ;;  %s3775_s29 = smov 0  }
  0x1d   :  { %s3777_s0 = smov 0   ;;  %s3779_s30 = smov 0  }
  0x1e   :  { %s3781_s18 = smov 0   ;;  %s3783_s19 = smov 0  }
  0x1f   :  { %s3785_s1 = smov 0  }
  0x20 LB: > { %4397 = sst [smem:[#allocation31_spill]] %s3618_s24  ;;  %s4370_s20 = sadd.s32 4294967295, %s3658_s1   ;;  %s3658_s1 = sphi %s3785_s1, %s38_s1   ;;  %s3654_s19 = sphi %s3783_s19, %s4447_s19   ;;  %s3650_s18 = sphi %s3781_s18, %s4446_s18   ;;  %s3646_s30 = sphi %s3779_s30, %s4445_s30   ;;  %s3642_s0 = sphi %s3777_s0, %s4444_s0   ;;  %s3638_s29 = sphi %s3775_s29, %s4443_s29   ;;  %s3634_s28 = sphi %s3773_s28, %s4442_s28   ;;  %s3630_s27 = sphi %s3771_s27, %s4441_s27   ;;  %s3626_s26 = sphi %s3769_s26, %s4440_s26   ;;  %s3622_s25 = sphi %s3767_s25, %s4439_s25   ;;  %s3618_s24 = sphi %s3765_s24, %s4438_s24  }
  0x21   : > { %4398 = sst [smem:[#allocation32_spill]] %s3622_s25  ;;  %p2877_p0 = scmp.ge.s32.totalorder %s3658_s1, 1 }
  0x22   : > { %4399 = sst [smem:[#allocation33_spill]] %s3642_s0  ;;  %p3824_p1 = scmp.eq.s32.totalorder %s4370_s20, 0 }
  0x23   : > { %4400 = sst [smem:[#allocation34_spill]] %s3646_s30  ;;  %p445_p2 = scmp.lt.s32.totalorder %s3658_s1, 5 }
  0x24   : > { %s4401_s21 = scalar_select %p3824_p1, 1, 0 }
  0x25   : > { %s4402_s17 = sld [smem:[#allocation37_spill]]  ;;  %p3832_p3 = pnand %p2877_p0, %p445_p2 }
  0x26   : > { %s3660_s30 = smov [#allocation8]   ;;  %s4406_s3 = sld [smem:[#allocation39_spill]] }
  0x27   : > { %s4403_s15 = scalar_select %p3832_p3, 1, 0 }
  0x28   : > { %p2972_p4 = pneg %p3832_p3  ;;  %s458_s14 = sshll.u32 %s3660_s30, 4  ;;  %s459_s14 = int_to_ptr.vmem [resolvable:$true] %s458_s14 }
  0x29   : > { %4404 = sst [smem:[#allocation35_spill]] %s4403_s15  ;;  %s4376_s22 = smov 256  }
  0x2a   : > { %p3840_p5 = pnand %p2972_p4, %p3824_p1  ;;  %s4377_s23 = smov 16  }
  0x2b   : > { %s456_s16 = sshll.u32 %s4402_s17, 4  ;;  %s3663_s30 = smov [#allocation11]   ;;  %s457_s16 = int_to_ptr.hbm [resolvable:$true] %s456_s16 }
  0x2c   : > { %s482_s17 = sshll.u32 %s4406_s3, 4  ;;  %s484_s4 = sshll.u32 %s3663_s30, 4  ;;  %s483_s17 = int_to_ptr.hbm [resolvable:$true] %s482_s17  ;;  %s485_s4 = int_to_ptr.vmem [resolvable:$true] %s484_s4 }
  0x2d   : > { %2975 = dma.hbm_to_vmem [thread:$0]  (!%p3840_p5), %s457_s16, 8192, %s459_s14, [#allocation9], %s4376_s22, %s4376_s22, %s4377_s23  }
  0x2e   : > { %s4407_s6 = sld [smem:[#allocation42_spill]]  ;;  %s3664_s25 = smov [#allocation14]  }
  0x2f   : > { %2981 = dma.hbm_to_vmem [thread:$0]  (!%p3840_p5), %s483_s17, 8192, %s485_s4, [#allocation12], %s4376_s22, %s4376_s22, %s4377_s23  }
  0x30   : > { %s4408_s8 = sld [smem:[#allocation44_spill]]  ;;  %s516_s14 = sshll.u32 %s3664_s25, 4  ;;  %s517_s14 = int_to_ptr.vmem [resolvable:$true] %s516_s14 }
  0x31   : > { %s3665_s15 = smov [#allocation17]   ;;  %s4409_s11 = sld [smem:[#allocation47_spill]] }
  0x32   : > { %s542_s16 = sshll.u32 %s3665_s15, 4  ;;  %s4410_s2 = sld [smem:[#allocation38_spill]]  ;;  %s543_s16 = int_to_ptr.vmem [resolvable:$true] %s542_s16 }
  0x33   : > { %s3666_s25 = smov [#allocation20]   ;;  %s4411_s5 = sld [smem:[#allocation41_spill]] }
  0x34   : > { %s514_s24 = sshll.u32 %s4407_s6, 4  ;;  %s568_s12 = sshll.u32 %s3666_s25, 4  ;;  %s515_s24 = int_to_ptr.hbm [resolvable:$true] %s514_s24  ;;  %s569_s12 = int_to_ptr.vmem [resolvable:$true] %s568_s12 }
  0x35   : > { %2987 = dma.hbm_to_vmem [thread:$0]  (!%p3840_p5), %s515_s24, 32, %s517_s14, [#allocation15]  }
  0x36   : > { %s540_s3 = sshll.u32 %s4408_s8, 4  ;;  %s3667_s24 = smov [#allocation10]   ;;  %s541_s3 = int_to_ptr.hbm [resolvable:$true] %s540_s3 }
  0x37   : > { %s566_s6 = sshll.u32 %s4409_s11, 4  ;;  %s473_s14 = sshll.u32 %s3667_s24, 4  ;;  %s567_s6 = int_to_ptr.hbm [resolvable:$true] %s566_s6  ;;  %s474_s14 = int_to_ptr.vmem [resolvable:$true] %s473_s14 }
  0x38   : > { %2993 = dma.hbm_to_vmem [thread:$0]  (!%p3840_p5), %s541_s3, 32, %s543_s16, [#allocation18]  }
  0x39   : > { %s471_s9 = sshll.u32 %s4410_s2, 4  ;;  %s499_s3 = sshll.u32 %s4411_s5, 4  ;;  %s472_s9 = int_to_ptr.hbm [resolvable:$true] %s471_s9  ;;  %s500_s3 = int_to_ptr.hbm [resolvable:$true] %s499_s3 }
  0x3a   : > { %2999 = dma.hbm_to_vmem [thread:$0]  (!%p3840_p5), %s567_s6, 16384, %s569_s12, [#allocation21], %s4376_s22, %s4376_s22, %s4377_s23  }
  0x3b   : > { %2978 = dma.hbm_to_vmem [thread:$0]  (!%p3840_p5), %s472_s9, 32, %s474_s14, [#allocation9]  }
  0x3c   : > { %s4412_s7 = sld [smem:[#allocation43_spill]]  ;;  %s3668_s17 = smov [#allocation13]  }
  0x3d   : > { %s501_s25 = sshll.u32 %s3668_s17, 4  ;;  %s3669_s6 = smov [#allocation16]   ;;  %s502_s25 = int_to_ptr.vmem [resolvable:$true] %s501_s25 }
  0x3e   : > { %2984 = dma.hbm_to_vmem [thread:$0]  (!%p3840_p5), %s500_s3, 8192, %s502_s25, [#allocation12], %s4376_s22, %s4376_s22, %s4377_s23  }
  0x3f   : > { %s527_s12 = sshll.u32 %s3669_s6, 4  ;;  %s4413_s10 = sld [smem:[#allocation46_spill]]  ;;  %s528_s12 = int_to_ptr.vmem [resolvable:$true] %s527_s12 }
  0x40   : > { %s583_s3 = sshll.u32 %s4364_s13, 4  ;;  %s3670_s16 = smov [#allocation19]   ;;  %s584_s3 = int_to_ptr.hbm [resolvable:$true] %s583_s3 }
  0x41   : > { %s557_s30 = sshll.u32 %s3670_s16, 4  ;;  %s3671_s17 = smov [#allocation22]   ;;  %s558_s30 = int_to_ptr.vmem [resolvable:$true] %s557_s30 }
  0x42   : > { %s525_s4 = sshll.u32 %s4412_s7, 4  ;;  %s4414_s25 = sld [smem:[#allocation32_spill]]  ;;  %s526_s4 = int_to_ptr.hbm [resolvable:$true] %s525_s4 }
  0x43   : > { %2990 = dma.hbm_to_vmem [thread:$0]  (!%p3840_p5), %s526_s4, 8192, %s528_s12, [#allocation15], %s4376_s22, %s4376_s22, %s4377_s23  }
  0x44   : > { %s585_s4 = sshll.u32 %s3671_s17, 4  ;;  %s47_s6 = sadd.s32 1, %s3650_s18  ;;  %s586_s4 = int_to_ptr.vmem [resolvable:$true] %s585_s4 }
  0x45   : > { %s555_s14 = sshll.u32 %s4413_s10, 4  ;;  %p48_p6 = scmp.ge.s32.totalorder %s47_s6, 2  ;;  %s556_s14 = int_to_ptr.hbm [resolvable:$true] %s555_s14 }
  0x46   : > { %2996 = dma.hbm_to_vmem [thread:$0]  (!%p3840_p5), %s556_s14, 32, %s558_s30, [#allocation18]  }
  0x47   : > { %3002 = dma.hbm_to_vmem [thread:$0]  (!%p3840_p5), %s584_s3, 16384, %s586_s4, [#allocation21], %s4376_s22, %s4376_s22, %s4377_s23  }
  0x48   : > { %s50_s12 = sadd.s32 1, %s3654_s19  ;;  %s2876_s24 = sadd.s32 4294967294, %s3658_s1  }
  0x49   : > { %s57_s9 = sadd.s32 1, %s3638_s29  ;;  %s4449_s6 = smov (%p48_p6, %s47_s6), 0 }
  0x4a   : > { %s4451_s12 = smov (!%p48_p6, %s50_s12), %s3654_s19  ;;  %p64_p7 = scmp.ne.s32.totalorder %s3638_s29, %s3634_s28 }
  0x4b   : > { %p70_p8 = scmp.ne.s32.totalorder %s3634_s28, %s3630_s27  ;;  %s4415_s20 = sld [smem:[#allocation31_spill]] }
  0x4c   : > { %p52_p9 = scmp.ge.s32.totalorder %s4451_s12, 2  ;;  %p65_p10 = scmp.eq.s32.totalorder %s3658_s1, 0 }
  0x4d   : > { %p3923_p11 = por %p3824_p1, %p70_p8  ;;  %s417_s15 = ssub.s32 %s3650_s18, %s4449_s6 }
  0x4e   : > { %s4453_s12 = smov (%p52_p9, %s4451_s12), 0  ;;  %s421_s0 = sadd.s32 1, %s3626_s26 }
  0x4f   : > { %p431_p12 = scmp.ne.s32.totalorder %s3626_s26, %s4414_s25  ;;  %s54_s27 = ssub.s32 %s3654_s19, %s4453_s12 }
  0x50   : > { %s4417_s3 = sadd.s32 4294967295, %s3658_s1   ;;  %p55_p0 = scmp.eq.s32.totalorder %s54_s27, 0 }
  0x51   : > { %p432_p13 = scmp.eq.s32.totalorder %s4417_s3, 3  ;;  %s418_s16 = sor.u32 %s417_s15, %s54_s27 }
  0x52   : > { %p419_p2 = scmp.eq.s32.totalorder %s418_s16, 0  ;;  %p437_p5 = scmp.ne.s32.totalorder %s4414_s25, %s4415_s20 }
  0x53   : > { %p3938_p4 = por %p432_p13, %p431_p12  ;;  %p438_p6 = scmp.eq.s32.totalorder %s2876_s24, 3 }
  0x54   : > { %s3943_s17 = scalar_select %p55_p0, %s3638_s29, %s57_s9  }
  0x55   : > { %s3946_s4 = scalar_select %p419_p2, %s3626_s26, %s421_s0  }
  0x56   : > { %p66_p8 = por %p65_p10, %p64_p7  ;;  %s608_s22 = sand.u32 1, %s3638_s29  }
  0x57   : > { %p3956_p9 = por %p438_p6, %p437_p5  ;;  %p3021_p1 = scmp.lt.s32.totalorder %s3658_s1, 4 }
  0x58   : > { %s2889_s15 = sshll.u32 %s608_s22, 6  ;;  %s2925_s27 = sshll.u32 %s3654_s19, 6 }
  0x59   : > { %s4420_s2 = sld [smem:[#allocation36_spill]]  ;;  %s612_s0 = scalar_lea.vmem [#allocation5], %s2889_s15 }
  0x5a   : > { %s620_s7 = sshll.u32 %s612_s0, 4  ;;  %p3004_p12 = pnand %p3021_p1, %p66_p8  ;;  %s621_s7 = int_to_ptr.vmem [resolvable:$true] %s620_s7 }
  0x5b   : > { %s609_s25 = scalar_lea.sflag [#allocation6], %s608_s22  ;;  %s4421_s24 = smov 16  }
  0x5c   : > { %s4422_s20 = smov 256   ;;  %s634_s10 = sand.u32 (!%p3832_p3), 1, %s3634_s28  }
  0x5d   : > { %632 = sbr.rel (%p3832_p3) target bundleno = 1930 (0x78a), region = 88  ;;  %s2893_s11 = sshll.u32 (!%p3832_p3), %s634_s10, 6 }
  0x5e   : > { %s635_s3 = scalar_lea.sflag (!%p3832_p3), [#allocation6], %s634_s10 }
  0x5f   : > { %s617_s9 = scalar_lea.hbm %s4420_s2, %s2925_s27  ;;  %s3971_s2 = scalar_lea.vmem (!%p3832_p3), [#allocation5], %s2893_s11 }
  0x60   : > { %s618_s5 = sshll.u32 %s617_s9, 4  ;;  %s619_s5 = int_to_ptr.hbm [resolvable:$true] %s618_s5 }
  0x61   : > { %3006 = dma.hbm_to_vmem [thread:$0]  (!%p3004_p12), %s619_s5, 1024, %s621_s7, %s609_s25, %s4422_s20, %s4422_s20, %s4421_s24  }
  0x62   : > { %3589 = dma.done.wait (%p3923_p11), %s635_s3, 1024  }
  0x63   : > { %3591 = vsyncadd (%p3923_p11), %s635_s3, 4294966272  ;;  %p4424_p1 = scmp.ne.s32.totalorder %s4401_s21, 0 }
  0x65   : > { %3593 = dma.done.wait (%p4424_p1), [#allocation9], 8224  }
  0x66   : > { %3595 = vsyncadd (%p4424_p1), [#allocation9], 4294959072 }
  0x67   : > { %3597 = dma.done.wait (%p4424_p1), [#allocation12], 16384  }
  0x68   : > { %3599 = vsyncadd (%p4424_p1), [#allocation12], 4294950912 }
  0x69   : > { %3601 = dma.done.wait (%p4424_p1), [#allocation15], 8224  }
  0x6a   : > { %3603 = vsyncadd (%p4424_p1), [#allocation15], 4294959072 }
  0x6b   : > { %3605 = dma.done.wait (%p4424_p1), [#allocation18], 64  }
  0x6c   : > { %3607 = vsyncadd (%p4424_p1), [#allocation18], 4294967232 }
  0x6d   : > { %3609 = dma.done.wait (%p4424_p1), [#allocation21], 32768  }
  0x6e   : > { %3611 = vsyncadd (%p4424_p1), [#allocation21], 4294934528  ;;  %s4425_s5 = sld [smem:[#allocation32_spill]] }
  0x6f   : > { %s4426_s11 = sld [smem:[#allocation33_spill]] }
  0x74   : > { %s737_s7 = sand.u32 1, %s4425_s5  }
  0x75   : > { %s2904_s8 = sshll.u32 %s737_s7, 5  ;;  %p2905_p3 = scmp.ne.s32.totalorder %s4426_s11, 0 }
  0x76   : > { %s4000_s10 = scalar_lea.vmem [#allocation23], %s2904_s8  ;;  %s4427_s14 = sld [smem:[#allocation40_spill]] (!%p2905_p3) }
  0x77   : > { %744 = sbr.rel (%p2905_p3) target bundleno = 355 (0x163), region = 136 }
  0x7c   : > { %v784_v0 = vld [vmem:[#allocation11 + $0xf8] sm:$0xff]  ;;  %v782_v1 = vld [vmem:[#allocation11 + $0xe8] sm:$0xff]  ;;  %v783_v4 = vld [vmem:[#allocation11 + $0xf0] sm:$0xff] }
  0x7d   : > { %v816_v2 = vld [vmem:[#allocation11 + $0x1f8] sm:$0xff]  ;;  %881 = vmatpush.msra.mxu2 %v784_v0  ;;  %v814_v3 = vld [vmem:[#allocation11 + $0x1e8] sm:$0xff]  ;;  %823 = vmatpush.msra.mxu0 %v783_v4  ;;  %v781_v7 = vld [vmem:[#allocation11 + $0xe0] sm:$0xff] }
  0x7e   : > { %910 = vmatpush.msra.mxu3 %v816_v2  ;;  %v780_v5 = vld [vmem:[#allocation11 + $0xd8] sm:$0xff]  ;;  %v778_v8 = vld [vmem:[#allocation11 + $0xc8] sm:$0xff]  ;;  %v815_v9 = vld [vmem:[#allocation11 + $0x1f0] sm:$0xff] }
  0x7f   : > { %v812_v6 = vld [vmem:[#allocation11 + $0x1d8] sm:$0xff]  ;;  %882 = vmatpush.msra.mxu2 %v782_v1  ;;  %824 = vmatpush.msra.mxu0 %v781_v7  ;;  %v810_v10 = vld [vmem:[#allocation11 + $0x1c8] sm:$0xff]  ;;  %v779_v11 = vld [vmem:[#allocation11 + $0xd0] sm:$0xff] }
  0x80   : > { %911 = vmatpush.msra.mxu3 %v814_v3  ;;  %852 = vmatpush.msra.mxu1 %v815_v9  ;;  %v813_v12 = vld [vmem:[#allocation11 + $0x1e0] sm:$0xff]  ;;  %v811_v14 = vld [vmem:[#allocation11 + $0x1d0] sm:$0xff]  ;;  %v776_v15 = vld [vmem:[#allocation11 + $0xb8] sm:$0xff] }
  0x81   : > { %883 = vmatpush.msra.mxu2 %v780_v5  ;;  %v777_v13 = vld [vmem:[#allocation11 + $0xc0] sm:$0xff]  ;;  %825 = vmatpush.msra.mxu0 %v779_v11  ;;  %v808_v16 = vld [vmem:[#allocation11 + $0x1b8] sm:$0xff]  ;;  %v775_v17 = vld [vmem:[#allocation11 + $0xb0] sm:$0xff] }
  0x82   : > { %912 = vmatpush.msra.mxu3 %v812_v6  ;;  %853 = vmatpush.msra.mxu1 %v813_v12  ;;  %v809_v18 = vld [vmem:[#allocation11 + $0x1c0] sm:$0xff]  ;;  %v774_v19 = vld [vmem:[#allocation11 + $0xa8] sm:$0xff]  ;;  %v807_v22 = vld [vmem:[#allocation11 + $0x1b0] sm:$0xff] }
  0x83   : > { %884 = vmatpush.msra.mxu2 %v778_v8  ;;  %826 = vmatpush.msra.mxu0 %v777_v13  ;;  %v806_v20 = vld [vmem:[#allocation11 + $0x1a8] sm:$0xff]  ;;  %v773_v21 = vld [vmem:[#allocation11 + $0xa0] sm:$0xff]  ;;  %v772_v23 = vld [vmem:[#allocation11 + $0x98] sm:$0xff] }
  0x84   : > { %913 = vmatpush.msra.mxu3 %v810_v10  ;;  %854 = vmatpush.msra.mxu1 %v811_v14  ;;  %v804_v24 = vld [vmem:[#allocation11 + $0x198] sm:$0xff]  ;;  %v771_v25 = vld [vmem:[#allocation11 + $0x90] sm:$0xff]  ;;  %v805_v26 = vld [vmem:[#allocation11 + $0x1a0] sm:$0xff] }
  0x85   : > { %885 = vmatpush.msra.mxu2 %v776_v15  ;;  %827 = vmatpush.msra.mxu0 %v775_v17  ;;  %v770_v27 = vld [vmem:[#allocation11 + $0x88] sm:$0xff]  ;;  %v769_v29 = vld [vmem:[#allocation11 + $0x80] sm:$0xff]  ;;  %v803_v30 = vld [vmem:[#allocation11 + $0x190] sm:$0xff] }
  0x86   : > { %914 = vmatpush.msra.mxu3 %v808_v16  ;;  %855 = vmatpush.msra.mxu1 %v809_v18  ;;  %v802_v28 = vld [vmem:[#allocation11 + $0x188] sm:$0xff]  ;;  %v768_v31 = vld [vmem:[#allocation11 + $0x78] sm:$0xff]  ;;  %v767_v33 = vld [vmem:[#allocation11 + $0x70] sm:$0xff] }
  0x87   : > { %886 = vmatpush.msra.mxu2 %v774_v19  ;;  %828 = vmatpush.msra.mxu0 %v773_v21  ;;  %v800_v32 = vld [vmem:[#allocation11 + $0x178] sm:$0xff]  ;;  %v801_v34 = vld [vmem:[#allocation11 + $0x180] sm:$0xff]  ;;  %v766_v35 = vld [vmem:[#allocation11 + $0x68] sm:$0xff] }
  0x88   : > { %915 = vmatpush.msra.mxu3 %v806_v20  ;;  %856 = vmatpush.msra.mxu1 %v807_v22  ;;  %v798_v36 = vld [vmem:[#allocation11 + $0x168] sm:$0xff]  ;;  %v765_v37 = vld [vmem:[#allocation11 + $0x60] sm:$0xff]  ;;  %v799_v38 = vld [vmem:[#allocation11 + $0x170] sm:$0xff] }
  0x89   : > { %887 = vmatpush.msra.mxu2 %v772_v23  ;;  %829 = vmatpush.msra.mxu0 %v771_v25  ;;  %v764_v39 = vld [vmem:[#allocation11 + $0x58] sm:$0xff]  ;;  %v763_v41 = vld [vmem:[#allocation11 + $0x50] sm:$0xff]  ;;  %v797_v42 = vld [vmem:[#allocation11 + $0x160] sm:$0xff] }
  0x8a   : > { %916 = vmatpush.msra.mxu3 %v804_v24  ;;  %857 = vmatpush.msra.mxu1 %v805_v26  ;;  %v796_v40 = vld [vmem:[#allocation11 + $0x158] sm:$0xff]  ;;  %v762_v43 = vld [vmem:[#allocation11 + $0x48] sm:$0xff]  ;;  %v761_v45 = vld [vmem:[#allocation11 + $0x40] sm:$0xff] }
  0x8b   : > { %888 = vmatpush.msra.mxu2 %v770_v27  ;;  %830 = vmatpush.msra.mxu0 %v769_v29  ;;  %v794_v44 = vld [vmem:[#allocation11 + $0x148] sm:$0xff]  ;;  %v795_v46 = vld [vmem:[#allocation11 + $0x150] sm:$0xff]  ;;  %v760_v47 = vld [vmem:[#allocation11 + $0x38] sm:$0xff] }
  0x8c   : > { %917 = vmatpush.msra.mxu3 %v802_v28  ;;  %858 = vmatpush.msra.mxu1 %v803_v30  ;;  %v792_v48 = vld [vmem:[#allocation11 + $0x138] sm:$0xff]  ;;  %v759_v49 = vld [vmem:[#allocation11 + $0x30] sm:$0xff]  ;;  %v793_v50 = vld [vmem:[#allocation11 + $0x140] sm:$0xff] }
  0x8d   : > { %889 = vmatpush.msra.mxu2 %v768_v31  ;;  %831 = vmatpush.msra.mxu0 %v767_v33  ;;  %v758_v51 = vld [vmem:[#allocation11 + $0x28] sm:$0xff]  ;;  %v757_v53 = vld [vmem:[#allocation11 + $0x20] sm:$0xff]  ;;  %v791_v54 = vld [vmem:[#allocation11 + $0x130] sm:$0xff] }
  0x8e   : > { %918 = vmatpush.msra.mxu3 %v800_v32  ;;  %859 = vmatpush.msra.mxu1 %v801_v34  ;;  %v790_v52 = vld [vmem:[#allocation11 + $0x128] sm:$0xff]  ;;  %v756_v55 = vld [vmem:[#allocation11 + $0x18] sm:$0xff]  ;;  %v755_v57 = vld [vmem:[#allocation11 + $0x10] sm:$0xff] }
  0x8f   : > { %890 = vmatpush.msra.mxu2 %v766_v35  ;;  %832 = vmatpush.msra.mxu0 %v765_v37  ;;  %v788_v56 = vld [vmem:[#allocation11 + $0x118] sm:$0xff]  ;;  %v789_v58 = vld [vmem:[#allocation11 + $0x120] sm:$0xff]  ;;  %v754_v59 = vld [vmem:[#allocation11 + $0x8] sm:$0xff] }
  0x90   : > { %919 = vmatpush.msra.mxu3 %v798_v36  ;;  %860 = vmatpush.msra.mxu1 %v799_v38  ;;  %v786_v60 = vld [vmem:[#allocation11 + $0x108] sm:$0xff]  ;;  %v4004_v61 = vld [vmem:[%s3971_s2] sm:$0xff]  ;;  %v787_v2 = vld [vmem:[#allocation11 + $0x110] sm:$0xff] }
  0x91   : > { %891 = vmatpush.msra.mxu2 %v764_v39  ;;  %833 = vmatpush.msra.mxu0 %v763_v41  ;;  %v4007_v62 = vld [vmem:[%s3971_s2 + $0x8] sm:$0xff]  ;;  %v970_v63 = vld [vmem:[#allocation13 + $0xf8] sm:$0xff]  ;;  %v969_v7 = vld [vmem:[#allocation13 + $0xf0] sm:$0xff] }
  0x92   : > { %920 = vmatpush.msra.mxu3 %v796_v40  ;;  %861 = vmatpush.msra.mxu1 %v797_v42  ;;  %v1002_v0 = vld [vmem:[#allocation13 + $0x1f8] sm:$0xff]  ;;  %v753_v1 = vld [vmem:[#allocation11] sm:$0xff]  ;;  %v968_v3 = vld [vmem:[#allocation13 + $0xe8] sm:$0xff] }
  0x93   : > { %892 = vmatpush.msra.mxu2 %v762_v43  ;;  %834 = vmatpush.msra.mxu0 %v761_v45  ;;  %v1000_v4 = vld [vmem:[#allocation13 + $0x1e8] sm:$0xff]  ;;  %v785_v5 = vld [vmem:[#allocation11 + $0x100] sm:$0xff]  ;;  %v966_v6 = vld [vmem:[#allocation13 + $0xd8] sm:$0xff] }
  0x94   : > { %921 = vmatpush.msra.mxu3 %v794_v44  ;;  %862 = vmatpush.msra.mxu1 %v795_v46  ;;  %v998_v8 = vld [vmem:[#allocation13 + $0x1d8] sm:$0xff]  ;;  %v964_v9 = vld [vmem:[#allocation13 + $0xc8] sm:$0xff]  ;;  %v967_v10 = vld [vmem:[#allocation13 + $0xe0] sm:$0xff] }
  0x95   : > { %893 = vmatpush.msra.mxu2 %v760_v47  ;;  %835 = vmatpush.msra.mxu0 %v759_v49  ;;  %v4013_v11 = vld [vmem:[%s3971_s2 + $0x10] sm:$0xff]  ;;  %v962_v13 = vld [vmem:[#allocation13 + $0xb8] sm:$0xff]  ;;  %v999_v17 = vld [vmem:[#allocation13 + $0x1e0] sm:$0xff] }
  0x96   : > { %922 = vmatpush.msra.mxu3 %v792_v48  ;;  %863 = vmatpush.msra.mxu1 %v793_v50  ;;  %v1001_v12 = vld [vmem:[#allocation13 + $0x1f0] sm:$0xff]  ;;  %v996_v14 = vld [vmem:[#allocation13 + $0x1c8] sm:$0xff]  ;;  %v994_v19 = vld [vmem:[#allocation13 + $0x1b8] sm:$0xff] }
  0x97   : > { %894 = vmatpush.msra.mxu2 %v758_v51  ;;  %836 = vmatpush.msra.mxu0 %v757_v53  ;;  %v4017_v15 = vld [vmem:[%s3971_s2 + $0x18] sm:$0xff]  ;;  %v960_v18 = vld [vmem:[#allocation13 + $0xa8] sm:$0xff]  ;;  %v963_v20 = vld [vmem:[#allocation13 + $0xc0] sm:$0xff] }
  0x98   : > { %923 = vmatpush.msra.mxu3 %v790_v52  ;;  %864 = vmatpush.msra.mxu1 %v791_v54  ;;  %v965_v16 = vld [vmem:[#allocation13 + $0xd0] sm:$0xff]  ;;  %v958_v22 = vld [vmem:[#allocation13 + $0x98] sm:$0xff]  ;;  %v992_v23 = vld [vmem:[#allocation13 + $0x1a8] sm:$0xff] }
  0x99   : > { %895 = vmatpush.msra.mxu2 %v756_v55  ;;  %837 = vmatpush.msra.mxu0 %v755_v57  ;;  %v997_v21 = vld [vmem:[#allocation13 + $0x1d0] sm:$0xff]  ;;  %v995_v25 = vld [vmem:[#allocation13 + $0x1c0] sm:$0xff]  ;;  %v956_v26 = vld [vmem:[#allocation13 + $0x88] sm:$0xff] }
  0x9a   : > { %924 = vmatpush.msra.mxu3 %v788_v56  ;;  %865 = vmatpush.msra.mxu1 %v789_v58  ;;  %v961_v24 = vld [vmem:[#allocation13 + $0xb0] sm:$0xff]  ;;  %v990_v27 = vld [vmem:[#allocation13 + $0x198] sm:$0xff]  ;;  %v959_v29 = vld [vmem:[#allocation13 + $0xa0] sm:$0xff] }
  0x9b   : > { %896 = vmatpush.msra.mxu2 %v754_v59  ;;  %838 = vmatpush.msra.mxu0 %v753_v1  ;;  %v4023_v28 = vld [vmem:[%s3971_s2 + $0x20] sm:$0xff]  ;;  %v993_v30 = vld [vmem:[#allocation13 + $0x1b0] sm:$0xff]  ;;  %v988_v32 = vld [vmem:[#allocation13 + $0x188] sm:$0xff] }
  0x9c   : > { %925 = vmatpush.msra.mxu3 %v786_v60  ;;  %897 = vmatmul.f32.vlgmr.msra.gmra.mxu2 %v4004_v61  ;;  %v954_v31 = vld [vmem:[#allocation13 + $0x78] sm:$0xff]  ;;  %v4028_v33 = vld [vmem:[%s3971_s2 + $0x28] sm:$0xff]  ;;  %v957_v34 = vld [vmem:[#allocation13 + $0x90] sm:$0xff] }
  0x9d   : > { %926 = vmatmul.f32.vlgmr.msra.gmra.mxu3 %v4007_v62  ;;  %1067 = vmatpush.msrb.mxu2 %v970_v63  ;;  %v991_v35 = vld [vmem:[#allocation13 + $0x1a0] sm:$0xff]  ;;  %v952_v36 = vld [vmem:[#allocation13 + $0x68] sm:$0xff]  ;;  %v986_v37 = vld [vmem:[#allocation13 + $0x178] sm:$0xff] }
  0x9e   : > { %1096 = vmatpush.msrb.mxu3 %v1002_v0  ;;  %866 = vmatpush.msra.mxu1 %v787_v2  ;;  %v955_v38 = vld [vmem:[#allocation13 + $0x80] sm:$0xff]  ;;  %v989_v39 = vld [vmem:[#allocation13 + $0x190] sm:$0xff]  ;;  %v950_v40 = vld [vmem:[#allocation13 + $0x58] sm:$0xff] }
  0x9f   : > { %1068 = vmatpush.msrb.mxu2 %v968_v3  ;;  %839 = vmatmul.f32.vlgmr.msra.gmra.mxu0 %v4004_v61  ;;  %v984_v41 = vld [vmem:[#allocation13 + $0x168] sm:$0xff]  ;;  %v953_v42 = vld [vmem:[#allocation13 + $0x70] sm:$0xff]  ;;  %v987_v43 = vld [vmem:[#allocation13 + $0x180] sm:$0xff] }
  0xa0   : > { %1097 = vmatpush.msrb.mxu3 %v1000_v4  ;;  %867 = vmatpush.msra.mxu1 %v785_v5  ;;  %v948_v44 = vld [vmem:[#allocation13 + $0x48] sm:$0xff]  ;;  %v982_v45 = vld [vmem:[#allocation13 + $0x158] sm:$0xff]  ;;  %v951_v47 = vld [vmem:[#allocation13 + $0x60] sm:$0xff] }
  0xa1   : > { %1069 = vmatpush.msrb.mxu2 %v966_v6  ;;  %1009 = vmatpush.msrb.mxu0 %v969_v7  ;;  %v4033_v46 = vld [vmem:[%s3971_s2 + $0x30] sm:$0xff]  ;;  %v946_v49 = vld [vmem:[#allocation13 + $0x38] sm:$0xff]  ;;  %v983_v53 = vld [vmem:[#allocation13 + $0x160] sm:$0xff] }
  0xa2   : > { %1098 = vmatpush.msrb.mxu3 %v998_v8  ;;  %868 = vmatmul.f32.vlgmr.msra.gmra.mxu1 %v4007_v62  ;;  %v985_v48 = vld [vmem:[#allocation13 + $0x170] sm:$0xff]  ;;  %v980_v50 = vld [vmem:[#allocation13 + $0x148] sm:$0xff]  ;;  %v978_v55 = vld [vmem:[#allocation13 + $0x138] sm:$0xff] }
  0xa3   : > { %1070 = vmatpush.msrb.mxu2 %v964_v9  ;;  %1010 = vmatpush.msrb.mxu0 %v967_v10  ;;  %v752_v51 = vld [vmem:[%s3971_s2 + $0x38] sm:$0xff]  ;;  %v944_v54 = vld [vmem:[#allocation13 + $0x28] sm:$0xff]  ;;  %v947_v56 = vld [vmem:[#allocation13 + $0x40] sm:$0xff] }
  0xa4   : > { %900 = vmatmul.f32.gmra.mxu2 %v4013_v11  ;;  %1038 = vmatpush.msrb.mxu1 %v1001_v12  ;;  %v949_v52 = vld [vmem:[#allocation13 + $0x50] sm:$0xff]  ;;  %v942_v58 = vld [vmem:[#allocation13 + $0x18] sm:$0xff]  ;;  %v976_v59 = vld [vmem:[#allocation13 + $0x128] sm:$0xff] }
  0xa5   : > { %1071 = vmatpush.msrb.mxu2 %v962_v13  ;;  %1099 = vmatpush.msrb.mxu3 %v996_v14  ;;  %v981_v57 = vld [vmem:[#allocation13 + $0x150] sm:$0xff]  ;;  %v979_v63 = vld [vmem:[#allocation13 + $0x140] sm:$0xff]  ;;  %v940_v0 = vld [vmem:[#allocation13 + $0x8] sm:$0xff] }
  0xa6   : > { %929 = vmatmul.f32.gmra.mxu3 %v4017_v15  ;;  %1011 = vmatpush.msrb.mxu0 %v965_v16  ;;  %v945_v60 = vld [vmem:[#allocation13 + $0x30] sm:$0xff]  ;;  %v974_v1 = vld [vmem:[#allocation13 + $0x118] sm:$0xff]  ;;  %v943_v2 = vld [vmem:[#allocation13 + $0x20] sm:$0xff] }
  0xa7   : > { %1039 = vmatpush.msrb.mxu1 %v999_v17  ;;  %1072 = vmatpush.msrb.mxu2 %v960_v18  ;;  %v977_v3 = vld [vmem:[#allocation13 + $0x130] sm:$0xff]  ;;  %v972_v4 = vld [vmem:[#allocation13 + $0x108] sm:$0xff]  ;;  %v975_v6 = vld [vmem:[#allocation13 + $0x120] sm:$0xff] }
  0xa8   : > { %1100 = vmatpush.msrb.mxu3 %v994_v19  ;;  %1012 = vmatpush.msrb.mxu0 %v963_v20  ;;  %v941_v5 = vld [vmem:[#allocation13 + $0x10] sm:$0xff]  ;;  %v939_v7 = vld [vmem:[#allocation13] sm:$0xff] }
  0xa9   : > { %1040 = vmatpush.msrb.mxu1 %v997_v21  ;;  %1073 = vmatpush.msrb.mxu2 %v958_v22  ;;  %v973_v8 = vld [vmem:[#allocation13 + $0x110] sm:$0xff]  ;;  %v971_v9 = vld [vmem:[#allocation13 + $0x100] sm:$0xff] }
  0xaa   : > { %1101 = vmatpush.msrb.mxu3 %v992_v23  ;;  %842 = vmatmul.f32.gmra.mxu0 %v4013_v11 }
  0xab   : > { %1013 = vmatpush.msrb.mxu0 %v961_v24  ;;  %1041 = vmatpush.msrb.mxu1 %v995_v25 }
  0xac   : > { %1074 = vmatpush.msrb.mxu2 %v956_v26  ;;  %1102 = vmatpush.msrb.mxu3 %v990_v27 }
  0xad   : > { %871 = vmatmul.f32.gmra.mxu1 %v4017_v15  ;;  %903 = vmatmul.f32.gmra.mxu2 %v4023_v28 }
  0xae   : > { %1014 = vmatpush.msrb.mxu0 %v959_v29  ;;  %1042 = vmatpush.msrb.mxu1 %v993_v30 }
  0xaf   : > { %1075 = vmatpush.msrb.mxu2 %v954_v31  ;;  %1103 = vmatpush.msrb.mxu3 %v988_v32 }
  0xb0   : > { %932 = vmatmul.f32.gmra.mxu3 %v4028_v33  ;;  %1015 = vmatpush.msrb.mxu0 %v957_v34 }
  0xb1   : > { %1043 = vmatpush.msrb.mxu1 %v991_v35  ;;  %1076 = vmatpush.msrb.mxu2 %v952_v36 }
  0xb2   : > { %1104 = vmatpush.msrb.mxu3 %v986_v37  ;;  %1016 = vmatpush.msrb.mxu0 %v955_v38 }
  0xb3   : > { %1044 = vmatpush.msrb.mxu1 %v989_v39  ;;  %1077 = vmatpush.msrb.mxu2 %v950_v40  ;;  %v1003_v40 = vld [vmem:[#allocation14] sm:$0x3] }
  0xb4   : > { %1105 = vmatpush.msrb.mxu3 %v984_v41  ;;  %845 = vmatmul.f32.gmra.mxu0 %v4023_v28 }
  0xb5   : > { %1017 = vmatpush.msrb.mxu0 %v953_v42  ;;  %1045 = vmatpush.msrb.mxu1 %v987_v43 }
  0xb6   : > { %1078 = vmatpush.msrb.mxu2 %v948_v44  ;;  %1106 = vmatpush.msrb.mxu3 %v982_v45  ;;  %v1005_v44 = vperm.slane %v1003_v40, 0  ;;  %v1006_v45 = vperm.slane %v1003_v40, 1 }
  0xb7   : > { %874 = vmatmul.f32.gmra.mxu1 %v4028_v33  ;;  %906 = vmatmul.f32.gmra.mxu2 %v4033_v46 }
  0xb8   : > { %1018 = vmatpush.msrb.mxu0 %v951_v47  ;;  %1046 = vmatpush.msrb.mxu1 %v985_v48 }
  0xb9   : > { %1079 = vmatpush.msrb.mxu2 %v946_v49  ;;  %1107 = vmatpush.msrb.mxu3 %v980_v50 }
  0xba   : > { %935 = vmatmul.f32.gmra.mxu3 %v752_v51  ;;  %1019 = vmatpush.msrb.mxu0 %v949_v52 }
  0xbb   : > { %1047 = vmatpush.msrb.mxu1 %v983_v53  ;;  %1080 = vmatpush.msrb.mxu2 %v944_v54 }
  0xbc   : > { %1108 = vmatpush.msrb.mxu3 %v978_v55  ;;  %1020 = vmatpush.msrb.mxu0 %v947_v56 }
  0xbd   : > { %1048 = vmatpush.msrb.mxu1 %v981_v57  ;;  %1081 = vmatpush.msrb.mxu2 %v942_v58 }
  0xbe   : > { %1109 = vmatpush.msrb.mxu3 %v976_v59  ;;  %848 = vmatmul.f32.gmra.mxu0 %v4033_v46 }
  0xbf   : > { %1021 = vmatpush.msrb.mxu0 %v945_v60  ;;  %1049 = vmatpush.msrb.mxu1 %v979_v63 }
  0xc0   : > { %1082 = vmatpush.msrb.mxu2 %v940_v0  ;;  %1110 = vmatpush.msrb.mxu3 %v974_v1 }
  0xc1   : > { %877 = vmatmul.f32.gmra.mxu1 %v752_v51  ;;  %1022 = vmatpush.msrb.mxu0 %v943_v2 }
  0xc2   : > { %1050 = vmatpush.msrb.mxu1 %v977_v3  ;;  %1083 = vmatmul.f32.vlgmr.msrb.gmra.mxu2 %v4004_v61 }
  0xc3   : > { %1111 = vmatpush.msrb.mxu3 %v972_v4  ;;  %1023 = vmatpush.msrb.mxu0 %v941_v5 }
  0xc4   : > { %1051 = vmatpush.msrb.mxu1 %v975_v6  ;;  %1112 = vmatmul.f32.vlgmr.msrb.gmra.mxu3 %v4007_v62 }
  0xc5   : > { %1024 = vmatpush.msrb.mxu0 %v939_v7 }
  0xc6   : > { %1052 = vmatpush.msrb.mxu1 %v973_v8  ;;  %1025 = vmatmul.f32.vlgmr.msrb.gmra.mxu0 %v4004_v61  ;;  %v817_v61 = vld [vmem:[%s4427_s14] sm:$0x3] }
  0xc7   : > { %v820_v10 = vperm.slane %v817_v61, 1 }
  0xc8   : > { %1053 = vmatpush.msrb.mxu1 %v971_v9 }
  0xc9   : > { %1054 = vmatmul.f32.vlgmr.msrb.gmra.mxu1 %v4007_v62  ;;  %v819_v62 = vperm.slane %v817_v61, 0 }
  0xca   : > { %1086 = vmatmul.f32.gmra.mxu2 %v4013_v11 }
  0xcc   : > { %1115 = vmatmul.f32.gmra.mxu3 %v4017_v15 }
  0xce   : > { %1028 = vmatmul.f32.gmra.mxu0 %v4013_v11 }
  0xd1   : > { %1057 = vmatmul.f32.gmra.mxu1 %v4017_v15 }
  0xd2   : > { %1089 = vmatmul.f32.gmra.mxu2 %v4023_v28 }
  0xd4   : > { %1118 = vmatmul.f32.gmra.mxu3 %v4028_v33 }
  0xd6   : > { %1031 = vmatmul.f32.gmra.mxu0 %v4023_v28 }
  0xd9   : > { %1060 = vmatmul.f32.gmra.mxu1 %v4028_v33 }
  0xda   : > { %1092 = vmatmul.f32.gmra.mxu2 %v4033_v46 }
  0xdc   : > { %1121 = vmatmul.f32.gmra.mxu3 %v752_v51 }
  0xde   : > { %1034 = vmatmul.f32.gmra.mxu0 %v4033_v46 }
  0xe1   : > { %1063 = vmatmul.f32.gmra.mxu1 %v752_v51 }
 0x11c   : > { %v840_v11 = vpop.f32.mrf.mxu0 }
 0x11d   : > { %v841_v12 = vadd.f32 %v840_v11, %v819_v62 }
 0x11f   : > { %v898_v13 = vpop.f32.mrf.mxu2  ;;  %v869_v14 = vpop.f32.mrf.mxu1 }
 0x120   : > { %v899_v15 = vadd.f32 %v898_v13, %v820_v10  ;;  %v870_v16 = vadd.f32 %v869_v14, %v841_v12  ;;  %v927_v17 = vpop.f32.mrf.mxu3 }
 0x122   : > { %1125 = vst [vmem:[#allocation3 + $0x30] sm:$0xff] %v870_v16  ;;  %v928_v18 = vadd.f32 %v927_v17, %v899_v15 }
 0x124   : > { %1134 = vst [vmem:[#allocation3 + $0x8] sm:$0xff] %v928_v18 }
 0x127   : > { %v843_v19 = vpop.f32.mrf.mxu0  ;;  %v901_v20 = vpop.f32.mrf.mxu2 }
 0x128   : > { %v844_v21 = vadd.f32 %v843_v19, %v819_v62  ;;  %v902_v22 = vadd.f32 %v901_v20, %v820_v10 }
 0x129   : > { %v930_v23 = vpop.f32.mrf.mxu3 }
 0x12a   : > { %v872_v24 = vpop.f32.mrf.mxu1  ;;  %v931_v25 = vadd.f32 %v930_v23, %v902_v22 }
 0x12b   : > { %v873_v26 = vadd.f32 %v872_v24, %v844_v21 }
 0x12c   : > { %1135 = vst [vmem:[#allocation3 + $0x20] sm:$0xff] %v931_v25 }
 0x12d   : > { %1126 = vst [vmem:[#allocation3] sm:$0xff] %v873_v26 }
 0x130   : > { %v904_v27 = vpop.f32.mrf.mxu2 }
 0x131   : > { %v846_v28 = vpop.f32.mrf.mxu0  ;;  %v905_v29 = vadd.f32 %v904_v27, %v820_v10 }
 0x132   : > { %v847_v30 = vadd.f32 %v846_v28, %v819_v62 }
 0x133   : > { %v933_v31 = vpop.f32.mrf.mxu3 }
 0x134   : > { %v875_v32 = vpop.f32.mrf.mxu1  ;;  %v934_v33 = vadd.f32 %v933_v31, %v905_v29 }
 0x135   : > { %v876_v34 = vadd.f32 %v875_v32, %v847_v30 }
 0x136   : > { %1136 = vst [vmem:[#allocation3 + $0x28] sm:$0xff] %v934_v33 }
 0x137   : > { %1127 = vst [vmem:[#allocation3 + $0x18] sm:$0xff] %v876_v34 }
 0x13a   : > { %v907_v35 = vpop.f32.mrf.mxu2 }
 0x13b   : > { %v849_v36 = vpop.f32.mrf.mxu0  ;;  %v908_v37 = vadd.f32 %v907_v35, %v820_v10 }
 0x13c   : > { %v850_v38 = vadd.f32 %v849_v36, %v819_v62 }
 0x13d   : > { %v936_v39 = vpop.f32.mrf.mxu3 }
 0x13e   : > { %v878_v41 = vpop.f32.mrf.mxu1  ;;  %v937_v42 = vadd.f32 %v936_v39, %v908_v37 }
 0x13f   : > { %v879_v43 = vadd.f32 %v878_v41, %v850_v38 }
 0x140   : > { %1137 = vst [vmem:[#allocation3 + $0x38] sm:$0xff] %v937_v42 }
 0x141   : > { %1128 = vst [vmem:[#allocation3 + $0x10] sm:$0xff] %v879_v43 }
 0x143   : > { %v1026_v46 = vpop.f32.mrf.mxu0 }
 0x144   : > { %v1027_v47 = vadd.f32 %v1026_v46, %v1005_v44 }
 0x145   : > { %v1084_v48 = vpop.f32.mrf.mxu2 }
 0x146   : > { %v1085_v49 = vadd.f32 %v1084_v48, %v1006_v45  ;;  %v1055_v50 = vpop.f32.mrf.mxu1 }
 0x147   : > { %v1056_v51 = vadd.f32 %v1055_v50, %v1027_v47  ;;  %v1113_v52 = vpop.f32.mrf.mxu3 }
 0x148   : > { %v1114_v53 = vadd.f32 %v1113_v52, %v1085_v49 }
 0x149   : > { %1129 = vst [vmem:[#allocation4] sm:$0xff] %v1056_v51 }
 0x14a   : > { %1139 = vst [vmem:[#allocation4 + $0x28] sm:$0xff] %v1114_v53 }
 0x14b   : > { %v1029_v54 = vpop.f32.mrf.mxu0 }
 0x14c   : > { %v1030_v55 = vadd.f32 %v1029_v54, %v1005_v44 }
 0x14d   : > { %v1087_v56 = vpop.f32.mrf.mxu2 }
 0x14e   : > { %v1088_v57 = vadd.f32 %v1087_v56, %v1006_v45  ;;  %v1058_v58 = vpop.f32.mrf.mxu1 }
 0x14f   : > { %v1059_v59 = vadd.f32 %v1058_v58, %v1030_v55  ;;  %v1116_v60 = vpop.f32.mrf.mxu3 }
 0x150   : > { %v1117_v63 = vadd.f32 %v1116_v60, %v1088_v57 }
 0x151   : > { %1130 = vst [vmem:[#allocation4 + $0x18] sm:$0xff] %v1059_v59 }
 0x152   : > { %1140 = vst [vmem:[#allocation4 + $0x8] sm:$0xff] %v1117_v63 }
 0x153   : > { %v1032_v0 = vpop.f32.mrf.mxu0 }
 0x154   : > { %v1033_v1 = vadd.f32 %v1032_v0, %v1005_v44 }
 0x155   : > { %v1090_v2 = vpop.f32.mrf.mxu2 }
 0x156   : > { %v1091_v3 = vadd.f32 %v1090_v2, %v1006_v45  ;;  %v1061_v4 = vpop.f32.mrf.mxu1 }
 0x157   : > { %v1062_v5 = vadd.f32 %v1061_v4, %v1033_v1  ;;  %v1119_v6 = vpop.f32.mrf.mxu3 }
 0x158   : > { %v1120_v7 = vadd.f32 %v1119_v6, %v1091_v3 }
 0x159   : > { %1131 = vst [vmem:[#allocation4 + $0x10] sm:$0xff] %v1062_v5 }
 0x15a   : > { %1141 = vst [vmem:[#allocation4 + $0x30] sm:$0xff] %v1120_v7 }
 0x15b   : > { %v1035_v8 = vpop.f32.mrf.mxu0 }
 0x15c   : > { %v1036_v9 = vadd.f32 %v1035_v8, %v1005_v44 }
 0x15d   : > { %v1093_v61 = vpop.f32.mrf.mxu2 }
 0x15e   : > { %v1094_v62 = vadd.f32 %v1093_v61, %v1006_v45  ;;  %v1064_v10 = vpop.f32.mrf.mxu1 }
 0x15f   : > { %v1065_v11 = vadd.f32 %v1064_v10, %v1036_v9  ;;  %v1122_v12 = vpop.f32.mrf.mxu3 }
 0x160   : > { %v1123_v13 = vadd.f32 %v1122_v12, %v1094_v62 }
 0x161   : > { %1132 = vst [vmem:[#allocation4 + $0x20] sm:$0xff] %v1065_v11 }
 0x162   : > { %1142 = vst [vmem:[#allocation4 + $0x38] sm:$0xff] %v1123_v13 }
 0x163 PF: > { %v1183_v14 = vld [vmem:[#allocation8 + $0xf0] sm:$0xff]  ;;  %v1184_v15 = vld [vmem:[#allocation8 + $0xf8] sm:$0xff]  ;;  %v1181_v16 = vld [vmem:[#allocation8 + $0xe0] sm:$0xff]  ;;  %s4428_s15 = sld [smem:[#allocation33_spill]]  ;;  %vm1382_vm0 = vcmask 130048  }
 0x164   : > { %1223 = vmatpush.msra.mxu0 %v1183_v14  ;;  %1269 = vmatpush.msra.mxu2 %v1184_v15  ;;  %v1215_v17 = vld [vmem:[#allocation8 + $0x1f0] sm:$0xff]  ;;  %v1182_v18 = vld [vmem:[#allocation8 + $0xe8] sm:$0xff]  ;;  %v1216_v19 = vld [vmem:[#allocation8 + $0x1f8] sm:$0xff]  ;;  %s4429_s20 = sld [smem:[#allocation45_spill]] }
 0x165   : > { %1246 = vmatpush.msra.mxu1 %v1215_v17  ;;  %1292 = vmatpush.msra.mxu3 %v1216_v19  ;;  %v1179_v20 = vld [vmem:[#allocation8 + $0xd0] sm:$0xff]  ;;  %v1213_v21 = vld [vmem:[#allocation8 + $0x1e0] sm:$0xff]  ;;  %v1180_v22 = vld [vmem:[#allocation8 + $0xd8] sm:$0xff]  ;;  %s4430_s5 = sld [smem:[#allocation48_spill]] }
 0x166   : > { %1224 = vmatpush.msra.mxu0 %v1181_v16  ;;  %1270 = vmatpush.msra.mxu2 %v1182_v18  ;;  %v1214_v23 = vld [vmem:[#allocation8 + $0x1e8] sm:$0xff]  ;;  %v1211_v24 = vld [vmem:[#allocation8 + $0x1d0] sm:$0xff]  ;;  %v1177_v25 = vld [vmem:[#allocation8 + $0xc0] sm:$0xff]  ;;  %s4431_s14 = sld [smem:[#allocation49_spill]] }
 0x167   : > { %1247 = vmatpush.msra.mxu1 %v1213_v21  ;;  %1293 = vmatpush.msra.mxu3 %v1214_v23  ;;  %v1178_v26 = vld [vmem:[#allocation8 + $0xc8] sm:$0xff]  ;;  %v1212_v27 = vld [vmem:[#allocation8 + $0x1d8] sm:$0xff]  ;;  %v1209_v28 = vld [vmem:[#allocation8 + $0x1c0] sm:$0xff]  ;;  %s4435_s22 = sld [smem:[#allocation52_spill]] }
 0x168   : > { %1225 = vmatpush.msra.mxu0 %v1179_v20  ;;  %1271 = vmatpush.msra.mxu2 %v1180_v22  ;;  %v1210_v29 = vld [vmem:[#allocation8 + $0x1c8] sm:$0xff]  ;;  %v1175_v30 = vld [vmem:[#allocation8 + $0xb0] sm:$0xff]  ;;  %v1176_v31 = vld [vmem:[#allocation8 + $0xb8] sm:$0xff] }
 0x169   : > { %1248 = vmatpush.msra.mxu1 %v1211_v24  ;;  %1294 = vmatpush.msra.mxu3 %v1212_v27  ;;  %v1207_v32 = vld [vmem:[#allocation8 + $0x1b0] sm:$0xff]  ;;  %v1208_v33 = vld [vmem:[#allocation8 + $0x1b8] sm:$0xff]  ;;  %v1173_v34 = vld [vmem:[#allocation8 + $0xa0] sm:$0xff]  ;;  %s2906_s27 = sshll.u32 %s4428_s15, 4  ;;  %s2927_s3 = sshll.u32 %s4428_s15, 2 }
 0x16a   : > { %1226 = vmatpush.msra.mxu0 %v1177_v25  ;;  %1272 = vmatpush.msra.mxu2 %v1178_v26  ;;  %v1174_v35 = vld [vmem:[#allocation8 + $0xa8] sm:$0xff]  ;;  %v1205_v36 = vld [vmem:[#allocation8 + $0x1a0] sm:$0xff]  ;;  %v1171_v38 = vld [vmem:[#allocation8 + $0x90] sm:$0xff]  ;;  %s1144_s16 = sshra.s32 %s2906_s27, 3  ;;  %s4432_s27 = sld [smem:[#allocation34_spill]] }
 0x16b   : > { %1249 = vmatpush.msra.mxu1 %v1209_v28  ;;  %1295 = vmatpush.msra.mxu3 %v1210_v29  ;;  %v1206_v37 = vld [vmem:[#allocation8 + $0x1a8] sm:$0xff]  ;;  %v1172_v39 = vld [vmem:[#allocation8 + $0x98] sm:$0xff]  ;;  %v1203_v40 = vld [vmem:[#allocation8 + $0x190] sm:$0xff]  ;;  %s2926_s9 = sshll.u32 %s1144_s16, 4  ;;  %s2688_s16 = sshll.u32 %s4000_s10, 4  ;;  %s2689_s16 = int_to_ptr.vmem [resolvable:$true] %s2688_s16 }
 0x16c   : > { %1227 = vmatpush.msra.mxu0 %v1175_v30  ;;  %1273 = vmatpush.msra.mxu2 %v1176_v31  ;;  %v1204_v41 = vld [vmem:[#allocation8 + $0x198] sm:$0xff]  ;;  %v1169_v42 = vld [vmem:[#allocation8 + $0x80] sm:$0xff]  ;;  %v1170_v43 = vld [vmem:[#allocation8 + $0x88] sm:$0xff]  ;;  %s4058_s0 = scalar_lea.vmem %s3971_s2, %s2926_s9 [#allocation5] }
 0x16d   : > { %1250 = vmatpush.msra.mxu1 %v1207_v32  ;;  %1296 = vmatpush.msra.mxu3 %v1208_v33  ;;  %v1201_v44 = vld [vmem:[#allocation8 + $0x180] sm:$0xff]  ;;  %v1202_v45 = vld [vmem:[#allocation8 + $0x188] sm:$0xff]  ;;  %v1167_v46 = vld [vmem:[#allocation8 + $0x70] sm:$0xff] }
 0x16e   : > { %1228 = vmatpush.msra.mxu0 %v1173_v34  ;;  %1274 = vmatpush.msra.mxu2 %v1174_v35  ;;  %v1168_v47 = vld [vmem:[#allocation8 + $0x78] sm:$0xff]  ;;  %v1199_v48 = vld [vmem:[#allocation8 + $0x170] sm:$0xff]  ;;  %v1165_v50 = vld [vmem:[#allocation8 + $0x60] sm:$0xff] }
 0x16f   : > { %1251 = vmatpush.msra.mxu1 %v1205_v36  ;;  %1297 = vmatpush.msra.mxu3 %v1206_v37  ;;  %v1200_v49 = vld [vmem:[#allocation8 + $0x178] sm:$0xff]  ;;  %v1166_v51 = vld [vmem:[#allocation8 + $0x68] sm:$0xff]  ;;  %v1197_v52 = vld [vmem:[#allocation8 + $0x160] sm:$0xff] }
 0x170   : > { %1229 = vmatpush.msra.mxu0 %v1171_v38  ;;  %1275 = vmatpush.msra.mxu2 %v1172_v39  ;;  %v1198_v53 = vld [vmem:[#allocation8 + $0x168] sm:$0xff]  ;;  %v1163_v54 = vld [vmem:[#allocation8 + $0x50] sm:$0xff]  ;;  %v1164_v55 = vld [vmem:[#allocation8 + $0x58] sm:$0xff]  ;;  %s2921_s2 = sshll.u32 %s4432_s27, 3 }
 0x171   : > { %1252 = vmatpush.msra.mxu1 %v1203_v40  ;;  %1298 = vmatpush.msra.mxu3 %v1204_v41  ;;  %v1195_v56 = vld [vmem:[#allocation8 + $0x150] sm:$0xff]  ;;  %v1196_v57 = vld [vmem:[#allocation8 + $0x158] sm:$0xff]  ;;  %v1161_v58 = vld [vmem:[#allocation8 + $0x40] sm:$0xff]  ;;  %s2685_s8 = sadd.s32 %s2927_s3, %s2921_s2  ;;  %s3536_s2 = scalar_lea.hbm %s4435_s22, 128 }
 0x172   : > { %1230 = vmatpush.msra.mxu0 %v1169_v42  ;;  %1276 = vmatpush.msra.mxu2 %v1170_v43  ;;  %v1162_v59 = vld [vmem:[#allocation8 + $0x48] sm:$0xff]  ;;  %v1193_v60 = vld [vmem:[#allocation8 + $0x140] sm:$0xff]  ;;  %v1159_v0 = vld [vmem:[#allocation8 + $0x30] sm:$0xff]  ;;  %s2922_s15 = sshll.u32 %s2685_s8, 3 }
 0x173   : > { %1253 = vmatpush.msra.mxu1 %v1201_v44  ;;  %1299 = vmatpush.msra.mxu3 %v1202_v45  ;;  %v1194_v63 = vld [vmem:[#allocation8 + $0x148] sm:$0xff]  ;;  %v1160_v1 = vld [vmem:[#allocation8 + $0x38] sm:$0xff]  ;;  %v1191_v2 = vld [vmem:[#allocation8 + $0x130] sm:$0xff]  ;;  %s2687_s27 = scalar_lea.hbm %s4435_s22, %s2922_s15 }
 0x174   : > { %1231 = vmatpush.msra.mxu0 %v1167_v46  ;;  %1277 = vmatpush.msra.mxu2 %v1168_v47  ;;  %v1192_v3 = vld [vmem:[#allocation8 + $0x138] sm:$0xff]  ;;  %v1157_v4 = vld [vmem:[#allocation8 + $0x20] sm:$0xff]  ;;  %v1158_v5 = vld [vmem:[#allocation8 + $0x28] sm:$0xff]  ;;  %s2690_s9 = sshll.u32 %s2687_s27, 4  ;;  %s2691_s9 = int_to_ptr.hbm [resolvable:$true] %s2690_s9 }
 0x175   : > { %1254 = vmatpush.msra.mxu1 %v1199_v48  ;;  %1300 = vmatpush.msra.mxu3 %v1200_v49  ;;  %v1189_v6 = vld [vmem:[#allocation8 + $0x120] sm:$0xff]  ;;  %v1190_v7 = vld [vmem:[#allocation8 + $0x128] sm:$0xff]  ;;  %v1155_v8 = vld [vmem:[#allocation8 + $0x10] sm:$0xff]  ;;  %s3530_s25 = sshra.s32 %s2691_s9, 4  ;;  %s3531_s25 = int_to_ptr.hbm [resolvable:$true] %s3530_s25 }
 0x176   : > { %1232 = vmatpush.msra.mxu0 %v1165_v50  ;;  %1278 = vmatpush.msra.mxu2 %v1166_v51  ;;  %v1156_v9 = vld [vmem:[#allocation8 + $0x18] sm:$0xff]  ;;  %v1187_v61 = vld [vmem:[#allocation8 + $0x110] sm:$0xff]  ;;  %v1153_v10 = vld [vmem:[#allocation8] sm:$0xff]  ;;  %s3532_s24 = scalar_lea.hbm %s3531_s25, 32  ;;  %p3537_p13 = scmp.lt.s32.totalorder %s3531_s25, %s4435_s22 }
 0x177   : > { %1255 = vmatpush.msra.mxu1 %v1197_v52  ;;  %1301 = vmatpush.msra.mxu3 %v1198_v53  ;;  %v1188_v62 = vld [vmem:[#allocation8 + $0x118] sm:$0xff]  ;;  %v1154_v11 = vld [vmem:[#allocation8 + $0x8] sm:$0xff]  ;;  %v4061_v12 = vld [vmem:[%s4058_s0] sm:$0xff]  ;;  %p3533_p7 = scmp.ne.s32.totalorder %s3531_s25, %s3532_s24  ;;  %p3538_p0 = scmp.lt.s32.totalorder %s3536_s2, %s3532_s24 }
 0x178   : > { %1233 = vmatpush.msra.mxu0 %v1163_v54  ;;  %1279 = vmatpush.msra.mxu2 %v1164_v55  ;;  %v1185_v13 = vld [vmem:[#allocation8 + $0x100] sm:$0xff]  ;;  %v1186_v14 = vld [vmem:[#allocation8 + $0x108] sm:$0xff]  ;;  %v1328_v18 = vld [vmem:[#allocation3 + $0x30] sm:$0xff] }
 0x179   : > { %1256 = vmatpush.msra.mxu1 %v1195_v56  ;;  %1302 = vmatpush.msra.mxu3 %v1196_v57  ;;  %v4064_v15 = vld [vmem:[%s4058_s0 + $0x8] sm:$0xff]  ;;  %v1329_v16 = vld [vmem:[#allocation3] sm:$0xff]  ;;  %v4071_v19 = vld [vmem:[%s4058_s0 + $0x10] sm:$0xff]  ;;  %p3534_p10 = pnand %p3533_p7, %p3938_p4  ;;  %p3539_p2 = por %p3538_p0, %p3537_p13 }
 0x17a   : > { %1234 = vmatpush.msra.mxu0 %v1161_v58  ;;  %1280 = vmatpush.msra.mxu2 %v1162_v59  ;;  %v1331_v17 = vld [vmem:[#allocation3 + $0x20] sm:$0xff]  ;;  %v4074_v20 = vld [vmem:[%s4058_s0 + $0x18] sm:$0xff]  ;;  %v1330_v21 = vld [vmem:[#allocation3 + $0x8] sm:$0xff]  ;;  %s4433_s0 = sld [smem:[#allocation50_spill]] }
 0x17b   : > { %1257 = vmatpush.msra.mxu1 %v1193_v60  ;;  %1303 = vmatpush.msra.mxu3 %v1194_v63  ;;  %v1502_v22 = vld [vmem:[#allocation3 + $0x10] sm:$0xff]  ;;  %v1501_v23 = vld [vmem:[#allocation3 + $0x18] sm:$0xff]  ;;  %v1503_v25 = vld [vmem:[#allocation3 + $0x28] sm:$0xff]  ;;  %p3535_p11 = pneg %p3534_p10 }
 0x17c   : > { %1235 = vmatpush.msra.mxu0 %v1159_v0  ;;  %1281 = vmatpush.msra.mxu2 %v1160_v1  ;;  %v1504_v24 = vld [vmem:[#allocation3 + $0x38] sm:$0xff]  ;;  %v1217_v26 = vld [vmem:[#allocation10] sm:$0x3] }
 0x17d   : > { %1258 = vmatpush.msra.mxu1 %v1191_v2  ;;  %1304 = vmatpush.msra.mxu3 %v1192_v3  ;;  %v1219_v27 = vperm.slane %v1217_v26, 0  ;;  %v1220_v32 = vperm.slane %v1217_v26, 1  ;;  %v1333_v50 = vld [vmem:[#allocation4 + $0x18] sm:$0xff]  ;;  %p3540_p5 = pnand %p3539_p2, %p3535_p11 }
 0x17e   : > { %1236 = vmatpush.msra.mxu0 %v1157_v4  ;;  %1282 = vmatpush.msra.mxu2 %v1158_v5  ;;  %v1335_v4 = vld [vmem:[#allocation4 + $0x8] sm:$0xff]  ;;  %v1332_v5 = vld [vmem:[#allocation4] sm:$0xff] }
 0x17f   : > { %1259 = vmatpush.msra.mxu1 %v1189_v6  ;;  %1305 = vmatpush.msra.mxu3 %v1190_v7  ;;  %v1334_v6 = vld [vmem:[#allocation4 + $0x28] sm:$0xff]  ;;  %v1506_v7 = vld [vmem:[#allocation4 + $0x20] sm:$0xff] }
 0x180   : > { %1237 = vmatpush.msra.mxu0 %v1155_v8  ;;  %1283 = vmatpush.msra.mxu2 %v1156_v9  ;;  %v1508_v8 = vld [vmem:[#allocation4 + $0x38] sm:$0xff]  ;;  %v1505_v9 = vld [vmem:[#allocation4 + $0x10] sm:$0xff] }
 0x181   : > { %1260 = vmatpush.msra.mxu1 %v1187_v61  ;;  %1306 = vmatpush.msra.mxu3 %v1188_v62 }
 0x182   : > { %1238 = vmatpush.msra.mxu0 %v1153_v10  ;;  %1284 = vmatpush.msra.mxu2 %v1154_v11  ;;  %v1507_v10 = vld [vmem:[#allocation4 + $0x30] sm:$0xff] }
 0x183   : > { %1239 = vmatmul.f32.vlgmr.msra.gmra.mxu0 %v4061_v12  ;;  %1285 = vmatmul.f32.vlgmr.msra.gmra.mxu2 %v4061_v12 }
 0x184   : > { %1261 = vmatpush.msra.mxu1 %v1185_v13  ;;  %1307 = vmatpush.msra.mxu3 %v1186_v14 }
 0x185   : > { %1262 = vmatmul.f32.vlgmr.msra.gmra.mxu1 %v4064_v15  ;;  %1308 = vmatmul.f32.vlgmr.msra.gmra.mxu3 %v4064_v15 }
 0x186   : > { %1350 = vmatpush.xpose.msrb.mxu0 %v1329_v16  ;;  %1373 = vmatpush.xpose.msrb.mxu1 %v1331_v17 }
 0x187   : > { %1459 = vmatpush.msrb.mxu2 %v1333_v50  ;;  %1488 = vmatpush.msrb.mxu3 %v1335_v4  ;;  %v1716_v4 = vld [vmem:[#allocation16 + $0xd8] sm:$0xff] }
 0x189   : > { %1460 = vmatpush.msrb.mxu2 %v1332_v5  ;;  %1489 = vmatpush.msrb.mxu3 %v1334_v6  ;;  %v1713_v5 = vld [vmem:[#allocation16 + $0xc0] sm:$0xff]  ;;  %v1714_v6 = vld [vmem:[#allocation16 + $0xc8] sm:$0xff] }
 0x18a   : > { %1351 = vmatpush.xpose.msrb.mxu0 %v1328_v18  ;;  %1374 = vmatpush.xpose.msrb.mxu1 %v1330_v21 }
 0x18b   : > { %1242 = vmatmul.f32.gmra.mxu0 %v4071_v19  ;;  %1288 = vmatmul.f32.gmra.mxu2 %v4071_v19 }
 0x18c   : > { %1639 = vmatpush.msra.mxu2 %v1506_v7  ;;  %1668 = vmatpush.msra.mxu3 %v1508_v8  ;;  %v1752_v8 = vld [vmem:[#allocation16 + $0x1f0] sm:$0xff] }
 0x18d   : > { %1265 = vmatmul.f32.gmra.mxu1 %v4074_v20  ;;  %1311 = vmatmul.f32.gmra.mxu3 %v4074_v20 }
 0x18e   : > { %1523 = vmatpush.xpose.msra.mxu0 %v1502_v22  ;;  %1546 = vmatpush.xpose.msra.mxu1 %v1504_v24 }
 0x18f   : > { %1640 = vmatpush.msra.mxu2 %v1505_v9  ;;  %1669 = vmatpush.msra.mxu3 %v1507_v10  ;;  %v1753_v9 = vld [vmem:[#allocation16 + $0x1f8] sm:$0xff] }
 0x190   : > { %v1712_v10 = vld [vmem:[#allocation16 + $0xb8] sm:$0xff] }
 0x192   : > { %1524 = vmatpush.xpose.msra.mxu0 %v1501_v23  ;;  %1547 = vmatpush.xpose.msra.mxu1 %v1503_v25 }
 0x200   : > { %v1240_v28 = vpop.f32.mrf.mxu0 }
 0x201   : > { %v1241_v29 = vadd.f32 %v1240_v28, %v1219_v27 }
 0x202   : > { %v1263_v30 = vpop.f32.mrf.mxu1 }
 0x203   : > { %v1264_v31 = vadd.f32 %v1263_v30, %v1241_v29 }
 0x205   : > { %v1315_v33 = vmul.f32 0.088388346, %v1264_v31 }
 0x206   : > { %v1286_v34 = vpop.f32.mrf.mxu2 }
 0x207   : > { %v1287_v35 = vadd.f32 %v1286_v34, %v1220_v32  ;;  %1352 = vmatmul.f32.vlgmr.msrb.gmra.mxu0 %v1315_v33 }
 0x208   : > { %v1243_v36 = vpop.f32.mrf.mxu0  ;;  %v1309_v37 = vpop.f32.mrf.mxu3  ;;  %1754 = vmatpush.msrb.mxu0 %v1752_v8 }
 0x209   : > { %v1244_v38 = vadd.f32 %v1243_v36, %v1219_v27  ;;  %v1310_v39 = vadd.f32 %v1309_v37, %v1287_v35 }
 0x20a   : > { %v1266_v40 = vpop.f32.mrf.mxu1 }
 0x20b   : > { %v1316_v41 = vmul.f32 0.088388346, %v1310_v39  ;;  %v1267_v42 = vadd.f32 %v1266_v40, %v1244_v38 }
 0x20d   : > { %v1317_v43 = vmul.f32 0.088388346, %v1267_v42  ;;  %1375 = vmatmul.f32.vlgmr.msrb.gmra.mxu1 %v1316_v41 }
 0x20e   : > { %v1289_v44 = vpop.f32.mrf.mxu2  ;;  %1777 = vmatpush.msrb.mxu1 %v1753_v9  ;;  %v1732_v9 = vld [vmem:[#allocation16 + $0x150] sm:$0xff] }
 0x20f   : > { %v1290_v45 = vadd.f32 %v1289_v44, %v1220_v32  ;;  %1355 = vmatmul.f32.gmra.mxu0 %v1317_v43 }
 0x210   : > { %v1312_v46 = vpop.f32.mrf.mxu3 }
 0x211   : > { %v1313_v47 = vadd.f32 %v1312_v46, %v1290_v45 }
 0x213   : > { %v1318_v48 = vmul.f32 0.088388346, %v1313_v47 }
 0x215   : > { %1378 = vmatmul.f32.gmra.mxu1 %v1318_v48 }
 0x217   : > { %1525 = vmatmul.f32.vlgmr.msra.gmra.mxu0 %v1315_v33 }
 0x21d   : > { %1548 = vmatmul.f32.vlgmr.msra.gmra.mxu1 %v1316_v41 }
 0x21f   : > { %1528 = vmatmul.f32.gmra.mxu0 %v1317_v43 }
 0x225   : > { %1551 = vmatmul.f32.gmra.mxu1 %v1318_v48 }
 0x284   : > { %v1353_v49 = vpop.f32.mrf.mxu0 }
 0x285   : > { %v1383_v51 = vsel %vm1382_vm0, %v1353_v49, -inf }
 0x286   : > { %1384 = vmax.xlane.f32.xlu0 %v1383_v51 }
 0x28a   : > { %v1376_v52 = vpop.f32.mrf.mxu1 }
 0x28b   : > { %v1389_v53 = vsel %vm1382_vm0, %v1376_v52, -inf }
 0x28c   : > { %v1356_v54 = vpop.f32.mrf.mxu0 }
 0x28d   : > { %v1386_v55 = vsel %vm1382_vm0, %v1356_v54, -inf }
 0x28e   : > { %1390 = vmax.xlane.f32.xlu0 %v1389_v53  ;;  %1387 = vmax.xlane.f32.xlu1 %v1386_v55 }
 0x292   : > { %v1379_v56 = vpop.f32.mrf.mxu1 }
 0x293   : > { %v1392_v57 = vsel %vm1382_vm0, %v1379_v56, -inf }
 0x294   : > { %v1526_v58 = vpop.f32.mrf.mxu0 }
 0x295   : > { %v1555_v59 = vsel %vm1382_vm0, %v1526_v58, -inf }
 0x296   : > { %1556 = vmax.xlane.f32.xlu2 %v1555_v59  ;;  %1393 = vmax.xlane.f32.xlu1 %v1392_v57 }
 0x29a   : > { %v4085_v60 = vpop.f32.mrf.mxu1 }
 0x29b   : > { %v1561_v0 = vsel %vm1382_vm0, %v4085_v60, -inf }
 0x29c   : > { %v4087_v63 = vpop.f32.mrf.mxu0 }
 0x29d   : > { %v1558_v1 = vsel %vm1382_vm0, %v4087_v63, -inf }
 0x29e   : > { %1562 = vmax.xlane.f32.xlu2 %v1561_v0  ;;  %1559 = vmax.xlane.f32.xlu0 %v1558_v1  ;;  %v1720_v0 = vld [vmem:[#allocation16 + $0xf8] sm:$0xff]  ;;  %v1717_v1 = vld [vmem:[#allocation16 + $0xe0] sm:$0xff] }
 0x2a2   : > { %v4093_v2 = vpop.f32.mrf.mxu1 }
 0x2a3   : > { %v1564_v3 = vsel %vm1382_vm0, %v4093_v2, -inf }
 0x2a4   : > { %1565 = vmax.xlane.f32.xlu1 %v1564_v3  ;;  %v1715_v3 = vld [vmem:[#allocation16 + $0xd0] sm:$0xff] }
 0x2f9   : > { %v4097_v61 = vpop.xlane.xlu0 %1384 }
 0x2fa   : > { %v1407_v62 = vsub.f32 %v1353_v49, %v4097_v61  ;;  %v1395_v7 = vsub.f32 -inf, %v4097_v61 }
 0x2fc   : > { %v1411_v11 = vmul.f32 1.442695, %v1407_v62  ;;  %v1711_v62 = vld [vmem:[#allocation16 + $0xb0] sm:$0xff] }
 0x2fe   : > { %3136 = vpow2.f32 %v1411_v11  ;;  %v1399_v11 = vmul.f32 1.442695, %v1395_v7  ;;  %v1735_v7 = vld [vmem:[#allocation16 + $0x168] sm:$0xff] }
 0x301   : > { %v4100_v13 = vpop.xlane.xlu0 %1390  ;;  %v4102_v14 = vpop.xlane.xlu1 %1387 }
 0x302   : > { %v1409_v16 = vsub.f32 %v1376_v52, %v4100_v13  ;;  %v1408_v17 = vsub.f32 %v1356_v54, %v4102_v14 }
 0x304   : > { %v3137_v18 = vpop.eup %3136  ;;  %v1415_v21 = vmul.f32 1.442695, %v1409_v16  ;;  %v1413_v22 = vmul.f32 1.442695, %v1408_v17  ;;  %v1750_v16 = vld [vmem:[#allocation16 + $0x1e0] sm:$0xff]  ;;  %v1751_v17 = vld [vmem:[#allocation16 + $0x1e8] sm:$0xff] }
 0x305   : > { %2909 = vmatmul.msk.f32.vlgmr.msrb.gmra.mxu2 %vm1382_vm0, %v3137_v18  ;;  %v1423_v23 = vsel %vm1382_vm0, %v3137_v18, 0.0  ;;  %v1709_v18 = vld [vmem:[#allocation16 + $0xa0] sm:$0xff]  ;;  %1755 = vmatpush.msrb.mxu0 %v1750_v16 }
 0x306   : > { %3138 = vpow2.f32 %v1415_v21  ;;  %1424 = vadd.xlane.f32.xlu2 %v1423_v23  ;;  %1778 = vmatpush.msrb.mxu1 %v1751_v17  ;;  %v1710_v21 = vld [vmem:[#allocation16 + $0xa8] sm:$0xff]  ;;  %v1749_v23 = vld [vmem:[#allocation16 + $0x1d8] sm:$0xff]  ;;  %v1730_v16 = vld [vmem:[#allocation16 + $0x140] sm:$0xff] }
 0x307   : > { %3140 = vpow2.f32 %v1413_v22  ;;  %v1748_v22 = vld [vmem:[#allocation16 + $0x1d0] sm:$0xff]  ;;  %v1731_v17 = vld [vmem:[#allocation16 + $0x148] sm:$0xff] }
 0x308   : > { %1756 = vmatpush.msrb.mxu0 %v1748_v22  ;;  %1779 = vmatpush.msrb.mxu1 %v1749_v23  ;;  %v1690_v22 = vld [vmem:[#allocation16 + $0x8] sm:$0xff]  ;;  %v1728_v23 = vld [vmem:[#allocation16 + $0x130] sm:$0xff] }
 0x309   : > { %v1557_v24 = vpop.xlane.xlu2 %1556  ;;  %v4108_v25 = vpop.xlane.xlu1 %1393 }
 0x30a   : > { %v4111_v26 = vmax.f32 %v4097_v61, %v1557_v24  ;;  %v1410_v27 = vsub.f32 %v1379_v56, %v4108_v25  ;;  %v1707_v24 = vld [vmem:[#allocation16 + $0x90] sm:$0xff] }
 0x30c   : > { %v3139_v28 = vpop.eup %3138  ;;  %v1571_v29 = vsub.f32 %v4097_v61, %v4111_v26  ;;  %v1583_v30 = vsub.f32 %v1526_v58, %v4111_v26  ;;  %v1417_v31 = vmul.f32 1.442695, %v1410_v27  ;;  %v1397_v27 = vsub.f32 -inf, %v4100_v13  ;;  %v1740_v26 = vld [vmem:[#allocation16 + $0x190] sm:$0xff] }
 0x30d   : > { %v3141_v32 = vpop.eup %3140  ;;  %2911 = vmatmul.msk.f32.vlgmr.msrb.gmra.mxu3 %vm1382_vm0, %v3139_v28  ;;  %v1429_v33 = vsel %vm1382_vm0, %v3139_v28, 0.0  ;;  %v1708_v28 = vld [vmem:[#allocation16 + $0x98] sm:$0xff] }
 0x30e   : > { %v1587_v34 = vmul.f32 1.442695, %v1583_v30  ;;  %3142 = vpow2.f32 %v1417_v31  ;;  %2910 = vmatmul.msk.f32.gmra.mxu2 %vm1382_vm0, %v3141_v32  ;;  %1430 = vadd.xlane.f32.xlu1 %v1429_v33  ;;  %v1426_v35 = vsel %vm1382_vm0, %v3141_v32, 0.0  ;;  %v1746_v30 = vld [vmem:[#allocation16 + $0x1c0] sm:$0xff]  ;;  %v1747_v31 = vld [vmem:[#allocation16 + $0x1c8] sm:$0xff]  ;;  %v1396_v32 = vsub.f32 -inf, %v4102_v14 }
 0x30f   : > { %1427 = vadd.xlane.f32.xlu2 %v1426_v35  ;;  %1823 = vmatpush.msrb.mxu3 %v1720_v0  ;;  %v1705_v33 = vld [vmem:[#allocation16 + $0x80] sm:$0xff]  ;;  %v1575_v35 = vmul.f32 1.442695, %v1571_v29  ;;  %v1741_v29 = vld [vmem:[#allocation16 + $0x198] sm:$0xff]  ;;  %v1736_v0 = vld [vmem:[#allocation16 + $0x170] sm:$0xff] }
 0x310   : > { %3144 = vpow2.f32 %v1587_v34  ;;  %v1706_v34 = vld [vmem:[#allocation16 + $0x88] sm:$0xff]  ;;  %1757 = vmatpush.msrb.mxu0 %v1746_v30  ;;  %1780 = vmatpush.msrb.mxu1 %v1747_v31 }
 0x311   : > { %v1563_v36 = vpop.xlane.xlu2 %1562  ;;  %v1560_v37 = vpop.xlane.xlu0 %1559 }
 0x312   : > { %v4122_v38 = vmax.f32 %v4100_v13, %v1563_v36  ;;  %v4125_v39 = vmax.f32 %v4102_v14, %v1560_v37  ;;  %v1744_v36 = vld [vmem:[#allocation16 + $0x1b0] sm:$0xff]  ;;  %v1745_v37 = vld [vmem:[#allocation16 + $0x1b8] sm:$0xff] }
 0x313   : > { %1758 = vmatpush.msrb.mxu0 %v1744_v36  ;;  %1781 = vmatpush.msrb.mxu1 %v1745_v37  ;;  %v1726_v37 = vld [vmem:[#allocation16 + $0x120] sm:$0xff] }
 0x314   : > { %v3143_v40 = vpop.eup %3142  ;;  %v1573_v41 = vsub.f32 %v4100_v13, %v4122_v38  ;;  %v1585_v42 = vsub.f32 %v4085_v60, %v4122_v38  ;;  %v1572_v43 = vsub.f32 %v4102_v14, %v4125_v39  ;;  %v1584_v44 = vsub.f32 %v4087_v63, %v4125_v39  ;;  %v1719_v63 = vld [vmem:[#allocation16 + $0xf0] sm:$0xff]  ;;  %v1693_v14 = vld [vmem:[#allocation16 + $0x20] sm:$0xff] }
 0x315   : > { %2912 = vmatmul.msk.f32.gmra.mxu3 %vm1382_vm0, %v3143_v40  ;;  %v1432_v45 = vsel %vm1382_vm0, %v3143_v40, 0.0  ;;  %1800 = vmatpush.msrb.mxu2 %v1719_v63  ;;  %v1703_v40 = vld [vmem:[#allocation16 + $0x70] sm:$0xff]  ;;  %v1698_v63 = vld [vmem:[#allocation16 + $0x48] sm:$0xff] }
 0x316   : > { %v1591_v46 = vmul.f32 1.442695, %v1585_v42  ;;  %v3145_v47 = vpop.eup %3144  ;;  %v1589_v48 = vmul.f32 1.442695, %v1584_v44  ;;  %v1403_v42 = vmul.f32 1.442695, %v1397_v27 }
 0x317   : > { %1433 = vadd.xlane.f32.xlu2 %v1432_v45  ;;  %v1566_v49 = vpop.xlane.xlu1 %1565  ;;  %2913 = vmatmul.msk.f32.vlgmr.msra.gmra.mxu2 %vm1382_vm0, %v3145_v47  ;;  %v1599_v51 = vsel %vm1382_vm0, %v3145_v47, 0.0  ;;  %v1704_v44 = vld [vmem:[#allocation16 + $0x78] sm:$0xff]  ;;  %v1742_v45 = vld [vmem:[#allocation16 + $0x1a0] sm:$0xff]  ;;  %v1401_v47 = vmul.f32 1.442695, %v1396_v32 }
 0x318   : > { %v4139_v50 = vmax.f32 %v4108_v25, %v1566_v49  ;;  %3146 = vpow2.f32 %v1591_v46  ;;  %1600 = vadd.xlane.f32.xlu0 %v1599_v51  ;;  %1801 = vmatpush.msrb.mxu2 %v1717_v1  ;;  %v1743_v46 = vld [vmem:[#allocation16 + $0x1a8] sm:$0xff]  ;;  %v1699_v51 = vld [vmem:[#allocation16 + $0x50] sm:$0xff]  ;;  %v1737_v1 = vld [vmem:[#allocation16 + $0x178] sm:$0xff] }
 0x319   : > { %3148 = vpow2.f32 %v1589_v48  ;;  %v1701_v48 = vld [vmem:[#allocation16 + $0x60] sm:$0xff]  ;;  %v1702_v49 = vld [vmem:[#allocation16 + $0x68] sm:$0xff]  ;;  %1759 = vmatpush.msrb.mxu0 %v1742_v45  ;;  %1782 = vmatpush.msrb.mxu1 %v1743_v46  ;;  %v1724_v45 = vld [vmem:[#allocation16 + $0x110] sm:$0xff] }
 0x31a   : > { %v1574_v52 = vsub.f32 %v4108_v25, %v4139_v50  ;;  %v1586_v53 = vsub.f32 %v4093_v2, %v4139_v50  ;;  %v1718_v2 = vld [vmem:[#allocation16 + $0xe8] sm:$0xff]  ;;  %1802 = vmatpush.msrb.mxu2 %v1715_v3  ;;  %v1722_v50 = vld [vmem:[#allocation16 + $0x100] sm:$0xff] }
 0x31b   : > { %1824 = vmatpush.msrb.mxu3 %v1718_v2  ;;  %1760 = vmatpush.msrb.mxu0 %v1740_v26  ;;  %v1577_v2 = vmul.f32 1.442695, %v1572_v43  ;;  %v1694_v43 = vld [vmem:[#allocation16 + $0x28] sm:$0xff] }
 0x31c   : > { %v1593_v54 = vmul.f32 1.442695, %v1586_v53  ;;  %1803 = vmatpush.msrb.mxu2 %v1713_v5  ;;  %1783 = vmatpush.msrb.mxu1 %v1741_v29  ;;  %v1700_v53 = vld [vmem:[#allocation16 + $0x58] sm:$0xff]  ;;  %v1581_v30 = vmul.f32 1.442695, %v1574_v52  ;;  %v1723_v52 = vld [vmem:[#allocation16 + $0x108] sm:$0xff] }
 0x31d   : > { %1825 = vmatpush.msrb.mxu3 %v1716_v4  ;;  %v1695_v4 = vld [vmem:[#allocation16 + $0x30] sm:$0xff]  ;;  %v1696_v5 = vld [vmem:[#allocation16 + $0x38] sm:$0xff] }
 0x31e   : > { %v3147_v55 = vpop.eup %3146  ;;  %3150 = vpow2.f32 %v1593_v54  ;;  %1804 = vmatpush.msrb.mxu2 %v1711_v62  ;;  %v1733_v62 = vld [vmem:[#allocation16 + $0x158] sm:$0xff] }
 0x31f   : > { %2915 = vmatmul.msk.f32.vlgmr.msra.gmra.mxu3 %vm1382_vm0, %v3147_v55  ;;  %v1605_v56 = vsel %vm1382_vm0, %v3147_v55, 0.0  ;;  %v3149_v57 = vpop.eup %3148  ;;  %3152 = vpow2.f32 %v1399_v11  ;;  %v1398_v55 = vsub.f32 -inf, %v4108_v25  ;;  %v1692_v11 = vld [vmem:[#allocation16 + $0x18] sm:$0xff] }
 0x320   : > { %1606 = vadd.xlane.f32.xlu0 %v1605_v56  ;;  %2914 = vmatmul.msk.f32.gmra.mxu2 %vm1382_vm0, %v3149_v57  ;;  %v1602_v58 = vsel %vm1382_vm0, %v3149_v57, 0.0  ;;  %3154 = vpow2.f32 %v1575_v35  ;;  %v1738_v56 = vld [vmem:[#allocation16 + $0x180] sm:$0xff]  ;;  %v1739_v57 = vld [vmem:[#allocation16 + $0x188] sm:$0xff]  ;;  %v1725_v25 = vld [vmem:[#allocation16 + $0x118] sm:$0xff] }
 0x321   : > { %1603 = vadd.xlane.f32.xlu1 %v1602_v58  ;;  %1826 = vmatpush.msrb.mxu3 %v1714_v6  ;;  %3156 = vpow2.f32 %v1403_v42  ;;  %v1697_v58 = vld [vmem:[#allocation16 + $0x40] sm:$0xff]  ;;  %v1405_v13 = vmul.f32 1.442695, %v1398_v55 }
 0x322   : > { %1805 = vmatpush.msrb.mxu2 %v1709_v18  ;;  %3158 = vpow2.f32 %v1401_v47  ;;  %1761 = vmatpush.msrb.mxu0 %v1738_v56 }
 0x323   : > { %1827 = vmatpush.msrb.mxu3 %v1712_v10  ;;  %1784 = vmatpush.msrb.mxu1 %v1739_v57  ;;  %v1691_v10 = vld [vmem:[#allocation16 + $0x10] sm:$0xff] }
 0x324   : > { %v3151_v59 = vpop.eup %3150  ;;  %1806 = vmatpush.msrb.mxu2 %v1707_v24  ;;  %1762 = vmatpush.msrb.mxu0 %v1736_v0 }
 0x325   : > { %v1608_v60 = vsel %vm1382_vm0, %v3151_v59, 0.0  ;;  %1828 = vmatpush.msrb.mxu3 %v1710_v21  ;;  %v3153_v61 = vpop.eup %3152  ;;  %1785 = vmatpush.msrb.mxu1 %v1737_v1  ;;  %v1689_v21 = vld [vmem:[#allocation16] sm:$0xff] }
 0x326   : > { %1807 = vmatpush.msrb.mxu2 %v1705_v33  ;;  %v4158_v54 = vmul.f32 0.0, %v3153_v61  ;;  %v4168_v6 = vpop.eup %3154 }
 0x327   : > { %2916 = vmatmul.msk.f32.gmra.mxu3 %vm1382_vm0, %v3151_v59  ;;  %v1579_v59 = vmul.f32 1.442695, %v1573_v41  ;;  %v1734_v41 = vld [vmem:[#allocation16 + $0x160] sm:$0xff]  ;;  %v3157_v39 = vpop.eup %3156  ;;  %1786 = vmatpush.msrb.mxu1 %v1735_v7 }
 0x328   : > { %1609 = vadd.xlane.f32.xlu0 %v1608_v60  ;;  %1829 = vmatpush.msrb.mxu3 %v1708_v28  ;;  %v3159_v8 = vpop.eup %3158  ;;  %v1421_v18 = vmul.f32 0.0, %v3157_v39  ;;  %v1729_v28 = vld [vmem:[#allocation16 + $0x138] sm:$0xff] }
 0x329   : > { %1808 = vmatpush.msrb.mxu2 %v1703_v40  ;;  %3160 = vpow2.f32 %v1579_v59  ;;  %1763 = vmatpush.msrb.mxu0 %v1734_v41  ;;  %v1420_v24 = vmul.f32 0.0, %v3159_v8  ;;  %v1727_v40 = vld [vmem:[#allocation16 + $0x128] sm:$0xff] }
 0x32a   : > { %1830 = vmatpush.msrb.mxu3 %v1706_v34  ;;  %3162 = vpow2.f32 %v1577_v2  ;;  %1787 = vmatpush.msrb.mxu1 %v1733_v62 }
 0x32b   : > { %1809 = vmatpush.msrb.mxu2 %v1701_v48  ;;  %1764 = vmatpush.msrb.mxu0 %v1732_v9  ;;  %3164 = vpow2.f32 %v1405_v13 }
 0x32c   : > { %1831 = vmatpush.msrb.mxu3 %v1704_v44  ;;  %1788 = vmatpush.msrb.mxu1 %v1731_v17  ;;  %3166 = vpow2.f32 %v1581_v30 }
 0x32d   : > { %1810 = vmatpush.msrb.mxu2 %v1699_v51  ;;  %1765 = vmatpush.msrb.mxu0 %v1730_v16 }
 0x32e   : > { %1832 = vmatpush.msrb.mxu3 %v1702_v49  ;;  %1789 = vmatpush.msrb.mxu1 %v1729_v28 }
 0x32f   : > { %1811 = vmatpush.msrb.mxu2 %v1697_v58  ;;  %v3161_v33 = vpop.eup %3160  ;;  %1766 = vmatpush.msrb.mxu0 %v1728_v23  ;;  %v1846_v23 = vld [vmem:[#allocation17] sm:$0x3] }
 0x330   : > { %1833 = vmatpush.msrb.mxu3 %v1700_v53  ;;  %v3163_v35 = vpop.eup %3162  ;;  %1790 = vmatpush.msrb.mxu1 %v1727_v40  ;;  %v1848_v28 = vperm.slane %v1846_v23, 0  ;;  %v1849_v30 = vperm.slane %v1846_v23, 1 }
 0x331   : > { %1812 = vmatpush.msrb.mxu2 %v1695_v4  ;;  %1767 = vmatpush.msrb.mxu0 %v1726_v37  ;;  %v3165_v44 = vpop.eup %3164 }
 0x332   : > { %1834 = vmatpush.msrb.mxu3 %v1698_v63  ;;  %1791 = vmatpush.msrb.mxu1 %v1725_v25  ;;  %v1422_v48 = vmul.f32 0.0, %v3165_v44  ;;  %v3167_v29 = vpop.eup %3166 }
 0x333   : > { %1813 = vmatpush.msrb.mxu2 %v1693_v14  ;;  %1768 = vmatpush.msrb.mxu0 %v1724_v45 }
 0x334   : > { %1835 = vmatpush.msrb.mxu3 %v1696_v5  ;;  %1792 = vmatpush.msrb.mxu1 %v1723_v52 }
 0x335   : > { %1814 = vmatpush.msrb.mxu2 %v1691_v10  ;;  %1769 = vmatpush.msrb.mxu0 %v1722_v50 }
 0x336   : > { %1836 = vmatpush.msrb.mxu3 %v1694_v43 }
 0x337   : > { %1815 = vmatpush.msrb.mxu2 %v1689_v21 }
 0x338   : > { %1837 = vmatpush.msrb.mxu3 %v1692_v11 }
 0x33a   : > { %1838 = vmatpush.msrb.mxu3 %v1690_v22 }
 0x379   : > { %v1425_v60 = vpop.xlane.xlu2 %1424 }
 0x37a   : > { %v1435_v3 = vadd.f32 %v1425_v60, %v4158_v54 }
 0x37c   : > { %v4171_v38 = vmul.f32 %v4168_v6, %v1435_v3 }
 0x381   : > { %v1431_v27 = vpop.xlane.xlu1 %1430 }
 0x382   : > { %v1428_v31 = vpop.xlane.xlu2 %1427  ;;  %v1437_v32 = vadd.f32 %v1431_v27, %v1421_v18 }
 0x383   : > { %v1436_v34 = vadd.f32 %v1428_v31, %v1420_v24 }
 0x384   : > { %v1597_v36 = vmul.f32 %v3161_v33, %v1437_v32 }
 0x385   : > { %v1596_v42 = vmul.f32 %v3163_v35, %v1436_v34 }
 0x388   : > { %v1462_v46 = vpop.f32.mrf.mxu2 }
 0x389   : > { %v1497_v47 = vadd.f32 %v1462_v46, %v4158_v54 }
 0x38a   : > { %v1434_v49 = vpop.xlane.xlu2 %1433 }
 0x38b   : > { %v1438_v61 = vadd.f32 %v1434_v49, %v1422_v48  ;;  %v1615_v26 = vmul.f32 %v4168_v6, %v1497_v47  ;;  %v1601_v51 = vpop.xlane.xlu0 %1600 }
 0x38c   : > { %v1611_v59 = vadd.f32 %v1601_v51, %v4171_v38 }
 0x38d   : > { %v1598_v53 = vmul.f32 %v3167_v29, %v1438_v61  ;;  %v3672_v61 = vmov 256.0  }
 0x38e   : > { %3168 = vrcp.f32 %v1611_v59  ;;  %v1998_v59 = vld [vmem:[#allocation20 + $0x1e8] sm:$0xff] }
 0x390   : > { %v1491_v55 = vpop.f32.mrf.mxu3 }
 0x391   : > { %v1465_v56 = vpop.f32.mrf.mxu2  ;;  %v1499_v57 = vadd.f32 %v1491_v55, %v1421_v18  ;;  %v1999_v55 = vld [vmem:[#allocation20 + $0x1f0] sm:$0xff] }
 0x392   : > { %v1498_v58 = vadd.f32 %v1465_v56, %v1420_v24  ;;  %v1968_v56 = vld [vmem:[#allocation20 + $0xf8] sm:$0xff]  ;;  %2030 = vmatpush.msra.mxu1 %v1999_v55  ;;  %v1943_v55 = vld [vmem:[#allocation20 + $0x30] sm:$0xff] }
 0x393   : > { %v1617_v60 = vmul.f32 %v3161_v33, %v1499_v57  ;;  %v1607_v0 = vpop.xlane.xlu0 %1606  ;;  %v2000_v57 = vld [vmem:[#allocation20 + $0x1f8] sm:$0xff]  ;;  %2053 = vmatpush.msra.mxu2 %v1968_v56  ;;  %v1975_v56 = vld [vmem:[#allocation20 + $0x130] sm:$0xff] }
 0x394   : > { %v1616_v63 = vmul.f32 %v3163_v35, %v1498_v58  ;;  %v1604_v2 = vpop.xlane.xlu1 %1603  ;;  %v1613_v3 = vadd.f32 %v1607_v0, %v1597_v36  ;;  %v3169_v13 = vpop.eup %3168  ;;  %v1997_v58 = vld [vmem:[#allocation20 + $0x1e0] sm:$0xff]  ;;  %2076 = vmatpush.msra.mxu3 %v2000_v57  ;;  %v1964_v0 = vld [vmem:[#allocation20 + $0xd8] sm:$0xff] }
 0x395   : > { %v1612_v41 = vadd.f32 %v1604_v2, %v1596_v42  ;;  %2031 = vmatpush.msra.mxu1 %v1997_v58  ;;  %v1961_v2 = vld [vmem:[#allocation20 + $0xc0] sm:$0xff]  ;;  %v1944_v57 = vld [vmem:[#allocation20 + $0x38] sm:$0xff] }
 0x396   : > { %3170 = vrcp.f32 %v1613_v3  ;;  %2077 = vmatpush.msra.mxu3 %v1998_v59  ;;  %v1993_v3 = vld [vmem:[#allocation20 + $0x1c0] sm:$0xff]  ;;  %v1942_v59 = vld [vmem:[#allocation20 + $0x28] sm:$0xff] }
 0x397   : > { %3172 = vrcp.f32 %v1612_v41  ;;  %v1960_v41 = vld [vmem:[#allocation20 + $0xb8] sm:$0xff]  ;;  %v1941_v58 = vld [vmem:[#allocation20 + $0x20] sm:$0xff] }
 0x398   : > { %v1494_v54 = vpop.f32.mrf.mxu3 }
 0x399   : > { %v1500_v1 = vadd.f32 %v1494_v54, %v1422_v48  ;;  %v1996_v54 = vld [vmem:[#allocation20 + $0x1d8] sm:$0xff] }
 0x39a   : > { %v1642_v4 = vpop.f32.mrf.mxu2  ;;  %2078 = vmatpush.msra.mxu3 %v1996_v54  ;;  %v1940_v54 = vld [vmem:[#allocation20 + $0x18] sm:$0xff] }
 0x39b   : > { %v1618_v5 = vmul.f32 %v3167_v29, %v1500_v1  ;;  %v1677_v6 = vadd.f32 %v1642_v4, %v1615_v26  ;;  %v1610_v14 = vpop.xlane.xlu0 %1609  ;;  %v1962_v4 = vld [vmem:[#allocation20 + $0xc8] sm:$0xff] }
 0x39c   : > { %v1614_v38 = vadd.f32 %v1610_v14, %v1598_v53  ;;  %v3171_v8 = vpop.eup %3170  ;;  %v1967_v53 = vld [vmem:[#allocation20 + $0xf0] sm:$0xff] }
 0x39d   : > { %v1685_v7 = vmul.f32 %v3169_v13, %v1677_v6  ;;  %v3173_v11 = vpop.eup %3172  ;;  %2007 = vmatpush.msra.mxu0 %v1967_v53  ;;  %v1959_v6 = vld [vmem:[#allocation20 + $0xb0] sm:$0xff]  ;;  %v1978_v53 = vld [vmem:[#allocation20 + $0x148] sm:$0xff] }
 0x39e   : > { %3174 = vrcp.f32 %v1614_v38  ;;  %v1991_v13 = vld [vmem:[#allocation20 + $0x1b0] sm:$0xff]  ;;  %v1957_v38 = vld [vmem:[#allocation20 + $0xa0] sm:$0xff] }
 0x39f   : > { %1816 = vmatmul.f32.vlgmr.msrb.gmra.mxu2 %v1685_v7  ;;  %1839 = vmatmul.f32.vlgmr.msrb.gmra.mxu3 %v1685_v7  ;;  %3176 = vrcp.f32 %v3672_v61  ;;  %v1992_v7 = vld [vmem:[#allocation20 + $0x1b8] sm:$0xff] }
 0x3a0   : > { %v1980_v61 = vld [vmem:[#allocation20 + $0x158] sm:$0xff] }
 0x3a2   : > { %v1671_v39 = vpop.f32.mrf.mxu3 }
 0x3a3   : > { %v1679_v43 = vadd.f32 %v1671_v39, %v1617_v60  ;;  %v1645_v9 = vpop.f32.mrf.mxu2  ;;  %v1963_v60 = vld [vmem:[#allocation20 + $0xd0] sm:$0xff]  ;;  %v1989_v39 = vld [vmem:[#allocation20 + $0x1a0] sm:$0xff] }
 0x3a4   : > { %v1678_v62 = vadd.f32 %v1645_v9, %v1616_v63  ;;  %v3175_v21 = vpop.eup %3174  ;;  %v1995_v63 = vld [vmem:[#allocation20 + $0x1d0] sm:$0xff] }
 0x3a5   : > { %v1687_v10 = vmul.f32 %v3171_v8, %v1679_v43  ;;  %v3177_v26 = vpop.eup %3176  ;;  %2032 = vmatpush.msra.mxu1 %v1995_v63  ;;  %v1958_v43 = vld [vmem:[#allocation20 + $0xa8] sm:$0xff]  ;;  %v1955_v9 = vld [vmem:[#allocation20 + $0x90] sm:$0xff] }
 0x3a6   : > { %v1686_v16 = vmul.f32 %v3173_v11, %v1678_v62  ;;  %v1869_v29 = vmul.f32 256.0, %v3177_v26  ;;  %vm1873_vm1 = vweird.f32 %v3177_v26  ;;  %v1990_v8 = vld [vmem:[#allocation20 + $0x1a8] sm:$0xff]  ;;  %v1987_v62 = vld [vmem:[#allocation20 + $0x190] sm:$0xff]  ;;  %v1988_v11 = vld [vmem:[#allocation20 + $0x198] sm:$0xff] }
 0x3a7   : > { %1770 = vmatmul.f32.vlgmr.msrb.gmra.mxu0 %v1687_v10  ;;  %1793 = vmatmul.f32.vlgmr.msrb.gmra.mxu1 %v1687_v10  ;;  %v1956_v10 = vld [vmem:[#allocation20 + $0x98] sm:$0xff]  ;;  %v1939_v63 = vld [vmem:[#allocation20 + $0x10] sm:$0xff] }
 0x3a8   : > { %1819 = vmatmul.f32.gmra.mxu2 %v1686_v16  ;;  %1842 = vmatmul.f32.gmra.mxu3 %v1686_v16  ;;  %v1870_v51 = vsub.f32 1.0, %v1869_v29  ;;  %v1977_v29 = vld [vmem:[#allocation20 + $0x140] sm:$0xff] }
 0x3a9   : > { %2033 = vmatpush.msra.mxu1 %v1993_v3  ;;  %v1969_v3 = vld [vmem:[#allocation20 + $0x100] sm:$0xff] }
 0x3aa   : > { %v1674_v17 = vpop.f32.mrf.mxu3  ;;  %v1871_v1 = vmul.f32 %v3177_v26, %v1870_v51  ;;  %v1946_v51 = vld [vmem:[#allocation20 + $0x48] sm:$0xff] }
 0x3ab   : > { %v1680_v18 = vadd.f32 %v1674_v17, %v1618_v5  ;;  %v1994_v5 = vld [vmem:[#allocation20 + $0x1c8] sm:$0xff]  ;;  %2034 = vmatpush.msra.mxu1 %v1991_v13  ;;  %v1953_v17 = vld [vmem:[#allocation20 + $0x80] sm:$0xff]  ;;  %v2230_v13 = vld [vmem:[#allocation20 + $0x3f0] sm:$0xff] }
 0x3ac   : > { %v1872_v14 = vadd.f32 %v3177_v26, %v1871_v1  ;;  %2079 = vmatpush.msra.mxu3 %v1994_v5  ;;  %v1972_v1 = vld [vmem:[#allocation20 + $0x118] sm:$0xff]  ;;  %v1970_v5 = vld [vmem:[#allocation20 + $0x108] sm:$0xff] }
 0x3ad   : > { %v1688_v22 = vmul.f32 %v3175_v21, %v1680_v18  ;;  %2035 = vmatpush.msra.mxu1 %v1989_v39  ;;  %v1985_v18 = vld [vmem:[#allocation20 + $0x180] sm:$0xff]  ;;  %v1954_v21 = vld [vmem:[#allocation20 + $0x88] sm:$0xff] }
 0x3ae   : > { %2080 = vmatpush.msra.mxu3 %v1992_v7  ;;  %v4195_v16 = vsel %vm1873_vm1, %v3177_v26, %v1872_v14  ;;  %v1945_v26 = vld [vmem:[#allocation20 + $0x40] sm:$0xff]  ;;  %v2231_v7 = vld [vmem:[#allocation20 + $0x3f8] sm:$0xff]  ;;  %v2197_v39 = vld [vmem:[#allocation20 + $0x2e8] sm:$0xff] }
 0x3af   : > { %1773 = vmatmul.f32.gmra.mxu0 %v1688_v22  ;;  %1796 = vmatmul.f32.gmra.mxu1 %v1688_v22  ;;  %v1986_v22 = vld [vmem:[#allocation20 + $0x188] sm:$0xff]  ;;  %v2196_v14 = vld [vmem:[#allocation20 + $0x2e0] sm:$0xff] }
 0x3b0   : > { %2081 = vmatpush.msra.mxu3 %v1990_v8  ;;  %2036 = vmatpush.msra.mxu1 %v1987_v62  ;;  %v2194_v8 = vld [vmem:[#allocation20 + $0x2d0] sm:$0xff]  ;;  %v2195_v62 = vld [vmem:[#allocation20 + $0x2d8] sm:$0xff] }
 0x3b2   : > { %2082 = vmatpush.msra.mxu3 %v1988_v11  ;;  %2037 = vmatpush.msra.mxu1 %v1985_v18  ;;  %v2192_v11 = vld [vmem:[#allocation20 + $0x2c0] sm:$0xff]  ;;  %v2193_v18 = vld [vmem:[#allocation20 + $0x2c8] sm:$0xff] }
 0x3b4   : > { %2083 = vmatpush.msra.mxu3 %v1986_v22  ;;  %v2190_v22 = vld [vmem:[#allocation20 + $0x2b0] sm:$0xff] }
 0x422   : > { %v1817_v24 = vpop.f32.mrf.mxu2  ;;  %v1840_v27 = vpop.f32.mrf.mxu3 }
 0x424   : > { %v1771_v31 = vpop.f32.mrf.mxu0  ;;  %v1794_v32 = vpop.f32.mrf.mxu1 }
 0x425   : > { %v1818_v33 = vadd.f32 %v1817_v24, %v1771_v31  ;;  %v1841_v34 = vadd.f32 %v1840_v27, %v1794_v32  ;;  %v1951_v24 = vld [vmem:[#allocation20 + $0x70] sm:$0xff]  ;;  %v1984_v31 = vld [vmem:[#allocation20 + $0x178] sm:$0xff] }
 0x426   : > { %v1983_v27 = vld [vmem:[#allocation20 + $0x170] sm:$0xff]  ;;  %2084 = vmatpush.msra.mxu3 %v1984_v31  ;;  %v2189_v31 = vld [vmem:[#allocation20 + $0x2a8] sm:$0xff] }
 0x427   : > { %v1852_v35 = vadd.f32 %v1848_v28, %v1818_v33  ;;  %v1853_v36 = vadd.f32 %v1849_v30, %v1841_v34  ;;  %2038 = vmatpush.msra.mxu1 %v1983_v27  ;;  %v2223_v27 = vld [vmem:[#allocation20 + $0x3b8] sm:$0xff] }
 0x429   : > { %v4180_v37 = vadd.f32 %v1852_v35, %v4061_v12  ;;  %v4183_v40 = vadd.f32 %v1853_v36, %v4064_v15 }
 0x42b   : > { %v1862_v42 = vadd.f32 %v4183_v40, %v4180_v37  ;;  %v1820_v44 = vpop.f32.mrf.mxu2  ;;  %v1843_v45 = vpop.f32.mrf.mxu3 }
 0x42c   : > { %v1774_v25 = vpop.f32.mrf.mxu0  ;;  %v1797_v50 = vpop.f32.mrf.mxu1 }
 0x42d   : > { %1863 = vadd.xlane.f32.xlu1 %v1862_v42  ;;  %v1821_v52 = vadd.f32 %v1820_v44, %v1774_v25  ;;  %v1844_v46 = vadd.f32 %v1843_v45, %v1797_v50 }
 0x42f   : > { %v1854_v47 = vadd.f32 %v1848_v28, %v1821_v52  ;;  %v1855_v48 = vadd.f32 %v1849_v30, %v1844_v46  ;;  %v1952_v30 = vld [vmem:[#allocation20 + $0x78] sm:$0xff]  ;;  %v1949_v52 = vld [vmem:[#allocation20 + $0x60] sm:$0xff] }
 0x430   : > { %v1981_v46 = vld [vmem:[#allocation20 + $0x160] sm:$0xff] }
 0x431   : > { %v4188_v49 = vadd.f32 %v1854_v47, %v4071_v19  ;;  %v4191_v12 = vadd.f32 %v1855_v48, %v4074_v20  ;;  %v1965_v19 = vld [vmem:[#allocation20 + $0xe0] sm:$0xff]  ;;  %v1966_v20 = vld [vmem:[#allocation20 + $0xe8] sm:$0xff]  ;;  %2039 = vmatpush.msra.mxu1 %v1981_v46  ;;  %v2182_v46 = vld [vmem:[#allocation20 + $0x270] sm:$0xff] }
 0x432   : > { %2008 = vmatpush.msra.mxu0 %v1965_v19  ;;  %2054 = vmatpush.msra.mxu2 %v1966_v20  ;;  %v1950_v47 = vld [vmem:[#allocation20 + $0x68] sm:$0xff]  ;;  %v1976_v19 = vld [vmem:[#allocation20 + $0x138] sm:$0xff]  ;;  %v1973_v20 = vld [vmem:[#allocation20 + $0x120] sm:$0xff] }
 0x433   : > { %v1865_v15 = vadd.f32 %v4191_v12, %v4188_v49  ;;  %v1982_v48 = vld [vmem:[#allocation20 + $0x168] sm:$0xff] }
 0x434   : > { %2009 = vmatpush.msra.mxu0 %v1963_v60  ;;  %2055 = vmatpush.msra.mxu2 %v1964_v0  ;;  %v1974_v60 = vld [vmem:[#allocation20 + $0x128] sm:$0xff]  ;;  %v1971_v0 = vld [vmem:[#allocation20 + $0x110] sm:$0xff] }
 0x435   : > { %1866 = vadd.xlane.f32.xlu2 %v1865_v15  ;;  %2085 = vmatpush.msra.mxu3 %v1982_v48  ;;  %v1979_v15 = vld [vmem:[#allocation20 + $0x150] sm:$0xff]  ;;  %v2183_v48 = vld [vmem:[#allocation20 + $0x278] sm:$0xff] }
 0x436   : > { %2010 = vmatpush.msra.mxu0 %v1961_v2  ;;  %2056 = vmatpush.msra.mxu2 %v1962_v4  ;;  %v1937_v2 = vld [vmem:[#allocation20] sm:$0xff]  ;;  %v1938_v4 = vld [vmem:[#allocation20 + $0x8] sm:$0xff] }
 0x437   : > { %2040 = vmatpush.msra.mxu1 %v1979_v15  ;;  %2086 = vmatpush.msra.mxu3 %v1980_v61  ;;  %v2215_v15 = vld [vmem:[#allocation20 + $0x378] sm:$0xff]  ;;  %v2180_v61 = vld [vmem:[#allocation20 + $0x260] sm:$0xff] }
 0x438   : > { %2011 = vmatpush.msra.mxu0 %v1959_v6  ;;  %2057 = vmatpush.msra.mxu2 %v1960_v41  ;;  %v2198_v6 = vld [vmem:[#allocation20 + $0x2f0] sm:$0xff]  ;;  %v2199_v41 = vld [vmem:[#allocation20 + $0x2f8] sm:$0xff] }
 0x439   : > { %2041 = vmatpush.msra.mxu1 %v1977_v29  ;;  %2087 = vmatpush.msra.mxu3 %v1978_v53  ;;  %v2181_v29 = vld [vmem:[#allocation20 + $0x268] sm:$0xff]  ;;  %v2178_v53 = vld [vmem:[#allocation20 + $0x250] sm:$0xff] }
 0x43a   : > { %2012 = vmatpush.msra.mxu0 %v1957_v38  ;;  %2058 = vmatpush.msra.mxu2 %v1958_v43  ;;  %v2228_v38 = vld [vmem:[#allocation20 + $0x3e0] sm:$0xff]  ;;  %v2229_v43 = vld [vmem:[#allocation20 + $0x3e8] sm:$0xff] }
 0x43b   : > { %2042 = vmatpush.msra.mxu1 %v1975_v56  ;;  %2088 = vmatpush.msra.mxu3 %v1976_v19  ;;  %v2211_v19 = vld [vmem:[#allocation20 + $0x358] sm:$0xff] }
 0x43c   : > { %2013 = vmatpush.msra.mxu0 %v1955_v9  ;;  %2059 = vmatpush.msra.mxu2 %v1956_v10  ;;  %v2226_v9 = vld [vmem:[#allocation20 + $0x3d0] sm:$0xff]  ;;  %v2227_v10 = vld [vmem:[#allocation20 + $0x3d8] sm:$0xff] }
 0x43d   : > { %2043 = vmatpush.msra.mxu1 %v1973_v20  ;;  %2089 = vmatpush.msra.mxu3 %v1974_v60  ;;  %v2208_v20 = vld [vmem:[#allocation20 + $0x340] sm:$0xff]  ;;  %v2209_v60 = vld [vmem:[#allocation20 + $0x348] sm:$0xff] }
 0x43e   : > { %2014 = vmatpush.msra.mxu0 %v1953_v17  ;;  %2060 = vmatpush.msra.mxu2 %v1954_v21  ;;  %v2224_v17 = vld [vmem:[#allocation20 + $0x3c0] sm:$0xff]  ;;  %v2225_v21 = vld [vmem:[#allocation20 + $0x3c8] sm:$0xff] }
 0x43f   : > { %2044 = vmatpush.msra.mxu1 %v1971_v0  ;;  %2090 = vmatpush.msra.mxu3 %v1972_v1  ;;  %v2206_v0 = vld [vmem:[#allocation20 + $0x330] sm:$0xff]  ;;  %v2207_v1 = vld [vmem:[#allocation20 + $0x338] sm:$0xff] }
 0x440   : > { %2015 = vmatpush.msra.mxu0 %v1951_v24  ;;  %2061 = vmatpush.msra.mxu2 %v1952_v30  ;;  %v2191_v24 = vld [vmem:[#allocation20 + $0x2b8] sm:$0xff]  ;;  %v2220_v30 = vld [vmem:[#allocation20 + $0x3a0] sm:$0xff] }
 0x441   : > { %2045 = vmatpush.msra.mxu1 %v1969_v3  ;;  %2091 = vmatpush.msra.mxu3 %v1970_v5  ;;  %v2204_v3 = vld [vmem:[#allocation20 + $0x320] sm:$0xff]  ;;  %v2173_v5 = vld [vmem:[#allocation20 + $0x228] sm:$0xff] }
 0x442   : > { %2016 = vmatpush.msra.mxu0 %v1949_v52  ;;  %2062 = vmatpush.msra.mxu2 %v1950_v47  ;;  %v2217_v52 = vld [vmem:[#allocation20 + $0x388] sm:$0xff]  ;;  %v2214_v47 = vld [vmem:[#allocation20 + $0x370] sm:$0xff] }
 0x443   : > { %2262 = vmatpush.msrb.mxu1 %v2230_v13  ;;  %2308 = vmatpush.msrb.mxu3 %v2231_v7  ;;  %v2202_v7 = vld [vmem:[#allocation20 + $0x310] sm:$0xff] }
 0x445   : > { %2263 = vmatpush.msrb.mxu1 %v2228_v38  ;;  %2309 = vmatpush.msrb.mxu3 %v2229_v43  ;;  %v2171_v38 = vld [vmem:[#allocation20 + $0x218] sm:$0xff] }
 0x447   : > { %2264 = vmatpush.msrb.mxu1 %v2226_v9  ;;  %2310 = vmatpush.msrb.mxu3 %v2227_v10  ;;  %v2168_v9 = vld [vmem:[#allocation20 + $0x200] sm:$0xff]  ;;  %v2169_v10 = vld [vmem:[#allocation20 + $0x208] sm:$0xff] }
 0x449   : > { %2265 = vmatpush.msrb.mxu1 %v2224_v17  ;;  %2311 = vmatpush.msrb.mxu3 %v2225_v21  ;;  %v1860_v21 = vld [vmem:[%s4429_s20] sm:$0x3]  ;;  %s4434_s20 = sld [smem:[#allocation51_spill]] }
 0x44b   : > { %2312 = vmatpush.msrb.mxu3 %v2223_v27 }
 0x4a0   : > { %v1864_v23 = vpop.xlane.xlu1 %1863 }
 0x4a1   : > { %v1875_v28 = vmul.f32 %v4195_v16, %v1864_v23  ;;  %v2222_v23 = vld [vmem:[#allocation20 + $0x3b0] sm:$0xff] }
 0x4a2   : > { %2266 = vmatpush.msrb.mxu1 %v2222_v23  ;;  %v1861_v23 = vld [vmem:[#allocation19] sm:$0x3] }
 0x4a3   : > { %v4199_v32 = vsub.f32 %v4180_v37, %v1875_v28  ;;  %v4202_v33 = vsub.f32 %v4183_v40, %v1875_v28  ;;  %v2188_v28 = vld [vmem:[#allocation20 + $0x2a0] sm:$0xff] }
 0x4a4   : > { %2267 = vmatpush.msrb.mxu1 %v2220_v30  ;;  %v1921_v30 = vperm.slane %v1860_v21, 1 }
 0x4a5   : > { %v1881_v34 = vmul.f32 %v4199_v32, %v4199_v32  ;;  %v1882_v35 = vmul.f32 %v4202_v33, %v4202_v33 }
 0x4a7   : > { %v1885_v36 = vadd.f32 %v1882_v35, %v1881_v34  ;;  %v2221_v34 = vld [vmem:[#allocation20 + $0x3a8] sm:$0xff]  ;;  %v2186_v35 = vld [vmem:[#allocation20 + $0x290] sm:$0xff] }
 0x4a8   : > { %v1867_v42 = vpop.xlane.xlu2 %1866  ;;  %2313 = vmatpush.msrb.mxu3 %v2221_v34 }
 0x4a9   : > { %1886 = vadd.xlane.f32.xlu0 %v1885_v36  ;;  %v1876_v44 = vmul.f32 %v4195_v16, %v1867_v42  ;;  %v2218_v36 = vld [vmem:[#allocation20 + $0x390] sm:$0xff]  ;;  %v2187_v42 = vld [vmem:[#allocation20 + $0x298] sm:$0xff] }
 0x4aa   : > { %2268 = vmatpush.msrb.mxu1 %v2218_v36 }
 0x4ab   : > { %v4210_v37 = vsub.f32 %v4188_v49, %v1876_v44  ;;  %v4213_v40 = vsub.f32 %v4191_v12, %v1876_v44  ;;  %v1947_v49 = vld [vmem:[#allocation20 + $0x50] sm:$0xff]  ;;  %v1948_v12 = vld [vmem:[#allocation20 + $0x58] sm:$0xff] }
 0x4ac   : > { %2017 = vmatpush.msra.mxu0 %v1947_v49  ;;  %2063 = vmatpush.msra.mxu2 %v1948_v12  ;;  %v2219_v44 = vld [vmem:[#allocation20 + $0x398] sm:$0xff] }
 0x4ad   : > { %v1883_v45 = vmul.f32 %v4210_v37, %v4210_v37  ;;  %v1884_v25 = vmul.f32 %v4213_v40, %v4213_v40  ;;  %2314 = vmatpush.msrb.mxu3 %v2219_v44 }
 0x4ae   : > { %2018 = vmatpush.msra.mxu0 %v1945_v26  ;;  %2064 = vmatpush.msra.mxu2 %v1946_v51  ;;  %v2212_v26 = vld [vmem:[#allocation20 + $0x360] sm:$0xff]  ;;  %v2213_v51 = vld [vmem:[#allocation20 + $0x368] sm:$0xff] }
 0x4af   : > { %v1888_v50 = vadd.f32 %v1884_v25, %v1883_v45  ;;  %v2184_v45 = vld [vmem:[#allocation20 + $0x280] sm:$0xff]  ;;  %2315 = vmatpush.msrb.mxu3 %v2217_v52 }
 0x4b0   : > { %2019 = vmatpush.msra.mxu0 %v1943_v55  ;;  %2065 = vmatpush.msra.mxu2 %v1944_v57  ;;  %v2216_v25 = vld [vmem:[#allocation20 + $0x380] sm:$0xff]  ;;  %v2210_v55 = vld [vmem:[#allocation20 + $0x350] sm:$0xff]  ;;  %v2179_v57 = vld [vmem:[#allocation20 + $0x258] sm:$0xff] }
 0x4b1   : > { %1889 = vadd.xlane.f32.xlu1 %v1888_v50  ;;  %v2185_v50 = vld [vmem:[#allocation20 + $0x288] sm:$0xff]  ;;  %2269 = vmatpush.msrb.mxu1 %v2216_v25 }
 0x4b2   : > { %2020 = vmatpush.msra.mxu0 %v1941_v58  ;;  %2066 = vmatpush.msra.mxu2 %v1942_v59  ;;  %v2176_v58 = vld [vmem:[#allocation20 + $0x240] sm:$0xff]  ;;  %v2177_v59 = vld [vmem:[#allocation20 + $0x248] sm:$0xff] }
 0x4b3   : > { %2270 = vmatpush.msrb.mxu1 %v2214_v47  ;;  %2316 = vmatpush.msrb.mxu3 %v2215_v15  ;;  %v2367_v15 = vld [vmem:[#allocation22 + $0x2f8] sm:$0xff] }
 0x4b4   : > { %2021 = vmatpush.msra.mxu0 %v1939_v63  ;;  %2067 = vmatpush.msra.mxu2 %v1940_v54  ;;  %v2174_v63 = vld [vmem:[#allocation20 + $0x230] sm:$0xff]  ;;  %v2175_v54 = vld [vmem:[#allocation20 + $0x238] sm:$0xff] }
 0x4b5   : > { %2271 = vmatpush.msrb.mxu1 %v2212_v26  ;;  %2317 = vmatpush.msrb.mxu3 %v2213_v51  ;;  %v2365_v26 = vld [vmem:[#allocation22 + $0x2e8] sm:$0xff]  ;;  %v2396_v51 = vld [vmem:[#allocation22 + $0x3e0] sm:$0xff] }
 0x4b6   : > { %2022 = vmatpush.msra.mxu0 %v1937_v2  ;;  %2068 = vmatpush.msra.mxu2 %v1938_v4  ;;  %v2172_v2 = vld [vmem:[#allocation20 + $0x220] sm:$0xff] }
 0x4b7   : > { %2272 = vmatpush.msrb.mxu1 %v2210_v55  ;;  %2318 = vmatpush.msrb.mxu3 %v2211_v19  ;;  %v2363_v19 = vld [vmem:[#allocation22 + $0x2d8] sm:$0xff] }
 0x4b8   : > { %2239 = vmatpush.msrb.mxu0 %v2198_v6  ;;  %2285 = vmatpush.msrb.mxu2 %v2199_v41  ;;  %v2205_v6 = vld [vmem:[#allocation20 + $0x328] sm:$0xff]  ;;  %v2170_v41 = vld [vmem:[#allocation20 + $0x210] sm:$0xff] }
 0x4b9   : > { %2273 = vmatpush.msrb.mxu1 %v2208_v20  ;;  %2319 = vmatpush.msrb.mxu3 %v2209_v60  ;;  %v2395_v20 = vld [vmem:[#allocation22 + $0x3d8] sm:$0xff] }
 0x4ba   : > { %2240 = vmatpush.msrb.mxu0 %v2196_v14  ;;  %2286 = vmatpush.msrb.mxu2 %v2197_v39  ;;  %v2203_v39 = vld [vmem:[#allocation20 + $0x318] sm:$0xff] }
 0x4bb   : > { %2274 = vmatpush.msrb.mxu1 %v2206_v0  ;;  %2320 = vmatpush.msrb.mxu3 %v2207_v1  ;;  %v2361_v0 = vld [vmem:[#allocation22 + $0x2c8] sm:$0xff]  ;;  %v2359_v1 = vld [vmem:[#allocation22 + $0x2b8] sm:$0xff] }
 0x4bc   : > { %2241 = vmatpush.msrb.mxu0 %v2194_v8  ;;  %2287 = vmatpush.msrb.mxu2 %v2195_v62  ;;  %v2200_v62 = vld [vmem:[#allocation20 + $0x300] sm:$0xff] }
 0x4bd   : > { %2275 = vmatpush.msrb.mxu1 %v2204_v3  ;;  %2321 = vmatpush.msrb.mxu3 %v2205_v6  ;;  %v2393_v3 = vld [vmem:[#allocation22 + $0x3c8] sm:$0xff]  ;;  %v2390_v6 = vld [vmem:[#allocation22 + $0x3b0] sm:$0xff] }
 0x4be   : > { %2242 = vmatpush.msrb.mxu0 %v2192_v11  ;;  %2288 = vmatpush.msrb.mxu2 %v2193_v18  ;;  %v2201_v11 = vld [vmem:[#allocation20 + $0x308] sm:$0xff] }
 0x4bf   : > { %2276 = vmatpush.msrb.mxu1 %v2202_v7  ;;  %2322 = vmatpush.msrb.mxu3 %v2203_v39  ;;  %v2355_v7 = vld [vmem:[#allocation22 + $0x298] sm:$0xff]  ;;  %v2352_v39 = vld [vmem:[#allocation22 + $0x280] sm:$0xff] }
 0x4c0   : > { %2243 = vmatpush.msrb.mxu0 %v2190_v22  ;;  %2289 = vmatpush.msrb.mxu2 %v2191_v24 }
 0x4c1   : > { %2277 = vmatpush.msrb.mxu1 %v2200_v62  ;;  %2323 = vmatpush.msrb.mxu3 %v2201_v11  ;;  %v2350_v62 = vld [vmem:[#allocation22 + $0x270] sm:$0xff]  ;;  %v2384_v11 = vld [vmem:[#allocation22 + $0x380] sm:$0xff] }
 0x4c2   : > { %2244 = vmatpush.msrb.mxu0 %v2188_v28  ;;  %2290 = vmatpush.msrb.mxu2 %v2189_v31  ;;  %v1920_v28 = vperm.slane %v1860_v21, 0  ;;  %v2349_v21 = vld [vmem:[#allocation22 + $0x268] sm:$0xff] }
 0x4c4   : > { %2245 = vmatpush.msrb.mxu0 %v2186_v35  ;;  %2291 = vmatpush.msrb.mxu2 %v2187_v42  ;;  %v1929_v35 = vperm.slane %v1861_v23, 0 }
 0x4c6   : > { %2246 = vmatpush.msrb.mxu0 %v2184_v45  ;;  %2292 = vmatpush.msrb.mxu2 %v2185_v50  ;;  %v1930_v45 = vperm.slane %v1861_v23, 1  ;;  %v2383_v23 = vld [vmem:[#allocation22 + $0x378] sm:$0xff] }
 0x4c8   : > { %2247 = vmatpush.msrb.mxu0 %v2182_v46  ;;  %2293 = vmatpush.msrb.mxu2 %v2183_v48 }
 0x4ca   : > { %2248 = vmatpush.msrb.mxu0 %v2180_v61  ;;  %2294 = vmatpush.msrb.mxu2 %v2181_v29  ;;  %v2364_v61 = vld [vmem:[#allocation22 + $0x2e0] sm:$0xff] }
 0x4cc   : > { %2249 = vmatpush.msrb.mxu0 %v2178_v53  ;;  %2295 = vmatpush.msrb.mxu2 %v2179_v57  ;;  %v2397_v53 = vld [vmem:[#allocation22 + $0x3e8] sm:$0xff]  ;;  %v2362_v57 = vld [vmem:[#allocation22 + $0x2d0] sm:$0xff] }
 0x4ce   : > { %2250 = vmatpush.msrb.mxu0 %v2176_v58  ;;  %2296 = vmatpush.msrb.mxu2 %v2177_v59  ;;  %v2394_v58 = vld [vmem:[#allocation22 + $0x3d0] sm:$0xff] }
 0x4d0   : > { %2251 = vmatpush.msrb.mxu0 %v2174_v63  ;;  %2297 = vmatpush.msrb.mxu2 %v2175_v54  ;;  %v2360_v63 = vld [vmem:[#allocation22 + $0x2c0] sm:$0xff] }
 0x4d2   : > { %2252 = vmatpush.msrb.mxu0 %v2172_v2  ;;  %2298 = vmatpush.msrb.mxu2 %v2173_v5  ;;  %v2392_v2 = vld [vmem:[#allocation22 + $0x3c0] sm:$0xff]  ;;  %v2357_v5 = vld [vmem:[#allocation22 + $0x2a8] sm:$0xff] }
 0x4d4   : > { %2253 = vmatpush.msrb.mxu0 %v2170_v41  ;;  %2299 = vmatpush.msrb.mxu2 %v2171_v38  ;;  %v2354_v41 = vld [vmem:[#allocation22 + $0x290] sm:$0xff]  ;;  %v2389_v38 = vld [vmem:[#allocation22 + $0x3a8] sm:$0xff] }
 0x4d6   : > { %2254 = vmatpush.msrb.mxu0 %v2168_v9  ;;  %2300 = vmatpush.msrb.mxu2 %v2169_v10  ;;  %v2387_v9 = vld [vmem:[#allocation22 + $0x398] sm:$0xff] }
 0x4d7   : > { %v2351_v10 = vld [vmem:[#allocation22 + $0x278] sm:$0xff] }
 0x51c   : > { %v1887_v49 = vpop.xlane.xlu0 %1886 }
 0x51d   : > { %v1891_v12 = vmul.f32 %v1887_v49, %v4195_v16  ;;  %v2366_v49 = vld [vmem:[#allocation22 + $0x2f0] sm:$0xff] }
 0x51f   : > { %v4220_v56 = vadd.f32 1e-05, %v1891_v12 }
 0x521   : > { %3178 = vrsqrt.f32 %v4220_v56  ;;  %vm1901_vm3 = vweird.f32 %v4220_v56 }
 0x524   : > { %v1890_v4 = vpop.xlane.xlu1 %1889 }
 0x525   : > { %v1892_v13 = vmul.f32 %v1890_v4, %v4195_v16  ;;  %v2356_v4 = vld [vmem:[#allocation22 + $0x2a0] sm:$0xff] }
 0x527   : > { %v3179_v14 = vpop.eup %3178  ;;  %v1894_v8 = vadd.f32 1e-05, %v1892_v13  ;;  %v2391_v13 = vld [vmem:[#allocation22 + $0x3b8] sm:$0xff] }
 0x528   : > { %v1896_v43 = vmul.f32 %v3179_v14, %v4220_v56  ;;  %vm1902_vm2 = vweird.f32 %v3179_v14 }
 0x529   : > { %3180 = vrsqrt.f32 %v1894_v8  ;;  %vm1903_vm4 = vmor %vm1901_vm3, %vm1902_vm2  ;;  %vm1911_vm6 = vweird.f32 %v1894_v8 }
 0x52a   : > { %v1897_v17 = vmul.f32 %v3179_v14, %v1896_v43  ;;  %v2353_v43 = vld [vmem:[#allocation22 + $0x288] sm:$0xff] }
 0x52c   : > { %v1898_v18 = vmul.f32 0.5, %v1897_v17  ;;  %v2385_v17 = vld [vmem:[#allocation22 + $0x388] sm:$0xff] }
 0x52e   : > { %v1899_v22 = vsub.f32 1.5, %v1898_v18  ;;  %v2348_v18 = vld [vmem:[#allocation22 + $0x260] sm:$0xff] }
 0x52f   : > { %v3181_v24 = vpop.eup %3180 }
 0x530   : > { %v1900_v27 = vmul.f32 %v3179_v14, %v1899_v22  ;;  %v1906_v31 = vmul.f32 %v3181_v24, %v1894_v8  ;;  %vm1912_vm5 = vweird.f32 %v3181_v24  ;;  %v2386_v8 = vld [vmem:[#allocation22 + $0x390] sm:$0xff] }
 0x531   : > { %vm1913_vm7 = vmor %vm1911_vm6, %vm1912_vm5  ;;  %v2382_v22 = vld [vmem:[#allocation22 + $0x370] sm:$0xff] }
 0x532   : > { %v1904_v34 = vsel %vm1903_vm4, %v3179_v14, %v1900_v27  ;;  %v1907_v44 = vmul.f32 %v3181_v24, %v1906_v31  ;;  %v2388_v14 = vld [vmem:[#allocation22 + $0x3a0] sm:$0xff]  ;;  %v2347_v27 = vld [vmem:[#allocation22 + $0x258] sm:$0xff]  ;;  %v2342_v31 = vld [vmem:[#allocation22 + $0x230] sm:$0xff] }
 0x533   : > { %v1915_v36 = vmul.f32 %v1904_v34, %v4199_v32  ;;  %v1916_v42 = vmul.f32 %v1904_v34, %v4202_v33  ;;  %v2398_v32 = vld [vmem:[#allocation22 + $0x3f0] sm:$0xff]  ;;  %v2399_v33 = vld [vmem:[#allocation22 + $0x3f8] sm:$0xff]  ;;  %v2380_v34 = vld [vmem:[#allocation22 + $0x360] sm:$0xff] }
 0x534   : > { %v1908_v52 = vmul.f32 0.5, %v1907_v44  ;;  %v2378_v44 = vld [vmem:[#allocation22 + $0x350] sm:$0xff] }
 0x535   : > { %v1924_v25 = vmul.f32 %v1920_v28, %v1915_v36  ;;  %v1925_v50 = vmul.f32 %v1921_v30, %v1916_v42  ;;  %v2381_v36 = vld [vmem:[#allocation22 + $0x368] sm:$0xff]  ;;  %v2340_v42 = vld [vmem:[#allocation22 + $0x220] sm:$0xff] }
 0x536   : > { %v1909_v46 = vsub.f32 1.5, %v1908_v52  ;;  %v2376_v52 = vld [vmem:[#allocation22 + $0x340] sm:$0xff] }
 0x537   : > { %v4231_v47 = vadd.f32 %v1929_v35, %v1924_v25  ;;  %v4233_v48 = vadd.f32 %v1930_v45, %v1925_v50  ;;  %v2379_v25 = vld [vmem:[#allocation22 + $0x358] sm:$0xff]  ;;  %v2338_v50 = vld [vmem:[#allocation22 + $0x210] sm:$0xff] }
 0x538   : > { %v1910_v12 = vmul.f32 %v3181_v24, %v1909_v46  ;;  %v2339_v46 = vld [vmem:[#allocation22 + $0x218] sm:$0xff] }
 0x539   : > { %2023 = vmatmul.f32.vlgmr.msra.gmra.mxu0 %v4231_v47  ;;  %2046 = vmatmul.f32.vlgmr.msra.gmra.mxu1 %v4233_v48 }
 0x53a   : > { %2069 = vmatmul.f32.vlgmr.msra.gmra.mxu2 %v4231_v47  ;;  %2092 = vmatmul.f32.vlgmr.msra.gmra.mxu3 %v4233_v48  ;;  %v1914_v29 = vsel %vm1913_vm7, %v3181_v24, %v1910_v12  ;;  %v2346_v24 = vld [vmem:[#allocation22 + $0x250] sm:$0xff] }
 0x53b   : > { %2400 = vmatpush.msra.mxu0 %v2366_v49  ;;  %2446 = vmatpush.msra.mxu2 %v2367_v15  ;;  %v1917_v55 = vmul.f32 %v1914_v29, %v4210_v37  ;;  %v1918_v56 = vmul.f32 %v1914_v29, %v4213_v40  ;;  %v2358_v40 = vld [vmem:[#allocation22 + $0x2b0] sm:$0xff]  ;;  %v2377_v49 = vld [vmem:[#allocation22 + $0x348] sm:$0xff]  ;;  %v2336_v15 = vld [vmem:[#allocation22 + $0x200] sm:$0xff] }
 0x53c   : > { %2423 = vmatpush.msra.mxu1 %v2398_v32  ;;  %2469 = vmatpush.msra.mxu3 %v2399_v33  ;;  %v2374_v12 = vld [vmem:[#allocation22 + $0x330] sm:$0xff]  ;;  %v2337_v32 = vld [vmem:[#allocation22 + $0x208] sm:$0xff]  ;;  %v2375_v33 = vld [vmem:[#allocation22 + $0x338] sm:$0xff] }
 0x53d   : > { %2401 = vmatpush.msra.mxu0 %v2364_v61  ;;  %2447 = vmatpush.msra.mxu2 %v2365_v26  ;;  %v1926_v59 = vmul.f32 %v1920_v28, %v1917_v55  ;;  %v1927_v60 = vmul.f32 %v1921_v30, %v1918_v56  ;;  %v2344_v28 = vld [vmem:[#allocation22 + $0x240] sm:$0xff]  ;;  %v2345_v30 = vld [vmem:[#allocation22 + $0x248] sm:$0xff]  ;;  %v2133_v61 = vld [vmem:[#allocation22 + $0xf0] sm:$0xff] }
 0x53e   : > { %2424 = vmatpush.msra.mxu1 %v2396_v51  ;;  %2470 = vmatpush.msra.mxu3 %v2397_v53  ;;  %v2134_v26 = vld [vmem:[#allocation22 + $0xf8] sm:$0xff]  ;;  %v2372_v29 = vld [vmem:[#allocation22 + $0x320] sm:$0xff]  ;;  %v2373_v51 = vld [vmem:[#allocation22 + $0x328] sm:$0xff] }
 0x53f   : > { %2402 = vmatpush.msra.mxu0 %v2362_v57  ;;  %2448 = vmatpush.msra.mxu2 %v2363_v19  ;;  %v4241_v54 = vadd.f32 %v1929_v35, %v1926_v59  ;;  %v4243_v37 = vadd.f32 %v1930_v45, %v1927_v60  ;;  %v2343_v35 = vld [vmem:[#allocation22 + $0x238] sm:$0xff]  ;;  %v2341_v45 = vld [vmem:[#allocation22 + $0x228] sm:$0xff]  ;;  %v2131_v53 = vld [vmem:[#allocation22 + $0xe0] sm:$0xff] }
 0x540   : > { %2425 = vmatpush.msra.mxu1 %v2394_v58  ;;  %2471 = vmatpush.msra.mxu3 %v2395_v20  ;;  %v2132_v55 = vld [vmem:[#allocation22 + $0xe8] sm:$0xff]  ;;  %v2370_v56 = vld [vmem:[#allocation22 + $0x310] sm:$0xff]  ;;  %v2371_v57 = vld [vmem:[#allocation22 + $0x318] sm:$0xff] }
 0x541   : > { %2403 = vmatpush.msra.mxu0 %v2360_v63  ;;  %2449 = vmatpush.msra.mxu2 %v2361_v0  ;;  %v2129_v19 = vld [vmem:[#allocation22 + $0xd0] sm:$0xff]  ;;  %v2130_v58 = vld [vmem:[#allocation22 + $0xd8] sm:$0xff]  ;;  %v2368_v20 = vld [vmem:[#allocation22 + $0x300] sm:$0xff] }
 0x542   : > { %2026 = vmatmul.f32.gmra.mxu0 %v4241_v54  ;;  %2049 = vmatmul.f32.gmra.mxu1 %v4243_v37  ;;  %v2369_v59 = vld [vmem:[#allocation22 + $0x308] sm:$0xff]  ;;  %v2127_v60 = vld [vmem:[#allocation22 + $0xc0] sm:$0xff]  ;;  %v2165_v63 = vld [vmem:[#allocation22 + $0x1f0] sm:$0xff] }
 0x543   : > { %2072 = vmatmul.f32.gmra.mxu2 %v4241_v54  ;;  %2095 = vmatmul.f32.gmra.mxu3 %v4243_v37  ;;  %v2128_v0 = vld [vmem:[#allocation22 + $0xc8] sm:$0xff] }
 0x544   : > { %2404 = vmatpush.msra.mxu0 %v2358_v40  ;;  %2450 = vmatpush.msra.mxu2 %v2359_v1  ;;  %v2166_v40 = vld [vmem:[#allocation22 + $0x1f8] sm:$0xff]  ;;  %v2125_v1 = vld [vmem:[#allocation22 + $0xb0] sm:$0xff] }
 0x545   : > { %2426 = vmatpush.msra.mxu1 %v2392_v2  ;;  %2472 = vmatpush.msra.mxu3 %v2393_v3  ;;  %v2163_v2 = vld [vmem:[#allocation22 + $0x1e0] sm:$0xff]  ;;  %v2126_v3 = vld [vmem:[#allocation22 + $0xb8] sm:$0xff] }
 0x546   : > { %2405 = vmatpush.msra.mxu0 %v2356_v4  ;;  %2451 = vmatpush.msra.mxu2 %v2357_v5  ;;  %v2164_v4 = vld [vmem:[#allocation22 + $0x1e8] sm:$0xff]  ;;  %v2123_v5 = vld [vmem:[#allocation22 + $0xa0] sm:$0xff] }
 0x547   : > { %2427 = vmatpush.msra.mxu1 %v2390_v6  ;;  %2473 = vmatpush.msra.mxu3 %v2391_v13  ;;  %v2161_v6 = vld [vmem:[#allocation22 + $0x1d0] sm:$0xff]  ;;  %v2124_v13 = vld [vmem:[#allocation22 + $0xa8] sm:$0xff] }
 0x548   : > { %2406 = vmatpush.msra.mxu0 %v2354_v41  ;;  %2452 = vmatpush.msra.mxu2 %v2355_v7  ;;  %v2162_v41 = vld [vmem:[#allocation22 + $0x1d8] sm:$0xff]  ;;  %v2121_v7 = vld [vmem:[#allocation22 + $0x90] sm:$0xff] }
 0x549   : > { %2428 = vmatpush.msra.mxu1 %v2388_v14  ;;  %2474 = vmatpush.msra.mxu3 %v2389_v38  ;;  %v2159_v14 = vld [vmem:[#allocation22 + $0x1c0] sm:$0xff]  ;;  %v2122_v38 = vld [vmem:[#allocation22 + $0x98] sm:$0xff] }
 0x54a   : > { %2255 = vmatmul.f32.vlgmr.msrb.gmra.mxu0 %v4231_v47  ;;  %2278 = vmatmul.f32.vlgmr.msrb.gmra.mxu1 %v4233_v48 }
 0x54b   : > { %2301 = vmatmul.f32.vlgmr.msrb.gmra.mxu2 %v4231_v47  ;;  %2324 = vmatmul.f32.vlgmr.msrb.gmra.mxu3 %v4233_v48 }
 0x54c   : > { %2407 = vmatpush.msra.mxu0 %v2352_v39  ;;  %2453 = vmatpush.msra.mxu2 %v2353_v43  ;;  %v2160_v39 = vld [vmem:[#allocation22 + $0x1c8] sm:$0xff]  ;;  %v2119_v43 = vld [vmem:[#allocation22 + $0x80] sm:$0xff] }
 0x54d   : > { %2429 = vmatpush.msra.mxu1 %v2386_v8  ;;  %2475 = vmatpush.msra.mxu3 %v2387_v9  ;;  %v2157_v8 = vld [vmem:[#allocation22 + $0x1b0] sm:$0xff]  ;;  %v2120_v9 = vld [vmem:[#allocation22 + $0x88] sm:$0xff] }
 0x54e   : > { %2408 = vmatpush.msra.mxu0 %v2350_v62  ;;  %2454 = vmatpush.msra.mxu2 %v2351_v10  ;;  %v2158_v62 = vld [vmem:[#allocation22 + $0x1b8] sm:$0xff]  ;;  %v2117_v10 = vld [vmem:[#allocation22 + $0x70] sm:$0xff] }
 0x54f   : > { %2430 = vmatpush.msra.mxu1 %v2384_v11  ;;  %2476 = vmatpush.msra.mxu3 %v2385_v17  ;;  %v2155_v11 = vld [vmem:[#allocation22 + $0x1a0] sm:$0xff]  ;;  %v2118_v17 = vld [vmem:[#allocation22 + $0x78] sm:$0xff] }
 0x550   : > { %2409 = vmatpush.msra.mxu0 %v2348_v18  ;;  %2455 = vmatpush.msra.mxu2 %v2349_v21  ;;  %v2156_v18 = vld [vmem:[#allocation22 + $0x1a8] sm:$0xff]  ;;  %v2115_v21 = vld [vmem:[#allocation22 + $0x60] sm:$0xff] }
 0x551   : > { %2431 = vmatpush.msra.mxu1 %v2382_v22  ;;  %2477 = vmatpush.msra.mxu3 %v2383_v23  ;;  %v2153_v22 = vld [vmem:[#allocation22 + $0x190] sm:$0xff]  ;;  %v2116_v23 = vld [vmem:[#allocation22 + $0x68] sm:$0xff] }
 0x552   : > { %2258 = vmatmul.f32.gmra.mxu0 %v4241_v54  ;;  %2281 = vmatmul.f32.gmra.mxu1 %v4243_v37 }
 0x553   : > { %2304 = vmatmul.f32.gmra.mxu2 %v4241_v54  ;;  %2327 = vmatmul.f32.gmra.mxu3 %v4243_v37 }
 0x554   : > { %2410 = vmatpush.msra.mxu0 %v2346_v24  ;;  %2456 = vmatpush.msra.mxu2 %v2347_v27  ;;  %v2154_v24 = vld [vmem:[#allocation22 + $0x198] sm:$0xff]  ;;  %v2113_v27 = vld [vmem:[#allocation22 + $0x50] sm:$0xff] }
 0x555   : > { %2432 = vmatpush.msra.mxu1 %v2380_v34  ;;  %2478 = vmatpush.msra.mxu3 %v2381_v36  ;;  %v2111_v34 = vld [vmem:[#allocation22 + $0x40] sm:$0xff]  ;;  %v2112_v36 = vld [vmem:[#allocation22 + $0x48] sm:$0xff] }
 0x556   : > { %2411 = vmatpush.msra.mxu0 %v2344_v28  ;;  %2457 = vmatpush.msra.mxu2 %v2345_v30  ;;  %v2151_v28 = vld [vmem:[#allocation22 + $0x180] sm:$0xff]  ;;  %v2114_v30 = vld [vmem:[#allocation22 + $0x58] sm:$0xff] }
 0x557   : > { %2433 = vmatpush.msra.mxu1 %v2378_v44  ;;  %2479 = vmatpush.msra.mxu3 %v2379_v25  ;;  %v2109_v25 = vld [vmem:[#allocation22 + $0x30] sm:$0xff] }
 0x558   : > { %2412 = vmatpush.msra.mxu0 %v2342_v31  ;;  %2458 = vmatpush.msra.mxu2 %v2343_v35  ;;  %v2152_v31 = vld [vmem:[#allocation22 + $0x188] sm:$0xff]  ;;  %v2149_v35 = vld [vmem:[#allocation22 + $0x170] sm:$0xff] }
 0x559   : > { %2434 = vmatpush.msra.mxu1 %v2376_v52  ;;  %2480 = vmatpush.msra.mxu3 %v2377_v49  ;;  %v2110_v52 = vld [vmem:[#allocation22 + $0x38] sm:$0xff]  ;;  %v2107_v49 = vld [vmem:[#allocation22 + $0x20] sm:$0xff] }
 0x55a   : > { %2413 = vmatpush.msra.mxu0 %v2340_v42  ;;  %2459 = vmatpush.msra.mxu2 %v2341_v45  ;;  %v2150_v45 = vld [vmem:[#allocation22 + $0x178] sm:$0xff] }
 0x55b   : > { %2435 = vmatpush.msra.mxu1 %v2374_v12  ;;  %2481 = vmatpush.msra.mxu3 %v2375_v33  ;;  %v2108_v12 = vld [vmem:[#allocation22 + $0x28] sm:$0xff]  ;;  %v2105_v33 = vld [vmem:[#allocation22 + $0x10] sm:$0xff] }
 0x55c   : > { %2414 = vmatpush.msra.mxu0 %v2338_v50  ;;  %2460 = vmatpush.msra.mxu2 %v2339_v46  ;;  %v2147_v50 = vld [vmem:[#allocation22 + $0x160] sm:$0xff]  ;;  %v2148_v46 = vld [vmem:[#allocation22 + $0x168] sm:$0xff] }
 0x55d   : > { %2436 = vmatpush.msra.mxu1 %v2372_v29  ;;  %2482 = vmatpush.msra.mxu3 %v2373_v51  ;;  %v2144_v29 = vld [vmem:[#allocation22 + $0x148] sm:$0xff] }
 0x55e   : > { %2415 = vmatpush.msra.mxu0 %v2336_v15  ;;  %2461 = vmatpush.msra.mxu2 %v2337_v32  ;;  %v2145_v15 = vld [vmem:[#allocation22 + $0x150] sm:$0xff]  ;;  %v2146_v32 = vld [vmem:[#allocation22 + $0x158] sm:$0xff] }
 0x55f   : > { %2437 = vmatpush.msra.mxu1 %v2370_v56  ;;  %2483 = vmatpush.msra.mxu3 %v2371_v57  ;;  %v2141_v56 = vld [vmem:[#allocation22 + $0x130] sm:$0xff]  ;;  %v2104_v57 = vld [vmem:[#allocation22 + $0x8] sm:$0xff] }
 0x560   : > { %2492 = vmatpush.msrb.mxu0 %v2133_v61  ;;  %2538 = vmatpush.msrb.mxu2 %v2134_v26  ;;  %v2143_v61 = vld [vmem:[#allocation22 + $0x140] sm:$0xff]  ;;  %v2106_v26 = vld [vmem:[#allocation22 + $0x18] sm:$0xff] }
 0x561   : > { %2438 = vmatpush.msra.mxu1 %v2368_v20  ;;  %2484 = vmatpush.msra.mxu3 %v2369_v59 }
 0x562   : > { %2493 = vmatpush.msrb.mxu0 %v2131_v53  ;;  %2539 = vmatpush.msrb.mxu2 %v2132_v55  ;;  %v2103_v55 = vld [vmem:[#allocation22] sm:$0xff] }
 0x563   : > { %2515 = vmatpush.msrb.mxu1 %v2165_v63  ;;  %2561 = vmatpush.msrb.mxu3 %v2166_v40  ;;  %v2137_v63 = vld [vmem:[#allocation22 + $0x110] sm:$0xff]  ;;  %v2138_v40 = vld [vmem:[#allocation22 + $0x118] sm:$0xff] }
 0x564   : > { %2494 = vmatpush.msrb.mxu0 %v2129_v19  ;;  %2540 = vmatpush.msrb.mxu2 %v2130_v58  ;;  %v2142_v19 = vld [vmem:[#allocation22 + $0x138] sm:$0xff]  ;;  %v2139_v58 = vld [vmem:[#allocation22 + $0x120] sm:$0xff] }
 0x565   : > { %2516 = vmatpush.msrb.mxu1 %v2163_v2  ;;  %2562 = vmatpush.msrb.mxu3 %v2164_v4  ;;  %v2136_v2 = vld [vmem:[#allocation22 + $0x108] sm:$0xff] }
 0x566   : > { %2495 = vmatpush.msrb.mxu0 %v2127_v60  ;;  %2541 = vmatpush.msrb.mxu2 %v2128_v0  ;;  %v2140_v60 = vld [vmem:[#allocation22 + $0x128] sm:$0xff]  ;;  %v2917_v0 = vld [vmem:[%s4430_s5 + $0x2] sm:$0x3] }
 0x567   : > { %2517 = vmatpush.msrb.mxu1 %v2161_v6  ;;  %2563 = vmatpush.msrb.mxu3 %v2162_v41 }
 0x568   : > { %2496 = vmatpush.msrb.mxu0 %v2125_v1  ;;  %2542 = vmatpush.msrb.mxu2 %v2126_v3  ;;  %v2135_v1 = vld [vmem:[#allocation22 + $0x100] sm:$0xff]  ;;  %v2235_v3 = vperm.slane %v2917_v0, 0 }
 0x569   : > { %2518 = vmatpush.msrb.mxu1 %v2159_v14  ;;  %2564 = vmatpush.msrb.mxu3 %v2160_v39  ;;  %v2236_v14 = vperm.slane %v2917_v0, 1  ;;  %v2001_v39 = vld [vmem:[%s4430_s5] sm:$0x3] }
 0x56a   : > { %2497 = vmatpush.msrb.mxu0 %v2123_v5  ;;  %2543 = vmatpush.msrb.mxu2 %v2124_v13 }
 0x56b   : > { %2519 = vmatpush.msrb.mxu1 %v2157_v8  ;;  %2565 = vmatpush.msrb.mxu3 %v2158_v62 }
 0x56c   : > { %2498 = vmatpush.msrb.mxu0 %v2121_v7  ;;  %2544 = vmatpush.msrb.mxu2 %v2122_v38 }
 0x56d   : > { %2520 = vmatpush.msrb.mxu1 %v2155_v11  ;;  %2566 = vmatpush.msrb.mxu3 %v2156_v18 }
 0x56e   : > { %2499 = vmatpush.msrb.mxu0 %v2119_v43  ;;  %2545 = vmatpush.msrb.mxu2 %v2120_v9 }
 0x56f   : > { %2521 = vmatpush.msrb.mxu1 %v2153_v22  ;;  %2567 = vmatpush.msrb.mxu3 %v2154_v24 }
 0x570   : > { %2500 = vmatpush.msrb.mxu0 %v2117_v10  ;;  %2546 = vmatpush.msrb.mxu2 %v2118_v17  ;;  %v2003_v10 = vperm.slane %v2001_v39, 0 }
 0x571   : > { %2522 = vmatpush.msrb.mxu1 %v2151_v28  ;;  %2568 = vmatpush.msrb.mxu3 %v2152_v31  ;;  %v2004_v28 = vperm.slane %v2001_v39, 1 }
 0x572   : > { %2501 = vmatpush.msrb.mxu0 %v2115_v21  ;;  %2547 = vmatpush.msrb.mxu2 %v2116_v23 }
 0x573   : > { %2523 = vmatpush.msrb.mxu1 %v2149_v35  ;;  %2569 = vmatpush.msrb.mxu3 %v2150_v45 }
 0x574   : > { %2502 = vmatpush.msrb.mxu0 %v2113_v27  ;;  %2548 = vmatpush.msrb.mxu2 %v2114_v30 }
 0x575   : > { %2524 = vmatpush.msrb.mxu1 %v2147_v50  ;;  %2570 = vmatpush.msrb.mxu3 %v2148_v46 }
 0x576   : > { %2503 = vmatpush.msrb.mxu0 %v2111_v34  ;;  %2549 = vmatpush.msrb.mxu2 %v2112_v36 }
 0x577   : > { %2525 = vmatpush.msrb.mxu1 %v2145_v15  ;;  %2571 = vmatpush.msrb.mxu3 %v2146_v32 }
 0x578   : > { %2504 = vmatpush.msrb.mxu0 %v2109_v25  ;;  %2550 = vmatpush.msrb.mxu2 %v2110_v52 }
 0x579   : > { %2526 = vmatpush.msrb.mxu1 %v2143_v61  ;;  %2572 = vmatpush.msrb.mxu3 %v2144_v29 }
 0x57a   : > { %2505 = vmatpush.msrb.mxu0 %v2107_v49  ;;  %2551 = vmatpush.msrb.mxu2 %v2108_v12 }
 0x57b   : > { %2527 = vmatpush.msrb.mxu1 %v2141_v56  ;;  %2573 = vmatpush.msrb.mxu3 %v2142_v19 }
 0x57c   : > { %2506 = vmatpush.msrb.mxu0 %v2105_v33  ;;  %2552 = vmatpush.msrb.mxu2 %v2106_v26 }
 0x57d   : > { %2528 = vmatpush.msrb.mxu1 %v2139_v58  ;;  %2574 = vmatpush.msrb.mxu3 %v2140_v60  ;;  %v2584_v58 = vld [vmem:[%s4431_s14] sm:$0x3] }
 0x57e   : > { %2507 = vmatpush.msrb.mxu0 %v2103_v55  ;;  %2553 = vmatpush.msrb.mxu2 %v2104_v57  ;;  %v2586_v0 = vperm.slane %v2584_v58, 0 }
 0x57f   : > { %2529 = vmatpush.msrb.mxu1 %v2137_v63  ;;  %2575 = vmatpush.msrb.mxu3 %v2138_v40 }
 0x581   : > { %2530 = vmatpush.msrb.mxu1 %v2135_v1  ;;  %2576 = vmatpush.msrb.mxu3 %v2136_v2  ;;  %v2587_v1 = vperm.slane %v2584_v58, 1 }
 0x5b6   : > { %v4257_v42 = vpop.f32.mrf.mxu0  ;;  %v4259_v44 = vpop.f32.mrf.mxu1 }
 0x5b7   : > { %v2025_v23 = vadd.f32 %v4257_v42, %v2003_v10 }
 0x5b9   : > { %v2048_v31 = vadd.f32 %v4259_v44, %v2025_v23 }
 0x5bb   : > { %v2099_v25 = vmax.f32 %v2048_v31, 0.0 }
 0x5bd   : > { %v4261_v51 = vpop.f32.mrf.mxu2  ;;  %v4263_v53 = vpop.f32.mrf.mxu3 }
 0x5be   : > { %v2071_v36 = vadd.f32 %v4261_v51, %v2004_v28 }
 0x5bf   : > { %v2027_v20 = vpop.f32.mrf.mxu0  ;;  %v2050_v59 = vpop.f32.mrf.mxu1 }
 0x5c0   : > { %v2028_v50 = vadd.f32 %v2027_v20, %v2003_v10  ;;  %v2094_v42 = vadd.f32 %v4263_v53, %v2071_v36 }
 0x5c2   : > { %v2051_v52 = vadd.f32 %v2050_v59, %v2028_v50  ;;  %v2100_v46 = vmax.f32 %v2094_v42, 0.0 }
 0x5c4   : > { %v2101_v15 = vmax.f32 %v2051_v52, 0.0 }
 0x5c6   : > { %v2073_v4 = vpop.f32.mrf.mxu2  ;;  %v2096_v5 = vpop.f32.mrf.mxu3 }
 0x5c7   : > { %v2256_v6 = vpop.f32.mrf.mxu0  ;;  %v2279_v13 = vpop.f32.mrf.mxu1  ;;  %v2074_v49 = vadd.f32 %v2073_v4, %v2004_v28 }
 0x5c8   : > { %v2257_v41 = vadd.f32 %v2256_v6, %v2235_v3 }
 0x5c9   : > { %v2097_v44 = vadd.f32 %v2096_v5, %v2074_v49 }
 0x5ca   : > { %v2280_v7 = vadd.f32 %v2279_v13, %v2257_v41 }
 0x5cb   : > { %v2102_v12 = vmax.f32 %v2097_v44, 0.0 }
 0x5cc   : > { %v2331_v38 = vmax.f32 %v2280_v7, 0.0 }
 0x5ce   : > { %v2302_v43 = vpop.f32.mrf.mxu2  ;;  %v2325_v8 = vpop.f32.mrf.mxu3  ;;  %2416 = vmatmul.f32.vlgmr.msra.gmra.mxu0 %v2331_v38  ;;  %2462 = vmatmul.f32.vlgmr.msra.gmra.mxu2 %v2331_v38 }
 0x5cf   : > { %v2303_v9 = vadd.f32 %v2302_v43, %v2236_v14  ;;  %v2259_v62 = vpop.f32.mrf.mxu0  ;;  %v2282_v18 = vpop.f32.mrf.mxu1 }
 0x5d0   : > { %v2260_v11 = vadd.f32 %v2259_v62, %v2235_v3 }
 0x5d1   : > { %v2326_v17 = vadd.f32 %v2325_v8, %v2303_v9 }
 0x5d2   : > { %v2283_v21 = vadd.f32 %v2282_v18, %v2260_v11 }
 0x5d3   : > { %v2332_v22 = vmax.f32 %v2326_v17, 0.0 }
 0x5d4   : > { %v2333_v24 = vmax.f32 %v2283_v21, 0.0 }
 0x5d5   : > { %2439 = vmatmul.f32.vlgmr.msra.gmra.mxu1 %v2332_v22  ;;  %2485 = vmatmul.f32.vlgmr.msra.gmra.mxu3 %v2332_v22 }
 0x5d6   : > { %v2305_v27 = vpop.f32.mrf.mxu2  ;;  %2419 = vmatmul.f32.gmra.mxu0 %v2333_v24  ;;  %2465 = vmatmul.f32.gmra.mxu2 %v2333_v24  ;;  %v2328_v34 = vpop.f32.mrf.mxu3 }
 0x5d7   : > { %v2306_v30 = vadd.f32 %v2305_v27, %v2236_v14 }
 0x5d9   : > { %v2329_v35 = vadd.f32 %v2328_v34, %v2306_v30 }
 0x5db   : > { %v2334_v45 = vmax.f32 %v2329_v35, 0.0 }
 0x5dd   : > { %2442 = vmatmul.f32.gmra.mxu1 %v2334_v45  ;;  %2488 = vmatmul.f32.gmra.mxu3 %v2334_v45 }
 0x5de   : > { %2508 = vmatmul.f32.vlgmr.msrb.gmra.mxu0 %v2099_v25  ;;  %2554 = vmatmul.f32.vlgmr.msrb.gmra.mxu2 %v2099_v25 }
 0x5e5   : > { %2531 = vmatmul.f32.vlgmr.msrb.gmra.mxu1 %v2100_v46  ;;  %2577 = vmatmul.f32.vlgmr.msrb.gmra.mxu3 %v2100_v46 }
 0x5e6   : > { %2511 = vmatmul.f32.gmra.mxu0 %v2101_v15  ;;  %2557 = vmatmul.f32.gmra.mxu2 %v2101_v15 }
 0x5ed   : > { %2534 = vmatmul.f32.gmra.mxu1 %v2102_v12  ;;  %2580 = vmatmul.f32.gmra.mxu3 %v2102_v12 }
 0x64b   : > { %v2417_v32 = vpop.f32.mrf.mxu0 }
 0x651   : > { %v2463_v33 = vpop.f32.mrf.mxu2 }
 0x652   : > { %v2440_v61 = vpop.f32.mrf.mxu1 }
 0x653   : > { %v2420_v26 = vpop.f32.mrf.mxu0  ;;  %v2441_v57 = vadd.f32 %v2440_v61, %v2417_v32  ;;  %v2598_v61 = vld [vmem:[%s4433_s0] sm:$0x3]  ;;  %s2673_s0 = scalar_lea.sflag [#allocation7], %s737_s7 }
 0x658   : > { %v2486_v29 = vpop.f32.mrf.mxu3 }
 0x659   : > { %v2466_v51 = vpop.f32.mrf.mxu2  ;;  %v2487_v60 = vadd.f32 %v2486_v29, %v2463_v33 }
 0x65a   : > { %v2443_v55 = vpop.f32.mrf.mxu1 }
 0x65b   : > { %v2509_v53 = vpop.f32.mrf.mxu0  ;;  %v2444_v4 = vadd.f32 %v2443_v55, %v2420_v26 }
 0x65c   : > { %v2510_v59 = vadd.f32 %v2509_v53, %v2441_v57  ;;  %v2651_v53 = vperm.slane %v2598_v61, 0 }
 0x660   : > { %v2489_v56 = vpop.f32.mrf.mxu3 }
 0x661   : > { %v2555_v20 = vpop.f32.mrf.mxu2  ;;  %v2490_v38 = vadd.f32 %v2489_v56, %v2466_v51  ;;  %v2599_v51 = vld [vmem:[%s4434_s20] sm:$0x3]  ;;  %v2652_v56 = vperm.slane %v2598_v61, 1 }
 0x662   : > { %v2532_v19 = vpop.f32.mrf.mxu1  ;;  %v2556_v40 = vadd.f32 %v2555_v20, %v2487_v60  ;;  %v2660_v58 = vperm.slane %v2599_v51, 0  ;;  %v2661_v20 = vperm.slane %v2599_v51, 1 }
 0x663   : > { %v2533_v63 = vadd.f32 %v2532_v19, %v2510_v59  ;;  %v2512_v2 = vpop.f32.mrf.mxu0 }
 0x664   : > { %v2513_v41 = vadd.f32 %v2512_v2, %v2444_v4 }
 0x665   : > { %v2590_v5 = vadd.f32 %v2586_v0, %v2533_v63 }
 0x667   : > { %v2594_v43 = vadd.f32 %v2590_v5, %v4231_v47 }
 0x668   : > { %v2578_v3 = vpop.f32.mrf.mxu3 }
 0x669   : > { %v2579_v6 = vadd.f32 %v2578_v3, %v2556_v40  ;;  %v2558_v14 = vpop.f32.mrf.mxu2 }
 0x66a   : > { %v2535_v13 = vpop.f32.mrf.mxu1  ;;  %v2559_v9 = vadd.f32 %v2558_v14, %v2490_v38 }
 0x66b   : > { %v2591_v7 = vadd.f32 %v2587_v1, %v2579_v6  ;;  %v2536_v39 = vadd.f32 %v2535_v13, %v2513_v41 }
 0x66d   : > { %v2595_v8 = vadd.f32 %v2591_v7, %v4233_v48  ;;  %v2592_v11 = vadd.f32 %v2586_v0, %v2536_v39 }
 0x66f   : > { %v2600_v62 = vadd.f32 %v2595_v8, %v2594_v43  ;;  %v2596_v21 = vadd.f32 %v2592_v11, %v4241_v54 }
 0x670   : > { %v2581_v10 = vpop.f32.mrf.mxu3 }
 0x671   : > { %v2582_v17 = vadd.f32 %v2581_v10, %v2559_v9  ;;  %2601 = vadd.xlane.f32.xlu2 %v2600_v62 }
 0x673   : > { %v2593_v18 = vadd.f32 %v2587_v1, %v2582_v17 }
 0x675   : > { %v2597_v22 = vadd.f32 %v2593_v18, %v4243_v37 }
 0x677   : > { %v2603_v23 = vadd.f32 %v2597_v22, %v2596_v21 }
 0x679   : > { %2604 = vadd.xlane.f32.xlu0 %v2603_v23 }
 0x6e4   : > { %v2602_v24 = vpop.xlane.xlu2 %2601 }
 0x6e5   : > { %v2606_v27 = vmul.f32 %v2602_v24, %v4195_v16 }
 0x6e7   : > { %v2608_v28 = vsub.f32 %v2594_v43, %v2606_v27  ;;  %v2609_v47 = vsub.f32 %v2595_v8, %v2606_v27 }
 0x6e9   : > { %v2612_v30 = vmul.f32 %v2608_v28, %v2608_v28  ;;  %v2613_v48 = vmul.f32 %v2609_v47, %v2609_v47 }
 0x6eb   : > { %v2616_v31 = vadd.f32 %v2613_v48, %v2612_v30 }
 0x6ec   : > { %v2605_v34 = vpop.xlane.xlu0 %2604 }
 0x6ed   : > { %v2607_v35 = vmul.f32 %v2605_v34, %v4195_v16  ;;  %2617 = vadd.xlane.f32.xlu1 %v2616_v31 }
 0x6ef   : > { %v2610_v36 = vsub.f32 %v2596_v21, %v2607_v35  ;;  %v2611_v45 = vsub.f32 %v2597_v22, %v2607_v35 }
 0x6f1   : > { %v2614_v25 = vmul.f32 %v2610_v36, %v2610_v36  ;;  %v2615_v54 = vmul.f32 %v2611_v45, %v2611_v45 }
 0x6f3   : > { %v2619_v50 = vadd.f32 %v2615_v54, %v2614_v25 }
 0x6f5   : > { %2620 = vadd.xlane.f32.xlu2 %v2619_v50 }
 0x760   : > { %v2618_v37 = vpop.xlane.xlu1 %2617 }
 0x761   : > { %v2622_v42 = vmul.f32 %v2618_v37, %v4195_v16 }
 0x763   : > { %v2624_v52 = vadd.f32 1e-05, %v2622_v42 }
 0x765   : > { %3182 = vrsqrt.f32 %v2624_v52  ;;  %vm2632_vm9 = vweird.f32 %v2624_v52 }
 0x768   : > { %v2621_v46 = vpop.xlane.xlu2 %2620 }
 0x769   : > { %v2623_v49 = vmul.f32 %v2621_v46, %v4195_v16 }
 0x76b   : > { %v3183_v15 = vpop.eup %3182  ;;  %v2625_v44 = vadd.f32 1e-05, %v2623_v49 }
 0x76c   : > { %v2627_v12 = vmul.f32 %v3183_v15, %v2624_v52  ;;  %vm2633_vm8 = vweird.f32 %v3183_v15 }
 0x76d   : > { %3184 = vrsqrt.f32 %v2625_v44  ;;  %vm2634_vm10 = vmor %vm2632_vm9, %vm2633_vm8  ;;  %vm2642_vm12 = vweird.f32 %v2625_v44 }
 0x76e   : > { %v2628_v32 = vmul.f32 %v3183_v15, %v2627_v12 }
 0x770   : > { %v2629_v33 = vmul.f32 0.5, %v2628_v32 }
 0x772   : > { %v2630_v26 = vsub.f32 1.5, %v2629_v33 }
 0x773   : > { %v3185_v29 = vpop.eup %3184 }
 0x774   : > { %v2631_v55 = vmul.f32 %v3183_v15, %v2630_v26  ;;  %v2637_v16 = vmul.f32 %v3185_v29, %v2625_v44  ;;  %vm2643_vm11 = vweird.f32 %v3185_v29 }
 0x775   : > { %vm2644_vm13 = vmor %vm2642_vm12, %vm2643_vm11 }
 0x776   : > { %v2635_v57 = vsel %vm2634_vm10, %v3183_v15, %v2631_v55  ;;  %v2638_v19 = vmul.f32 %v3185_v29, %v2637_v16 }
 0x777   : > { %v2646_v59 = vmul.f32 %v2635_v57, %v2608_v28  ;;  %v2647_v60 = vmul.f32 %v2635_v57, %v2609_v47 }
 0x778   : > { %v2639_v63 = vmul.f32 0.5, %v2638_v19 }
 0x779   : > { %v2655_v0 = vmul.f32 %v2651_v53, %v2646_v59  ;;  %v2656_v40 = vmul.f32 %v2652_v56, %v2647_v60 }
 0x77a   : > { %v2640_v1 = vsub.f32 1.5, %v2639_v63 }
 0x77b   : > { %v2664_v2 = vadd.f32 %v2660_v58, %v2655_v0  ;;  %v2665_v3 = vadd.f32 %v2661_v20, %v2656_v40 }
 0x77c   : > { %v2641_v4 = vmul.f32 %v3185_v29, %v2640_v1 }
 0x77d   : > { %2668 = vst [vmem:[%s4000_s10] sm:$0xff] %v2664_v2 }
 0x77e   : > { %2669 = vst [vmem:[%s4000_s10 + $0x8] sm:$0xff] %v2665_v3  ;;  %v2645_v5 = vsel %vm2644_vm13, %v3185_v29, %v2641_v4 }
 0x77f   : > { %v2648_v6 = vmul.f32 %v2645_v5, %v2610_v36  ;;  %v2649_v13 = vmul.f32 %v2645_v5, %v2611_v45 }
 0x781   : > { %v2657_v41 = vmul.f32 %v2651_v53, %v2648_v6  ;;  %v2658_v7 = vmul.f32 %v2652_v56, %v2649_v13 }
 0x783   : > { %v2666_v14 = vadd.f32 %v2660_v58, %v2657_v41  ;;  %v2667_v38 = vadd.f32 %v2661_v20, %v2658_v7 }
 0x785   : > { %2670 = vst [vmem:[%s4000_s10 + $0x10] sm:$0xff] %v2666_v14 }
 0x786   : > { %2671 = vst [vmem:[%s4000_s10 + $0x18] sm:$0xff] %v2667_v38 }
 0x787   : > { %3543 = shalt.err (!%p3540_p5)
}
 0x788   : > { %s3673_s7 = smov 256   ;;  %s3674_s10 = smov 16  }
 0x789   : > { %2970 = dma.vmem_to_hbm [thread:$0]  (%p3938_p4), %s2689_s16, 512, %s2691_s9, %s2673_s0, %s3673_s7, %s3673_s7, %s3674_s10  }
 0x78a PF: > { %s4437_s11 = sld [smem:[#allocation31_spill]]  ;;  %p3032_p6 = scmp.ge.s32.totalorder %s3658_s1, 2 }
 0x78c   : > { %p3008_p8 = pnand %p3032_p6, %p3956_p9 }
 0x78e   : > { %p3009_p12 = pneg %p3008_p8 }
 0x790   : > { %s2705_s21 = sand.u32 1, %s4437_s11  }
 0x791   : > { %s2706_s14 = scalar_lea.sflag [#allocation7], %s2705_s21 }
 0x792   : > { %3613 = dma.done.wait (%p3009_p12), %s2706_s14, 512  }
 0x793   : > { %3615 = vsyncadd (%p3009_p12), %s2706_s14, 4294966784  ;;  %s38_s1 = sadd.s32 1, %s3658_s1   ;;  %s4438_s24 = sld [smem:[#allocation32_spill]] }
 0x794   : > { %p35_p1 = scmp.ge.s32.totalorder %s38_s1, 6   ;;  %s4439_s25 = smov %s3626_s26 }
 0x795   : > { %s4440_s26 = smov %s3946_s4  ;;  %s4441_s27 = smov %s3634_s28 }
 0x796   : > { %s4442_s28 = smov %s3638_s29  ;;  %s4443_s29 = smov %s3943_s17 }
 0x797   : > { %s4444_s0 = smov %s3650_s18  ;;  %s4445_s30 = smov %s3654_s19 }
 0x798   : > { %s4446_s18 = smov %s4449_s6  ;;  %s4447_s19 = smov %s4453_s12 }
 0x799   :  { %37 = sbr.rel (!%p35_p1) target bundleno = 32 (0x20), region = 185 }
 0x79e   :  { %2712 = vsyncpa [#allocation6], 1 }
 0x79f   :  { %2714 = vsyncpa [#allocation6 + $0x1], 1 }
 0x7a0   :  { %2715 = vsyncpa [#allocation9], 1 }
 0x7a1   :  { %2716 = vsyncpa [#allocation12], 1 }
 0x7a2   :  { %2717 = vsyncpa [#allocation15], 1 }
 0x7a3   :  { %2718 = vsyncpa [#allocation18], 1 }
 0x7a4   :  { %2719 = vsyncpa [#allocation21], 1 }
 0x7a5   :  { %2720 = vsyncpa [#allocation7], 1 }
 0x7a6   :  { %2722 = vsyncpa [#allocation7 + $0x1], 1 }

</bundles_post_ra>
